<compile_context>
chip_gen: v7x
topology: tpu7x:2x2x1
jax: 0.10.0
libtpu: 0.0.40
codegen_flags: <defaults>
</compile_context>

<pallas_src>
import functools

import jax
import jax.numpy as jnp
from jax.experimental import pallas as pl
from jax.experimental.pallas import tpu as pltpu

LANE = 128


def _round_up(x, m):
    return ((x + m - 1) // m) * m


def _pick_row_tile(h):
    # Biggest row tile (multiple of 8 for clean (8,128)/(16,128) blocks) that
    # divides H; fall back to the full extent (block == full dim is allowed).
    for th in (64, 32, 16, 8):
        if h % th == 0:
            return th
    return h


def _conv3x3_kernel(xa_ref, xh_ref, w_ref, b_ref, m_ref, o_ref, g_ref, *,
                    TH, Wp, Cp, activation):
    """One (batch, row-band) tile of a 3x3 / pad=1 conv + bias + activation.

    xa_ref: (1, TH*Wp, Cp)     bf16 flattened row band (stored layout)
    xh_ref: (1, 1, 2*Wp, Cp)   bf16 halo rows: [row above band ; row below band]
    w_ref : (3, 3*Cp, Coutp)   bf16 folded weights, W[dy, dx*Cp + ci, co]
    b_ref : (1, Coutp)         f32 bias
    m_ref : (TH*Wp, 1)         f32 column-validity mask (0 on the 2 pad cols)
    o_ref : (1, TH*Wp, Coutp)  output band (bf16 hidden layers / f32 final)
    g_ref : ((TH+2)*Wp, 3*Cp)  bf16 scratch, G[n, dx*Cp:(dx+1)*Cp] = F[n+dx-1]
    """
    NOUT = TH * Wp
    NF = (TH + 2) * Wp
    c0, c1, c2 = 0, Cp, 2 * Cp

    band = xa_ref[0]                          # (NOUT, Cp)
    top = xh_ref[0, 0, 0:Wp, :]               # (Wp, Cp)
    bot = xh_ref[0, 0, Wp:2 * Wp, :]          # (Wp, Cp)
    zrow = jnp.zeros((1, Cp), band.dtype)

    # Assemble the dx-folded operand with static row-offset stores
    # (3 band copies total, vs. 9 slice+reshape copies in the naive tap loop).
    # centre slot: G[n, Cp:2Cp] = F[n]
    g_ref[0:Wp, c1:c1 + Cp] = top
    g_ref[Wp:Wp + NOUT, c1:c1 + Cp] = band
    g_ref[Wp + NOUT:NF, c1:c1 + Cp] = bot
    # left-neighbour slot: G[n, 0:Cp] = F[n-1]   (F[-1] := 0)
    g_ref[0:1, c0:c0 + Cp] = zrow
    g_ref[1:Wp + 1, c0:c0 + Cp] = top
    g_ref[Wp + 1:Wp + 1 + NOUT, c0:c0 + Cp] = band
    g_ref[Wp + 1 + NOUT:NF, c0:c0 + Cp] = bot[0:Wp - 1, :]
    # right-neighbour slot: G[n, 2Cp:3Cp] = F[n+1]   (F[NF] := 0)
    g_ref[0:Wp - 1, c2:c2 + Cp] = top[1:Wp, :]
    g_ref[Wp - 1:Wp - 1 + NOUT, c2:c2 + Cp] = band
    g_ref[Wp - 1 + NOUT:NF - 1, c2:c2 + Cp] = bot
    g_ref[NF - 1:NF, c2:c2 + Cp] = zrow

    # 3 MXU matmuls with K = 3*Cp (one per dy tap), f32 accumulation.
    acc = jnp.dot(g_ref[0:NOUT, :], w_ref[0],
                  preferred_element_type=jnp.float32)
    acc = acc + jnp.dot(g_ref[Wp:Wp + NOUT, :], w_ref[1],
                        preferred_element_type=jnp.float32)
    acc = acc + jnp.dot(g_ref[2 * Wp:2 * Wp + NOUT, :], w_ref[2],
                        preferred_element_type=jnp.float32)

    acc = acc + b_ref[...]                    # (1, Coutp) broadcast, f32
    if activation == "relu":
        acc = jnp.maximum(acc, 0.0)
    else:
        acc = jax.nn.sigmoid(acc)
    # Zero the two wrap-around (padding) columns so the next layer sees
    # genuine zero padding.
    acc = jnp.where(m_ref[...] != 0.0, acc, 0.0)
    o_ref[0] = acc.astype(o_ref.dtype)


def conv3x3_pallas(x_flat, halo, w_fold, bias2d, colmask, *,
                   H, W, TH, activation, out_dtype):
    """3x3 conv, stride 1, SAME padding, fused bias + activation.

    x_flat : (B, H*(W+2), Cp)  bf16 stored layout (zero cols at [W, W+2))
    halo   : (B, n, 2*(W+2), Cp)  top/bottom halo rows per row tile
    w_fold : (3, 3*Cp, Coutp)  bf16 folded weights
    returns: (B, H*(W+2), Coutp) in `out_dtype`, stored layout.
    """
    B = x_flat.shape[0]
    Cp = x_flat.shape[-1]
    Coutp = w_fold.shape[-1]
    Wp = W + 2
    n = H // TH
    NOUT = TH * Wp
    NF = (TH + 2) * Wp

    kernel = functools.partial(_conv3x3_kernel, TH=TH, Wp=Wp, Cp=Cp,
                               activation=activation)
    return pl.pallas_call(
        kernel,
        out_shape=jax.ShapeDtypeStruct((B, H * Wp, Coutp), out_dtype),
        grid=(B, n),
        in_specs=[
            pl.BlockSpec((1, NOUT, Cp), lambda b, i: (b, i, 0)),
            pl.BlockSpec((1, 1, 2 * Wp, Cp), lambda b, i: (b, i, 0, 0)),
            pl.BlockSpec((3, 3 * Cp, Coutp), lambda b, i: (0, 0, 0)),
            pl.BlockSpec((1, Coutp), lambda b, i: (0, 0)),
            pl.BlockSpec((NOUT, 1), lambda b, i: (0, 0)),
        ],
        out_specs=pl.BlockSpec((1, NOUT, Coutp), lambda b, i: (b, i, 0)),
        scratch_shapes=[pltpu.VMEM((NF, 3 * Cp), jnp.bfloat16)],
        compiler_params=pltpu.CompilerParams(
            dimension_semantics=("parallel", "parallel"),
            vmem_limit_bytes=64 * 1024 * 1024),
    )(x_flat, halo, w_fold, bias2d, colmask)


def _build_halo(x_flat, H, W, TH):
    """Top/bottom halo rows for every row tile: (B, n, 2*(W+2), Cp)."""
    B = x_flat.shape[0]
    C = x_flat.shape[-1]
    Wp = W + 2
    n = H // TH
    x4 = x_flat.reshape(B, H, Wp, C)
    zrow = jnp.zeros((B, 1, Wp, C), x_flat.dtype)
    if n == 1:
        tops, bots = zrow, zrow
    else:
        tops = jnp.concatenate([zrow, x4[:, TH - 1:H - 1:TH]], axis=1)
        bots = jnp.concatenate([x4[:, TH:H:TH], zrow], axis=1)
    halo = jnp.stack([tops, bots], axis=2)          # (B, n, 2, Wp, C)
    return halo.reshape(B, n, 2 * Wp, C)


def init_class_subnet_params(key, num_features_in, num_anchors, num_classes,
                             feature_size=None):
    feature_size = num_features_in if feature_size is None else feature_size
    dims = [
        (num_features_in, feature_size),
        (feature_size, feature_size),
        (feature_size, feature_size),
        (feature_size, feature_size),
        (feature_size, num_anchors * num_classes),
    ]
    params = []
    for i, (cin, cout) in enumerate(dims):
        kw, kb = jax.random.split(jax.random.fold_in(key, i))
        fan_in = cin * 9
        bound = 1.0 / jnp.sqrt(fan_in)
        w = jax.random.uniform(kw, (3, 3, cin, cout), jnp.float32, -bound, bound)
        b = jax.random.uniform(kb, (cout,), jnp.float32, -bound, bound)
        params.append((w, b))
    return params


def class_subnet_forward(x_nchw, params):
    """Forward pass matching the PyTorch ClassSubnet: input/output NCHW f32."""
    B, Cin, H, W = x_nchw.shape
    Wp = W + 2
    TH = _pick_row_tile(H)
    NOUT = TH * Wp

    # Input -> stored layout: NHWC, pad 2 zero cols on the right, pad channels
    # to a multiple of 128, cast bf16, flatten rows.  (The only wrapper pad.)
    Cp0 = _round_up(Cin, LANE)
    x = jnp.transpose(x_nchw, (0, 2, 3, 1))
    x = jnp.pad(x, ((0, 0), (0, 0), (0, 2), (0, Cp0 - Cin)))
    x = x.astype(jnp.bfloat16).reshape(B, H * Wp, Cp0)

    colmask = ((jnp.arange(NOUT) % Wp) < W).astype(jnp.float32).reshape(NOUT, 1)

    n_layers = len(params)
    for li, (w, b) in enumerate(params):
        cin, cout = w.shape[2], w.shape[3]
        Cp = _round_up(cin, LANE)
        Coutp = _round_up(cout, LANE)
        w_p = jnp.pad(w, ((0, 0), (0, 0), (0, Cp - cin), (0, Coutp - cout)))
        w_fold = w_p.astype(jnp.bfloat16).reshape(3, 3 * Cp, Coutp)
        b_p = jnp.pad(b, (0, Coutp - cout)).astype(jnp.float32).reshape(1, Coutp)

        halo = _build_halo(x, H, W, TH)
        last = li == n_layers - 1
        x = conv3x3_pallas(
            x, halo, w_fold, b_p, colmask,
            H=H, W=W, TH=TH,
            activation="sigmoid" if last else "relu",
            out_dtype=jnp.float32 if last else jnp.bfloat16)

    cout_final = params[-1][1].shape[0]
    y = x.reshape(B, H, Wp, -1)[:, :, :W, :cout_final]
    return jnp.transpose(y, (0, 3, 1, 2))


def _reference_forward_bf16(x_nchw, params):
    # Pure-JAX reference with the same bf16-operand / f32-accumulate recipe.
    out = jnp.transpose(x_nchw, (0, 2, 3, 1)).astype(jnp.bfloat16)
    nl = len(params)
    for i, (w, b) in enumerate(params):
        y = jax.lax.conv_general_dilated(
            out, w.astype(jnp.bfloat16), (1, 1), "SAME",
            dimension_numbers=("NHWC", "HWIO", "NHWC"),
            preferred_element_type=jnp.float32)
        y = y + b[None, None, None, :]
        if i == nl - 1:
            out = jax.nn.sigmoid(y)
        else:
            out = jnp.maximum(y, 0.0).astype(jnp.bfloat16)
    return jnp.transpose(out, (0, 3, 1, 2))


def _reference_forward_f32(x_nchw, params):
    out = jnp.transpose(x_nchw, (0, 2, 3, 1))
    nl = len(params)
    for i, (w, b) in enumerate(params):
        out = jax.lax.conv_general_dilated(
            out, w, (1, 1), "SAME",
            dimension_numbers=("NHWC", "HWIO", "NHWC"))
        out = out + b[None, None, None, :]
        out = jax.nn.sigmoid(out) if i == nl - 1 else jnp.maximum(out, 0.0)
    return jnp.transpose(out, (0, 3, 1, 2))


if __name__ == "__main__":
    # Small shapes consistent with the module.
    B, C_in, H, W = 2, 4, 16, 16
    num_anchors, num_classes, feature_size = 3, 2, 8

    key = jax.random.PRNGKey(0)
    kx, kp = jax.random.split(key)
    x = jax.random.normal(kx, (B, C_in, H, W), jnp.float32)
    params = init_class_subnet_params(kp, C_in, num_anchors, num_classes,
                                      feature_size)

    out = jax.block_until_ready(jax.jit(class_subnet_forward)(x, params))
    assert out.shape == (B, num_anchors * num_classes, H, W), out.shape

    ref = jax.block_until_ready(_reference_forward_bf16(x, params))
    err = float(jnp.max(jnp.abs(out - ref)))
    assert err < 2e-2, f"bf16-matched reference mismatch: {err}"

    ref32 = jax.block_until_ready(_reference_forward_f32(x, params))
    err32 = float(jnp.max(jnp.abs(out - ref32)))
    assert err32 < 1e-1, f"f32 reference mismatch: {err32}"

    print("KERNEL_OK")
</pallas_src>

<mosaic_0001>
module attributes {stable_mosaic.version = 11 : i64} {
  func.func @_conv3x3_kernel(%arg0: i32, %arg1: i32, %arg2: memref<1x288x128xbf16, #tpu.memory_space<vmem>>, %arg3: memref<1x1x36x128xbf16, #tpu.memory_space<vmem>>, %arg4: memref<3x384x128xbf16, #tpu.memory_space<vmem>>, %arg5: memref<1x128xf32, #tpu.memory_space<vmem>>, %arg6: memref<288x1xf32, #tpu.memory_space<vmem>>, %arg7: memref<1x288x128xbf16, #tpu.memory_space<vmem>>, %arg8: memref<324x384xbf16, #tpu.memory_space<vmem>>) attributes {dimension_semantics = [#tpu.dimension_semantics<parallel>, #tpu.dimension_semantics<parallel>], iteration_bounds = array<i64: 2, 1>, scalar_prefetch = 0 : i64, scratch_operands = 1 : i64, tpu.core_type = #tpu.core_type<tc>, window_params = [{transform_indices = @transform_0, window_bounds = array<i64: 1, 288, 128>}, {transform_indices = @transform_1, window_bounds = array<i64: 1, 1, 36, 128>}, {pipeline_mode = #tpu.pipeline_mode<synchronous>, transform_indices = @transform_2, window_bounds = array<i64: 3, 384, 128>}, {pipeline_mode = #tpu.pipeline_mode<synchronous>, transform_indices = @transform_3, window_bounds = array<i64: 1, 128>}, {pipeline_mode = #tpu.pipeline_mode<synchronous>, transform_indices = @transform_4, window_bounds = array<i64: 288, 1>}, {transform_indices = @transform_5, window_bounds = array<i64: 1, 288, 128>}]} {
    %c0 = arith.constant 0 : index
    %c0_0 = arith.constant 0 : index
    %c0_1 = arith.constant 0 : index
    %0 = vector.load %arg2[%c0, %c0_0, %c0_1] : memref<1x288x128xbf16, #tpu.memory_space<vmem>>, vector<1x288x128xbf16>
    %1 = vector.shape_cast %0 : vector<1x288x128xbf16> to vector<288x128xbf16>
    %c0_2 = arith.constant 0 : index
    %c0_3 = arith.constant 0 : index
    %c0_4 = arith.constant 0 : index
    %c0_5 = arith.constant 0 : index
    %2 = vector.load %arg3[%c0_2, %c0_3, %c0_4, %c0_5] : memref<1x1x36x128xbf16, #tpu.memory_space<vmem>>, vector<1x1x18x128xbf16>
    %3 = vector.shape_cast %2 : vector<1x1x18x128xbf16> to vector<18x128xbf16>
    %c0_6 = arith.constant 0 : index
    %c0_7 = arith.constant 0 : index
    %c18 = arith.constant 18 : index
    %c0_8 = arith.constant 0 : index
    %4 = vector.load %arg3[%c0_6, %c0_7, %c18, %c0_8] : memref<1x1x36x128xbf16, #tpu.memory_space<vmem>>, vector<1x1x18x128xbf16>
    %5 = vector.shape_cast %4 : vector<1x1x18x128xbf16> to vector<18x128xbf16>
    %cst = arith.constant 0.000000e+00 : bf16
    %6 = vector.broadcast %cst : bf16 to vector<1x128xbf16>
    %c0_9 = arith.constant 0 : index
    %c128 = arith.constant 128 : index
    %7 = vector.load %arg8[%c0_9, %c128] : memref<324x384xbf16, #tpu.memory_space<vmem>>, vector<18x128xbf16>
    tpu.vector_store %arg8[%c0_9, %c128], %3 {strides = array<i32>} : memref<324x384xbf16, #tpu.memory_space<vmem>>, vector<18x128xbf16>,
    %c18_10 = arith.constant 18 : index
    %c128_11 = arith.constant 128 : index
    %8 = vector.load %arg8[%c18_10, %c128_11] : memref<324x384xbf16, #tpu.memory_space<vmem>>, vector<288x128xbf16>
    tpu.vector_store %arg8[%c18_10, %c128_11], %1 {strides = array<i32>} : memref<324x384xbf16, #tpu.memory_space<vmem>>, vector<288x128xbf16>,
    %c306 = arith.constant 306 : index
    %c128_12 = arith.constant 128 : index
    %9 = vector.load %arg8[%c306, %c128_12] : memref<324x384xbf16, #tpu.memory_space<vmem>>, vector<18x128xbf16>
    tpu.vector_store %arg8[%c306, %c128_12], %5 {strides = array<i32>} : memref<324x384xbf16, #tpu.memory_space<vmem>>, vector<18x128xbf16>,
    %c0_13 = arith.constant 0 : index
    %c0_14 = arith.constant 0 : index
    %10 = vector.load %arg8[%c0_13, %c0_14] : memref<324x384xbf16, #tpu.memory_space<vmem>>, vector<1x128xbf16>
    tpu.vector_store %arg8[%c0_13, %c0_14], %6 {strides = array<i32>} : memref<324x384xbf16, #tpu.memory_space<vmem>>, vector<1x128xbf16>,
    %c1 = arith.constant 1 : index
    %c0_15 = arith.constant 0 : index
    %11 = vector.load %arg8[%c1, %c0_15] : memref<324x384xbf16, #tpu.memory_space<vmem>>, vector<18x128xbf16>
    tpu.vector_store %arg8[%c1, %c0_15], %3 {strides = array<i32>} : memref<324x384xbf16, #tpu.memory_space<vmem>>, vector<18x128xbf16>,
    %c19 = arith.constant 19 : index
    %c0_16 = arith.constant 0 : index
    %12 = vector.load %arg8[%c19, %c0_16] : memref<324x384xbf16, #tpu.memory_space<vmem>>, vector<288x128xbf16>
    tpu.vector_store %arg8[%c19, %c0_16], %1 {strides = array<i32>} : memref<324x384xbf16, #tpu.memory_space<vmem>>, vector<288x128xbf16>,
    %13 = vector.extract_strided_slice %5 {offsets = [0, 0], sizes = [17, 128], strides = [1, 1]} : vector<18x128xbf16> to vector<17x128xbf16>
    %c307 = arith.constant 307 : index
    %c0_17 = arith.constant 0 : index
    %14 = vector.load %arg8[%c307, %c0_17] : memref<324x384xbf16, #tpu.memory_space<vmem>>, vector<17x128xbf16>
    tpu.vector_store %arg8[%c307, %c0_17], %13 {strides = array<i32>} : memref<324x384xbf16, #tpu.memory_space<vmem>>, vector<17x128xbf16>,
    %15 = vector.extract_strided_slice %3 {offsets = [1, 0], sizes = [17, 128], strides = [1, 1]} : vector<18x128xbf16> to vector<17x128xbf16>
    %c0_18 = arith.constant 0 : index
    %c256 = arith.constant 256 : index
    %16 = vector.load %arg8[%c0_18, %c256] : memref<324x384xbf16, #tpu.memory_space<vmem>>, vector<17x128xbf16>
    tpu.vector_store %arg8[%c0_18, %c256], %15 {strides = array<i32>} : memref<324x384xbf16, #tpu.memory_space<vmem>>, vector<17x128xbf16>,
    %c17 = arith.constant 17 : index
    %c256_19 = arith.constant 256 : index
    %17 = vector.load %arg8[%c17, %c256_19] : memref<324x384xbf16, #tpu.memory_space<vmem>>, vector<288x128xbf16>
    tpu.vector_store %arg8[%c17, %c256_19], %1 {strides = array<i32>} : memref<324x384xbf16, #tpu.memory_space<vmem>>, vector<288x128xbf16>,
    %c305 = arith.constant 305 : index
    %c256_20 = arith.constant 256 : index
    %18 = vector.load %arg8[%c305, %c256_20] : memref<324x384xbf16, #tpu.memory_space<vmem>>, vector<18x128xbf16>
    tpu.vector_store %arg8[%c305, %c256_20], %5 {strides = array<i32>} : memref<324x384xbf16, #tpu.memory_space<vmem>>, vector<18x128xbf16>,
    %c323 = arith.constant 323 : index
    %c256_21 = arith.constant 256 : index
    %19 = vector.load %arg8[%c323, %c256_21] : memref<324x384xbf16, #tpu.memory_space<vmem>>, vector<1x128xbf16>
    tpu.vector_store %arg8[%c323, %c256_21], %6 {strides = array<i32>} : memref<324x384xbf16, #tpu.memory_space<vmem>>, vector<1x128xbf16>,
    %c0_22 = arith.constant 0 : index
    %c0_23 = arith.constant 0 : index
    %20 = vector.load %arg8[%c0_22, %c0_23] : memref<324x384xbf16, #tpu.memory_space<vmem>>, vector<288x384xbf16>
    %c0_24 = arith.constant 0 : index
    %c0_25 = arith.constant 0 : index
    %c0_26 = arith.constant 0 : index
    %21 = vector.load %arg4[%c0_24, %c0_25, %c0_26] : memref<3x384x128xbf16, #tpu.memory_space<vmem>>, vector<1x384x128xbf16>
    %22 = vector.shape_cast %21 : vector<1x384x128xbf16> to vector<384x128xbf16>
    %cst_27 = arith.constant dense<0.000000e+00> : vector<288x128xf32>
    %23 = tpu.matmul %20, %22, %cst_27 {dimension_numbers = #tpu.dot_dimension_numbers<[1], [0], [0], [1], [0, 0, 1, 1], [], []>} : vector<288x384xbf16>, vector<384x128xbf16>, vector<288x128xf32> -> vector<288x128xf32>
    %c18_28 = arith.constant 18 : index
    %c0_29 = arith.constant 0 : index
    %24 = vector.load %arg8[%c18_28, %c0_29] : memref<324x384xbf16, #tpu.memory_space<vmem>>, vector<288x384xbf16>
    %c1_30 = arith.constant 1 : index
    %c0_31 = arith.constant 0 : index
    %c0_32 = arith.constant 0 : index
    %25 = vector.load %arg4[%c1_30, %c0_31, %c0_32] : memref<3x384x128xbf16, #tpu.memory_space<vmem>>, vector<1x384x128xbf16>
    %26 = vector.shape_cast %25 : vector<1x384x128xbf16> to vector<384x128xbf16>
    %cst_33 = arith.constant dense<0.000000e+00> : vector<288x128xf32>
    %27 = tpu.matmul %24, %26, %cst_33 {dimension_numbers = #tpu.dot_dimension_numbers<[1], [0], [0], [1], [0, 0, 1, 1], [], []>} : vector<288x384xbf16>, vector<384x128xbf16>, vector<288x128xf32> -> vector<288x128xf32>
    %28 = arith.addf %23, %27 : vector<288x128xf32>
    %c36 = arith.constant 36 : index
    %c0_34 = arith.constant 0 : index
    %29 = vector.load %arg8[%c36, %c0_34] : memref<324x384xbf16, #tpu.memory_space<vmem>>, vector<288x384xbf16>
    %c2 = arith.constant 2 : index
    %c0_35 = arith.constant 0 : index
    %c0_36 = arith.constant 0 : index
    %30 = vector.load %arg4[%c2, %c0_35, %c0_36] : memref<3x384x128xbf16, #tpu.memory_space<vmem>>, vector<1x384x128xbf16>
    %31 = vector.shape_cast %30 : vector<1x384x128xbf16> to vector<384x128xbf16>
    %cst_37 = arith.constant dense<0.000000e+00> : vector<288x128xf32>
    %32 = tpu.matmul %29, %31, %cst_37 {dimension_numbers = #tpu.dot_dimension_numbers<[1], [0], [0], [1], [0, 0, 1, 1], [], []>} : vector<288x384xbf16>, vector<384x128xbf16>, vector<288x128xf32> -> vector<288x128xf32>
    %33 = arith.addf %28, %32 : vector<288x128xf32>
    %c0_38 = arith.constant 0 : index
    %c0_39 = arith.constant 0 : index
    %34 = vector.load %arg5[%c0_38, %c0_39] : memref<1x128xf32, #tpu.memory_space<vmem>>, vector<1x128xf32>
    %35 = vector.broadcast %34 : vector<1x128xf32> to vector<288x128xf32>
    %36 = arith.addf %33, %35 : vector<288x128xf32>
    %cst_40 = arith.constant 0.000000e+00 : f32
    %37 = vector.broadcast %cst_40 : f32 to vector<288x128xf32>
    %38 = arith.maximumf %36, %37 : vector<288x128xf32>
    %c0_41 = arith.constant 0 : index
    %c0_42 = arith.constant 0 : index
    %39 = vector.load %arg6[%c0_41, %c0_42] : memref<288x1xf32, #tpu.memory_space<vmem>>, vector<288x1xf32>
    %cst_43 = arith.constant 0.000000e+00 : f32
    %40 = vector.broadcast %cst_43 : f32 to vector<288x1xf32>
    %41 = arith.cmpf one, %39, %40 : vector<288x1xf32>
    %cst_44 = arith.constant 0.000000e+00 : f32
    %42 = vector.shape_cast %41 : vector<288x1xi1> to vector<288x1xi1>
    %43 = vector.broadcast %42 : vector<288x1xi1> to vector<288x128xi1>
    %44 = vector.broadcast %cst_44 : f32 to vector<288x128xf32>
    %45 = arith.select %43, %38, %44 : vector<288x128xi1>, vector<288x128xf32>
    %46 = arith.truncf %45 : vector<288x128xf32> to vector<288x128xbf16>
    %c0_45 = arith.constant 0 : index
    %c0_46 = arith.constant 0 : index
    %c0_47 = arith.constant 0 : index
    %47 = vector.load %arg7[%c0_45, %c0_46, %c0_47] : memref<1x288x128xbf16, #tpu.memory_space<vmem>>, vector<1x288x128xbf16>
    %48 = vector.shape_cast %47 : vector<1x288x128xbf16> to vector<288x128xbf16>
    %49 = vector.shape_cast %46 : vector<288x128xbf16> to vector<1x288x128xbf16>
    tpu.vector_store %arg7[%c0_45, %c0_46, %c0_47], %49 {strides = array<i32>} : memref<1x288x128xbf16, #tpu.memory_space<vmem>>, vector<1x288x128xbf16>,
    return
  }
  func.func @transform_0(%arg0: i32, %arg1: i32) -> (i32, i32, i32) {
    %c0_i32 = arith.constant 0 : i32
    %c0_i32_0 = arith.constant 0 : i32
    return %arg0, %arg1, %c0_i32 : i32, i32, i32
  }
  func.func @transform_1(%arg0: i32, %arg1: i32) -> (i32, i32, i32, i32) {
    %c0_i32 = arith.constant 0 : i32
    %c0_i32_0 = arith.constant 0 : i32
    %c0_i32_1 = arith.constant 0 : i32
    return %arg0, %arg1, %c0_i32, %c0_i32_0 : i32, i32, i32, i32
  }
  func.func @transform_2(%arg0: i32, %arg1: i32) -> (i32, i32, i32) {
    %c0_i32 = arith.constant 0 : i32
    %c0_i32_0 = arith.constant 0 : i32
    %c0_i32_1 = arith.constant 0 : i32
    %c0_i32_2 = arith.constant 0 : i32
    return %c0_i32, %c0_i32_0, %c0_i32_1 : i32, i32, i32
  }
  func.func @transform_3(%arg0: i32, %arg1: i32) -> (i32, i32) {
    %c0_i32 = arith.constant 0 : i32
    %c0_i32_0 = arith.constant 0 : i32
    %c0_i32_1 = arith.constant 0 : i32
    return %c0_i32, %c0_i32_0 : i32, i32
  }
  func.func @transform_4(%arg0: i32, %arg1: i32) -> (i32, i32) {
    %c0_i32 = arith.constant 0 : i32
    %c0_i32_0 = arith.constant 0 : i32
    %c0_i32_1 = arith.constant 0 : i32
    return %c0_i32, %c0_i32_0 : i32, i32
  }
  func.func @transform_5(%arg0: i32, %arg1: i32) -> (i32, i32, i32) {
    %c0_i32 = arith.constant 0 : i32
    %c0_i32_0 = arith.constant 0 : i32
    return %arg0, %arg1, %c0_i32 : i32, i32, i32
  }
}

module attributes {stable_mosaic.version = 11 : i64} {
  func.func @_conv3x3_kernel(%arg0: i32, %arg1: i32, %arg2: memref<1x288x128xbf16, #tpu.memory_space<vmem>>, %arg3: memref<1x1x36x128xbf16, #tpu.memory_space<vmem>>, %arg4: memref<3x384x128xbf16, #tpu.memory_space<vmem>>, %arg5: memref<1x128xf32, #tpu.memory_space<vmem>>, %arg6: memref<288x1xf32, #tpu.memory_space<vmem>>, %arg7: memref<1x288x128xf32, #tpu.memory_space<vmem>>, %arg8: memref<324x384xbf16, #tpu.memory_space<vmem>>) attributes {dimension_semantics = [#tpu.dimension_semantics<parallel>, #tpu.dimension_semantics<parallel>], iteration_bounds = array<i64: 2, 1>, scalar_prefetch = 0 : i64, scratch_operands = 1 : i64, tpu.core_type = #tpu.core_type<tc>, window_params = [{transform_indices = @transform_0, window_bounds = array<i64: 1, 288, 128>}, {transform_indices = @transform_1, window_bounds = array<i64: 1, 1, 36, 128>}, {pipeline_mode = #tpu.pipeline_mode<synchronous>, transform_indices = @transform_2, window_bounds = array<i64: 3, 384, 128>}, {pipeline_mode = #tpu.pipeline_mode<synchronous>, transform_indices = @transform_3, window_bounds = array<i64: 1, 128>}, {pipeline_mode = #tpu.pipeline_mode<synchronous>, transform_indices = @transform_4, window_bounds = array<i64: 288, 1>}, {transform_indices = @transform_5, window_bounds = array<i64: 1, 288, 128>}]} {
    %c0 = arith.constant 0 : index
    %c0_0 = arith.constant 0 : index
    %c0_1 = arith.constant 0 : index
    %0 = vector.load %arg2[%c0, %c0_0, %c0_1] : memref<1x288x128xbf16, #tpu.memory_space<vmem>>, vector<1x288x128xbf16>
    %1 = vector.shape_cast %0 : vector<1x288x128xbf16> to vector<288x128xbf16>
    %c0_2 = arith.constant 0 : index
    %c0_3 = arith.constant 0 : index
    %c0_4 = arith.constant 0 : index
    %c0_5 = arith.constant 0 : index
    %2 = vector.load %arg3[%c0_2, %c0_3, %c0_4, %c0_5] : memref<1x1x36x128xbf16, #tpu.memory_space<vmem>>, vector<1x1x18x128xbf16>
    %3 = vector.shape_cast %2 : vector<1x1x18x128xbf16> to vector<18x128xbf16>
    %c0_6 = arith.constant 0 : index
    %c0_7 = arith.constant 0 : index
    %c18 = arith.constant 18 : index
    %c0_8 = arith.constant 0 : index
    %4 = vector.load %arg3[%c0_6, %c0_7, %c18, %c0_8] : memref<1x1x36x128xbf16, #tpu.memory_space<vmem>>, vector<1x1x18x128xbf16>
    %5 = vector.shape_cast %4 : vector<1x1x18x128xbf16> to vector<18x128xbf16>
    %cst = arith.constant 0.000000e+00 : bf16
    %6 = vector.broadcast %cst : bf16 to vector<1x128xbf16>
    %c0_9 = arith.constant 0 : index
    %c128 = arith.constant 128 : index
    %7 = vector.load %arg8[%c0_9, %c128] : memref<324x384xbf16, #tpu.memory_space<vmem>>, vector<18x128xbf16>
    tpu.vector_store %arg8[%c0_9, %c128], %3 {strides = array<i32>} : memref<324x384xbf16, #tpu.memory_space<vmem>>, vector<18x128xbf16>,
    %c18_10 = arith.constant 18 : index
    %c128_11 = arith.constant 128 : index
    %8 = vector.load %arg8[%c18_10, %c128_11] : memref<324x384xbf16, #tpu.memory_space<vmem>>, vector<288x128xbf16>
    tpu.vector_store %arg8[%c18_10, %c128_11], %1 {strides = array<i32>} : memref<324x384xbf16, #tpu.memory_space<vmem>>, vector<288x128xbf16>,
    %c306 = arith.constant 306 : index
    %c128_12 = arith.constant 128 : index
    %9 = vector.load %arg8[%c306, %c128_12] : memref<324x384xbf16, #tpu.memory_space<vmem>>, vector<18x128xbf16>
    tpu.vector_store %arg8[%c306, %c128_12], %5 {strides = array<i32>} : memref<324x384xbf16, #tpu.memory_space<vmem>>, vector<18x128xbf16>,
    %c0_13 = arith.constant 0 : index
    %c0_14 = arith.constant 0 : index
    %10 = vector.load %arg8[%c0_13, %c0_14] : memref<324x384xbf16, #tpu.memory_space<vmem>>, vector<1x128xbf16>
    tpu.vector_store %arg8[%c0_13, %c0_14], %6 {strides = array<i32>} : memref<324x384xbf16, #tpu.memory_space<vmem>>, vector<1x128xbf16>,
    %c1 = arith.constant 1 : index
    %c0_15 = arith.constant 0 : index
    %11 = vector.load %arg8[%c1, %c0_15] : memref<324x384xbf16, #tpu.memory_space<vmem>>, vector<18x128xbf16>
    tpu.vector_store %arg8[%c1, %c0_15], %3 {strides = array<i32>} : memref<324x384xbf16, #tpu.memory_space<vmem>>, vector<18x128xbf16>,
    %c19 = arith.constant 19 : index
    %c0_16 = arith.constant 0 : index
    %12 = vector.load %arg8[%c19, %c0_16] : memref<324x384xbf16, #tpu.memory_space<vmem>>, vector<288x128xbf16>
    tpu.vector_store %arg8[%c19, %c0_16], %1 {strides = array<i32>} : memref<324x384xbf16, #tpu.memory_space<vmem>>, vector<288x128xbf16>,
    %13 = vector.extract_strided_slice %5 {offsets = [0, 0], sizes = [17, 128], strides = [1, 1]} : vector<18x128xbf16> to vector<17x128xbf16>
    %c307 = arith.constant 307 : index
    %c0_17 = arith.constant 0 : index
    %14 = vector.load %arg8[%c307, %c0_17] : memref<324x384xbf16, #tpu.memory_space<vmem>>, vector<17x128xbf16>
    tpu.vector_store %arg8[%c307, %c0_17], %13 {strides = array<i32>} : memref<324x384xbf16, #tpu.memory_space<vmem>>, vector<17x128xbf16>,
    %15 = vector.extract_strided_slice %3 {offsets = [1, 0], sizes = [17, 128], strides = [1, 1]} : vector<18x128xbf16> to vector<17x128xbf16>
    %c0_18 = arith.constant 0 : index
    %c256 = arith.constant 256 : index
    %16 = vector.load %arg8[%c0_18, %c256] : memref<324x384xbf16, #tpu.memory_space<vmem>>, vector<17x128xbf16>
    tpu.vector_store %arg8[%c0_18, %c256], %15 {strides = array<i32>} : memref<324x384xbf16, #tpu.memory_space<vmem>>, vector<17x128xbf16>,
    %c17 = arith.constant 17 : index
    %c256_19 = arith.constant 256 : index
    %17 = vector.load %arg8[%c17, %c256_19] : memref<324x384xbf16, #tpu.memory_space<vmem>>, vector<288x128xbf16>
    tpu.vector_store %arg8[%c17, %c256_19], %1 {strides = array<i32>} : memref<324x384xbf16, #tpu.memory_space<vmem>>, vector<288x128xbf16>,
    %c305 = arith.constant 305 : index
    %c256_20 = arith.constant 256 : index
    %18 = vector.load %arg8[%c305, %c256_20] : memref<324x384xbf16, #tpu.memory_space<vmem>>, vector<18x128xbf16>
    tpu.vector_store %arg8[%c305, %c256_20], %5 {strides = array<i32>} : memref<324x384xbf16, #tpu.memory_space<vmem>>, vector<18x128xbf16>,
    %c323 = arith.constant 323 : index
    %c256_21 = arith.constant 256 : index
    %19 = vector.load %arg8[%c323, %c256_21] : memref<324x384xbf16, #tpu.memory_space<vmem>>, vector<1x128xbf16>
    tpu.vector_store %arg8[%c323, %c256_21], %6 {strides = array<i32>} : memref<324x384xbf16, #tpu.memory_space<vmem>>, vector<1x128xbf16>,
    %c0_22 = arith.constant 0 : index
    %c0_23 = arith.constant 0 : index
    %20 = vector.load %arg8[%c0_22, %c0_23] : memref<324x384xbf16, #tpu.memory_space<vmem>>, vector<288x384xbf16>
    %c0_24 = arith.constant 0 : index
    %c0_25 = arith.constant 0 : index
    %c0_26 = arith.constant 0 : index
    %21 = vector.load %arg4[%c0_24, %c0_25, %c0_26] : memref<3x384x128xbf16, #tpu.memory_space<vmem>>, vector<1x384x128xbf16>
    %22 = vector.shape_cast %21 : vector<1x384x128xbf16> to vector<384x128xbf16>
    %cst_27 = arith.constant dense<0.000000e+00> : vector<288x128xf32>
    %23 = tpu.matmul %20, %22, %cst_27 {dimension_numbers = #tpu.dot_dimension_numbers<[1], [0], [0], [1], [0, 0, 1, 1], [], []>} : vector<288x384xbf16>, vector<384x128xbf16>, vector<288x128xf32> -> vector<288x128xf32>
    %c18_28 = arith.constant 18 : index
    %c0_29 = arith.constant 0 : index
    %24 = vector.load %arg8[%c18_28, %c0_29] : memref<324x384xbf16, #tpu.memory_space<vmem>>, vector<288x384xbf16>
    %c1_30 = arith.constant 1 : index
    %c0_31 = arith.constant 0 : index
    %c0_32 = arith.constant 0 : index
    %25 = vector.load %arg4[%c1_30, %c0_31, %c0_32] : memref<3x384x128xbf16, #tpu.memory_space<vmem>>, vector<1x384x128xbf16>
    %26 = vector.shape_cast %25 : vector<1x384x128xbf16> to vector<384x128xbf16>
    %cst_33 = arith.constant dense<0.000000e+00> : vector<288x128xf32>
    %27 = tpu.matmul %24, %26, %cst_33 {dimension_numbers = #tpu.dot_dimension_numbers<[1], [0], [0], [1], [0, 0, 1, 1], [], []>} : vector<288x384xbf16>, vector<384x128xbf16>, vector<288x128xf32> -> vector<288x128xf32>
    %28 = arith.addf %23, %27 : vector<288x128xf32>
    %c36 = arith.constant 36 : index
    %c0_34 = arith.constant 0 : index
    %29 = vector.load %arg8[%c36, %c0_34] : memref<324x384xbf16, #tpu.memory_space<vmem>>, vector<288x384xbf16>
    %c2 = arith.constant 2 : index
    %c0_35 = arith.constant 0 : index
    %c0_36 = arith.constant 0 : index
    %30 = vector.load %arg4[%c2, %c0_35, %c0_36] : memref<3x384x128xbf16, #tpu.memory_space<vmem>>, vector<1x384x128xbf16>
    %31 = vector.shape_cast %30 : vector<1x384x128xbf16> to vector<384x128xbf16>
    %cst_37 = arith.constant dense<0.000000e+00> : vector<288x128xf32>
    %32 = tpu.matmul %29, %31, %cst_37 {dimension_numbers = #tpu.dot_dimension_numbers<[1], [0], [0], [1], [0, 0, 1, 1], [], []>} : vector<288x384xbf16>, vector<384x128xbf16>, vector<288x128xf32> -> vector<288x128xf32>
    %33 = arith.addf %28, %32 : vector<288x128xf32>
    %c0_38 = arith.constant 0 : index
    %c0_39 = arith.constant 0 : index
    %34 = vector.load %arg5[%c0_38, %c0_39] : memref<1x128xf32, #tpu.memory_space<vmem>>, vector<1x128xf32>
    %35 = vector.broadcast %34 : vector<1x128xf32> to vector<288x128xf32>
    %36 = arith.addf %33, %35 : vector<288x128xf32>
    %37 = arith.negf %36 : vector<288x128xf32>
    %38 = math.exp %37 : vector<288x128xf32>
    %cst_40 = arith.constant 1.000000e+00 : f32
    %39 = vector.broadcast %cst_40 : f32 to vector<288x128xf32>
    %40 = arith.addf %39, %38 : vector<288x128xf32>
    %41 = arith.divf %39, %40 : vector<288x128xf32>
    %c0_41 = arith.constant 0 : index
    %c0_42 = arith.constant 0 : index
    %42 = vector.load %arg6[%c0_41, %c0_42] : memref<288x1xf32, #tpu.memory_space<vmem>>, vector<288x1xf32>
    %cst_43 = arith.constant 0.000000e+00 : f32
    %43 = vector.broadcast %cst_43 : f32 to vector<288x1xf32>
    %44 = arith.cmpf one, %42, %43 : vector<288x1xf32>
    %cst_44 = arith.constant 0.000000e+00 : f32
    %45 = vector.shape_cast %44 : vector<288x1xi1> to vector<288x1xi1>
    %46 = vector.broadcast %45 : vector<288x1xi1> to vector<288x128xi1>
    %47 = vector.broadcast %cst_44 : f32 to vector<288x128xf32>
    %48 = arith.select %46, %41, %47 : vector<288x128xi1>, vector<288x128xf32>
    %c0_45 = arith.constant 0 : index
    %c0_46 = arith.constant 0 : index
    %c0_47 = arith.constant 0 : index
    %49 = vector.load %arg7[%c0_45, %c0_46, %c0_47] : memref<1x288x128xf32, #tpu.memory_space<vmem>>, vector<1x288x128xf32>
    %50 = vector.shape_cast %49 : vector<1x288x128xf32> to vector<288x128xf32>
    %51 = vector.shape_cast %48 : vector<288x128xf32> to vector<1x288x128xf32>
    tpu.vector_store %arg7[%c0_45, %c0_46, %c0_47], %51 {strides = array<i32>} : memref<1x288x128xf32, #tpu.memory_space<vmem>>, vector<1x288x128xf32>,
    return
  }
  func.func @transform_0(%arg0: i32, %arg1: i32) -> (i32, i32, i32) {
    %c0_i32 = arith.constant 0 : i32
    %c0_i32_0 = arith.constant 0 : i32
    return %arg0, %arg1, %c0_i32 : i32, i32, i32
  }
  func.func @transform_1(%arg0: i32, %arg1: i32) -> (i32, i32, i32, i32) {
    %c0_i32 = arith.constant 0 : i32
    %c0_i32_0 = arith.constant 0 : i32
    %c0_i32_1 = arith.constant 0 : i32
    return %arg0, %arg1, %c0_i32, %c0_i32_0 : i32, i32, i32, i32
  }
  func.func @transform_2(%arg0: i32, %arg1: i32) -> (i32, i32, i32) {
    %c0_i32 = arith.constant 0 : i32
    %c0_i32_0 = arith.constant 0 : i32
    %c0_i32_1 = arith.constant 0 : i32
    %c0_i32_2 = arith.constant 0 : i32
    return %c0_i32, %c0_i32_0, %c0_i32_1 : i32, i32, i32
  }
  func.func @transform_3(%arg0: i32, %arg1: i32) -> (i32, i32) {
    %c0_i32 = arith.constant 0 : i32
    %c0_i32_0 = arith.constant 0 : i32
    %c0_i32_1 = arith.constant 0 : i32
    return %c0_i32, %c0_i32_0 : i32, i32
  }
  func.func @transform_4(%arg0: i32, %arg1: i32) -> (i32, i32) {
    %c0_i32 = arith.constant 0 : i32
    %c0_i32_0 = arith.constant 0 : i32
    %c0_i32_1 = arith.constant 0 : i32
    return %c0_i32, %c0_i32_0 : i32, i32
  }
  func.func @transform_5(%arg0: i32, %arg1: i32) -> (i32, i32, i32) {
    %c0_i32 = arith.constant 0 : i32
    %c0_i32_0 = arith.constant 0 : i32
    return %arg0, %arg1, %c0_i32 : i32, i32, i32
  }
}

</mosaic_0001>

<bundles_post_ra>
// kernel: class_subnet_forward.5
= control target key start
LH: loop header
LB: loop body
LE: loop exit
PB: predicated region body
PF: predicated region fallthrough
CT: control target
= control target key end

     0   :  { %s8601_s0 = inlined_call_operand.hbm [shape: bf16[2,288,128], index: 0, kind: input, shape index: {}]   ;;  %s8602_s1 = inlined_call_operand.hbm [shape: bf16[2,1,36,128], index: 1, kind: input, shape index: {}]   ;;  %s8603_s2 = inlined_call_operand.hbm [shape: bf16[3,384,128], index: 2, kind: input, shape index: {}]   ;;  %s8604_s3 = inlined_call_operand.hbm [shape: f32[1,128], index: 3, kind: input, shape index: {}]   ;;  %s8605_s4 = inlined_call_operand.hbm [shape: f32[288,1], index: 4, kind: input, shape index: {}]   ;;  %s8606_s5 = inlined_call_operand.hbm [shape: bf16[2,288,128], index: 5, kind: output, shape index: {}]  }
   0x1   :  { %8711 = sst [smem:[#allocation38_spill]] %s8601_s0 }
   0x2   :  { %8712 = sst [smem:[#allocation39_spill]] %s8603_s2 }
   0x3   :  { %8713 = sst [smem:[#allocation40_spill]] %s8604_s3 }
   0x4   :  { %8714 = sst [smem:[#allocation41_spill]] %s8605_s4 }
   0x5   :  { %10 = vsyncpa [#allocation4], 0 }
   0x6   :  { %12 = vsyncpa [#allocation4 + $0x1], 0 }
   0x7   :  { %13 = vsyncpa [#allocation7], 0 }
   0x8   :  { %15 = vsyncpa [#allocation7 + $0x1], 0 }
   0x9   :  { %16 = vsyncpa [#allocation10], 0 }
   0xa   :  { %17 = vsyncpa [#allocation5], 0 }
   0xb   :  { %19 = vsyncpa [#allocation5 + $0x1], 0  ;;  %s6159_s18 = smov 0   ;;  %s6161_s19 = smov 0  }
   0xc   :  { %s6163_s20 = smov 0   ;;  %s6165_s21 = smov 0  }
   0xd   :  { %s6167_s22 = smov 0   ;;  %s6169_s23 = smov 0  }
   0xe LB: > { %s6190_s24 = sadd.s32 4294967295, %s6114_s23   ;;  %s4840_s25 = sadd.s32 4294967294, %s6114_s23   ;;  %s6114_s23 = sphi %s6169_s23, %s25_s23   ;;  %s6110_s22 = sphi %s6167_s22, %s8922_s22   ;;  %s6106_s21 = sphi %s6165_s21, %s8921_s21   ;;  %s6102_s20 = sphi %s6163_s20, %s8920_s20   ;;  %s6098_s19 = sphi %s6161_s19, %s8919_s19   ;;  %s6094_s18 = sphi %s6159_s18, %s8918_s18  }
   0xf   : > { %p59_p0 = scmp.ne.s32.totalorder %s6098_s19, %s6094_s18  ;;  %p8607_p1 = scmp.eq.s32.totalorder %s6190_s24, 0 }
  0x10   : > { %p182_p3 = scmp.eq.s32.totalorder %s4840_s25, 1  ;;  %p4841_p5 = scmp.ge.s32.totalorder %s6114_s23, 1 }
  0x11   : > { %p6199_p4 = por %p8607_p1, %p59_p0  ;;  %p189_p7 = scmp.lt.s32.totalorder %s6114_s23, 3 }
  0x12   : > { %p6204_p6 = por %p182_p3, %p59_p0  ;;  %s6116_s29 = smov [#allocation8]  }
  0x13   : > { %s8715_s26 = scalar_select %p6199_p4, 1, 0 }
  0x14   : > { %s8716_s27 = scalar_select %p6204_p6, 1, 0 }
  0x15   : > { %p6209_p8 = pnand %p4841_p5, %p189_p7  ;;  %s201_s30 = sshll.u32 %s6116_s29, 4  ;;  %s6213_s30 = int_to_ptr.vmem [resolvable:$true] %s201_s30 }
  0x16   : > { %8717 = sst [smem:[#allocation18_spill]] %s8716_s27  ;;  %s6117_s7 = smov [#allocation9]  }
  0x17   : > { %s8718_s28 = scalar_select %p6209_p8, 1, 0 }
  0x18   : > { %p5503_p9 = pneg %p6209_p8  ;;  %s215_s8 = sshll.u32 %s6117_s7, 4  ;;  %s6224_s8 = int_to_ptr.vmem [resolvable:$true] %s215_s8 }
  0x19   : > { %s6118_s9 = smov [#allocation11]   ;;  %s8720_s2 = sld [smem:[#allocation39_spill]] }
  0x1a   : > { %p6220_p11 = pnand %p5503_p9, %p8607_p1  ;;  %s6226_s10 = sshll.u32 %s6118_s9, 4  ;;  %s226_s10 = int_to_ptr.vmem [resolvable:$true] %s6226_s10 }
  0x1c   : > { %p6236_p13 = pneg %p6220_p11 }
  0x1f   : > { %s5876_s13 = scalar_lea.hbm %s8720_s2, 9216 }
  0x20   : > { %p5877_p12 = scmp.ne.s32.totalorder %s8720_s2, %s5876_s13  ;;  %p5883_p5 = scmp.lt.u32.totalorder %s5876_s13, %s8720_s2 }
  0x22   : > { %p5879_p0 = pnand %p6236_p13, %p5877_p12 }
  0x24   : > { %p5880_p3 = pneg %p5879_p0 }
  0x26   : > { %p5885_p7 = pnand %p5883_p5, %p5880_p3 }
  0x28   : > { %5888 = shalt.err (!%p5885_p7)
}
  0x29   : > { %s5889_s29 = scalar_lea.vmem %s6213_s30, 9216  ;;  %p5897_p2 = scmp.lt.s32.totalorder %s6213_s30, %s6213_s30 }
  0x2a   : > { %p5890_p9 = scmp.ne.s32.totalorder %s6213_s30, %s5889_s29  ;;  %p5898_p6 = scmp.lt.s32.totalorder %s5889_s29, %s5889_s29 }
  0x2c   : > { %p5892_p10 = pnand %p5890_p9, %p6236_p13  ;;  %p5899_p12 = por %p5898_p6, %p5897_p2 }
  0x2e   : > { %p5893_p1 = pneg %p5892_p10 }
  0x30   : > { %p5900_p0 = pnand %p5899_p12, %p5893_p1 }
  0x32   : > { %5903 = shalt.err (!%p5900_p0)
}
  0x33   : > { %s8611_s7 = smov 64   ;;  %s8613_s9 = smov 4  }
  0x34   : > { %5506 = dma.hbm_to_vmem [thread:$0]  (!%p6220_p11), %s8720_s2, 9216, %s6213_s30, [#allocation7], %s8611_s7, %s8611_s7, %s8613_s9  }
  0x35   : > { %s8722_s3 = sld [smem:[#allocation40_spill]] }
  0x3b   : > { %s5904_s15 = scalar_lea.hbm %s8722_s3, 16 }
  0x3c   : > { %p5905_p1 = scmp.ne.s32.totalorder %s8722_s3, %s5904_s15  ;;  %p5911_p10 = scmp.lt.u32.totalorder %s5904_s15, %s8722_s3 }
  0x3e   : > { %p5907_p2 = pnand %p5905_p1, %p6236_p13 }
  0x40   : > { %p5908_p6 = pneg %p5907_p2 }
  0x42   : > { %p5913_p3 = pnand %p5911_p10, %p5908_p6 }
  0x44   : > { %5916 = shalt.err (!%p5913_p3)
}
  0x45   : > { %s5917_s30 = scalar_lea.vmem %s6224_s8, 16  ;;  %s5924_s11 = scalar_lea.vmem %s6224_s8, 32 }
  0x46   : > { %p5918_p5 = scmp.ne.s32.totalorder %s6224_s8, %s5917_s30  ;;  %p5925_p12 = scmp.lt.s32.totalorder %s6224_s8, %s6224_s8 }
  0x47   : > { %p5926_p0 = scmp.lt.s32.totalorder %s5924_s11, %s5917_s30 }
  0x48   : > { %p5920_p7 = pnand %p5918_p5, %p6236_p13 }
  0x49   : > { %p5927_p1 = por %p5926_p0, %p5925_p12 }
  0x4a   : > { %p5921_p9 = pneg %p5920_p7 }
  0x4c   : > { %p5928_p2 = pnand %p5927_p1, %p5921_p9 }
  0x4e   : > { %5931 = shalt.err (!%p5928_p2)
}
  0x4f   : > { %5509 = dma.hbm_to_vmem [thread:$0]  (!%p6220_p11), %s8722_s3, 16, %s6224_s8, [#allocation10]  }
  0x50   : > { %s8723_s4 = sld [smem:[#allocation41_spill]] }
  0x56   : > { %s5932_s15 = scalar_lea.hbm %s8723_s4, 4608 }
  0x57   : > { %p5933_p6 = scmp.ne.s32.totalorder %s8723_s4, %s5932_s15  ;;  %p5939_p5 = scmp.lt.u32.totalorder %s5932_s15, %s8723_s4 }
  0x59   : > { %p5935_p10 = pnand %p5933_p6, %p6236_p13 }
  0x5b   : > { %p5936_p3 = pneg %p5935_p10 }
  0x5d   : > { %p5941_p7 = pnand %p5939_p5, %p5936_p3 }
  0x5f   : > { %5944 = shalt.err (!%p5941_p7)
}
  0x60   : > { %s5945_s11 = scalar_lea.vmem %s226_s10, 4608  ;;  %p5953_p1 = scmp.lt.s32.totalorder %s226_s10, %s226_s10 }
  0x61   : > { %p5946_p9 = scmp.ne.s32.totalorder %s226_s10, %s5945_s11  ;;  %p5954_p2 = scmp.lt.s32.totalorder %s5945_s11, %s5945_s11 }
  0x63   : > { %p5948_p12 = pnand %p5946_p9, %p6236_p13  ;;  %p5955_p4 = por %p5954_p2, %p5953_p1 }
  0x65   : > { %p5949_p0 = pneg %p5948_p12 }
  0x67   : > { %p5956_p8 = pnand %p5955_p4, %p5949_p0 }
  0x69   : > { %5959 = shalt.err (!%p5956_p8)
}
  0x6a   : > { %s6121_s8 = smov 128   ;;  %s6122_s16 = smov 8  }
  0x6b   : > { %5512 = dma.hbm_to_vmem [thread:$0]  (!%p6220_p11), %s8723_s4, 4608, %s226_s10, [#allocation10], %s6121_s8, %s6121_s8, %s6122_s16  }
  0x6c   : > { %s46_s13 = sadd.s32 1, %s6102_s20  ;;  %s37_s14 = sadd.s32 1, %s6110_s22 }
  0x6d   : > { %p53_p4 = scmp.ne.s32.totalorder %s6102_s20, %s6098_s19  ;;  %p39_p8 = scmp.ge.s32.totalorder %s37_s14, 2 }
  0x6e   : > { %p54_p13 = scmp.eq.s32.totalorder %s6114_s23, 0  ;;  %p8724_p6 = scmp.eq.s32.totalorder %s6190_s24, 1 }
  0x6f   : > { %p5527_p3 = scmp.lt.s32.totalorder %s6114_s23, 2  ;;  %s8924_s14 = smov (%p39_p8, %s37_s14), 0 }
  0x70   : > { %p6310_p10 = por %p8724_p6, %p53_p4  ;;  %p55_p5 = por %p54_p13, %p53_p4 }
  0x71   : > { %s6318_s6 = sand.u32 1, %s6102_s20   ;;  %s41_s10 = ssub.s32 %s6110_s22, %s8924_s14 }
  0x72   : > { %p44_p11 = scmp.eq.s32.totalorder %s41_s10, 0  ;;  %s5478_s17 = smul.u32 144, %s6318_s6 }
  0x73   : > { %s5479_s25 = smul.u32 2304, %s6110_s22  ;;  %p6324_p7 = pnand %p5527_p3, %p55_p5 }
  0x74   : > { %s6329_s30 = scalar_select %p44_p11, %s6102_s20, %s46_s13  }
  0x75   : > { %s8727_s0 = sld [smem:[#allocation38_spill]]  ;;  %s243_s27 = scalar_lea.vmem [#allocation3], %s5478_s17 }
  0x76   : > { %s252_s12 = sshll.u32 %s243_s27, 4  ;;  %s240_s7 = scalar_lea.sflag [#allocation4], %s6318_s6  ;;  %s6336_s12 = int_to_ptr.vmem [resolvable:$true] %s252_s12 }
  0x77   : > { %p5962_p12 = pneg %p6324_p7 }
  0x7b   : > { %s6334_s16 = scalar_lea.hbm %s8727_s0, %s5479_s25  ;;  %s5965_s11 = scalar_lea.hbm %s8727_s0, 4608 }
  0x7c   : > { %s5960_s9 = scalar_lea.hbm %s6334_s16, 2304  ;;  %p5966_p2 = scmp.lt.u32.totalorder %s6334_s16, %s8727_s0 }
  0x7d   : > { %p5961_p9 = scmp.ne.s32.totalorder %s6334_s16, %s5960_s9  ;;  %p5967_p4 = scmp.lt.u32.totalorder %s5965_s11, %s5960_s9 }
  0x7e   : > { %p5969_p13 = scmp.lt.u32.totalorder %s5960_s9, %s6334_s16 }
  0x7f   : > { %p5963_p0 = pnand %p5962_p12, %p5961_p9  ;;  %p5968_p8 = por %p5967_p4, %p5966_p2 }
  0x81   : > { %p5964_p1 = pneg %p5963_p0  ;;  %p5970_p6 = por %p5969_p13, %p5968_p8 }
  0x83   : > { %p5971_p3 = pnand %p5970_p6, %p5964_p1 }
  0x85   : > { %5974 = shalt.err (!%p5971_p3)
}
  0x86   : > { %s5975_s17 = scalar_lea.vmem %s6336_s12, 2304  ;;  %s6123_s27 = smov [#allocation3]  }
  0x87   : > { %p5976_p5 = scmp.ne.s32.totalorder %s6336_s12, %s5975_s17  ;;  %s5980_s13 = sshll.u32 %s6123_s27, 4  ;;  %s5981_s13 = int_to_ptr.vmem [resolvable:$false] %s5980_s13 }
  0x88   : > { %s5982_s2 = scalar_lea.vmem %s5981_s13, 4608  ;;  %p5983_p0 = scmp.lt.s32.totalorder %s6336_s12, %s5981_s13 }
  0x89   : > { %p5978_p11 = pnand %p5976_p5, %p5962_p12  ;;  %p5984_p2 = scmp.lt.s32.totalorder %s5982_s2, %s5975_s17 }
  0x8b   : > { %p5979_p9 = pneg %p5978_p11  ;;  %p5985_p4 = por %p5984_p2, %p5983_p0 }
  0x8d   : > { %p5986_p8 = pnand %p5985_p4, %p5979_p9 }
  0x8f   : > { %5989 = shalt.err (!%p5986_p8)
}
  0x90   : > { %s8728_s9 = smov 4   ;;  %s8729_s25 = smov 64  }
  0x91   : > { %5516 = dma.hbm_to_vmem [thread:$0]  (!%p6324_p7), %s6334_s16, 2304, %s6336_s12, %s240_s7, %s8729_s25, %s8729_s25, %s8728_s9  }
  0x92   : > { %s5480_s11 = smul.u32 20, %s6318_s6  ;;  %s8730_s0 = sand.u32 1, %s6114_s23  }
  0x93   : > { %s5481_s8 = smul.u32 320, %s6110_s22  ;;  %s6381_s3 = scalar_lea.sflag [#allocation7], %s8730_s0 }
  0x94   : > { %s266_s2 = scalar_lea.vmem [#allocation6], %s5480_s11  ;;  %s5995_s16 = scalar_lea.hbm %s8602_s1, 640 }
  0x95   : > { %s6375_s13 = scalar_lea.hbm %s8602_s1, %s5481_s8  ;;  %s275_s10 = sshll.u32 %s266_s2, 4  ;;  %s6377_s10 = int_to_ptr.vmem [resolvable:$true] %s275_s10 }
  0x96   : > { %s5990_s4 = scalar_lea.hbm %s6375_s13, 320  ;;  %p5996_p3 = scmp.lt.u32.totalorder %s6375_s13, %s8602_s1 }
  0x97   : > { %p5991_p1 = scmp.ne.s32.totalorder %s6375_s13, %s5990_s4  ;;  %p5997_p5 = scmp.lt.u32.totalorder %s5995_s16, %s5990_s4 }
  0x98   : > { %p5999_p9 = scmp.lt.u32.totalorder %s5990_s4, %s6375_s13 }
  0x99   : > { %p5993_p13 = pnand %p5991_p1, %p5962_p12  ;;  %p5998_p11 = por %p5997_p5, %p5996_p3 }
  0x9b   : > { %p5994_p6 = pneg %p5993_p13  ;;  %p6000_p0 = por %p5999_p9, %p5998_p11 }
  0x9d   : > { %p6001_p2 = pnand %p6000_p0, %p5994_p6 }
  0x9f   : > { %6004 = shalt.err (!%p6001_p2)
}
  0xa0   : > { %s6005_s0 = scalar_lea.vmem %s6377_s10, 320  ;;  %s6124_s11 = smov [#allocation6]  }
  0xa1   : > { %p6006_p4 = scmp.ne.s32.totalorder %s6377_s10, %s6005_s0  ;;  %s6010_s17 = sshll.u32 %s6124_s11, 4  ;;  %s6011_s17 = int_to_ptr.vmem [resolvable:$false] %s6010_s17 }
  0xa2   : > { %s6012_s27 = scalar_lea.vmem %s6011_s17, 640  ;;  %p6013_p13 = scmp.lt.s32.totalorder %s6377_s10, %s6011_s17 }
  0xa3   : > { %p6008_p8 = pnand %p6006_p4, %p5962_p12  ;;  %p6014_p3 = scmp.lt.s32.totalorder %s6012_s27, %s6005_s0 }
  0xa5   : > { %p6009_p1 = pneg %p6008_p8  ;;  %p6015_p5 = por %p6014_p3, %p6013_p13 }
  0xa7   : > { %p6016_p11 = pnand %p6015_p5, %p6009_p1 }
  0xa9   : > { %6019 = shalt.err (!%p6016_p11)
}
  0xaa   : > { %5519 = dma.hbm_to_vmem [thread:$0]  (!%p6324_p7), %s6375_s13, 320, %s6377_s10, %s6381_s3, %s8729_s25, %s8729_s25, %s8728_s9  }
  0xab   : > { %p8731_p12 = scmp.ne.s32.totalorder %s8718_s28, 0 }
  0xad   : > { %287 = sbr.rel (%p8731_p12) target bundleno = 876 (0x36c), region = 40 }
  0xb4   : > { %s6413_s4 = sand.u32 1, %s6098_s19   ;;  %p8732_p6 = scmp.ne.s32.totalorder %s8715_s26, 0 }
  0xb5   : > { %s5482_s2 = smul.u32 144, %s6413_s4  ;;  %s290_s7 = scalar_lea.sflag [#allocation4], %s6413_s4 }
  0xb7   : > { %s6419_s29 = scalar_lea.vmem [#allocation3], %s5482_s2 }
  0xb8   : > { %6073 = dma.done.wait (%p8732_p6), %s290_s7, 2304  }
  0xb9   : > { %6075 = vsyncadd (%p8732_p6), %s290_s7, 4294964992  ;;  %s298_s3 = sand.u32 1, %s6190_s24   ;;  %s5483_s28 = smul.u32 20, %s6413_s4 }
  0xba   : > { %s299_s10 = scalar_lea.sflag [#allocation7], %s298_s3 }
  0xbb   : > { %s6427_s9 = scalar_lea.vmem [#allocation6], %s5483_s28 }
  0xbc   : > { %6077 = dma.done.wait (%p8732_p6), %s299_s10, 320  }
  0xbd   : > { %6079 = vsyncadd (%p8732_p6), %s299_s10, 4294966976  ;;  %p8733_p7 = scmp.eq.s32.totalorder %s6190_s24, 0 }
  0xbf   : > { %6081 = dma.done.wait (%p8733_p7), [#allocation7], 9216   ;;  %p8734_p9 = pmov %p8733_p7 }
  0xc0   : > { %p8735_p0 = pmov %p8733_p7 }
  0xc1   : > { %6083 = vsyncadd (%p8734_p9), [#allocation7], 4294958080 }
  0xc2   : > { %6085 = dma.done.wait (%p8735_p0), [#allocation10], 4624   ;;  %p8736_p2 = pmov %p8735_p0 }
  0xc3   : > { %v8670_v0 = vmov 0   ;;  %v5592_v1 = vld [vmem:[#allocation8 + $0xc0] sm:$0xff]   ;;  %v5594_v3 = vld [vmem:[#allocation8 + $0xc8] sm:$0xff]   ;;  %v5597_v5 = vld [vmem:[#allocation8 + $0x150] sm:$0xff]   ;;  %vm617_vm0 = vsmask.f32 256 }
  0xc4   : > { %6087 = vsyncadd (%p8736_p2), [#allocation10], 4294962672  ;;  %2143 = vmatprep.subr.bf16.mxu0 %v8670_v0  ;;  %5591 = vset.pattern.permute.xlu1 %v8670_v0  ;;  %v6444_v2 = vld [vmem:[#allocation8 + $0x140] sm:$0xff]   ;;  %v5595_v4 = vld [vmem:[#allocation8 + $0x148] sm:$0xff]   ;;  %vm622_vm1 = vsmask.f32 4368 }
  0xc5   : > { %5590 = vset.pattern.permute.xlu0 %v8670_v0  ;;  %2144 = vmatpush1.bf16.msra.mxu0 %v5592_v1  ;;  %v5596_v6 = vld [vmem:[#allocation8 + $0xd0] sm:$0xff]   ;;  %v5599_v7 = vld [vmem:[#allocation8 + $0x158] sm:$0xff]   ;;  %v5601_v9 = vld [vmem:[#allocation8 + $0x160] sm:$0xff]   ;;  %vm1833_vm3 = vcmask 1046528   ;;  %vm430_vm4 = vcmask 1040384   ;;  %vm431_vm5 = vcmask 1044484  }
  0xc6   : > { %5462 = vmatprep.subr.bf16.mxu1 %v6444_v2  ;;  %2145 = vmatprep.subr.bf16.mxu0 %v8670_v0  ;;  %v5598_v8 = vld [vmem:[#allocation8 + $0xd8] sm:$0xff]   ;;  %v5600_v10 = vld [vmem:[#allocation8 + $0xe0] sm:$0xff]   ;;  %v5603_v11 = vld [vmem:[#allocation8 + $0x168] sm:$0xff]   ;;  %vm659_vm6 = vcmask 1041408   ;;  %vm660_vm7 = vsmask.f32 1280 }
  0xc7   : > { %5470 = vmatpush3.bf16.msra.mxu1 %v6444_v2  ;;  %v5602_v12 = vld [vmem:[#allocation8 + $0xe8] sm:$0xff]   ;;  %v6453_v13 = vld [vmem:[%s6419_s29 + $0xc] sm:$0xf]  ;;  %v6462_v16 = vld [vmem:[%s6419_s29 + $0x18] sm:$0xf]  ;;  %vm1063_vm10 = vcmask 1043457  }
  0xc8   : > { %5463 = vmatprep.subr.bf16.mxu1 %v5595_v4  ;;  %8737 = vst [vmem:[#allocation19_spill] sm:$0xff] %v6453_v13  ;;  %v6456_v14 = vld [vmem:[%s6419_s29 + $0x10] sm:$0xf]  ;;  %v6459_v15 = vld [vmem:[%s6419_s29 + $0x14] sm:$0xf]  ;;  %v697_v18 = vshrl.u32 %v6453_v13, 16  ;;  %vm6492_vm2 = vmor %vm617_vm0, %vm622_vm1 }
  0xc9   : > { %2146 = vmatpush1.bf16.msra.mxu0 %v5594_v3  ;;  %v6465_v17 = vld [vmem:[%s6419_s29 + $0x1c] sm:$0xf]  ;;  %v707_v19 = vshrl.u32 %v6456_v14, 16  ;;  %v710_v20 = vshll.u32 %v6456_v14, 16  ;;  %v717_v21 = vshrl.u32 %v6459_v15, 16  ;;  %v8659_v22 = vshll.u32 %v6459_v15, 16  ;;  %vm6714_vm9 = vmor %vm430_vm4, %vm431_vm5 }
  0xca   : > { %2147 = vmatprep.subr.bf16.mxu0 %v8670_v0  ;;  %v8655_v23 = vshrl.u32 %v6462_v16, 16  ;;  %v8653_v24 = vshll.u32 %v6462_v16, 16  ;;  %v8648_v25 = vshrl.u32 %v6465_v17, 16  ;;  %v8647_v26 = vshll.u32 %v6465_v17, 16  ;;  %v5604_v28 = vld [vmem:[#allocation8 + $0xf0] sm:$0xff]   ;;  %v5606_v52 = vld [vmem:[#allocation8 + $0xf8] sm:$0xff]   ;;  %vm6750_vm12 = vmand %vm659_vm6, %vm660_vm7 }
  0xcb   : > { %5471 = vmatpush3.bf16.msra.mxu1 %v5595_v4  ;;  %v6479_v27 = vrot.slane %v697_v18, 7  ;;  %v5605_v29 = vld [vmem:[#allocation8 + $0x170] sm:$0xff]   ;;  %v1179_v30 = vrot.slane %v707_v19, 7  ;;  %v1183_v31 = vrot.slane %v717_v21, 7  ;;  %v6488_v33 = vld [vmem:[%s6419_s29 + $0x20] sm:$0xf] }
  0xcc   : > { %5464 = vmatprep.subr.bf16.mxu1 %v5597_v5  ;;  %v1187_v32 = vrot.slane %v8655_v23, 7  ;;  %v1191_v36 = vrot.slane %v8648_v25, 7  ;;  %v6500_v37 = vld [vmem:[%s6419_s29 + $0x24] sm:$0xf]  ;;  %v8646_v38 = vshrl.u32 %v6488_v33, 16  ;;  %v8645_v39 = vshll.u32 %v6488_v33, 16 }
  0xcd   : > { %2148 = vmatpush1.bf16.msra.mxu0 %v5596_v6  ;;  %8738 = vst [vmem:[#allocation20_spill] sm:$0xff] %v6479_v27  ;;  %v1178_v35 = vrot.slane %v6479_v27, 4  ;;  %v1180_v40 = vor.u32 %v1179_v30, %v710_v20  ;;  %v1182_v41 = vrot.slane %v1179_v30, 4  ;;  %v1184_v42 = vor.u32 %v1183_v31, %v8659_v22  ;;  %v5607_v53 = vld [vmem:[#allocation8 + $0x178] sm:$0xff]   ;;  %v6528_v58 = vld [vmem:[%s6419_s29 + $0x28] sm:$0xf] }
  0xce   : > { %2149 = vmatprep.subr.bf16.mxu0 %v8670_v0  ;;  %v1186_v43 = vrot.slane %v1183_v31, 4  ;;  %v1188_v44 = vor.u32 %v1187_v32, %v8653_v24  ;;  %v1190_v45 = vrot.slane %v1187_v32, 4  ;;  %v1192_v46 = vor.u32 %v1191_v36, %v8647_v26  ;;  %v6531_v59 = vld [vmem:[%s6419_s29 + $0x2c] sm:$0xf]  ;;  %v6540_v1 = vld [vmem:[%s6419_s29 + $0x30] sm:$0xf] }
  0xcf   : > { %5472 = vmatpush3.bf16.msra.mxu1 %v5597_v5  ;;  %v8644_v47 = vshrl.u32 %v6500_v37, 16  ;;  %v1181_v48 = vsel %vm6492_vm2, %v1178_v35, %v1180_v40  ;;  %v1185_v49 = vsel %vm6492_vm2, %v1182_v41, %v1184_v42  ;;  %v8643_v50 = vshll.u32 %v6500_v37, 16  ;;  %v7002_v27 = vld [vmem:[%s6419_s29 + $0x80] sm:$0xf]  ;;  %s8381_s24 = scalar_lea.vmem [#allocation12], %s5482_s2  ;;  %s5484_s26 = smul.u32 2304, %s6106_s21 }
  0xd0   : > { %5465 = vmatprep.subr.bf16.mxu1 %v5599_v7  ;;  %v1194_v51 = vrot.slane %v1191_v36, 4  ;;  %v1189_v54 = vsel %vm6492_vm2, %v1186_v43, %v1188_v44  ;;  %v1193_v55 = vsel %vm6492_vm2, %v1190_v45, %v1192_v46  ;;  %1350 = vst [vmem:[#allocation2 + $0x50] sm:$0xf] %v1181_v48  ;;  %1351 = vst [vmem:[#allocation2 + $0x5c] sm:$0xf] %v1185_v49  ;;  %v1195_v56 = vrot.slane %v8646_v38, 7 }
  0xd1   : > { %2150 = vmatpush1.bf16.msra.mxu0 %v5598_v8  ;;  %v1199_v57 = vrot.slane %v8644_v47, 7  ;;  %1352 = vst [vmem:[#allocation2 + $0x68] sm:$0xf] %v1189_v54  ;;  %1353 = vst [vmem:[#allocation2 + $0x74] sm:$0xf] %v1193_v55  ;;  %v8640_v63 = vshrl.u32 %v6528_v58, 16  ;;  %s8549_s16 = scalar_lea.hbm %s8606_s5, %s5484_s26 }
  0xd2   : > { %2151 = vmatprep.subr.bf16.mxu0 %v8670_v0  ;;  %v1196_v60 = vor.u32 %v1195_v56, %v8645_v39  ;;  %v1198_v61 = vrot.slane %v1195_v56, 4  ;;  %v8638_v3 = vshll.u32 %v6528_v58, 16  ;;  %v8637_v4 = vshrl.u32 %v6531_v59, 16  ;;  %v5613_v46 = vld [vmem:[#allocation8 + $0x108] sm:$0xff]   ;;  %v6581_v54 = vld [vmem:[%s6419_s29 + $0x38] sm:$0xf] }
  0xd3   : > { %5473 = vmatpush3.bf16.msra.mxu1 %v5599_v7  ;;  %v1200_v62 = vor.u32 %v1199_v57, %v8643_v50  ;;  %v8636_v5 = vshll.u32 %v6531_v59, 16  ;;  %v1202_v6 = vrot.slane %v1199_v57, 4  ;;  %v6546_v7 = vld [vmem:[%s6419_s29 + $0x34] sm:$0xf]  ;;  %v5616_v55 = vld [vmem:[#allocation8 + $0x110] sm:$0xff]   ;;  %vm652_vm5 = vcmask 1043456  }
  0xd4   : > { %5466 = vmatprep.subr.bf16.mxu1 %v5601_v9  ;;  %v1197_v8 = vsel %vm6492_vm2, %v1194_v51, %v1196_v60  ;;  %v8633_v30 = vshrl.u32 %v6546_v7, 16  ;;  %v8628_v31 = vshll.u32 %v6546_v7, 16  ;;  %v6586_v57 = vld [vmem:[%s6419_s29 + $0x3c] sm:$0xf]  ;;  %v8626_v60 = vshrl.u32 %v6581_v54, 16  ;;  %v5632_v38 = vld [vmem:[#allocation8 + $0x38] sm:$0xff]  }
  0xd5   : > { %2152 = vmatpush1.bf16.msra.mxu0 %v5600_v10  ;;  %v1203_v10 = vrot.slane %v8640_v63, 7  ;;  %1354 = vst [vmem:[#allocation2 + $0x80] sm:$0xf] %v1197_v8  ;;  %vm665_vm8 = vsmask.f32 5392  ;;  %v4233_v34 = vld [vmem:[#allocation11 + $0x98] sm:$0xff] }
  0xd6   : > { %2153 = vmatprep.subr.bf16.mxu0 %v8670_v0  ;;  %vm1064_vm11 = vsmask.f32 7942  ;;  %vm6786_vm13 = vmor %vm660_vm7, %vm665_vm8  ;;  %vm1140_vm15 = vsmask.f32 3328  ;;  %vm1141_vm1 = vsmask.f32 7440 }
  0xd7   : > { %5474 = vmatpush3.bf16.msra.mxu1 %v5601_v9  ;;  %v1201_v9 = vsel %vm6492_vm2, %v1198_v61, %v1200_v62  ;;  %v1204_v32 = vor.u32 %v1203_v10, %v8638_v3  ;;  %v1206_v35 = vrot.slane %v1203_v10, 4  ;;  %v6565_v40 = vld [vmem:[#allocation2 + $0x50] ss:$12 sps:$4 sm:$0xff]   ;;  %v8624_v61 = vshll.u32 %v6581_v54, 16  ;;  %vm6825_vm14 = vmand %vm1063_vm10, %vm1064_vm11  ;;  %s4698_s25 = sshll.u32 %s8381_s24, 4  ;;  %s4683_s21 = scalar_lea.sflag [#allocation5], %s6413_s4  ;;  %s8551_s25 = int_to_ptr.vmem [resolvable:$true] %s4698_s25 }
  0xd8   : > { %5467 = vmatprep.subr.bf16.mxu1 %v5603_v11  ;;  %1355 = vst [vmem:[#allocation2 + $0x8c] sm:$0xf] %v1201_v9  ;;  %8741 = vst [vmem:[#allocation21_spill] sm:$0xff] %v6565_v40  ;;  %v5609_v42 = vld [vmem:[#allocation2 + $0x68] ss:$12 sps:$4 sm:$0xff]   ;;  %v8615_v45 = vrot.slane %v6565_v40, 1 }
  0xd9   : > { %2154 = vmatpush1.bf16.msra.mxu0 %v5602_v12  ;;  %v5610_v12 = vld [vmem:[#allocation8 + $0x100] sm:$0xff]   ;;  %v1205_v43 = vsel %vm6492_vm2, %v1202_v6, %v1204_v32  ;;  %v8619_v9 = vshrl.u32 %v6586_v57, 16  ;;  %v8617_v10 = vshll.u32 %v6586_v57, 16  ;;  %vm653_vm6 = vsmask.f32 7938  ;;  %vm7156_vm7 = vmand %vm430_vm4, %vm617_vm0  ;;  %s6020_s12 = scalar_lea.vmem %s8551_s25, 2304 }
  0xda   : > { %2155 = vmatprep.subr.bf16.mxu0 %v8670_v0  ;;  %1356 = vst [vmem:[#allocation2 + $0x98] sm:$0xf] %v1205_v43  ;;  %vm7199_vm0 = vmor %vm1140_vm15, %vm1141_vm1  ;;  %p6021_p4 = scmp.ne.s32.totalorder %s8551_s25, %s6020_s12  ;;  %s6126_s8 = smov [#allocation12]  }
  0xdb   : > { %5475 = vmatpush3.bf16.msra.mxu1 %v5603_v11  ;;  %v8635_v11 = vshrl.u32 %v6540_v1, 16  ;;  %vm7220_vm4 = vmand %vm652_vm5, %vm653_vm6  ;;  %s6024_s0 = sshll.u32 %s6126_s8, 4  ;;  %s6025_s0 = int_to_ptr.vmem [resolvable:$false] %s6024_s0 }
  0xdc   : > { %5468 = vmatprep.subr.bf16.mxu1 %v5605_v29  ;;  %p6022_p8 = pnand %p6021_p4, %p6310_p10  ;;  %s6026_s11 = scalar_lea.vmem %s6025_s0, 4608 }
  0xdd   : > { %2156 = vmatpush1.bf16.msra.mxu0 %v5604_v28  ;;  %v1207_v28 = vrot.slane %v8637_v4, 7  ;;  %v1211_v36 = vrot.slane %v8635_v11, 7  ;;  %p6027_p13 = scmp.lt.s32.totalorder %s8551_s25, %s6025_s0  ;;  %p6028_p3 = scmp.lt.s32.totalorder %s6026_s11, %s6020_s12 }
  0xde   : > { %2157 = vmatprep.subr.bf16.mxu0 %v8670_v0  ;;  %p6023_p1 = pneg %p6022_p8 }
  0xdf   : > { %5476 = vmatpush3.bf16.msra.mxu1 %v5605_v29  ;;  %v8634_v29 = vshll.u32 %v6540_v1, 16  ;;  %v1208_v41 = vor.u32 %v1207_v28, %v8636_v5  ;;  %v1210_v49 = vrot.slane %v1207_v28, 4  ;;  %v1214_v51 = vrot.slane %v1211_v36, 4  ;;  %v5611_v6 = vld [vmem:[#allocation2 + $0x80] ss:$12 sps:$4 sm:$0xff]   ;;  %p6029_p5 = por %p6028_p3, %p6027_p13 }
  0xe0   : > { %5469 = vmatprep.subr.bf16.mxu1 %v5607_v53  ;;  %v1219_v28 = vrot.slane %v8626_v60, 7  ;;  %v1859_v32 = vrot.slane %v5611_v6, 1 }
  0xe1   : > { %2158 = vmatpush1.bf16.msra.mxu0 %v5606_v52  ;;  %v1212_v44 = vor.u32 %v1211_v36, %v8634_v29  ;;  %v1209_v48 = vsel %vm6492_vm2, %v1206_v35, %v1208_v41  ;;  %v1853_v52 = vrot.slane %v5609_v42, 1  ;;  %v5612_v35 = vld [vmem:[#allocation8] sm:$0xff]   ;;  %v6603_v41 = vld [vmem:[%s6419_s29 + $0x40] sm:$0xf]  ;;  %v6606_v42 = vld [vmem:[%s6419_s29 + $0x44] sm:$0xf]  ;;  %p6030_p11 = pnand %p6029_p5, %p6023_p1 }
  0xe2   : > { %2159 = vmatprep.subr.bf16.mxu0 %v8670_v0  ;;  %1357 = vst [vmem:[#allocation2 + $0xa4] sm:$0xf] %v1209_v48  ;;  %v1220_v43 = vor.u32 %v1219_v28, %v8624_v61  ;;  %v8616_v48 = vshrl.u32 %v6603_v41, 16 }
  0xe3   : > { %5477 = vmatpush3.bf16.msra.mxu1 %v5607_v53  ;;  %v1215_v53 = vrot.slane %v8633_v30, 7  ;;  %v1213_v56 = vsel %vm6492_vm2, %v1210_v49, %v1212_v44  ;;  %v1854_v62 = vsel %vm1833_vm3, %v8615_v45, %v1853_v52  ;;  %v1222_v44 = vrot.slane %v1219_v28, 4  ;;  %v5614_v45 = vld [vmem:[#allocation8 + $0x8] sm:$0xff]  }
  0xe4   : > { %2716 = vmatprep.subr.bf16.mxu1 %v8670_v0  ;;  %1358 = vst [vmem:[#allocation2 + $0xb0] sm:$0xf] %v1213_v56  ;;  %5326 = vmatprep.mubr.bf16.mxu1 %v1854_v62  ;;  %v1860_v49 = vsel %vm1833_vm3, %v1853_v52, %v1859_v32  ;;  %v8621_v56 = vshll.u32 %v6603_v41, 16  ;;  %v8620_v62 = vshll.u32 %v6606_v42, 16  ;;  %v1227_v52 = vrot.slane %v8616_v48, 7 }
  0xe5   : > { %2160 = vmatpush1.bf16.msra.mxu0 %v5610_v12  ;;  %v1216_v8 = vor.u32 %v1215_v53, %v8628_v31  ;;  %v1218_v12 = vrot.slane %v1215_v53, 4  ;;  %v5619_v53 = vld [vmem:[#allocation8 + $0x118] sm:$0xff]  }
  0xe6   : > { %2161 = vmatprep.subr.bf16.mxu0 %v8670_v0  ;;  %5327 = vmatmul.mubr.bf16.vlgmr.msra.gmra.mrb[0].mxu1 %v1860_v49  ;;  %v1228_v49 = vor.u32 %v1227_v52, %v8621_v56  ;;  %v1230_v48 = vrot.slane %v1227_v52, 4 }
  0xe7   : > { %v1217_v36 = vsel %vm6492_vm2, %v1214_v51, %v1216_v8  ;;  %v8618_v51 = vshrl.u32 %v6606_v42, 16  ;;  %v1221_v8 = vsel %vm6492_vm2, %v1218_v12, %v1220_v43  ;;  %2717 = vmatpush1.bf16.msra.mxu1 %v5612_v35  ;;  %v5618_v35 = vld [vmem:[#allocation8 + $0x10] sm:$0xff]  }
  0xe8   : > { %1359 = vst [vmem:[#allocation2 + $0xbc] sm:$0xf] %v1217_v36  ;;  %1360 = vst [vmem:[#allocation2 + $0xc8] sm:$0xf] %v1221_v8  ;;  %2718 = vmatprep.subr.bf16.mxu1 %v8670_v0  ;;  %v6634_v8 = vld [vmem:[%s6419_s29 + $0x48] sm:$0xf] }
  0xe9   : > { %2162 = vmatpush1.bf16.msra.mxu0 %v5613_v46  ;;  %v1223_v46 = vrot.slane %v8619_v9, 7  ;;  %v5615_v6 = vld [vmem:[#allocation2 + $0x98] ss:$12 sps:$4 sm:$0xff]  }
  0xea   : > { %2163 = vmatprep.subr.bf16.mxu0 %v8670_v0  ;;  %v1865_v12 = vrot.slane %v5615_v6, 1  ;;  %v6640_v9 = vld [vmem:[%s6419_s29 + $0x4c] sm:$0xf] }
  0xeb   : > { %v1224_v28 = vor.u32 %v1223_v46, %v8617_v10  ;;  %v1226_v36 = vrot.slane %v1223_v46, 4  ;;  %v5622_v46 = vld [vmem:[#allocation8 + $0x120] sm:$0xff]   ;;  %2719 = vmatpush1.bf16.msra.mxu1 %v5614_v45 }
  0xec   : > { %2720 = vmatprep.subr.bf16.mxu1 %v8670_v0 }
  0xed   : > { %2164 = vmatpush1.bf16.msra.mxu0 %v5616_v55  ;;  %v1231_v55 = vrot.slane %v8618_v51, 7  ;;  %v1225_v43 = vsel %vm6492_vm2, %v1222_v44, %v1224_v28  ;;  %v1866_v51 = vsel %vm1833_vm3, %v1859_v32, %v1865_v12  ;;  %v1229_v6 = vsel %vm6492_vm2, %v1226_v36, %v1228_v49  ;;  %v5620_v49 = vld [vmem:[#allocation8 + $0x18] sm:$0xff]  }
  0xee   : > { %2165 = vmatprep.subr.bf16.mxu0 %v8670_v0  ;;  %1361 = vst [vmem:[#allocation2 + $0xd4] sm:$0xf] %v1225_v43  ;;  %v8622_v44 = vshrl.u32 %v6634_v8, 16  ;;  %v8625_v28 = vshll.u32 %v6634_v8, 16  ;;  %5330 = vmatprep.mubr.bf16.mxu1 %v1866_v51  ;;  %1362 = vst [vmem:[#allocation2 + $0xe0] sm:$0xf] %v1229_v6 }
  0xef   : > { %v1232_v10 = vor.u32 %v1231_v55, %v8620_v62  ;;  %v5617_v52 = vld [vmem:[#allocation2 + $0xb0] ss:$12 sps:$4 sm:$0xff]   ;;  %v8623_v32 = vshrl.u32 %v6640_v9, 16  ;;  %v1234_v36 = vrot.slane %v1231_v55, 4  ;;  %2721 = vmatpush1.bf16.msra.mxu1 %v5618_v35  ;;  %v5624_v35 = vld [vmem:[#allocation8 + $0x20] sm:$0xff]  }
  0xf0   : > { %v1235_v45 = vrot.slane %v8622_v44, 7  ;;  %v1871_v51 = vrot.slane %v5617_v52, 1  ;;  %v6658_v6 = vld [vmem:[%s6419_s29 + $0x54] sm:$0xf]  ;;  %2722 = vmatprep.subr.bf16.mxu1 %v8670_v0 }
  0xf1   : > { %2166 = vmatpush1.bf16.msra.mxu0 %v5619_v53  ;;  %v1233_v43 = vsel %vm6492_vm2, %v1230_v48, %v1232_v10  ;;  %v8627_v53 = vshll.u32 %v6640_v9, 16  ;;  %v1239_v10 = vrot.slane %v8623_v32, 7  ;;  %v6655_v48 = vld [vmem:[%s6419_s29 + $0x50] sm:$0xf]  ;;  %v8630_v61 = vshrl.u32 %v6658_v6, 16 }
  0xf2   : > { %2167 = vmatprep.subr.bf16.mxu0 %v8670_v0  ;;  %1363 = vst [vmem:[#allocation2 + $0xec] sm:$0xf] %v1233_v43  ;;  %v5625_v62 = vld [vmem:[#allocation8 + $0x128] sm:$0xff]   ;;  %v1236_v43 = vor.u32 %v1235_v45, %v8625_v28  ;;  %v1238_v55 = vrot.slane %v1235_v45, 4  ;;  %v8632_v56 = vshrl.u32 %v6655_v48, 16  ;;  %v8631_v44 = vshll.u32 %v6655_v48, 16 }
  0xf3   : > { %v1872_v52 = vsel %vm1833_vm3, %v1865_v12, %v1871_v51  ;;  %v1240_v32 = vor.u32 %v1239_v10, %v8627_v53  ;;  %v1242_v60 = vrot.slane %v1239_v10, 4  ;;  %v6679_v31 = vrot.slane %v8630_v61, 7  ;;  %2723 = vmatpush1.bf16.msra.mxu1 %v5620_v49  ;;  %v6700_v49 = vld [vmem:[%s6419_s29 + $0x8] sm:$0xf] }
  0xf4   : > { %5331 = vmatmul.mubr.bf16.gmra.mrb[4].mxu1 %v1872_v52  ;;  %v1237_v28 = vsel %vm6492_vm2, %v1234_v36, %v1236_v43  ;;  %v1243_v12 = vrot.slane %v8632_v56, 7  ;;  %v5628_v52 = vld [vmem:[#allocation8 + $0x130] sm:$0xff]   ;;  %2724 = vmatprep.subr.bf16.mxu1 %v8670_v0  ;;  %8743 = vst [vmem:[#allocation23_spill] sm:$0xff] %v6700_v49 }
  0xf5   : > { %2168 = vmatpush1.bf16.msra.mxu0 %v5622_v46  ;;  %v8629_v46 = vshll.u32 %v6658_v6, 16  ;;  %v5621_v45 = vld [vmem:[#allocation2 + $0xc8] ss:$12 sps:$4 sm:$0xff]   ;;  %v1241_v53 = vsel %vm6492_vm2, %v1238_v55, %v1240_v32  ;;  %1364 = vst [vmem:[#allocation2 + $0xf8] sm:$0xf] %v1237_v28 }
  0xf6   : > { %2169 = vmatprep.subr.bf16.mxu0 %v8670_v0  ;;  %v1877_v36 = vrot.slane %v5621_v45, 1  ;;  %1365 = vst [vmem:[#allocation2 + $0x104] sm:$0xf] %v1241_v53  ;;  %v1244_v10 = vor.u32 %v1243_v12, %v8631_v44  ;;  %v1246_v43 = vrot.slane %v1243_v12, 4  ;;  %v6694_v53 = vld [vmem:[%s6419_s29] sm:$0xf] }
  0xf7   : > { %v1248_v28 = vor.u32 %v6679_v31, %v8629_v46  ;;  %v6697_v45 = vld [vmem:[%s6419_s29 + $0x4] sm:$0xf]  ;;  %v6709_v61 = vld [vmem:[%s6427_s9 + $0x8] sm:$0x1]  ;;  %2725 = vmatpush1.bf16.msra.mxu1 %v5624_v35  ;;  %v668_v35 = vshrl.u32 %v6694_v53, 16  ;;  %v671_v3 = vshll.u32 %v6694_v53, 16 }
  0xf8   : > { %v1878_v55 = vsel %vm1833_vm3, %v1871_v51, %v1877_v36  ;;  %8742 = vst [vmem:[#allocation22_spill] sm:$0xff] %v6697_v45  ;;  %v6706_v51 = vld [vmem:[%s6427_s9 + $0x4] sm:$0xf]  ;;  %393 = vst [vmem:[#allocation2 + $0x1c] sm:$0x1] %v6709_v61  ;;  %v8641_v56 = vshrl.u32 %v6709_v61, 16  ;;  %2726 = vmatprep.subr.bf16.mxu1 %v8670_v0 }
  0xf9   : > { %2170 = vmatpush1.bf16.msra.mxu0 %v5625_v62  ;;  %v6683_v32 = vld [vmem:[#allocation2 + $0xe0] ss:$12 sps:$4 sm:$0xff]   ;;  %v1245_v62 = vsel %vm6492_vm2, %v1242_v60, %v1244_v10  ;;  %5334 = vmatprep.mubr.bf16.mxu1 %v1878_v55  ;;  %v1249_v46 = vsel %vm6492_vm2, %v1246_v43, %v1248_v28  ;;  %v433_v60 = vrot.slane %v6694_v53, 7  ;;  %v438_v43 = vrot.slane %v6700_v49, 7  ;;  %392 = vst [vmem:[#allocation2 + $0x10] sm:$0xf] %v6706_v51 }
  0xfa   : > { %2171 = vmatprep.subr.bf16.mxu0 %v8670_v0  ;;  %v1883_v12 = vrot.slane %v6683_v32, 1  ;;  %1366 = vst [vmem:[#allocation2 + $0x110] sm:$0xf] %v1245_v62  ;;  %1367 = vst [vmem:[#allocation2 + $0x11c] sm:$0xf] %v1249_v46  ;;  %v5631_v10 = vld [vmem:[#allocation8 + $0x138] sm:$0xff]  }
  0xfb   : > { %v435_v32 = vrot.slane %v6697_v45, 7  ;;  %v441_v28 = vrot.slane %v6453_v13, 7  ;;  %v8639_v55 = vshrl.u32 %v6706_v51, 16  ;;  %v434_v62 = vrot.slane %v433_v60, 4  ;;  %577 = vst [vmem:[#allocation2 + $0x1c] sm:$0xe] %v433_v60 }
  0xfc   : > { %v1884_v46 = vsel %vm1833_vm3, %v1877_v36, %v1883_v12  ;;  %v8642_v30 = vshll.u32 %v6709_v61, 16  ;;  %v440_v11 = vrot.slane %v438_v43, 4  ;;  %v644_v60 = vrot.slane %v8641_v56, 7  ;;  %v5630_v56 = vld [vmem:[#allocation8 + $0x30] sm:$0xff]  }
  0xfd   : > { %2172 = vmatpush1.bf16.msra.mxu0 %v5628_v52  ;;  %v5626_v52 = vld [vmem:[#allocation8 + $0x28] sm:$0xff]   ;;  %5335 = vmatmul.mubr.bf16.gmra.mrb[8].mxu1 %v1884_v46  ;;  %v437_v29 = vrot.slane %v435_v32, 4  ;;  %v6731_v5 = vrot.slane %v8639_v55, 7  ;;  %v5627_v36 = vld [vmem:[#allocation2 + $0xf8] ss:$12 sps:$4 sm:$0xff]   ;;  %v436_v4 = vsel %vm6714_vm9, %v434_v62, %v435_v32  ;;  %v670_v63 = vrot.slane %v668_v35, 6 }
  0xfe   : > { %2173 = vmatprep.subr.bf16.mxu0 %v8670_v0  ;;  %v442_v55 = vsel %vm6714_vm9, %v440_v11, %v441_v28  ;;  %578 = vst [vmem:[#allocation2 + $0x28] sm:$0xf] %v436_v4  ;;  %v662_v62 = vld [vmem:[#allocation2 + $0x18] sm:$0x3]  ;;  %2727 = vmatpush1.bf16.msra.mxu1 %v5626_v52  ;;  %v1889_v53 = vrot.slane %v5627_v36, 1  ;;  %v673_v4 = vrot.slane %v671_v3, 7 }
  0xff   : > { %v439_v46 = vsel %vm6714_vm9, %v437_v29, %v438_v43  ;;  %v640_v32 = vrot.slane %v6731_v5, 4  ;;  %580 = vst [vmem:[#allocation2 + $0x40] sm:$0xf] %v442_v55  ;;  %v8746_v29 = vmov 0  ;;  %v8652_v11 = vshrl.u32 %v6697_v45, 16  ;;  %2728 = vmatprep.subr.bf16.mxu1 %v8670_v0 }
 0x100   : > { %579 = vst [vmem:[#allocation2 + $0x34] sm:$0xf] %v439_v46  ;;  %v8747_v29 = vsel %vm6750_vm12, 4294967295, %v8746_v29  ;;  %v6756_v43 = vld [vmem:[%s6419_s29 + $0x58] sm:$0xf]  ;;  %v8650_v55 = vshll.u32 %v6697_v45, 16  ;;  %v674_v47 = vor.u32 %v673_v4, %v670_v63 }
 0x101   : > { %2174 = vmatpush1.bf16.msra.mxu0 %v5631_v10  ;;  %v647_v10 = vor.u32 %v8642_v30, %v644_v60  ;;  %8748 = vst [vmem:[#allocation24_spill] sm:$0xff] %v8747_v29  ;;  %v8651_v52 = vshrl.u32 %v6700_v49, 16  ;;  %v8649_v36 = vshll.u32 %v6700_v49, 16  ;;  %v699_v60 = vrot.slane %v697_v18, 6  ;;  %v6766_v46 = vld [vmem:[%s6419_s29 + $0x5c] sm:$0xf] }
 0x102   : > { %5306 = vmatprep.subr.bf16.mxu0 %v6444_v2  ;;  %v1890_v30 = vsel %vm1833_vm3, %v1883_v12, %v1889_v53  ;;  %v6769_v50 = vld [vmem:[#allocation2 + $0x110] ss:$12 sps:$4 sm:$0xff]   ;;  %v679_v39 = vrot.slane %v8652_v11, 6  ;;  %v682_v18 = vrot.slane %v8650_v55, 7  ;;  %2729 = vmatpush1.bf16.msra.mxu1 %v5630_v56  ;;  %v8665_v56 = vshll.u32 %v6756_v43, 16  ;;  %v5819_v29 = vld [vmem:[#allocation8 + $0x140] sm:$0xff]  }
 0x103   : > { %v648_v2 = vsel %vm6492_vm2, %v640_v32, %v647_v10  ;;  %5338 = vmatprep.mubr.bf16.mxu1 %v1890_v30  ;;  %v689_v12 = vrot.slane %v8651_v52, 6  ;;  %v692_v25 = vrot.slane %v8649_v36, 7  ;;  %v8658_v32 = vrot.slane %v6769_v50, 1  ;;  %2730 = vmatprep.subr.bf16.mxu1 %v8670_v0  ;;  %v6806_v11 = vld [vmem:[%s6419_s29 + $0x60] sm:$0xf] }
 0x104   : > { %v663_v26 = vsel %vm6750_vm12, %v648_v2, %v662_v62  ;;  %v675_v30 = vrot.slane %v674_v47, 4  ;;  %v8654_v62 = vshll.u32 %v6453_v13, 16  ;;  %v6791_v10 = vrot.slane %v668_v35, 7 }
 0x105   : > { %664 = vst [vmem:[#allocation2 + $0x18] sm:$0x3] %v663_v26  ;;  %v683_v4 = vor.u32 %v682_v18, %v679_v39  ;;  %v693_v2 = vor.u32 %v692_v25, %v689_v12  ;;  %v8657_v36 = vshrl.u32 %v6756_v43, 16  ;;  %v1896_v26 = vsel %vm1833_vm3, %v1889_v53, %v8658_v32  ;;  %v6809_v39 = vld [vmem:[%s6419_s29 + $0x64] sm:$0xf] }
 0x106   : > { %8751 = vst [vmem:[#allocation25_spill] sm:$0xff] %v6791_v10  ;;  %v702_v55 = vrot.slane %v8654_v62, 7  ;;  %v6802_v52 = vor.u32 %v6791_v10, %v671_v3  ;;  %v8656_v35 = vshrl.u32 %v6766_v46, 16  ;;  %5339 = vmatmul.mubr.bf16.gmra.mrb[12].mxu1 %v1896_v26  ;;  %v8662_v53 = vshll.u32 %v6766_v46, 16  ;;  %v5639_v26 = vld [vmem:[#allocation8 + $0x40] sm:$0xff]  }
 0x107   : > { %v684_v25 = vsel %vm6786_vm13, %v675_v30, %v683_v4  ;;  %v685_v18 = vrot.slane %v683_v4, 4  ;;  %v695_v12 = vrot.slane %v693_v2, 4  ;;  %2731 = vmatpush1.bf16.msra.mxu1 %v5632_v38  ;;  %v1250_v3 = vrot.slane %v6679_v31, 4 }
 0x108   : > { %v6814_v24 = vor.u32 %v702_v55, %v699_v60  ;;  %1069 = vst [vmem:[#allocation2 + $0x24] sm:$0xf] %v684_v25  ;;  %v1251_v62 = vrot.slane %v8657_v36, 7  ;;  %v1255_v23 = vrot.slane %v8656_v35, 7  ;;  %v8752_v4 = vmov 0  ;;  %2732 = vmatprep.subr.bf16.mxu1 %v8670_v0 }
 0x109   : > { %v694_v30 = vsel %vm6786_vm13, %v685_v18, %v693_v2  ;;  %v8753_v4 = vsel %vm6825_vm14, 4294967295, %v8752_v4  ;;  %v8660_v38 = vshrl.u32 %v6806_v11, 16  ;;  %v8664_v31 = vshll.u32 %v6806_v11, 16 }
 0x10a   : > { %8754 = vst [vmem:[#allocation26_spill] sm:$0xff] %v8753_v4  ;;  %v8661_v55 = vshrl.u32 %v6809_v39, 16  ;;  %v704_v60 = vsel %vm6786_vm13, %v695_v12, %v6814_v24  ;;  %1070 = vst [vmem:[#allocation2 + $0x30] sm:$0xf] %v694_v30  ;;  %v1252_v2 = vor.u32 %v1251_v62, %v8665_v56  ;;  %v1254_v25 = vrot.slane %v1251_v62, 4 }
 0x10b   : > { %v1256_v18 = vor.u32 %v1255_v23, %v8662_v53  ;;  %1071 = vst [vmem:[#allocation2 + $0x3c] sm:$0xf] %v704_v60  ;;  %v8663_v36 = vshll.u32 %v6809_v39, 16  ;;  %v1258_v32 = vrot.slane %v1255_v23, 4  ;;  %v1259_v22 = vrot.slane %v8660_v38, 7  ;;  %2733 = vmatpush1.bf16.msra.mxu1 %v5639_v26  ;;  %v5640_v23 = vld [vmem:[#allocation8 + $0x48] sm:$0xff]  }
 0x10c   : > { %v1066_v35 = vld [vmem:[#allocation2 + $0x18] sm:$0xe]  ;;  %v6845_v12 = vrot.slane %v8661_v55, 7  ;;  %v1253_v30 = vsel %vm6492_vm2, %v1250_v3, %v1252_v2  ;;  %v443_v38 = vrot.slane %v441_v28, 4  ;;  %2734 = vmatprep.subr.bf16.mxu1 %v8670_v0  ;;  %v6863_v3 = vld [vmem:[%s6419_s29 + $0x68] sm:$0xf] }
 0x10d   : > { %v1067_v62 = vsel %vm6825_vm14, %v674_v47, %v1066_v35  ;;  %v1257_v60 = vsel %vm6492_vm2, %v1254_v25, %v1256_v18  ;;  %1368 = vst [vmem:[#allocation2 + $0x128] sm:$0xf] %v1253_v30  ;;  %v1260_v55 = vor.u32 %v1259_v22, %v8664_v31  ;;  %v1262_v53 = vrot.slane %v1259_v22, 4  ;;  %v6866_v26 = vld [vmem:[%s6419_s29 + $0x6c] sm:$0xf] }
 0x10e   : > { %1068 = vst [vmem:[#allocation2 + $0x18] sm:$0xe] %v1067_v62  ;;  %1369 = vst [vmem:[#allocation2 + $0x134] sm:$0xf] %v1257_v60  ;;  %v1264_v47 = vor.u32 %v6845_v12, %v8663_v36  ;;  %v444_v35 = vrot.slane %v6456_v14, 7  ;;  %v8666_v28 = vrot.slane %v6459_v15, 7 }
 0x10f   : > { %v705_v2 = vrot.slane %v6814_v24, 4  ;;  %v709_v25 = vrot.slane %v707_v19, 6  ;;  %v712_v22 = vrot.slane %v710_v20, 7  ;;  %v6875_v18 = vld [vmem:[%s6419_s29 + $0x70] sm:$0xf]  ;;  %v1261_v62 = vsel %vm6492_vm2, %v1258_v32, %v1260_v55  ;;  %v5646_v31 = vld [vmem:[#allocation8 + $0x50] sm:$0xff]   ;;  %2735 = vmatpush1.bf16.msra.mxu1 %v5640_v23 }
 0x110   : > { %v1265_v30 = vsel %vm6492_vm2, %v1262_v53, %v1264_v47  ;;  %v445_v60 = vsel %vm6714_vm9, %v443_v38, %v444_v35  ;;  %v446_v36 = vrot.slane %v444_v35, 4  ;;  %v6883_v24 = vld [vmem:[#allocation2 + $0x24] sm:$0xff]  ;;  %1370 = vst [vmem:[#allocation2 + $0x140] sm:$0xf] %v1261_v62  ;;  %v719_v19 = vrot.slane %v717_v21, 6  ;;  %2736 = vmatprep.subr.bf16.mxu1 %v8670_v0 }
 0x111   : > { %1371 = vst [vmem:[#allocation2 + $0x14c] sm:$0xf] %v1265_v30  ;;  %581 = vst [vmem:[#allocation2 + $0x4c] sm:$0xf] %v445_v60  ;;  %v713_v14 = vor.u32 %v712_v22, %v709_v25  ;;  %v8755_v20 = vshll.u32 %v6459_v15, 16  ;;  %v8668_v53 = vshrl.u32 %v6863_v3, 16 }
 0x112   : > { %v448_v38 = vsel %vm6714_vm9, %v446_v36, %v8666_v28  ;;  %v8669_v55 = vshll.u32 %v6863_v3, 16  ;;  %v8667_v23 = vshrl.u32 %v6866_v26, 16  ;;  %v8672_v47 = vshll.u32 %v6866_v26, 16  ;;  %v6898_v21 = vld [vmem:[#allocation2 + $0x34] ss:$12 sps:$4 sm:$0xff]   ;;  %v5647_v36 = vld [vmem:[#allocation8 + $0x58] sm:$0xff]  }
 0x113   : > { %v722_v32 = vrot.slane %v8755_v20, 7  ;;  %v6900_v35 = vld [vmem:[#allocation2 + $0x30] ss:$12 sps:$4 sm:$0xff]   ;;  %582 = vst [vmem:[#allocation2 + $0x58] sm:$0xf] %v448_v38  ;;  %v714_v25 = vsel %vm6786_vm13, %v705_v2, %v713_v14  ;;  %v715_v22 = vrot.slane %v713_v14, 4  ;;  %2737 = vmatpush1.bf16.msra.mxu1 %v5646_v31 }
 0x114   : > { %1072 = vst [vmem:[#allocation2 + $0x48] sm:$0xf] %v714_v25  ;;  %v1266_v30 = vrot.slane %v6845_v12, 4  ;;  %v1267_v60 = vrot.slane %v8668_v53, 7  ;;  %v6911_v20 = vrot.slane %v8667_v23, 7  ;;  %2738 = vmatprep.subr.bf16.mxu1 %v8670_v0  ;;  %v8756_v31 = vshrl.u32 %v6875_v18, 16 }
 0x115   : > { %v6904_v62 = vor.u32 %v722_v32, %v719_v19  ;;  %v6914_v56 = vld [vmem:[%s6419_s29 + $0x74] sm:$0xf]  ;;  %v1534_v28 = vld [vmem:[#allocation2 + $0x18] sm:$0xee]  ;;  %v5637_v25 = vld [vmem:[#allocation2 + $0x128] ss:$12 sps:$4 sm:$0xff]  }
 0x116   : > { %v4854_v19 = vcombine.high %v1534_v28, %v6883_v24  ;;  %v4853_v32 = vcombine.low %v1534_v28, %v6883_v24  ;;  %v1268_v23 = vor.u32 %v1267_v60, %v8669_v55  ;;  %v1270_v53 = vrot.slane %v1267_v60, 4  ;;  %v5653_v55 = vld [vmem:[#allocation8 + $0x60] sm:$0xff]  }
 0x117   : > { %v724_v12 = vsel %vm6786_vm13, %v715_v22, %v6904_v62  ;;  %v1272_v14 = vor.u32 %v6911_v20, %v8672_v47  ;;  %v1274_v2 = vrot.slane %v6911_v20, 4  ;;  %v1275_v22 = vrot.slane %v8756_v31, 7  ;;  %2739 = vmatpush1.bf16.msra.mxu1 %v5647_v36  ;;  %v6957_v36 = vld [vmem:[%s6427_s9 + $0x8] sm:$0xe]  ;;  %v6977_v4 = vld [vmem:[%s6419_s29 + $0x1c] sm:$0xf] }
 0x118   : > { %1073 = vst [vmem:[#allocation2 + $0x54] sm:$0xf] %v724_v12  ;;  %v1837_v38 = vrot.slane %v4854_v19, 1  ;;  %v1834_v28 = vrot.slane %v4853_v32, 1  ;;  %v1901_v12 = vrot.slane %v5637_v25, 1  ;;  %v1269_v60 = vsel %vm6492_vm2, %v1266_v30, %v1268_v23  ;;  %8762 = vst [vmem:[#allocation27_spill] sm:$0xff] %v6957_v36 }
 0x119   : > { %v6935_v0 = vld [vmem:[#allocation2 + $0x140] ss:$12 sps:$4 sm:$0xff]   ;;  %v1273_v47 = vsel %vm6492_vm2, %v1270_v53, %v1272_v14  ;;  %1372 = vst [vmem:[#allocation2 + $0x158] sm:$0xf] %v1269_v60  ;;  %v8757_v19 = vrot.slane %v6898_v21, 1  ;;  %v8758_v23 = vrot.slane %v6900_v35, 1 }
 0x11a   : > { %v8759_v25 = vrot.slane %v6769_v50, 1  ;;  %1373 = vst [vmem:[#allocation2 + $0x164] sm:$0xf] %v1273_v47  ;;  %v8760_v20 = vshrl.u32 %v6914_v56, 16  ;;  %v8761_v31 = vmov 0   ;;  %v1278_v60 = vrot.slane %v1275_v22, 4 }
 0x11b   : > { %v1839_v32 = vsel %vm1833_vm3, %v1837_v38, %v8757_v19  ;;  %v1836_v30 = vsel %vm1833_vm3, %v1834_v28, %v8758_v23  ;;  %2740 = vmatprep.subr.bf16.mxu1 %v8761_v31  ;;  %v6960_v38 = vld [vmem:[%s6427_s9 + $0xc] sm:$0xf]  ;;  %v8764_v28 = vshll.u32 %v6875_v18, 16  ;;  %v8765_v19 = vrot.slane %v6459_v15, 7  ;;  %614 = vst [vmem:[#allocation2 + $0x1cc] sm:$0xe] %v6957_v36 }
 0x11c   : > { %v1902_v53 = vsel %vm1833_vm3, %v8759_v25, %v1901_v12  ;;  %v6953_v14 = vrot.slane %v8760_v20, 7  ;;  %8763 = vst [vmem:[#allocation28_spill] sm:$0xff] %v6960_v38  ;;  %2175 = vmatprep.mubr.bf16.mxu0 %v1839_v32  ;;  %v6968_v25 = vld [vmem:[%s6419_s29 + $0x78] sm:$0xf]  ;;  %615 = vst [vmem:[#allocation2 + $0x1d8] sm:$0xf] %v6960_v38  ;;  %2741 = vmatpush1.bf16.msra.mxu1 %v5653_v55 }
 0x11d   : > { %5342 = vmatprep.mubr.bf16.mxu1 %v1902_v53  ;;  %v1276_v47 = vor.u32 %v1275_v22, %v8764_v28  ;;  %v449_v23 = vrot.slane %v8765_v19, 4  ;;  %2176 = vmatmul.mubr.bf16.vlgmr.msra.gmra.mrb[0].mxu0 %v1836_v30  ;;  %v8766_v32 = vshll.u32 %v6914_v56, 16  ;;  %v5817_v20 = vld [vmem:[%s6419_s29 + $0x18] sm:$0xf]  ;;  %v725_v15 = vrot.slane %v6904_v62, 4  ;;  %v5654_v19 = vld [vmem:[#allocation8 + $0x68] sm:$0xff]  }
 0x11e   : > { %v450_v50 = vrot.slane %v5817_v20, 7  ;;  %v6982_v28 = vld [vmem:[%s6419_s29 + $0x7c] sm:$0xf]  ;;  %v8767_v40 = vrot.slane %v6935_v0, 1  ;;  %5307 = vmatpush3.bf16.msra.mxu0 %v5819_v29  ;;  %v8768_v22 = vshrl.u32 %v6462_v16, 16  ;;  %2742 = vmatprep.subr.bf16.mxu1 %v8761_v31 }
 0x11f   : > { %v1280_v53 = vor.u32 %v6953_v14, %v8766_v32  ;;  %v6987_v49 = vld [vmem:[#allocation2 + $0x4c] ss:$12 sps:$4 sm:$0xff]   ;;  %v6989_v32 = vld [vmem:[#allocation2 + $0x48] ss:$12 sps:$4 sm:$0xff]   ;;  %v1277_v20 = vsel %vm6492_vm2, %v1274_v2, %v1276_v47  ;;  %v5820_v2 = vld [vmem:[#allocation8 + $0x148] sm:$0xff]  }
 0x120   : > { %v1908_v30 = vsel %vm1833_vm3, %v1901_v12, %v8767_v40  ;;  %v729_v62 = vrot.slane %v8768_v22, 6  ;;  %1374 = vst [vmem:[#allocation2 + $0x170] sm:$0xf] %v1277_v20  ;;  %v451_v40 = vsel %vm6714_vm9, %v449_v23, %v450_v50  ;;  %v452_v29 = vrot.slane %v450_v50, 4  ;;  %5308 = vmatprep.subr.bf16.mxu0 %v5820_v2  ;;  %v7011_v22 = vld [vmem:[%s6419_s29 + $0x84] sm:$0xf]  ;;  %2743 = vmatpush1.bf16.msra.mxu1 %v5654_v19 }
 0x121   : > { %5343 = vmatmul.mubr.bf16.gmra.mrb[16].mxu1 %v1908_v30  ;;  %v1281_v45 = vsel %vm6492_vm2, %v1278_v60, %v1280_v53  ;;  %v8769_v12 = vshll.u32 %v6462_v16, 16  ;;  %v8687_v55 = vrot.slane %v6987_v49, 1  ;;  %v8686_v47 = vrot.slane %v6989_v32, 1  ;;  %583 = vst [vmem:[#allocation2 + $0x64] sm:$0xf] %v451_v40  ;;  %2744 = vmatprep.subr.bf16.mxu1 %v8761_v31 }
 0x122   : > { %1375 = vst [vmem:[#allocation2 + $0x17c] sm:$0xf] %v1281_v45  ;;  %v8770_v60 = vshrl.u32 %v6465_v17, 16  ;;  %v8771_v23 = vshll.u32 %v6465_v17, 16  ;;  %v8772_v16 = vrot.slane %v6977_v4, 7  ;;  %v8691_v45 = vshll.u32 %v6968_v25, 16  ;;  %5309 = vmatpush3.bf16.msra.mxu0 %v5820_v2 }
 0x123   : > { %v732_v10 = vrot.slane %v8769_v12, 7  ;;  %v8685_v12 = vshrl.u32 %v6968_v25, 16  ;;  %v7021_v40 = vld [vmem:[%s6427_s9] sm:$0xf]  ;;  %v8773_v17 = vrot.slane %v6898_v21, 1 }
 0x124   : > { %v739_v53 = vrot.slane %v8770_v60, 6  ;;  %v742_v50 = vrot.slane %v8771_v23, 7  ;;  %v454_v30 = vsel %vm6714_vm9, %v452_v29, %v8772_v16  ;;  %v8774_v23 = vrot.slane %v6900_v35, 1  ;;  %v7033_v29 = vld [vmem:[#allocation2 + $0x158] ss:$12 sps:$4 sm:$0xff]  }
 0x125   : > { %v733_v20 = vor.u32 %v732_v10, %v729_v62  ;;  %v1846_v60 = vsel %vm1833_vm3, %v8773_v17, %v8687_v55  ;;  %584 = vst [vmem:[#allocation2 + $0x70] sm:$0xf] %v454_v30  ;;  %v8684_v62 = vshrl.u32 %v6982_v28, 16  ;;  %v5660_v16 = vld [vmem:[#allocation8 + $0x70] sm:$0xff]   ;;  %391 = vst [vmem:[#allocation2 + $0x4] sm:$0xf] %v7021_v40 }
 0x126   : > { %v1844_v13 = vsel %vm1833_vm3, %v8774_v23, %v8686_v47  ;;  %v7035_v10 = vor.u32 %v742_v50, %v739_v53  ;;  %2183 = vmatprep.mubr.bf16.mxu0 %v1846_v60  ;;  %v8689_v35 = vshll.u32 %v6982_v28, 16  ;;  %v1282_v23 = vrot.slane %v6953_v14, 4  ;;  %v5821_v30 = vld [vmem:[#allocation8 + $0x150] sm:$0xff]   ;;  %2745 = vmatpush1.bf16.msra.mxu1 %v5660_v16 }
 0x127   : > { %v734_v21 = vsel %vm6786_vm13, %v725_v15, %v733_v20  ;;  %v735_v17 = vrot.slane %v733_v20, 4  ;;  %v1913_v53 = vrot.slane %v7033_v29, 1  ;;  %v1283_v19 = vrot.slane %v8685_v12, 7  ;;  %5310 = vmatprep.subr.bf16.mxu0 %v5821_v30  ;;  %2184 = vmatmul.mubr.bf16.gmra.mrb[4].mxu0 %v1844_v13 }
 0x128   : > { %1074 = vst [vmem:[#allocation2 + $0x60] sm:$0xf] %v734_v21  ;;  %v1287_v2 = vrot.slane %v8684_v62, 7  ;;  %v8688_v50 = vshrl.u32 %v7002_v27, 16  ;;  %v8693_v15 = vshll.u32 %v7002_v27, 16  ;;  %v8690_v20 = vshrl.u32 %v7011_v22, 16  ;;  %5311 = vmatpush3.bf16.msra.mxu0 %v5821_v30  ;;  %2746 = vmatprep.subr.bf16.mxu1 %v8761_v31 }
 0x129   : > { %v744_v14 = vsel %vm6786_vm13, %v735_v17, %v7035_v10  ;;  %v8692_v60 = vshll.u32 %v7011_v22, 16  ;;  %v8775_v29 = vrot.slane %v6935_v0, 1  ;;  %v1284_v62 = vor.u32 %v1283_v19, %v8691_v45  ;;  %v5661_v17 = vld [vmem:[#allocation8 + $0x78] sm:$0xff]  }
 0x12a   : > { %1075 = vst [vmem:[#allocation2 + $0x6c] sm:$0xf] %v744_v14  ;;  %v1286_v13 = vrot.slane %v1283_v19, 4  ;;  %v1288_v12 = vor.u32 %v1287_v2, %v8689_v35  ;;  %v7063_v47 = vld [vmem:[#allocation2 + $0x170] ss:$12 sps:$4 sm:$0xff]   ;;  %v1290_v55 = vrot.slane %v1287_v2, 4  ;;  %2747 = vmatpush1.bf16.msra.mxu1 %v5661_v17 }
 0x12b   : > { %v1914_v21 = vsel %vm1833_vm3, %v8775_v29, %v1913_v53  ;;  %v1291_v0 = vrot.slane %v8688_v50, 7  ;;  %v1285_v19 = vsel %vm6492_vm2, %v1282_v23, %v1284_v62  ;;  %v7074_v30 = vrot.slane %v8690_v20, 7  ;;  %v7079_v29 = vld [vmem:[%s6419_s29 + $0x88] sm:$0xf]  ;;  %v7086_v35 = vld [vmem:[%s6419_s29 + $0x8c] sm:$0xf]  ;;  %3745 = vmatprep.subr.bf16.mxu1 %v8761_v31 }
 0x12c   : > { %5346 = vmatprep.mubr.bf16.mxu1 %v1914_v21  ;;  %v1289_v16 = vsel %vm6492_vm2, %v1286_v13, %v1288_v12  ;;  %v8776_v14 = vrot.slane %v6977_v4, 7  ;;  %v5822_v21 = vld [vmem:[#allocation8 + $0x158] sm:$0xff]   ;;  %v1919_v50 = vrot.slane %v7063_v47, 1  ;;  %1376 = vst [vmem:[#allocation2 + $0x188] sm:$0xf] %v1285_v19  ;;  %v745_v45 = vrot.slane %v7035_v10, 4 }
 0x12d   : > { %5312 = vmatprep.subr.bf16.mxu0 %v5822_v21  ;;  %1377 = vst [vmem:[#allocation2 + $0x194] sm:$0xf] %v1289_v16  ;;  %v1292_v62 = vor.u32 %v1291_v0, %v8693_v15  ;;  %v1294_v23 = vrot.slane %v1291_v0, 4  ;;  %v5823_v12 = vld [vmem:[%s6419_s29 + $0x20] sm:$0xf]  ;;  %v1296_v4 = vor.u32 %v7074_v30, %v8692_v60  ;;  %v8777_v19 = vshrl.u32 %v6488_v33, 16 }
 0x12e   : > { %v455_v2 = vrot.slane %v8776_v14, 4  ;;  %v456_v13 = vrot.slane %v5823_v12, 7  ;;  %v7092_v14 = vld [vmem:[%s6419_s29 + $0x24] sm:$0xf]  ;;  %5313 = vmatpush3.bf16.msra.mxu0 %v5822_v21  ;;  %v1920_v0 = vsel %vm1833_vm3, %v1913_v53, %v1919_v50  ;;  %v5825_v20 = vld [vmem:[#allocation8 + $0x160] sm:$0xff]   ;;  %v8778_v17 = vshll.u32 %v6488_v33, 16 }
 0x12f   : > { %v749_v16 = vrot.slane %v8777_v19, 6  ;;  %v1293_v12 = vsel %vm6492_vm2, %v1290_v55, %v1292_v62  ;;  %5314 = vmatprep.subr.bf16.mxu0 %v5825_v20  ;;  %5347 = vmatmul.mubr.bf16.gmra.mrb[20].mxu1 %v1920_v0  ;;  %v1297_v10 = vsel %vm6492_vm2, %v1294_v23, %v1296_v4  ;;  %v8779_v21 = vshrl.u32 %v6500_v37, 16 }
 0x130   : > { %v457_v60 = vsel %vm6714_vm9, %v455_v2, %v456_v13  ;;  %v458_v15 = vrot.slane %v456_v13, 4  ;;  %1378 = vst [vmem:[#allocation2 + $0x1a0] sm:$0xf] %v1293_v12  ;;  %v752_v53 = vrot.slane %v8778_v17, 7  ;;  %v8780_v62 = vshll.u32 %v6500_v37, 16 }
 0x131   : > { %585 = vst [vmem:[#allocation2 + $0x7c] sm:$0xf] %v457_v60  ;;  %v759_v55 = vrot.slane %v8779_v21, 6  ;;  %v7114_v13 = vld [vmem:[#allocation2 + $0x64] ss:$12 sps:$4 sm:$0xff]   ;;  %v8781_v0 = vrot.slane %v7092_v14, 7 }
 0x132   : > { %v762_v2 = vrot.slane %v8780_v62, 7  ;;  %v7116_v19 = vld [vmem:[#allocation2 + $0x60] ss:$12 sps:$4 sm:$0xff]   ;;  %1379 = vst [vmem:[#allocation2 + $0x1ac] sm:$0xf] %v1297_v10  ;;  %v8697_v60 = vshrl.u32 %v7079_v29, 16  ;;  %v753_v33 = vor.u32 %v752_v53, %v749_v16  ;;  %5315 = vmatpush3.bf16.msra.mxu0 %v5825_v20 }
 0x133   : > { %v460_v23 = vsel %vm6714_vm9, %v458_v15, %v8781_v0  ;;  %v8696_v12 = vshll.u32 %v7079_v29, 16  ;;  %v8695_v37 = vshrl.u32 %v7086_v35, 16  ;;  %v8694_v10 = vrot.slane %v7114_v13, 1  ;;  %v5826_v62 = vld [vmem:[#allocation8 + $0x168] sm:$0xff]  }
 0x134   : > { %586 = vst [vmem:[#allocation2 + $0x88] sm:$0xf] %v460_v23  ;;  %v7123_v4 = vor.u32 %v762_v2, %v759_v55  ;;  %v8698_v17 = vrot.slane %v7116_v19, 1  ;;  %v1298_v15 = vrot.slane %v7074_v30, 4  ;;  %5316 = vmatprep.subr.bf16.mxu0 %v5826_v62  ;;  %v5651_v16 = vld [vmem:[#allocation2 + $0x188] ss:$12 sps:$4 sm:$0xff]   ;;  %v754_v53 = vsel %vm6786_vm13, %v745_v45, %v753_v33 }
 0x135   : > { %v8782_v55 = vrot.slane %v6987_v49, 1  ;;  %v8783_v2 = vrot.slane %v6989_v32, 1  ;;  %v755_v23 = vrot.slane %v753_v33, 4  ;;  %1076 = vst [vmem:[#allocation2 + $0x78] sm:$0xf] %v754_v53  ;;  %v1299_v30 = vrot.slane %v8697_v60, 7 }
 0x136   : > { %v1382_v45 = vld [vmem:[#allocation2 + $0x1d0] sm:$0x1]  ;;  %v1925_v21 = vrot.slane %v5651_v16, 1  ;;  %v1303_v49 = vrot.slane %v8695_v37, 7  ;;  %5317 = vmatpush3.bf16.msra.mxu0 %v5826_v62  ;;  %v619_v60 = vld [vmem:[#allocation2] sm:$0x1] }
 0x137   : > { %v1852_v20 = vsel %vm1833_vm3, %v8782_v55, %v8694_v10  ;;  %v1850_v0 = vsel %vm1833_vm3, %v8783_v2, %v8698_v17  ;;  %v8699_v55 = vshrl.u32 %v6957_v36, 16  ;;  %v8700_v10 = vshll.u32 %v6957_v36, 16  ;;  %v5827_v2 = vld [vmem:[#allocation8 + $0x170] sm:$0xff]  }
 0x138   : > { %2191 = vmatprep.mubr.bf16.mxu0 %v1852_v20  ;;  %v764_v32 = vsel %vm6786_vm13, %v755_v23, %v7123_v4  ;;  %v1300_v33 = vor.u32 %v1299_v30, %v8696_v12  ;;  %v1302_v53 = vrot.slane %v1299_v30, 4  ;;  %v8701_v20 = vshll.u32 %v6960_v38, 16  ;;  %5318 = vmatprep.subr.bf16.mxu0 %v5827_v2  ;;  %v5830_v38 = vld [vmem:[#allocation8 + $0x178] sm:$0xff]  }
 0x139   : > { %2192 = vmatmul.mubr.bf16.gmra.mrb[8].mxu0 %v1850_v0  ;;  %v1926_v62 = vsel %vm1833_vm3, %v1919_v50, %v1925_v21  ;;  %v7164_v0 = vld [vmem:[#allocation2 + $0x1a0] ss:$12 sps:$4 sm:$0xff]   ;;  %1077 = vst [vmem:[#allocation2 + $0x84] sm:$0xf] %v764_v32  ;;  %v8786_v23 = vshll.u32 %v7086_v35, 16  ;;  %v1306_v37 = vrot.slane %v1303_v49, 4 }
 0x13a   : > { %v1385_v12 = vrot.slane %v8699_v55, 4  ;;  %5350 = vmatprep.mubr.bf16.mxu1 %v1926_v62  ;;  %v1301_v17 = vsel %vm6492_vm2, %v1298_v15, %v1300_v33  ;;  %v1386_v47 = vrot.slane %v8700_v10, 5  ;;  %v7176_v50 = vrot.slane %v8701_v20, 5  ;;  %v5828_v15 = vld [vmem:[%s6419_s29 + $0x28] sm:$0xf]  ;;  %5319 = vmatpush3.bf16.msra.mxu0 %v5827_v2 }
 0x13b   : > { %v1304_v30 = vor.u32 %v1303_v49, %v8786_v23  ;;  %v8787_v32 = vrot.slane %v7092_v14, 7  ;;  %1380 = vst [vmem:[#allocation2 + $0x1b8] sm:$0xf] %v1301_v17  ;;  %v1383_v62 = vsel %vm7156_vm7, %v1306_v37, %v1382_v45  ;;  %v462_v33 = vrot.slane %v5828_v15, 7  ;;  %v5829_v20 = vld [vmem:[%s6419_s29 + $0x2c] sm:$0xf]  ;;  %5320 = vmatprep.subr.bf16.mxu0 %v5830_v38 }
 0x13c   : > { %1384 = vst [vmem:[#allocation2 + $0x1d0] sm:$0x1] %v1383_v62  ;;  %v1387_v10 = vor.u32 %v1386_v47, %v1385_v12  ;;  %v465_v36 = vrot.slane %v5829_v20, 7  ;;  %v765_v14 = vrot.slane %v7123_v4, 4  ;;  %v8789_v17 = vrot.slane %v7164_v0, 1 }
 0x13d   : > { %v461_v23 = vrot.slane %v8787_v32, 4  ;;  %v1305_v55 = vsel %vm6492_vm2, %v1302_v53, %v1304_v30  ;;  %v8788_v32 = vshrl.u32 %v6528_v58, 16  ;;  %v464_v45 = vrot.slane %v462_v33, 4 }
 0x13e   : > { %1381 = vst [vmem:[#allocation2 + $0x1c4] sm:$0xf] %v1305_v55  ;;  %v1932_v53 = vsel %vm1833_vm3, %v1925_v21, %v8789_v17  ;;  %v8790_v55 = vshll.u32 %v6528_v58, 16  ;;  %v1388_v20 = vrot.slane %v1387_v10, 4  ;;  %v8793_v2 = vshrl.u32 %v6531_v59, 16  ;;  %5321 = vmatpush3.bf16.msra.mxu0 %v5830_v38 }
 0x13f   : > { %v769_v49 = vrot.slane %v8788_v32, 6  ;;  %v463_v37 = vsel %vm6714_vm9, %v461_v23, %v462_v33  ;;  %5351 = vmatmul.mubr.bf16.gmra.mrb[24].mxu1 %v1932_v53  ;;  %v8794_v21 = vshll.u32 %v6531_v59, 16  ;;  %v620_v23 = vsel %vm7156_vm7, 0, %v619_v60  ;;  %v7213_v10 = vld [vmem:[#allocation2 + $0x7c] ss:$12 sps:$4 sm:$0xff]  }
 0x140   : > { %v772_v12 = vrot.slane %v8790_v55, 7  ;;  %587 = vst [vmem:[#allocation2 + $0x94] sm:$0xf] %v463_v37  ;;  %v779_v30 = vrot.slane %v8793_v2, 6  ;;  %v466_v58 = vsel %vm6714_vm9, %v464_v45, %v465_v36  ;;  %621 = vst [vmem:[#allocation2] sm:$0x1] %v620_v23 }
 0x141   : > { %v782_v47 = vrot.slane %v8794_v21, 7  ;;  %v8708_v15 = vshrl.u32 %v7021_v40, 16  ;;  %v8707_v33 = vshll.u32 %v7021_v40, 16  ;;  %v7215_v32 = vld [vmem:[#allocation2 + $0x78] ss:$12 sps:$4 sm:$0xff]   ;;  %v8706_v17 = vshll.u32 %v6706_v51, 16 }
 0x142   : > { %v773_v62 = vor.u32 %v772_v12, %v769_v49  ;;  %588 = vst [vmem:[#allocation2 + $0xa0] sm:$0xf] %v466_v58  ;;  %v1390_v49 = vsel %vm7199_vm0, %v1388_v20, %v7176_v50  ;;  %v8709_v45 = vrot.slane %v7213_v10, 1  ;;  %v8710_v55 = vrot.slane %v7215_v32, 1  ;;  %v5721_v2 = vld [vmem:[#allocation8 + $0x80] sm:$0xff]  }
 0x143   : > { %v783_v59 = vor.u32 %v782_v47, %v779_v30  ;;  %v627_v37 = vrot.slane %v8708_v15, 7  ;;  %v638_v12 = vor.u32 %v8706_v17, %v6731_v5  ;;  %v1402_v20 = vld [vmem:[#allocation2 + $0x1d0] sm:$0xf]  ;;  %v8797_v47 = vrot.slane %v7114_v13, 1  ;;  %5358 = vmatprep.subr.bf16.mxu0 %v5721_v2 }
 0x144   : > { %v774_v38 = vsel %vm6786_vm13, %v765_v14, %v773_v62  ;;  %v775_v53 = vrot.slane %v773_v62, 4  ;;  %v8798_v5 = vrot.slane %v7116_v19, 1  ;;  %v1403_v62 = vsel %vm7220_vm4, %v1390_v49, %v1402_v20 }
 0x145   : > { %1078 = vst [vmem:[#allocation2 + $0x90] sm:$0xf] %v774_v38  ;;  %v7236_v30 = vld [vmem:[#allocation2 + $0x1b8] ss:$12 sps:$4 sm:$0xff]   ;;  %v630_v21 = vor.u32 %v8707_v33, %v627_v37  ;;  %v1858_v23 = vsel %vm1833_vm3, %v8797_v47, %v8709_v45  ;;  %v631_v38 = vrot.slane %v627_v37, 4  ;;  %v467_v17 = vrot.slane %v465_v36, 4 }
 0x146   : > { %v784_v14 = vsel %vm6786_vm13, %v775_v53, %v783_v59  ;;  %v1856_v58 = vsel %vm1833_vm3, %v8798_v5, %v8710_v55  ;;  %2199 = vmatprep.mubr.bf16.mxu0 %v1858_v23  ;;  %v1937_v53 = vrot.slane %v7236_v30, 1  ;;  %1404 = vst [vmem:[#allocation2 + $0x1d0] sm:$0xf] %v1403_v62  ;;  %v5831_v33 = vld [vmem:[%s6419_s29 + $0x30] sm:$0xf]  ;;  %v785_v55 = vrot.slane %v783_v59, 4 }
 0x147   : > { %1079 = vst [vmem:[#allocation2 + $0x9c] sm:$0xf] %v784_v14  ;;  %v468_v15 = vrot.slane %v5831_v33, 7  ;;  %v5832_v47 = vld [vmem:[%s6419_s29 + $0x34] sm:$0xf]  ;;  %2200 = vmatmul.mubr.bf16.gmra.mrb[12].mxu0 %v1856_v58  ;;  %v639_v19 = vsel %vm6492_vm2, %v631_v38, %v638_v12  ;;  %v8799_v49 = vshrl.u32 %v6540_v1, 16 }
 0x148   : > { %v471_v45 = vrot.slane %v5832_v47, 7  ;;  %v655_v5 = vld [vmem:[#allocation2] sm:$0xf]  ;;  %v8800_v37 = vshll.u32 %v6540_v1, 16  ;;  %v8801_v36 = vrot.slane %v7164_v0, 1  ;;  %v8802_v58 = vshrl.u32 %v6546_v7, 16 }
 0x149   : > { %v789_v20 = vrot.slane %v8799_v49, 6  ;;  %v1161_v14 = vld [vmem:[#allocation2 + $0x20] sm:$0x1]  ;;  %v656_v12 = vsel %vm7220_vm4, %v630_v21, %v655_v5  ;;  %658 = vst [vmem:[#allocation2 + $0xc] sm:$0xf] %v639_v19  ;;  %v469_v59 = vsel %vm6714_vm9, %v467_v17, %v468_v15  ;;  %v470_v23 = vrot.slane %v468_v15, 4 }
 0x14a   : > { %v792_v2 = vrot.slane %v8800_v37, 7  ;;  %v1938_v33 = vsel %vm1833_vm3, %v8801_v36, %v1937_v53  ;;  %657 = vst [vmem:[#allocation2] sm:$0xf] %v656_v12  ;;  %589 = vst [vmem:[#allocation2 + $0xac] sm:$0xf] %v469_v59  ;;  %v799_v62 = vrot.slane %v8802_v58, 6 }
 0x14b   : > { %5354 = vmatprep.mubr.bf16.mxu1 %v1938_v33  ;;  %v8803_v0 = vshll.u32 %v6546_v7, 16  ;;  %v473_v47 = vrot.slane %v471_v45, 4  ;;  %v472_v49 = vsel %vm6714_vm9, %v470_v23, %v471_v45  ;;  %v5833_v21 = vld [vmem:[%s6419_s29 + $0x38] sm:$0xf]  ;;  %v5834_v5 = vld [vmem:[%s6419_s29 + $0x3c] sm:$0xf] }
 0x14c   : > { %v793_v1 = vor.u32 %v792_v2, %v789_v20  ;;  %v474_v19 = vrot.slane %v5833_v21, 7  ;;  %v477_v37 = vrot.slane %v5834_v5, 7  ;;  %v8804_v15 = vshrl.u32 %v6581_v54, 16  ;;  %590 = vst [vmem:[#allocation2 + $0xb8] sm:$0xf] %v472_v49 }
 0x14d   : > { %v802_v38 = vrot.slane %v8803_v0, 7  ;;  %v8805_v7 = vshll.u32 %v6581_v54, 16  ;;  %v7286_v12 = vld [vmem:[#allocation2 + $0x94] ss:$12 sps:$4 sm:$0xff]   ;;  %v8806_v58 = vshrl.u32 %v6709_v61, 16  ;;  %v8807_v16 = vshrl.u32 %v6586_v57, 16 }
 0x14e   : > { %v809_v17 = vrot.slane %v8804_v15, 6  ;;  %v794_v20 = vsel %vm6786_vm13, %v785_v55, %v793_v1  ;;  %v795_v2 = vrot.slane %v793_v1, 4  ;;  %v7288_v59 = vld [vmem:[#allocation2 + $0x90] ss:$12 sps:$4 sm:$0xff]   ;;  %v475_v45 = vsel %vm6714_vm9, %v473_v47, %v474_v19 }
 0x14f   : > { %v803_v36 = vor.u32 %v802_v38, %v799_v62  ;;  %v812_v33 = vrot.slane %v8805_v7, 7  ;;  %1080 = vst [vmem:[#allocation2 + $0xa8] sm:$0xf] %v794_v20  ;;  %v476_v23 = vrot.slane %v474_v19, 4  ;;  %v1162_v0 = vsel %vm7156_vm7, %v8806_v58, %v1161_v14  ;;  %591 = vst [vmem:[#allocation2 + $0xc4] sm:$0xf] %v475_v45 }
 0x150   : > { %v5659_v55 = vld [vmem:[#allocation2 + $0x1d0] ss:$0 sps:$4 sm:$0x11]   ;;  %1163 = vst [vmem:[#allocation2 + $0x20] sm:$0x1] %v1162_v0  ;;  %v1863_v38 = vrot.slane %v7286_v12, 1 }
 0x151   : > { %v804_v1 = vsel %vm6786_vm13, %v795_v2, %v803_v36  ;;  %v805_v54 = vrot.slane %v803_v36, 4  ;;  %v813_v62 = vor.u32 %v812_v33, %v809_v17  ;;  %v1861_v49 = vrot.slane %v7288_v59, 1  ;;  %v5667_v33 = vld [vmem:[#allocation2 + $0x4] ss:$12 sps:$4 sm:$0xff]   ;;  %v5835_v58 = vld [vmem:[%s6419_s29 + $0x40] sm:$0xf] }
 0x152   : > { %1081 = vst [vmem:[#allocation2 + $0xb4] sm:$0xf] %v804_v1  ;;  %v478_v47 = vsel %vm6714_vm9, %v476_v23, %v477_v37  ;;  %v819_v14 = vrot.slane %v8807_v16, 6  ;;  %v1943_v21 = vrot.slane %v5659_v55, 1  ;;  %v8808_v15 = vshll.u32 %v6586_v57, 16 }
 0x153   : > { %592 = vst [vmem:[#allocation2 + $0xd0] sm:$0xf] %v478_v47  ;;  %v814_v19 = vsel %vm6786_vm13, %v805_v54, %v813_v62  ;;  %v815_v5 = vrot.slane %v813_v62, 4  ;;  %v8809_v20 = vrot.slane %v7213_v10, 1  ;;  %v8810_v36 = vrot.slane %v7215_v32, 1  ;;  %v7323_v54 = vld [vmem:[#allocation2 + $0x18] sm:$0xff] }
 0x154   : > { %v822_v17 = vrot.slane %v8808_v15, 7  ;;  %1082 = vst [vmem:[#allocation2 + $0xc0] sm:$0xf] %v814_v19  ;;  %v479_v45 = vrot.slane %v477_v37, 4  ;;  %v1944_v57 = vsel %vm1833_vm3, %v1937_v53, %v1943_v21  ;;  %v480_v0 = vrot.slane %v5835_v58, 7 }
 0x155   : > { %v1864_v2 = vsel %vm1833_vm3, %v8809_v20, %v1863_v38  ;;  %v1862_v7 = vsel %vm1833_vm3, %v8810_v36, %v1861_v49  ;;  %v5836_v55 = vld [vmem:[%s6419_s29 + $0x44] sm:$0xf]  ;;  %5355 = vmatmul.mubr.bf16.gmra.mrb[28].mxu1 %v1944_v57  ;;  %v8811_v62 = vshrl.u32 %v6603_v41, 16  ;;  %v8812_v37 = vshll.u32 %v6603_v41, 16  ;;  %v5837_v57 = vld [vmem:[%s6419_s29 + $0x48] sm:$0xf] }
 0x156   : > { %2207 = vmatprep.mubr.bf16.mxu0 %v1864_v2  ;;  %v823_v23 = vor.u32 %v822_v17, %v819_v14  ;;  %v483_v1 = vrot.slane %v5836_v55, 7  ;;  %v8813_v30 = vshrl.u32 %v6606_v42, 16  ;;  %v8814_v14 = vshll.u32 %v6606_v42, 16  ;;  %2748 = vmatprep.mubr.bf16.mxu1 %v5667_v33  ;;  %v5665_v2 = vld [vmem:[#allocation2] ss:$12 sps:$4 sm:$0xff]  }
 0x157   : > { %2208 = vmatmul.mubr.bf16.gmra.mrb[16].mxu0 %v1862_v7  ;;  %v829_v47 = vrot.slane %v8811_v62, 6  ;;  %v832_v16 = vrot.slane %v8812_v37, 7  ;;  %v481_v15 = vsel %vm6714_vm9, %v479_v45, %v480_v0  ;;  %v482_v17 = vrot.slane %v480_v0, 4  ;;  %v1344_v42 = vld [vmem:[#allocation2 + $0x20] sm:$0xf] }
 0x158   : > { %v839_v53 = vrot.slane %v8813_v30, 6  ;;  %v842_v21 = vrot.slane %v8814_v14, 7  ;;  %v824_v19 = vsel %vm6786_vm13, %v815_v5, %v823_v23  ;;  %v825_v20 = vrot.slane %v823_v23, 4  ;;  %593 = vst [vmem:[#allocation2 + $0xdc] sm:$0xf] %v481_v15 }
 0x159   : > { %1083 = vst [vmem:[#allocation2 + $0xcc] sm:$0xf] %v824_v19  ;;  %v833_v41 = vor.u32 %v832_v16, %v829_v47  ;;  %v485_v7 = vrot.slane %v483_v1, 4  ;;  %v486_v58 = vrot.slane %v5837_v57, 7  ;;  %v7338_v55 = vld [vmem:[#allocation2 + $0xac] ss:$12 sps:$4 sm:$0xff]   ;;  %v4938_v5 = vcombine.high %v7323_v54, %v6883_v24 }
 0x15a   : > { %v843_v36 = vor.u32 %v842_v21, %v839_v53  ;;  %v7340_v33 = vld [vmem:[#allocation2 + $0xa8] ss:$12 sps:$4 sm:$0xff]   ;;  %v484_v45 = vsel %vm6714_vm9, %v482_v17, %v483_v1  ;;  %v1345_v62 = vsel %vm7220_vm4, %v6802_v52, %v1344_v42  ;;  %v1869_v14 = vrot.slane %v7338_v55, 1  ;;  %v7884_v4 = vld [vmem:[#allocation2 + $0xac] ss:$12 sps:$4 sm:$0xff]  }
 0x15b   : > { %v5838_v23 = vld [vmem:[%s6419_s29 + $0x4c] sm:$0xf]  ;;  %594 = vst [vmem:[#allocation2 + $0xe8] sm:$0xf] %v484_v45  ;;  %v834_v47 = vsel %vm6786_vm13, %v825_v20, %v833_v41  ;;  %v835_v37 = vrot.slane %v833_v41, 4  ;;  %v487_v16 = vsel %vm6714_vm9, %v485_v7, %v486_v58  ;;  %v488_v30 = vrot.slane %v486_v58, 4 }
 0x15c   : > { %v489_v0 = vrot.slane %v5838_v23, 7  ;;  %1346 = vst [vmem:[#allocation2 + $0x20] sm:$0xf] %v1345_v62  ;;  %v5668_v53 = vld [vmem:[#allocation8 + $0x180] sm:$0xff]   ;;  %v1867_v1 = vrot.slane %v7340_v33, 1  ;;  %v845_v21 = vrot.slane %v843_v36, 4  ;;  %v1870_v57 = vsel %vm1833_vm3, %v1863_v38, %v1869_v14 }
 0x15d   : > { %1084 = vst [vmem:[#allocation2 + $0xd8] sm:$0xf] %v834_v47  ;;  %595 = vst [vmem:[#allocation2 + $0xf4] sm:$0xf] %v487_v16  ;;  %v8815_v52 = vshrl.u32 %v6634_v8, 16  ;;  %v844_v19 = vsel %vm6786_vm13, %v835_v37, %v843_v36  ;;  %v8816_v17 = vshll.u32 %v6634_v8, 16  ;;  %2749 = vmatmul.mubr.bf16.vlgmr.msra.gmra.mrb[32].mxu1 %v5665_v2  ;;  %2215 = vmatprep.mubr.bf16.mxu0 %v1870_v57 }
 0x15e   : > { %v490_v15 = vsel %vm6714_vm9, %v488_v30, %v489_v0  ;;  %v8817_v41 = vshrl.u32 %v6640_v9, 16  ;;  %v1868_v58 = vsel %vm1833_vm3, %v1861_v49, %v1867_v1  ;;  %1085 = vst [vmem:[#allocation2 + $0xe4] sm:$0xf] %v844_v19  ;;  %v8818_v36 = vshll.u32 %v6640_v9, 16  ;;  %v5672_v8 = vld [vmem:[#allocation8 + $0x188] sm:$0xff]   ;;  %3746 = vmatpush1.bf16.msra.mxu1 %v5668_v53  ;;  %2756 = vmatprep.mubr.bf16.mxu1 %v4938_v5 }
 0x15f   : > { %v849_v60 = vrot.slane %v8815_v52, 6  ;;  %v852_v20 = vrot.slane %v8816_v17, 7  ;;  %596 = vst [vmem:[#allocation2 + $0x100] sm:$0xf] %v490_v15  ;;  %v491_v45 = vrot.slane %v489_v0, 4  ;;  %v8819_v38 = vshrl.u32 %v6655_v48, 16  ;;  %2216 = vmatmul.mubr.bf16.gmra.mrb[20].mxu0 %v1868_v58  ;;  %3747 = vmatprep.subr.bf16.mxu1 %v8761_v31 }
 0x160   : > { %v859_v7 = vrot.slane %v8817_v41, 6  ;;  %v862_v42 = vrot.slane %v8818_v36, 7  ;;  %v5839_v62 = vld [vmem:[%s6419_s29 + $0x50] sm:$0xf]  ;;  %v5840_v37 = vld [vmem:[%s6419_s29 + $0x54] sm:$0xf]  ;;  %v4937_v49 = vcombine.low %v7323_v54, %v6883_v24 }
 0x161   : > { %v853_v23 = vor.u32 %v852_v20, %v849_v60  ;;  %v492_v47 = vrot.slane %v5839_v62, 7  ;;  %v495_v16 = vrot.slane %v5840_v37, 7  ;;  %v869_v30 = vrot.slane %v8819_v38, 6  ;;  %v7380_v52 = vld [vmem:[#allocation2 + $0xc4] ss:$12 sps:$4 sm:$0xff]  }
 0x162   : > { %v7382_v9 = vld [vmem:[#allocation2 + $0xc0] ss:$12 sps:$4 sm:$0xff]   ;;  %v863_v2 = vor.u32 %v862_v42, %v859_v7  ;;  %v8820_v0 = vshll.u32 %v6655_v48, 16  ;;  %v1875_v24 = vrot.slane %v7380_v52, 1  ;;  %v5676_v41 = vld [vmem:[#allocation8 + $0x190] sm:$0xff]   ;;  %v8821_v7 = vshrl.u32 %v6658_v6, 16  ;;  %3748 = vmatpush1.bf16.msra.mxu1 %v5672_v8 }
 0x163   : > { %v854_v19 = vsel %vm6786_vm13, %v845_v21, %v853_v23  ;;  %v855_v15 = vrot.slane %v853_v23, 4  ;;  %v493_v53 = vsel %vm6714_vm9, %v491_v45, %v492_v47  ;;  %v494_v17 = vrot.slane %v492_v47, 4  ;;  %3749 = vmatprep.subr.bf16.mxu1 %v8761_v31  ;;  %v5841_v37 = vld [vmem:[%s6419_s29 + $0x58] sm:$0xf] }
 0x164   : > { %v872_v60 = vrot.slane %v8820_v0, 7  ;;  %v1873_v54 = vrot.slane %v7382_v9, 1  ;;  %1086 = vst [vmem:[#allocation2 + $0xf0] sm:$0xf] %v854_v19  ;;  %597 = vst [vmem:[#allocation2 + $0x10c] sm:$0xf] %v493_v53  ;;  %v1876_v42 = vsel %vm1833_vm3, %v1869_v14, %v1875_v24 }
 0x165   : > { %v865_v20 = vrot.slane %v863_v2, 4  ;;  %v864_v5 = vsel %vm6786_vm13, %v855_v15, %v863_v2  ;;  %v496_v21 = vsel %vm6714_vm9, %v494_v17, %v495_v16  ;;  %v879_v57 = vrot.slane %v8821_v7, 6  ;;  %2223 = vmatprep.mubr.bf16.mxu0 %v1876_v42  ;;  %v7410_v47 = vld [vmem:[#allocation2 + $0xd8] ss:$12 sps:$4 sm:$0xff]   ;;  %2757 = vmatmul.mubr.bf16.gmra.mrb[36].mxu1 %v4937_v49 }
 0x166   : > { %v873_v48 = vor.u32 %v872_v60, %v869_v30  ;;  %v8822_v58 = vshll.u32 %v6658_v6, 16  ;;  %1087 = vst [vmem:[#allocation2 + $0xfc] sm:$0xf] %v864_v5  ;;  %598 = vst [vmem:[#allocation2 + $0x118] sm:$0xf] %v496_v21  ;;  %v1874_v62 = vsel %vm1833_vm3, %v1867_v1, %v1873_v54  ;;  %v497_v14 = vrot.slane %v495_v16, 4  ;;  %3750 = vmatpush1.bf16.msra.mxu1 %v5676_v41 }
 0x167   : > { %v7408_v6 = vld [vmem:[#allocation2 + $0xdc] ss:$12 sps:$4 sm:$0xff]   ;;  %v498_v38 = vrot.slane %v5841_v37, 7  ;;  %v8823_v0 = vshrl.u32 %v6756_v43, 16  ;;  %v8824_v19 = vshll.u32 %v6756_v43, 16  ;;  %2224 = vmatmul.mubr.bf16.gmra.mrb[24].mxu0 %v1874_v62  ;;  %v8825_v43 = vshrl.u32 %v6766_v46, 16  ;;  %3751 = vmatprep.subr.bf16.mxu1 %v8761_v31 }
 0x168   : > { %v882_v36 = vrot.slane %v8822_v58, 7  ;;  %v874_v45 = vsel %vm6786_vm13, %v865_v20, %v873_v48  ;;  %v875_v23 = vrot.slane %v873_v48, 4  ;;  %v5842_v30 = vld [vmem:[%s6419_s29 + $0x5c] sm:$0xf]  ;;  %v1881_v1 = vrot.slane %v7408_v6, 1 }
 0x169   : > { %1088 = vst [vmem:[#allocation2 + $0x108] sm:$0xf] %v874_v45  ;;  %v501_v2 = vrot.slane %v5842_v30, 7  ;;  %v889_v60 = vrot.slane %v8823_v0, 6  ;;  %v892_v15 = vrot.slane %v8824_v19, 7  ;;  %v499_v16 = vsel %vm6714_vm9, %v497_v14, %v498_v38 }
 0x16a   : > { %v883_v8 = vor.u32 %v882_v36, %v879_v57  ;;  %v5843_v20 = vld [vmem:[#allocation2 + $0x34] ss:$12 sps:$4 sm:$0xff]   ;;  %v500_v48 = vrot.slane %v498_v38, 4  ;;  %v899_v21 = vrot.slane %v8825_v43, 6  ;;  %v1882_v49 = vsel %vm1833_vm3, %v1875_v24, %v1881_v1  ;;  %v5680_v57 = vld [vmem:[#allocation8 + $0x198] sm:$0xff]  }
 0x16b   : > { %2764 = vmatprep.mubr.bf16.mxu1 %v5843_v20  ;;  %v893_v5 = vor.u32 %v892_v15, %v889_v60  ;;  %v1879_v7 = vrot.slane %v7410_v47, 1  ;;  %599 = vst [vmem:[#allocation2 + $0x124] sm:$0xf] %v499_v16  ;;  %v8826_v58 = vshll.u32 %v6766_v46, 16  ;;  %v503_v42 = vrot.slane %v501_v2, 4  ;;  %2231 = vmatprep.mubr.bf16.mxu0 %v1882_v49  ;;  %v5684_v20 = vld [vmem:[#allocation8 + $0x1a0] sm:$0xff]  }
 0x16c   : > { %v884_v53 = vsel %vm6786_vm13, %v875_v23, %v883_v8  ;;  %v885_v17 = vrot.slane %v883_v8, 4  ;;  %v502_v45 = vsel %vm6714_vm9, %v500_v48, %v501_v2  ;;  %v5844_v24 = vld [vmem:[%s6419_s29 + $0x60] sm:$0xf]  ;;  %v7435_v8 = vld [vmem:[#allocation2 + $0xf4] ss:$12 sps:$4 sm:$0xff]   ;;  %v8827_v2 = vshrl.u32 %v6806_v11, 16  ;;  %3752 = vmatpush1.bf16.msra.mxu1 %v5680_v57 }
 0x16d   : > { %1089 = vst [vmem:[#allocation2 + $0x114] sm:$0xf] %v884_v53  ;;  %v902_v36 = vrot.slane %v8826_v58, 7  ;;  %v895_v23 = vrot.slane %v893_v5, 4  ;;  %v504_v62 = vrot.slane %v5844_v24, 7  ;;  %v8828_v19 = vshll.u32 %v6806_v11, 16  ;;  %3753 = vmatprep.subr.bf16.mxu1 %v8761_v31 }
 0x16e   : > { %v894_v41 = vsel %vm6786_vm13, %v885_v17, %v893_v5  ;;  %600 = vst [vmem:[#allocation2 + $0x130] sm:$0xf] %v502_v45  ;;  %v5845_v46 = vld [vmem:[%s6419_s29 + $0x64] sm:$0xf]  ;;  %v909_v60 = vrot.slane %v8827_v2, 6  ;;  %v1880_v53 = vsel %vm1833_vm3, %v1873_v54, %v1879_v7  ;;  %v1887_v17 = vrot.slane %v7435_v8, 1 }
 0x16f   : > { %v903_v14 = vor.u32 %v902_v36, %v899_v21  ;;  %1090 = vst [vmem:[#allocation2 + $0x120] sm:$0xf] %v894_v41  ;;  %v507_v37 = vrot.slane %v5845_v46, 7  ;;  %v7438_v38 = vld [vmem:[#allocation2 + $0xf0] ss:$12 sps:$4 sm:$0xff]   ;;  %v505_v30 = vsel %vm6714_vm9, %v503_v42, %v504_v62  ;;  %v506_v0 = vrot.slane %v504_v62, 4  ;;  %2232 = vmatmul.mubr.bf16.gmra.mrb[28].mxu0 %v1880_v53 }
 0x170   : > { %v912_v15 = vrot.slane %v8828_v19, 7  ;;  %601 = vst [vmem:[#allocation2 + $0x13c] sm:$0xf] %v505_v30  ;;  %v8829_v43 = vshrl.u32 %v6809_v39, 16  ;;  %v8830_v21 = vshll.u32 %v6809_v39, 16  ;;  %v1888_v58 = vsel %vm1833_vm3, %v1881_v1, %v1887_v17  ;;  %v5690_v41 = vld [vmem:[#allocation8 + $0x1a8] sm:$0xff]   ;;  %3754 = vmatpush1.bf16.msra.mxu1 %v5684_v20 }
 0x171   : > { %v904_v16 = vsel %vm6786_vm13, %v895_v23, %v903_v14  ;;  %v905_v48 = vrot.slane %v903_v14, 4  ;;  %v508_v11 = vsel %vm6714_vm9, %v506_v0, %v507_v37  ;;  %v5846_v57 = vld [vmem:[#allocation2 + $0x30] ss:$12 sps:$4 sm:$0xff]   ;;  %v7462_v36 = vld [vmem:[#allocation2 + $0x10c] ss:$12 sps:$4 sm:$0xff]   ;;  %v509_v42 = vrot.slane %v507_v37, 4  ;;  %2239 = vmatprep.mubr.bf16.mxu0 %v1888_v58  ;;  %3755 = vmatprep.subr.bf16.mxu1 %v8761_v31 }
 0x172   : > { %1091 = vst [vmem:[#allocation2 + $0x12c] sm:$0xf] %v904_v16  ;;  %v913_v5 = vor.u32 %v912_v15, %v909_v60  ;;  %v919_v54 = vrot.slane %v8829_v43, 6  ;;  %v922_v49 = vrot.slane %v8830_v21, 7  ;;  %2765 = vmatmul.mubr.bf16.gmra.mrb[40].mxu1 %v5846_v57  ;;  %602 = vst [vmem:[#allocation2 + $0x148] sm:$0xf] %v508_v11 }
 0x173   : > { %v5847_v45 = vld [vmem:[#allocation2 + $0x4c] ss:$12 sps:$4 sm:$0xff]   ;;  %v5848_v39 = vld [vmem:[%s6419_s29 + $0x68] sm:$0xf]  ;;  %v1885_v46 = vrot.slane %v7438_v38, 1  ;;  %v1893_v1 = vrot.slane %v7462_v36, 1 }
 0x174   : > { %2772 = vmatprep.mubr.bf16.mxu1 %v5847_v45  ;;  %v914_v23 = vsel %vm6786_vm13, %v905_v48, %v913_v5  ;;  %v915_v24 = vrot.slane %v913_v5, 4  ;;  %v923_v62 = vor.u32 %v922_v49, %v919_v54  ;;  %v510_v14 = vrot.slane %v5848_v39, 7  ;;  %v7469_v30 = vld [vmem:[#allocation2 + $0x108] ss:$12 sps:$4 sm:$0xff]   ;;  %v5850_v58 = vld [vmem:[%s6419_s29 + $0x70] sm:$0xf]  ;;  %3756 = vmatpush1.bf16.msra.mxu1 %v5690_v41 }
 0x175   : > { %1092 = vst [vmem:[#allocation2 + $0x138] sm:$0xf] %v914_v23  ;;  %v5849_v37 = vld [vmem:[%s6419_s29 + $0x6c] sm:$0xf]  ;;  %v8831_v2 = vshrl.u32 %v6863_v3, 16  ;;  %v8832_v48 = vshll.u32 %v6863_v3, 16  ;;  %v1886_v45 = vsel %vm1833_vm3, %v1879_v7, %v1885_v46  ;;  %v1894_v3 = vsel %vm1833_vm3, %v1887_v17, %v1893_v1  ;;  %3757 = vmatprep.subr.bf16.mxu1 %v8761_v31 }
 0x176   : > { %v513_v0 = vrot.slane %v5849_v37, 7  ;;  %v924_v19 = vsel %vm6786_vm13, %v915_v24, %v923_v62  ;;  %v511_v15 = vsel %vm6714_vm9, %v509_v42, %v510_v14  ;;  %v512_v53 = vrot.slane %v510_v14, 4  ;;  %v5695_v16 = vld [vmem:[#allocation8 + $0x1b0] sm:$0xff]  }
 0x177   : > { %v929_v60 = vrot.slane %v8831_v2, 6  ;;  %v925_v20 = vrot.slane %v923_v62, 4  ;;  %1093 = vst [vmem:[#allocation2 + $0x144] sm:$0xf] %v924_v19  ;;  %603 = vst [vmem:[#allocation2 + $0x154] sm:$0xf] %v511_v15  ;;  %2240 = vmatmul.mubr.bf16.gmra.mrb[32].mxu0 %v1886_v45 }
 0x178   : > { %v932_v11 = vrot.slane %v8832_v48, 7  ;;  %v8833_v5 = vshrl.u32 %v6866_v26, 16  ;;  %v514_v54 = vsel %vm6714_vm9, %v512_v53, %v513_v0  ;;  %v8834_v21 = vshll.u32 %v6866_v26, 16  ;;  %v7496_v23 = vld [vmem:[#allocation2 + $0x124] ss:$12 sps:$4 sm:$0xff]   ;;  %2247 = vmatprep.mubr.bf16.mxu0 %v1894_v3  ;;  %3758 = vmatpush1.bf16.msra.mxu1 %v5695_v16 }
 0x179   : > { %v515_v57 = vrot.slane %v513_v0, 4  ;;  %v516_v42 = vrot.slane %v5850_v58, 7  ;;  %v7498_v24 = vld [vmem:[#allocation2 + $0x120] ss:$12 sps:$4 sm:$0xff]   ;;  %604 = vst [vmem:[#allocation2 + $0x160] sm:$0xf] %v514_v54  ;;  %3759 = vmatprep.subr.bf16.mxu1 %v8761_v31 }
 0x17a   : > { %v939_v43 = vrot.slane %v8833_v5, 6  ;;  %v942_v49 = vrot.slane %v8834_v21, 7  ;;  %v933_v26 = vor.u32 %v932_v11, %v929_v60  ;;  %v5851_v62 = vld [vmem:[%s6419_s29 + $0x74] sm:$0xf]  ;;  %v8835_v0 = vshrl.u32 %v6875_v18, 16 }
 0x17b   : > { %v519_v39 = vrot.slane %v5851_v62, 7  ;;  %v517_v37 = vsel %vm6714_vm9, %v515_v57, %v516_v42  ;;  %v518_v7 = vrot.slane %v516_v42, 4  ;;  %v5852_v17 = vld [vmem:[#allocation2 + $0x48] ss:$12 sps:$4 sm:$0xff]   ;;  %v1891_v41 = vrot.slane %v7469_v30, 1  ;;  %v5699_v15 = vld [vmem:[#allocation8 + $0x1b8] sm:$0xff]  }
 0x17c   : > { %v943_v14 = vor.u32 %v942_v49, %v939_v43  ;;  %v949_v2 = vrot.slane %v8835_v0, 6  ;;  %2773 = vmatmul.mubr.bf16.gmra.mrb[44].mxu1 %v5852_v17  ;;  %v934_v19 = vsel %vm6786_vm13, %v925_v20, %v933_v26  ;;  %v935_v60 = vrot.slane %v933_v26, 4  ;;  %605 = vst [vmem:[#allocation2 + $0x16c] sm:$0xf] %v517_v37  ;;  %v5703_v37 = vld [vmem:[#allocation8 + $0x1c0] sm:$0xff]  }
 0x17d   : > { %2780 = vmatprep.mubr.bf16.mxu1 %v7114_v13  ;;  %1094 = vst [vmem:[#allocation2 + $0x150] sm:$0xf] %v934_v19  ;;  %v520_v53 = vsel %vm6714_vm9, %v518_v7, %v519_v39  ;;  %v8836_v11 = vshll.u32 %v6875_v18, 16  ;;  %v8837_v43 = vshrl.u32 %v6914_v56, 16  ;;  %v8838_v21 = vshrl.u32 %v7021_v40, 16  ;;  %3760 = vmatpush1.bf16.msra.mxu1 %v5699_v15 }
 0x17e   : > { %v945_v48 = vrot.slane %v943_v14, 4  ;;  %v8839_v49 = vshll.u32 %v7021_v40, 16  ;;  %v944_v57 = vsel %vm6786_vm13, %v935_v60, %v943_v14  ;;  %606 = vst [vmem:[#allocation2 + $0x178] sm:$0xf] %v520_v53  ;;  %v8840_v18 = vshll.u32 %v6914_v56, 16  ;;  %3761 = vmatprep.subr.bf16.mxu1 %v8761_v31 }
 0x17f   : > { %v952_v5 = vrot.slane %v8836_v11, 7  ;;  %v959_v54 = vrot.slane %v8837_v43, 6  ;;  %v7518_v20 = vrot.slane %v8838_v21, 4  ;;  %v1899_v42 = vrot.slane %v7496_v23, 1  ;;  %1095 = vst [vmem:[#allocation2 + $0x15c] sm:$0xf] %v944_v57 }
 0x180   : > { %v7522_v13 = vrot.slane %v8839_v49, 5  ;;  %v962_v58 = vrot.slane %v8840_v18, 7  ;;  %v1897_v45 = vrot.slane %v7498_v24, 1  ;;  %v521_v26 = vrot.slane %v519_v39, 4  ;;  %v5853_v3 = vld [vmem:[%s6419_s29 + $0x78] sm:$0xf] }
 0x181   : > { %v953_v40 = vor.u32 %v952_v5, %v949_v2  ;;  %v522_v16 = vrot.slane %v5853_v3, 7  ;;  %v5854_v7 = vld [vmem:[%s6419_s29 + $0x7c] sm:$0xf]  ;;  %v8841_v14 = vshrl.u32 %v6968_v25, 16  ;;  %v1892_v56 = vsel %vm1833_vm3, %v1885_v46, %v1891_v41  ;;  %v5855_v21 = vld [vmem:[#allocation2 + $0x60] ss:$12 sps:$4 sm:$0xff]   ;;  %3762 = vmatpush1.bf16.msra.mxu1 %v5703_v37 }
 0x182   : > { %v963_v62 = vor.u32 %v962_v58, %v959_v54  ;;  %v525_v0 = vrot.slane %v5854_v7, 7  ;;  %v7540_v19 = vld [vmem:[#allocation2 + $0x13c] ss:$12 sps:$4 sm:$0xff]   ;;  %v8842_v5 = vshll.u32 %v6968_v25, 16  ;;  %v1900_v46 = vsel %vm1833_vm3, %v1893_v1, %v1899_v42  ;;  %2248 = vmatmul.mubr.bf16.gmra.mrb[36].mxu0 %v1892_v56  ;;  %3763 = vmatprep.subr.bf16.mxu1 %v8761_v31 }
 0x183   : > { %v969_v17 = vrot.slane %v8841_v14, 6  ;;  %v954_v39 = vsel %vm6786_vm13, %v945_v48, %v953_v40  ;;  %v955_v2 = vrot.slane %v953_v40, 4  ;;  %v523_v60 = vsel %vm6714_vm9, %v521_v26, %v522_v16  ;;  %v5856_v58 = vld [vmem:[%s6419_s29 + $0x80] sm:$0xf]  ;;  %v5857_v26 = vld [vmem:[%s6419_s29 + $0x84] sm:$0xf]  ;;  %2255 = vmatprep.mubr.bf16.mxu0 %v1900_v46 }
 0x184   : > { %1096 = vst [vmem:[#allocation2 + $0x168] sm:$0xf] %v954_v39  ;;  %v524_v53 = vrot.slane %v522_v16, 4  ;;  %v965_v11 = vrot.slane %v963_v62, 4  ;;  %v972_v43 = vrot.slane %v8842_v5, 7  ;;  %v8843_v15 = vshrl.u32 %v6982_v28, 16  ;;  %2781 = vmatmul.mubr.bf16.gmra.mrb[48].mxu1 %v5855_v21 }
 0x185   : > { %v964_v48 = vsel %vm6786_vm13, %v955_v2, %v963_v62  ;;  %607 = vst [vmem:[#allocation2 + $0x184] sm:$0xf] %v523_v60  ;;  %v8844_v57 = vshll.u32 %v6982_v28, 16  ;;  %v527_v18 = vrot.slane %v525_v0, 4  ;;  %2788 = vmatprep.mubr.bf16.mxu1 %v7213_v10  ;;  %v528_v40 = vrot.slane %v5856_v58, 7  ;;  %v5707_v56 = vld [vmem:[#allocation8 + $0x1c8] sm:$0xff]  }
 0x186   : > { %v979_v54 = vrot.slane %v8843_v15, 6  ;;  %1097 = vst [vmem:[#allocation2 + $0x174] sm:$0xf] %v964_v48  ;;  %v526_v25 = vsel %vm6714_vm9, %v524_v53, %v525_v0  ;;  %v973_v49 = vor.u32 %v972_v43, %v969_v17  ;;  %v531_v62 = vrot.slane %v5857_v26, 7  ;;  %v7572_v39 = vld [vmem:[#allocation2 + $0x138] ss:$12 sps:$4 sm:$0xff]   ;;  %3764 = vmatpush1.bf16.msra.mxu1 %v5707_v56 }
 0x187   : > { %v982_v1 = vrot.slane %v8844_v57, 7  ;;  %608 = vst [vmem:[#allocation2 + $0x190] sm:$0xf] %v526_v25  ;;  %v8845_v3 = vshrl.u32 %v7002_v27, 16  ;;  %v8846_v7 = vshll.u32 %v7002_v27, 16  ;;  %v1905_v17 = vrot.slane %v7540_v19, 1  ;;  %3765 = vmatprep.subr.bf16.mxu1 %v8761_v31 }
 0x188   : > { %v974_v28 = vsel %vm6786_vm13, %v965_v11, %v973_v49  ;;  %v975_v0 = vrot.slane %v973_v49, 4  ;;  %v529_v2 = vsel %vm6714_vm9, %v527_v18, %v528_v40  ;;  %v530_v27 = vrot.slane %v528_v40, 4  ;;  %v7579_v5 = vld [vmem:[#allocation2 + $0x154] ss:$12 sps:$4 sm:$0xff]   ;;  %v5711_v46 = vld [vmem:[#allocation8 + $0x1d0] sm:$0xff]  }
 0x189   : > { %v989_v16 = vrot.slane %v8845_v3, 6  ;;  %v992_v14 = vrot.slane %v8846_v7, 7  ;;  %v983_v10 = vor.u32 %v982_v1, %v979_v54  ;;  %1098 = vst [vmem:[#allocation2 + $0x180] sm:$0xf] %v974_v28  ;;  %v8847_v53 = vshrl.u32 %v7011_v22, 16 }
 0x18a   : > { %609 = vst [vmem:[#allocation2 + $0x19c] sm:$0xf] %v529_v2  ;;  %v532_v48 = vsel %vm6714_vm9, %v530_v27, %v531_v62  ;;  %v8848_v54 = vshll.u32 %v7011_v22, 16  ;;  %v533_v25 = vrot.slane %v531_v62, 4  ;;  %v1898_v49 = vsel %vm1833_vm3, %v1891_v41, %v1897_v45  ;;  %v5858_v1 = vld [vmem:[%s6419_s29 + $0x88] sm:$0xf]  ;;  %3766 = vmatpush1.bf16.msra.mxu1 %v5711_v46 }
 0x18b   : > { %v993_v60 = vor.u32 %v992_v14, %v989_v16  ;;  %v999_v37 = vrot.slane %v8847_v53, 6  ;;  %v984_v11 = vsel %vm6786_vm13, %v975_v0, %v983_v10  ;;  %v985_v43 = vrot.slane %v983_v10, 4  ;;  %610 = vst [vmem:[#allocation2 + $0x1a8] sm:$0xf] %v532_v48  ;;  %v5859_v41 = vld [vmem:[%s6419_s29 + $0x8c] sm:$0xf]  ;;  %2256 = vmatmul.mubr.bf16.gmra.mrb[40].mxu0 %v1898_v49  ;;  %3767 = vmatprep.subr.bf16.mxu1 %v8761_v31 }
 0x18c   : > { %1099 = vst [vmem:[#allocation2 + $0x18c] sm:$0xf] %v984_v11  ;;  %v1002_v21 = vrot.slane %v8848_v54, 7  ;;  %v534_v18 = vrot.slane %v5858_v1, 7  ;;  %v1906_v22 = vsel %vm1833_vm3, %v1899_v42, %v1905_v17  ;;  %v1903_v58 = vrot.slane %v7572_v39, 1  ;;  %2789 = vmatmul.mubr.bf16.gmra.mrb[52].mxu1 %v7215_v32  ;;  %v5715_v53 = vld [vmem:[#allocation8 + $0x1d8] sm:$0xff]  }
 0x18d   : > { %v995_v15 = vrot.slane %v993_v60, 4  ;;  %v994_v57 = vsel %vm6786_vm13, %v985_v43, %v993_v60  ;;  %v537_v26 = vrot.slane %v5859_v41, 7  ;;  %v8849_v16 = vshrl.u32 %v7079_v29, 16  ;;  %2796 = vmatprep.mubr.bf16.mxu1 %v7286_v12  ;;  %2263 = vmatprep.mubr.bf16.mxu0 %v1906_v22  ;;  %v8853_v11 = vld [vmem:[#allocation19_spill] sm:$0xff]  ;;  %v1104_v54 = vld [vmem:[#allocation2 + $0x1c8] sm:$0x3] }
 0x18e   : > { %v1003_v40 = vor.u32 %v1002_v21, %v999_v37  ;;  %1100 = vst [vmem:[#allocation2 + $0x198] sm:$0xf] %v994_v57  ;;  %v535_v62 = vsel %vm6714_vm9, %v533_v25, %v534_v18  ;;  %v536_v3 = vrot.slane %v534_v18, 4  ;;  %v8850_v14 = vshll.u32 %v7079_v29, 16  ;;  %v7631_v46 = vld [vmem:[#allocation2 + $0x150] ss:$12 sps:$4 sm:$0xff]   ;;  %3768 = vmatpush1.bf16.msra.mxu1 %v5715_v53 }
 0x18f   : > { %v1009_v7 = vrot.slane %v8849_v16, 6  ;;  %v1911_v28 = vrot.slane %v7579_v5, 1  ;;  %611 = vst [vmem:[#allocation2 + $0x1b4] sm:$0xf] %v535_v62  ;;  %v1145_v10 = vor.u32 %v7522_v13, %v7518_v20  ;;  %v8851_v2 = vshrl.u32 %v7086_v35, 16  ;;  %v8855_v13 = vld [vmem:[#allocation20_spill] sm:$0xff]  ;;  %3769 = vmatprep.subr.bf16.mxu1 %v8761_v31 }
 0x190   : > { %v1012_v42 = vrot.slane %v8850_v14, 7  ;;  %v1004_v0 = vsel %vm6786_vm13, %v995_v15, %v1003_v40  ;;  %v1005_v32 = vrot.slane %v1003_v40, 4  ;;  %v538_v29 = vsel %vm6714_vm9, %v536_v3, %v537_v26  ;;  %v7635_v21 = vld [vmem:[#allocation2 + $0x16c] ss:$12 sps:$4 sm:$0xff]  }
 0x191   : > { %1101 = vst [vmem:[#allocation2 + $0x1a4] sm:$0xf] %v1004_v0  ;;  %v1019_v12 = vrot.slane %v8851_v2, 6  ;;  %v8852_v27 = vshll.u32 %v7086_v35, 16  ;;  %612 = vst [vmem:[#allocation2 + $0x1c0] sm:$0xf] %v538_v29  ;;  %v1904_v44 = vsel %vm1833_vm3, %v1897_v45, %v1903_v58 }
 0x192   : > { %v1013_v56 = vor.u32 %v1012_v42, %v1009_v7  ;;  %v539_v37 = vrot.slane %v537_v26, 4  ;;  %v8854_v20 = vshll.u32 %v8853_v11, 16  ;;  %v8856_v25 = vld [vmem:[#allocation25_spill] sm:$0xff]  ;;  %v8857_v57 = vld [vmem:[#allocation22_spill] sm:$0xff]  ;;  %v8859_v22 = vld [vmem:[#allocation23_spill] sm:$0xff]  ;;  %v1146_v41 = vrot.slane %v1145_v10, 4 }
 0x193   : > { %v1022_v60 = vrot.slane %v8852_v27, 7  ;;  %v1166_v49 = vrot.slane %v8856_v25, 4  ;;  %v8858_v1 = vshrl.u32 %v8857_v57, 16  ;;  %v8860_v40 = vshrl.u32 %v8859_v22, 16  ;;  %v5718_v16 = vld [vmem:[#allocation8 + $0x1e0] sm:$0xff]   ;;  %2264 = vmatmul.mubr.bf16.gmra.mrb[44].mxu0 %v1904_v44  ;;  %v5727_v44 = vld [vmem:[#allocation8 + $0x1f0] sm:$0xff]  }
 0x194   : > { %v1176_v43 = vor.u32 %v8855_v13, %v8854_v20  ;;  %v1014_v35 = vsel %vm6786_vm13, %v1005_v32, %v1013_v56  ;;  %v1015_v48 = vrot.slane %v1013_v56, 4  ;;  %613 = vst [vmem:[#allocation2 + $0x1cc] sm:$0x1] %v539_v37  ;;  %v1912_v26 = vsel %vm1833_vm3, %v1905_v17, %v1911_v28  ;;  %2797 = vmatmul.mubr.bf16.gmra.mrb[56].mxu1 %v7288_v59  ;;  %v5730_v25 = vld [vmem:[#allocation8 + $0x1f8] sm:$0xff]  }
 0x195   : > { %v1023_v15 = vor.u32 %v1022_v60, %v1019_v12  ;;  %1102 = vst [vmem:[#allocation2 + $0x1b0] sm:$0xf] %v1014_v35  ;;  %v1167_v18 = vrot.slane %v8858_v1, 7  ;;  %v1171_v45 = vrot.slane %v8860_v40, 7  ;;  %v8861_v7 = vshll.u32 %v6706_v51, 16  ;;  %2804 = vmatprep.mubr.bf16.mxu1 %v7338_v55  ;;  %2271 = vmatprep.mubr.bf16.mxu0 %v1912_v26  ;;  %v5724_v55 = vld [vmem:[#allocation8 + $0x1e8] sm:$0xff]  }
 0x196   : > { %v8862_v42 = vshll.u32 %v8857_v57, 16  ;;  %v8863_v10 = vshll.u32 %v8859_v22, 16  ;;  %v8865_v59 = vshrl.u32 %v6706_v51, 16  ;;  %v1909_v37 = vrot.slane %v7631_v46, 1  ;;  %3770 = vmatpush1.bf16.msra.mxu1 %v5718_v16  ;;  %v7697_v1 = vld [vmem:[#allocation2 + $0x19c] ss:$12 sps:$4 sm:$0xff]  }
 0x197   : > { %v1024_v62 = vsel %vm6786_vm13, %v1015_v48, %v1023_v15  ;;  %v1025_v3 = vrot.slane %v1023_v15, 4  ;;  %v1147_v14 = vrot.slane %v8861_v7, 5  ;;  %v1170_v32 = vrot.slane %v1167_v18, 4  ;;  %3771 = vmatprep.subr.bf16.mxu1 %v8761_v31  ;;  %v7678_v48 = vld [vmem:[#allocation2 + $0x168] ss:$12 sps:$4 sm:$0xff]  }
 0x198   : > { %1103 = vst [vmem:[#allocation2 + $0x1bc] sm:$0xf] %v1024_v62  ;;  %v1168_v0 = vor.u32 %v1167_v18, %v8862_v42  ;;  %v1172_v29 = vor.u32 %v1171_v45, %v8863_v10  ;;  %v1174_v17 = vrot.slane %v1171_v45, 4  ;;  %v1149_v53 = vrot.slane %v8865_v59, 4  ;;  %v7680_v15 = vld [vmem:[#allocation2 + $0x184] ss:$12 sps:$4 sm:$0xff]  }
 0x199   : > { %v1105_v56 = vsel %vm6750_vm12, %v1025_v3, %v1104_v54  ;;  %v1148_v2 = vsel %vm7199_vm0, %v1146_v41, %v1147_v14  ;;  %v1917_v11 = vrot.slane %v7635_v21, 1  ;;  %v8866_v13 = vshll.u32 %v6709_v61, 16  ;;  %v7704_v40 = vld [vmem:[#allocation2 + $0x198] ss:$12 sps:$4 sm:$0xff]   ;;  %v5712_v41 = vld [vmem:[#allocation2 + $0x1b4] ss:$12 sps:$4 sm:$0xff]  }
 0x19a   : > { %1106 = vst [vmem:[#allocation2 + $0x1c8] sm:$0x3] %v1105_v56  ;;  %v1169_v12 = vsel %vm6492_vm2, %v1166_v49, %v1168_v0  ;;  %v1173_v27 = vsel %vm6492_vm2, %v1170_v32, %v1172_v29  ;;  %v1177_v60 = vsel %vm6492_vm2, %v1174_v17, %v1176_v43  ;;  %1159 = vst [vmem:[#allocation2 + $0x8] sm:$0xf] %v1148_v2  ;;  %3772 = vmatpush1.bf16.msra.mxu1 %v5724_v55  ;;  %v1535_v42 = vld [vmem:[#allocation2 + $0x20] sm:$0xe] }
 0x19b   : > { %1347 = vst [vmem:[#allocation2 + $0x2c] sm:$0xf] %v1169_v12  ;;  %1348 = vst [vmem:[#allocation2 + $0x38] sm:$0xf] %v1173_v27  ;;  %v1150_v20 = vor.u32 %v1149_v53, %v1147_v14  ;;  %v1152_v43 = vrot.slane %v8866_v13, 5  ;;  %v1910_v35 = vsel %vm1833_vm3, %v1903_v58, %v1909_v37  ;;  %v1918_v54 = vsel %vm1833_vm3, %v1911_v28, %v1917_v11  ;;  %v8867_v27 = vld [vmem:[#allocation21_spill] sm:$0xff] }
 0x19c   : > { %1349 = vst [vmem:[#allocation2 + $0x44] sm:$0xf] %v1177_v60  ;;  %3773 = vmatprep.subr.bf16.mxu1 %v8761_v31  ;;  %2805 = vmatmul.mubr.bf16.gmra.mrb[60].mxu1 %v7340_v33  ;;  %v1915_v58 = vrot.slane %v7678_v48, 1  ;;  %v1923_v49 = vrot.slane %v7680_v15, 1  ;;  %v7693_v28 = vld [vmem:[#allocation2 + $0x180] ss:$12 sps:$4 sm:$0xff]  }
 0x19d   : > { %v1151_v51 = vrot.slane %v1150_v20, 4  ;;  %2272 = vmatmul.mubr.bf16.gmra.mrb[48].mxu0 %v1910_v35  ;;  %2812 = vmatprep.mubr.bf16.mxu1 %v7380_v52  ;;  %v1921_v52 = vrot.slane %v7693_v28, 1  ;;  %v1929_v18 = vrot.slane %v7697_v1, 1  ;;  %v5722_v59 = vld [vmem:[#allocation8 + $0x88] sm:$0xff]   ;;  %v5860_v53 = vld [vmem:[#allocation8 + $0x80] sm:$0xff]   ;;  %v5723_v55 = vld [vmem:[#allocation8 + $0x90] sm:$0xff]  }
 0x19e   : > { %2279 = vmatprep.mubr.bf16.mxu0 %v1918_v54  ;;  %3774 = vmatpush1.bf16.msra.mxu1 %v5727_v44  ;;  %v1916_v57 = vsel %vm1833_vm3, %v1909_v37, %v1915_v58  ;;  %v1924_v33 = vsel %vm1833_vm3, %v1917_v11, %v1923_v49  ;;  %v4216_v37 = vld [vmem:[#allocation11 + $0x10] sm:$0xff] }
 0x19f   : > { %v1153_v61 = vsel %vm7199_vm0, %v1151_v51, %v1152_v43  ;;  %3775 = vmatprep.subr.bf16.mxu1 %v8761_v31  ;;  %v1922_v22 = vsel %vm1833_vm3, %v1915_v58, %v1921_v52  ;;  %v1930_v45 = vsel %vm1833_vm3, %v1923_v49, %v1929_v18  ;;  %v5714_v3 = vld [vmem:[#allocation2 + $0x1b0] ss:$12 sps:$4 sm:$0xff]   ;;  %vm4252_vm8 = vcmp.ne.f32.partialorder %v4216_v37, 0.0 }
 0x1a0   : > { %1160 = vst [vmem:[#allocation2 + $0x14] sm:$0xf] %v1153_v61  ;;  %v4288_v11 = vsel %vm4252_vm8, 1, %v8761_v31  ;;  %v4215_v43 = vld [vmem:[#allocation11 + $0x8] sm:$0xff]  ;;  %v5725_v44 = vld [vmem:[#allocation8 + $0x98] sm:$0xff]   ;;  %v4218_v58 = vld [vmem:[#allocation11 + $0x20] sm:$0xff] }
 0x1a1   : > { %v1540_v26 = vld [vmem:[#allocation2 + $0x1c8] sm:$0x11]  ;;  %4329 = vperm.xlu1 %5591, %v4288_v11   ;;  %vm4251_vm10 = vcmp.ne.f32.partialorder %v4215_v43, 0.0  ;;  %v4219_v61 = vld [vmem:[#allocation11 + $0x28] sm:$0xff]  ;;  %vm4254_vm15 = vcmp.ne.f32.partialorder %v4218_v58, 0.0 }
 0x1a2   : > { %3776 = vmatpush1.bf16.msra.mxu1 %v5730_v25  ;;  %v4908_v7 = vcombine.high %v1540_v26, %v1540_v26  ;;  %v4907_v32 = vcombine.low %v1540_v26, %v1540_v26  ;;  %v4287_v54 = vsel %vm4251_vm10, 1, %v8761_v31  ;;  %v5726_v25 = vld [vmem:[#allocation8 + $0xa0] sm:$0xff]   ;;  %vm4255_vm13 = vcmp.ne.f32.partialorder %v4219_v61, 0.0  ;;  %v4227_v58 = vld [vmem:[#allocation11 + $0x68] sm:$0xff] }
 0x1a3   : > { %v7719_v17 = vld [vmem:[#allocation2 + $0x38] ss:$12 sps:$4 sm:$0xff]   ;;  %v4291_v49 = vsel %vm4255_vm13, 1, %v8761_v31 }
 0x1a4   : > { %2813 = vmatmul.mubr.bf16.gmra.mrb[64].mxu1 %v7382_v9  ;;  %v1927_v9 = vrot.slane %v7704_v40, 1  ;;  %v1941_v14 = vrot.slane %v4908_v7, 1  ;;  %v1841_v56 = vrot.slane %v7719_v17, 1  ;;  %v5729_v7 = vld [vmem:[#allocation8 + $0xb0] sm:$0xff]  }
 0x1a5   : > { %2280 = vmatmul.mubr.bf16.gmra.mrb[52].mxu0 %v1916_v57  ;;  %2820 = vmatprep.mubr.bf16.mxu1 %v7408_v6  ;;  %v1935_v6 = vrot.slane %v5712_v41, 1 }
 0x1a6   : > { %2287 = vmatprep.mubr.bf16.mxu0 %v1924_v33  ;;  %v1928_v62 = vsel %vm1833_vm3, %v1921_v52, %v1927_v9  ;;  %v4220_v33 = vld [vmem:[#allocation11 + $0x30] sm:$0xff]  ;;  %v5728_v52 = vld [vmem:[#allocation8 + $0xa8] sm:$0xff]  }
 0x1a7   : > { %v1936_v16 = vsel %vm1833_vm3, %v1929_v18, %v1935_v6  ;;  %v1942_v10 = vsel %vm1833_vm3, %v1935_v6, %v1941_v14  ;;  %vm4256_vm5 = vcmp.ne.f32.partialorder %v4220_v33, 0.0  ;;  %v5740_v33 = vld [vmem:[#allocation8 + $0x200] sm:$0xff]  }
 0x1ac   : > { %2821 = vmatmul.mubr.bf16.gmra.mrb[68].mxu1 %v7410_v47  ;;  %v1933_v47 = vrot.slane %v5714_v3, 1  ;;  %v4222_v3 = vld [vmem:[#allocation11 + $0x40] sm:$0xff] }
 0x1ad   : > { %2288 = vmatmul.mubr.bf16.gmra.mrb[56].mxu0 %v1922_v22  ;;  %2828 = vmatprep.mubr.bf16.mxu1 %v7435_v8  ;;  %v7714_v8 = vld [vmem:[#allocation2 + $0x2c] sm:$0xf]  ;;  %v7754_v22 = vld [vmem:[%s6427_s9 + $0x10] sm:$0x3]  ;;  %vm4258_vm7 = vcmp.ne.f32.partialorder %v4222_v3, 0.0 }
 0x1ae   : > { %2295 = vmatprep.mubr.bf16.mxu0 %v1930_v45  ;;  %v1934_v0 = vsel %vm1833_vm3, %v1927_v9, %v1933_v47  ;;  %v4855_v29 = vcombine.low %v1535_v42, %v7714_v8  ;;  %v4292_v9 = vsel %vm4256_vm5, 1, %v8761_v31  ;;  %v1128_v6 = vshll.u32 %v7754_v22, 16  ;;  %616 = vst [vmem:[#allocation2 + $0x1e4] sm:$0x3] %v7754_v22 }
 0x1af   : > { %v4294_v14 = vsel %vm4258_vm7, 1, %v8761_v31  ;;  %v5736_v42 = vld [vmem:[#allocation2 + $0x34] ss:$12 sps:$4 sm:$0xfc]  }
 0x1b4   : > { %2829 = vmatmul.mubr.bf16.gmra.mrb[72].mxu1 %v7438_v38  ;;  %v1939_v38 = vrot.slane %v4907_v32, 1 }
 0x1b5   : > { %2296 = vmatmul.mubr.bf16.gmra.mrb[60].mxu0 %v1928_v62  ;;  %2836 = vmatprep.mubr.bf16.mxu1 %v7462_v36  ;;  %v1840_v36 = vrot.slane %v4855_v29, 1  ;;  %v1125_v62 = vshrl.u32 %v7754_v22, 16  ;;  %v7777_v29 = vld [vmem:[#allocation2 + $0x4c] ss:$12 sps:$4 sm:$0xff]  }
 0x1b6   : > { %2303 = vmatprep.mubr.bf16.mxu0 %v1936_v16  ;;  %v1940_v2 = vsel %vm1833_vm3, %v1933_v47, %v1939_v38  ;;  %v7769_v16 = vrot.slane %v1128_v6, 5  ;;  %v3440_v61 = vrot.slane %v7777_v29, 2 }
 0x1b7   : > { %v1842_v12 = vsel %vm1833_vm3, %v1840_v36, %v1841_v56  ;;  %v4225_v36 = vld [vmem:[#allocation11 + $0x58] sm:$0xff] }
 0x1b8   : > { %vm4261_vm4 = vcmp.ne.f32.partialorder %v4225_v36, 0.0 }
 0x1b9   : > { %v4297_v37 = vsel %vm4261_vm4, 1, %v8761_v31 }
 0x1bc   : > { %2837 = vmatmul.mubr.bf16.gmra.mrb[76].mxu1 %v7469_v30  ;;  %v8868_v30 = vrot.slane %v8867_v27, 1 }
 0x1bd   : > { %2304 = vmatmul.mubr.bf16.gmra.mrb[64].mxu0 %v1934_v0  ;;  %2844 = vmatprep.mubr.bf16.mxu1 %v7496_v23  ;;  %v5732_v23 = vld [vmem:[#allocation2 + $0x8] ss:$12 sps:$4 sm:$0xff]   ;;  %v8869_v0 = vld [vmem:[#allocation28_spill] sm:$0xff] }
 0x1be   : > { %2311 = vmatprep.mubr.bf16.mxu0 %v1942_v10  ;;  %v1848_v60 = vsel %vm1833_vm3, %v1841_v56, %v8868_v30  ;;  %v1116_v32 = vshrl.u32 %v8869_v0, 16  ;;  %v4224_v56 = vld [vmem:[#allocation11 + $0x50] sm:$0xff] }
 0x1bf   : > { %v5731_v30 = vld [vmem:[#allocation8 + $0xb8] sm:$0xff]   ;;  %vm4260_vm8 = vcmp.ne.f32.partialorder %v4224_v56, 0.0 }
 0x1c4   : > { %2845 = vmatmul.mubr.bf16.gmra.mrb[80].mxu1 %v7498_v24  ;;  %v4214_v24 = vld [vmem:[#allocation11] sm:$0xff] }
 0x1c5   : > { %2312 = vmatmul.mubr.bf16.gmra.mrb[68].mxu0 %v1940_v2  ;;  %2852 = vmatprep.mubr.bf16.mxu1 %v7540_v19  ;;  %vm4250_vm9 = vcmp.ne.f32.partialorder %v4214_v24, 0.0  ;;  %v7733_v19 = vpop.f32.mrb[0].mxu1  ;;  %v8870_v2 = vld [vmem:[#allocation27_spill] sm:$0xff]  ;;  %v4296_v24 = vsel %vm4260_vm8, 1, %v8761_v31 }
 0x1c6   : > { %5322 = vmatprep.mubr.bf16.mxu0 %v1842_v12  ;;  %v4286_v20 = vsel %vm4250_vm9, 1, %v8761_v31  ;;  %v7737_v13 = vpop.f32.mrb[1].mxu1  ;;  %v8871_v12 = vshrl.u32 %v8870_v2, 16  ;;  %vm3435_vm9 = vcmask 1045504  }
 0x1c7   : > { %4323 = vperm.xlu0 %5590, %v4286_v20  }
 0x1c8   : > { %v1110_v27 = vrot.slane %v8871_v12, 7 }
 0x1ca   : > { %v1114_v20 = vrot.slane %v1110_v27, 4 }
 0x1cb   : > { %4326 = vperm.xlu0 %5590, %v4287_v54  }
 0x1cc   : > { %2853 = vmatmul.mubr.bf16.gmra.mrb[84].mxu1 %v7572_v39  ;;  %v7739_v39 = vpop.f32.mrb[2].mxu1 }
 0x1cd   : > { %5323 = vmatmul.mubr.bf16.vlgmr.msra.gmra.mrb[72].mxu0 %v1848_v60  ;;  %2860 = vmatprep.mubr.bf16.mxu1 %v7579_v5  ;;  %v4217_v5 = vld [vmem:[#allocation11 + $0x18] sm:$0xff]  ;;  %v7741_v51 = vpop.f32.mrb[3].mxu1 }
 0x1ce   : > { %5359 = vmatpush3.bf16.msra.mxu0 %v5860_v53  ;;  %5374 = vmatprep.mubr.bf16.mxu0 %v5732_v23  ;;  %vm4253_vm3 = vcmp.ne.f32.partialorder %v4217_v5, 0.0  ;;  %v7749_v57 = vpop.f32.mrb[4].mxu1  ;;  %v7785_v23 = vrot.slane %v1116_v32, 7  ;;  %v3439_v5 = vrot.slane %v5736_v42, 2  ;;  %v7816_v42 = vld [vmem:[#allocation2 + $0x64] ss:$12 sps:$4 sm:$0xff]  }
 0x1cf   : > { %5360 = vmatprep.subr.bf16.mxu0 %v5722_v59  ;;  %v4289_v35 = vsel %vm4253_vm3, 1, %v8761_v31  ;;  %v7751_v18 = vpop.f32.mrb[5].mxu1  ;;  %vm4263_vm3 = vcmp.ne.f32.partialorder %v4227_v58, 0.0  ;;  %v3447_v22 = vrot.slane %v7816_v42, 2  ;;  %v5752_v58 = vld [vmem:[#allocation8 + $0x218] sm:$0xff]  }
 0x1d0   : > { %4332 = vperm.xlu1 %5591, %v4289_v35   ;;  %v7757_v45 = vpop.f32.mrb[6].mxu1  ;;  %v1135_v35 = vld [vmem:[#allocation2 + $0x1c8] sm:$0xe] }
 0x1d1   : > { %v7764_v26 = vpop.f32.mrb[7].mxu1  ;;  %v4236_v42 = vld [vmem:[#allocation11 + $0xb0] sm:$0xff] }
 0x1d2   : > { %5361 = vmatpush3.bf16.msra.mxu0 %v5722_v59  ;;  %v7779_v38 = vpop.f32.mrb[8].mxu1  ;;  %v1419_v59 = vld [vmem:[#allocation2 + $0x20] sm:$0xf]  ;;  %vm4272_vm4 = vcmp.ne.f32.partialorder %v4236_v42, 0.0 }
 0x1d3   : > { %5362 = vmatprep.subr.bf16.mxu0 %v5723_v55  ;;  %v7783_v60 = vpop.f32.mrb[9].mxu1  ;;  %v4939_v3 = vcombine.low %v1419_v59, %v7714_v8  ;;  %v1127_v8 = vrot.slane %v1125_v62, 7  ;;  %v4231_v59 = vld [vmem:[#allocation11 + $0x88] sm:$0xff] }
 0x1d4   : > { %2861 = vmatmul.mubr.bf16.gmra.mrb[88].mxu1 %v7631_v46  ;;  %v4290_v46 = vsel %vm4254_vm15, 1, %v8761_v31  ;;  %4338 = vperm.xlu1 %5591, %v4291_v49   ;;  %v7788_v53 = vpop.f32.mrb[10].mxu1  ;;  %vm4267_vm15 = vcmp.ne.f32.partialorder %v4231_v59, 0.0 }
 0x1d5   : > { %2868 = vmatprep.mubr.bf16.mxu1 %v7635_v21  ;;  %4335 = vperm.xlu0 %5590, %v4290_v46   ;;  %v4221_v21 = vld [vmem:[#allocation11 + $0x38] sm:$0xff]  ;;  %v7795_v43 = vpop.f32.mrb[11].mxu1 }
 0x1d6   : > { %5363 = vmatpush3.bf16.msra.mxu0 %v5723_v55  ;;  %vm4257_vm1 = vcmp.ne.f32.partialorder %v4221_v21, 0.0  ;;  %v8872_v55 = vshll.u32 %v8870_v2, 16  ;;  %v1406_v21 = vld [vmem:[#allocation2 + $0x1e8] sm:$0x3]  ;;  %v1130_v2 = vor.u32 %v1128_v6, %v1127_v8 }
 0x1d7   : > { %5364 = vmatprep.subr.bf16.mxu0 %v5725_v44  ;;  %v4293_v41 = vsel %vm4257_vm1, 1, %v8761_v31 }
 0x1d8   : > { %4344 = vperm.xlu1 %5591, %v4293_v41   ;;  %v1113_v11 = vor.u32 %v8872_v55, %v1110_v27  ;;  %v5734_v41 = vld [vmem:[#allocation2 + $0x30] ss:$12 sps:$4 sm:$0xfc]  }
 0x1d9   : > { %4341 = vperm.xlu0 %5590, %v4292_v9   ;;  %v4299_v9 = vsel %vm4263_vm3, 1, %v8761_v31  ;;  %v3436_v63 = vrot.slane %v5734_v41, 2  ;;  %v7821_v36 = vpop.f32.mrb[12].mxu1 }
 0x1da   : > { %5365 = vmatpush3.bf16.msra.mxu0 %v5725_v44  ;;  %v1136_v46 = vsel %vm6825_vm14, %v1113_v11, %v1135_v35  ;;  %v7850_v11 = vld [vmem:[#allocation2 + $0x60] ss:$12 sps:$4 sm:$0xff]  }
 0x1db   : > { %5366 = vmatprep.subr.bf16.mxu0 %v5726_v25  ;;  %1137 = vst [vmem:[#allocation2 + $0x1c8] sm:$0xe] %v1136_v46  ;;  %v4232_v35 = vld [vmem:[#allocation11 + $0x90] sm:$0xff] }
 0x1dc   : > { %2869 = vmatmul.mubr.bf16.gmra.mrb[92].mxu1 %v7678_v48  ;;  %v4223_v48 = vld [vmem:[#allocation11 + $0x48] sm:$0xff]  ;;  %v5862_v46 = vld [vmem:[#allocation2 + $0x68] ss:$12 sps:$4 sm:$0xff]  }
 0x1dd   : > { %2876 = vmatprep.mubr.bf16.mxu1 %v7680_v15  ;;  %vm4259_vm6 = vcmp.ne.f32.partialorder %v4223_v48, 0.0  ;;  %v1396_v15 = vrot.slane %v1125_v62, 4  ;;  %4347 = vperm.xlu0 %5590, %v4294_v14   ;;  %v3441_v14 = vsel %vm3435_vm9, %v3439_v5, %v3440_v61  ;;  %v7827_v62 = vpop.f32.mrb[13].mxu1 }
 0x1de   : > { %5367 = vmatpush3.bf16.msra.mxu0 %v5726_v25  ;;  %v4295_v47 = vsel %vm4259_vm6, 1, %v8761_v31  ;;  %v4226_v25 = vld [vmem:[#allocation11 + $0x60] sm:$0xff]  ;;  %v7836_v6 = vpop.f32.mrb[14].mxu1 }
 0x1df   : > { %5368 = vmatprep.subr.bf16.mxu0 %v5728_v52  ;;  %4350 = vperm.xlu1 %5591, %v4295_v47   ;;  %v1397_v10 = vor.u32 %v1396_v15, %v7769_v16  ;;  %vm4262_vm10 = vcmp.ne.f32.partialorder %v4226_v25, 0.0  ;;  %v7838_v55 = vpop.f32.mrb[15].mxu1  ;;  %v5861_v25 = vld [vmem:[#allocation2 + $0x50] ss:$12 sps:$4 sm:$0xff]  }
 0x1e0   : > { %v4298_v48 = vsel %vm4262_vm10, 1, %v8761_v31 }
 0x1e1   : > { %v1398_v54 = vrot.slane %v1397_v10, 4  ;;  %4353 = vperm.xlu0 %5590, %v4296_v24   ;;  %v5744_v10 = vld [vmem:[#allocation8 + $0x208] sm:$0xff]   ;;  %v5748_v24 = vld [vmem:[#allocation8 + $0x210] sm:$0xff]  }
 0x1e2   : > { %5369 = vmatpush3.bf16.msra.mxu0 %v5728_v52 }
 0x1e3   : > { %5370 = vmatprep.subr.bf16.mxu0 %v5729_v7  ;;  %4356 = vperm.xlu1 %5591, %v4297_v37   ;;  %v1407_v47 = vsel %vm6750_vm12, %v1398_v54, %v1406_v21  ;;  %vm1409_vm12 = vcmask 1041409   ;;  %v4230_v37 = vld [vmem:[#allocation11 + $0x80] sm:$0xff]  ;;  %v4235_v21 = vld [vmem:[#allocation11 + $0xa8] sm:$0xff] }
 0x1e4   : > { %2877 = vmatmul.mubr.bf16.gmra.mrb[96].mxu1 %v7693_v28  ;;  %v8873_v28 = vshll.u32 %v8869_v0, 16  ;;  %v4229_v0 = vld [vmem:[#allocation11 + $0x78] sm:$0xff]  ;;  %1408 = vst [vmem:[#allocation2 + $0x1e8] sm:$0x3] %v1407_v47  ;;  %vm4266_vm1 = vcmp.ne.f32.partialorder %v4230_v37, 0.0  ;;  %vm4271_vm5 = vcmp.ne.f32.partialorder %v4235_v21, 0.0 }
 0x1e5   : > { %2884 = vmatprep.mubr.bf16.mxu1 %v7697_v1  ;;  %v1391_v1 = vrot.slane %v1116_v32, 4  ;;  %4359 = vperm.xlu0 %5590, %v4298_v48   ;;  %v4228_v32 = vld [vmem:[#allocation11 + $0x70] sm:$0xff]  ;;  %vm4265_vm14 = vcmp.ne.f32.partialorder %v4229_v0, 0.0  ;;  %v4307_v41 = vsel %vm4271_vm5, 1, %v8761_v31  ;;  %v5760_v47 = vld [vmem:[#allocation8 + $0x228] sm:$0xff]  }
 0x1e6   : > { %v1121_v44 = vor.u32 %v8873_v28, %v7785_v23  ;;  %5371 = vmatpush3.bf16.msra.mxu0 %v5729_v7  ;;  %v7808_v7 = vld [vmem:[#allocation2 + $0x48] ss:$12 sps:$4 sm:$0xff]   ;;  %vm4264_vm13 = vcmp.ne.f32.partialorder %v4228_v32, 0.0  ;;  %v4301_v56 = vsel %vm4265_vm14, 1, %v8761_v31  ;;  %v3448_v28 = vsel %vm3435_vm9, %v3440_v61, %v3447_v22  ;;  %v7866_v48 = vld [vmem:[#allocation2 + $0x78] ss:$12 sps:$4 sm:$0xff]  }
 0x1e7   : > { %5372 = vmatprep.subr.bf16.mxu0 %v5731_v30  ;;  %4362 = vperm.xlu1 %5591, %v4299_v9   ;;  %v1392_v15 = vor.u32 %v1391_v1, %v7176_v50  ;;  %v3437_v12 = vrot.slane %v7808_v7, 2  ;;  %v4300_v27 = vsel %vm4264_vm13, 1, %v8761_v31  ;;  %v3445_v61 = vrot.slane %v7850_v11, 2  ;;  %v5863_v0 = vld [vmem:[#allocation2 + $0x80] ss:$12 sps:$4 sm:$0xff]  }
 0x1e8   : > { %v1122_v52 = vsel %vm6492_vm2, %v1114_v20, %v1121_v44  ;;  %v4302_v20 = vsel %vm4266_vm1, 1, %v8761_v31  ;;  %v7856_v44 = vld [vmem:[#allocation2 + $0x7c] ss:$12 sps:$4 sm:$0xff]   ;;  %v3451_v32 = vrot.slane %v7866_v48, 2 }
 0x1e9   : > { %1138 = vst [vmem:[#allocation2 + $0x1d4] sm:$0xf] %v1122_v52  ;;  %v1393_v50 = vrot.slane %v1392_v15, 4  ;;  %4365 = vperm.xlu0 %5590, %v4300_v27   ;;  %v3453_v1 = vrot.slane %v7856_v44, 2  ;;  %v5756_v52 = vld [vmem:[#allocation8 + $0x220] sm:$0xff]   ;;  %v3446_v9 = vsel %vm3435_vm9, %v3437_v12, %v3445_v61  ;;  %v4240_v11 = vld [vmem:[#allocation11 + $0xd0] sm:$0xff] }
 0x1ea   : > { %5373 = vmatpush3.bf16.msra.mxu0 %v5731_v30  ;;  %v1123_v30 = vrot.slane %v7785_v23, 4  ;;  %v3438_v23 = vsel %vm3435_vm9, %v3436_v63, %v3437_v12  ;;  %v7870_v15 = vld [vmem:[#allocation2 + $0x94] ss:$12 sps:$4 sm:$0xff]   ;;  %v5764_v12 = vld [vmem:[#allocation8 + $0x230] sm:$0xff]   ;;  %vm4276_vm14 = vcmp.ne.f32.partialorder %v4240_v11, 0.0 }
 0x1eb   : > { %5410 = vmatprep.subr.bf16.mxu0 %v5740_v33  ;;  %4368 = vperm.xlu1 %5591, %v4301_v56   ;;  %v1411_v5 = vld [vmem:[#allocation2 + $0x1e8] sm:$0x2]  ;;  %v3454_v7 = vsel %vm3435_vm9, %v3447_v22, %v3453_v1  ;;  %v3459_v63 = vrot.slane %v7870_v15, 2  ;;  %v4239_v56 = vld [vmem:[#allocation11 + $0xc8] sm:$0xff]  ;;  %v4245_v15 = vld [vmem:[#allocation11 + $0xf8] sm:$0xff] }
 0x1ec   : > { %2885 = vmatmul.mubr.bf16.gmra.mrb[100].mxu1 %v7704_v40  ;;  %v1395_v40 = vsel %vm7199_vm0, %v1393_v50, %v7769_v16  ;;  %vm7842_vm0 = vmand %vm1409_vm12, %vm1064_vm11  ;;  %v4303_v16 = vsel %vm4267_vm15, 1, %v8761_v31  ;;  %vm4268_vm11 = vcmp.ne.f32.partialorder %v4232_v35, 0.0  ;;  %v5864_v50 = vld [vmem:[#allocation2 + $0x98] ss:$12 sps:$4 sm:$0xff]   ;;  %vm4275_vm8 = vcmp.ne.f32.partialorder %v4239_v56, 0.0  ;;  %v4249_v11 = vld [vmem:[#allocation11 + $0x118] sm:$0xff] }
 0x1ed   : > { %5375 = vmatmul.mubr.bf16.vlgmr.msra.gmra.mrb[76].mxu0 %v4939_v3  ;;  %3777 = vmatprep.mubr.bf16.mxu1 %v3441_v14  ;;  %1405 = vst [vmem:[#allocation2 + $0x1dc] sm:$0xf] %v1395_v40  ;;  %v1412_v54 = vsel %vm7842_vm0, 0, %v1411_v5  ;;  %v4304_v49 = vsel %vm4268_vm11, 1, %v8761_v31  ;;  %v4237_v14 = vld [vmem:[#allocation11 + $0xb8] sm:$0xff]  ;;  %v4311_v40 = vsel %vm4275_vm8, 1, %v8761_v31 }
 0x1ee   : > { %5411 = vmatpush3.bf16.msra.mxu0 %v5740_v33  ;;  %5378 = vmatprep.mubr.bf16.mxu0 %v7719_v17  ;;  %v1131_v17 = vsel %vm6492_vm2, %v1123_v30, %v1130_v2  ;;  %vm4269_vm2 = vcmp.ne.f32.partialorder %v4233_v34, 0.0  ;;  %1413 = vst [vmem:[#allocation2 + $0x1e8] sm:$0x2] %v1412_v54  ;;  %v4234_v33 = vld [vmem:[#allocation11 + $0xa0] sm:$0xff]  ;;  %vm4273_vm7 = vcmp.ne.f32.partialorder %v4237_v14, 0.0  ;;  %v3452_v30 = vsel %vm3435_vm9, %v3445_v61, %v3451_v32 }
 0x1ef   : > { %5412 = vmatprep.subr.bf16.mxu0 %v5744_v10  ;;  %1139 = vst [vmem:[#allocation2 + $0x1e0] sm:$0x3] %v1131_v17  ;;  %4374 = vperm.xlu1 %5591, %v4303_v16   ;;  %v4305_v29 = vsel %vm4269_vm2, 1, %v8761_v31  ;;  %vm4270_vm6 = vcmp.ne.f32.partialorder %v4234_v33, 0.0  ;;  %v4309_v8 = vsel %vm4273_vm7, 1, %v8761_v31  ;;  %v4238_v2 = vld [vmem:[#allocation11 + $0xc0] sm:$0xff] }
 0x1f0   : > { %4371 = vperm.xlu0 %5590, %v4302_v20   ;;  %v4306_v3 = vsel %vm4270_vm6, 1, %v8761_v31  ;;  %vm4274_vm3 = vcmp.ne.f32.partialorder %v4238_v2, 0.0  ;;  %v7876_v27 = vpop.f32.mrb[0].mxu0  ;;  %v7880_v22 = vld [vmem:[#allocation2 + $0x90] ss:$12 sps:$4 sm:$0xff]   ;;  %v3465_v61 = vrot.slane %v7884_v4, 2 }
 0x1f1   : > { %v2179_v59 = vpop.f32.mrb[1].mxu0  ;;  %v4310_v37 = vsel %vm4274_vm3, 1, %v8761_v31  ;;  %v5865_v35 = vld [vmem:[#allocation2 + $0xb0] ss:$12 sps:$4 sm:$0xff]   ;;  %v3457_v54 = vrot.slane %v7880_v22, 2  ;;  %vm4281_vm15 = vcmp.ne.f32.partialorder %v4245_v15, 0.0 }
 0x1f2   : > { %5413 = vmatpush3.bf16.msra.mxu0 %v5744_v10  ;;  %v4308_v10 = vsel %vm4272_vm4, 1, %v8761_v31  ;;  %v7888_v16 = vpop.f32.mrb[2].mxu0  ;;  %v3466_v48 = vsel %vm3435_vm9, %v3459_v63, %v3465_v61  ;;  %v4317_v42 = vsel %vm4281_vm15, 1, %v8761_v31  ;;  %v4246_v56 = vld [vmem:[#allocation11 + $0x100] sm:$0xff]  ;;  %v5759_v22 = vld [vmem:[#allocation2 + $0xc0] ss:$12 sps:$4 sm:$0xff]  }
 0x1f3   : > { %5414 = vmatprep.subr.bf16.mxu0 %v5748_v24  ;;  %4380 = vperm.xlu1 %5591, %v4305_v29   ;;  %v2182_v5 = vpop.f32.mrb[3].mxu0  ;;  %v4312_v29 = vsel %vm4276_vm14, 1, %v8761_v31  ;;  %v3458_v33 = vsel %vm3435_vm9, %v3451_v32, %v3457_v54  ;;  %vm4282_vm2 = vcmp.ne.f32.partialorder %v4246_v56, 0.0  ;;  %vm4285_vm11 = vcmp.ne.f32.partialorder %v4249_v11, 0.0  ;;  %v5871_v15 = vld [vmem:[#allocation2 + $0x140] ss:$12 sps:$4 sm:$0xff]  }
 0x1f4   : > { %3778 = vmatmul.mubr.bf16.vlgmr.msra.gmra.mrb[104].mxu1 %v3438_v23  ;;  %4377 = vperm.xlu0 %5590, %v4304_v49   ;;  %v7886_v17 = vpop.f32.mrb[16].mxu1  ;;  %v4241_v23 = vld [vmem:[#allocation11 + $0xd8] sm:$0xff]  ;;  %v4243_v49 = vld [vmem:[#allocation11 + $0xe8] sm:$0xff]  ;;  %v4248_v5 = vld [vmem:[#allocation11 + $0x110] sm:$0xff] }
 0x1f5   : > { %5379 = vmatmul.mubr.bf16.gmra.mrb[80].mxu0 %v5861_v25  ;;  %3785 = vmatprep.mubr.bf16.mxu1 %v3448_v28  ;;  %v7890_v20 = vpop.f32.mrb[17].mxu1  ;;  %v5768_v28 = vld [vmem:[#allocation8 + $0x238] sm:$0xff]   ;;  %vm4277_vm10 = vcmp.ne.f32.partialorder %v4241_v23, 0.0  ;;  %v5866_v25 = vld [vmem:[#allocation2 + $0xc8] ss:$12 sps:$4 sm:$0xff]   ;;  %vm4279_vm13 = vcmp.ne.f32.partialorder %v4243_v49, 0.0 }
 0x1f6   : > { %5382 = vmatprep.mubr.bf16.mxu0 %v5862_v46  ;;  %5415 = vmatpush3.bf16.msra.mxu0 %v5748_v24  ;;  %v3460_v24 = vsel %vm3435_vm9, %v3453_v1, %v3459_v63  ;;  %v7892_v44 = vpop.f32.mrb[18].mxu1  ;;  %v4313_v34 = vsel %vm4277_vm10, 1, %v8761_v31  ;;  %v4242_v46 = vld [vmem:[#allocation11 + $0xe0] sm:$0xff]  ;;  %v4315_v21 = vsel %vm4279_vm13, 1, %v8761_v31  ;;  %v4247_v63 = vld [vmem:[#allocation11 + $0x108] sm:$0xff]  ;;  %vm4284_vm5 = vcmp.ne.f32.partialorder %v4248_v5, 0.0 }
 0x1f7   : > { %5416 = vmatprep.subr.bf16.mxu0 %v5752_v58  ;;  %4386 = vperm.xlu1 %5591, %v4307_v41   ;;  %vm4278_vm12 = vcmp.ne.f32.partialorder %v4242_v46, 0.0  ;;  %vm4283_vm0 = vcmp.ne.f32.partialorder %v4247_v63, 0.0  ;;  %v5761_v23 = vld [vmem:[#allocation2 + $0xdc] ss:$12 sps:$4 sm:$0xff]  }
 0x1f8   : > { %4383 = vperm.xlu0 %5590, %v4306_v3   ;;  %v7908_v3 = vld [vmem:[#allocation2 + $0xc4] ss:$12 sps:$4 sm:$0xff]   ;;  %v5874_v11 = vld [vmem:[#allocation2 + $0x188] ss:$12 sps:$4 sm:$0xff]  }
 0x1f9   : > { %v5772_v63 = vld [vmem:[#allocation2 + $0x38] ss:$12 sps:$4 sm:$0xfc]   ;;  %v5773_v56 = vld [vmem:[#allocation2 + $0x50] ss:$12 sps:$4 sm:$0xff]  }
 0x1fa   : > { %5417 = vmatpush3.bf16.msra.mxu0 %v5752_v58  ;;  %v7896_v58 = vpop.f32.mrb[19].mxu1  ;;  %v7900_v1 = vpop.f32.mrb[4].mxu0 }
 0x1fb   : > { %5418 = vmatprep.subr.bf16.mxu0 %v5756_v52  ;;  %4392 = vperm.xlu1 %5591, %v4309_v8   ;;  %v2187_v41 = vpop.f32.mrb[5].mxu0 }
 0x1fc   : > { %3786 = vmatmul.mubr.bf16.gmra.mrb[108].mxu1 %v3446_v9  ;;  %4389 = vperm.xlu0 %5590, %v4308_v10   ;;  %v4314_v9 = vsel %vm4278_vm12, 1, %v8761_v31  ;;  %v5868_v10 = vld [vmem:[#allocation2 + $0xf8] ss:$12 sps:$4 sm:$0xff]  }
 0x1fd   : > { %5383 = vmatmul.mubr.bf16.gmra.mrb[84].mxu0 %v5863_v0  ;;  %3793 = vmatprep.mubr.bf16.mxu1 %v3454_v7  ;;  %v7910_v7 = vpop.f32.mrb[6].mxu0  ;;  %v5867_v0 = vld [vmem:[#allocation2 + $0xe0] ss:$12 sps:$4 sm:$0xff]  }
 0x1fe   : > { %5386 = vmatprep.mubr.bf16.mxu0 %v5864_v50  ;;  %5419 = vmatpush3.bf16.msra.mxu0 %v5756_v52  ;;  %v7904_v52 = vld [vmem:[#allocation2 + $0xa8] ss:$12 sps:$4 sm:$0xff]   ;;  %v2190_v14 = vpop.f32.mrb[7].mxu0  ;;  %v3471_v50 = vrot.slane %v7908_v3, 2 }
 0x1ff   : > { %5420 = vmatprep.subr.bf16.mxu0 %v5760_v47  ;;  %4398 = vperm.xlu1 %5591, %v4311_v40   ;;  %v3463_v32 = vrot.slane %v7904_v52, 2  ;;  %v4319_v40 = vsel %vm4283_vm0, 1, %v8761_v31  ;;  %v5763_v52 = vld [vmem:[#allocation2 + $0xd8] ss:$12 sps:$4 sm:$0xff]  }
 0x200   : > { %4395 = vperm.xlu0 %5590, %v4310_v37   ;;  %v4318_v37 = vsel %vm4282_vm2, 1, %v8761_v31 }
 0x202   : > { %5421 = vmatpush3.bf16.msra.mxu0 %v5760_v47  ;;  %v4244_v47 = vld [vmem:[#allocation11 + $0xf0] sm:$0xff]  ;;  %v7916_v2 = vpop.f32.mrb[20].mxu1 }
 0x203   : > { %5422 = vmatprep.subr.bf16.mxu0 %v5764_v12  ;;  %4404 = vperm.xlu1 %5591, %v4313_v34   ;;  %vm4280_vm1 = vcmp.ne.f32.partialorder %v4244_v47, 0.0  ;;  %v5869_v34 = vld [vmem:[#allocation2 + $0x110] ss:$12 sps:$4 sm:$0xff]  }
 0x204   : > { %3794 = vmatmul.mubr.bf16.gmra.mrb[112].mxu1 %v3452_v30  ;;  %4401 = vperm.xlu0 %5590, %v4312_v29   ;;  %v4316_v8 = vsel %vm4280_vm1, 1, %v8761_v31  ;;  %v3464_v30 = vsel %vm3435_vm9, %v3457_v54, %v3463_v32  ;;  %v4320_v54 = vsel %vm4284_vm5, 1, %v8761_v31  ;;  %v5870_v29 = vld [vmem:[#allocation2 + $0x128] ss:$12 sps:$4 sm:$0xff]  }
 0x205   : > { %5387 = vmatmul.mubr.bf16.gmra.mrb[88].mxu0 %v5865_v35  ;;  %3801 = vmatprep.mubr.bf16.mxu1 %v3460_v24  ;;  %v3472_v24 = vsel %vm3435_vm9, %v3465_v61, %v3471_v50  ;;  %v3469_v35 = vrot.slane %v5759_v22, 2 }
 0x206   : > { %5390 = vmatprep.mubr.bf16.mxu0 %v5866_v25  ;;  %5423 = vmatpush3.bf16.msra.mxu0 %v5764_v12  ;;  %v7918_v12 = vpop.f32.mrb[21].mxu1  ;;  %v3477_v25 = vrot.slane %v5761_v23, 2 }
 0x207   : > { %5424 = vmatprep.subr.bf16.mxu0 %v5768_v28  ;;  %4410 = vperm.xlu1 %5591, %v4315_v21   ;;  %v7922_v59 = vpop.f32.mrb[22].mxu1 }
 0x208   : > { %4407 = vperm.xlu0 %5590, %v4314_v9   ;;  %v7926_v4 = vpop.f32.mrb[23].mxu1 }
 0x20a   : > { %5425 = vmatpush3.bf16.msra.mxu0 %v5768_v28  ;;  %v4321_v28 = vsel %vm4285_vm11, 1, %v8761_v31  ;;  %v3478_v31 = vsel %vm3435_vm9, %v3471_v50, %v3477_v25  ;;  %v5769_v50 = vld [vmem:[#allocation2 + $0x10c] ss:$12 sps:$4 sm:$0xff]  }
 0x20b   : > { %4416 = vperm.xlu1 %5591, %v4317_v42   ;;  %v5872_v42 = vld [vmem:[#allocation2 + $0x158] ss:$12 sps:$4 sm:$0xff]   ;;  %v3489_v5 = vrot.slane %v5769_v50, 2 }
 0x20c   : > { %3802 = vmatmul.mubr.bf16.gmra.mrb[116].mxu1 %v3458_v33  ;;  %4413 = vperm.xlu0 %5590, %v4316_v8   ;;  %v2193_v61 = vpop.f32.mrb[8].mxu0  ;;  %v3470_v33 = vsel %vm3435_vm9, %v3463_v32, %v3469_v35  ;;  %v5767_v8 = vld [vmem:[#allocation2 + $0xf0] ss:$12 sps:$4 sm:$0xff]  }
 0x20d   : > { %5391 = vmatmul.mubr.bf16.gmra.mrb[92].mxu0 %v5867_v0  ;;  %3809 = vmatprep.mubr.bf16.mxu1 %v3466_v48  ;;  %v7931_v49 = vadd.f32 %v7737_v13, %v2193_v61  ;;  %v2195_v46 = vpop.f32.mrb[9].mxu0  ;;  %v5765_v48 = vld [vmem:[#allocation2 + $0xf4] ss:$12 sps:$4 sm:$0xff]   ;;  %v3475_v13 = vrot.slane %v5763_v52, 2  ;;  %v3481_v22 = vrot.slane %v5767_v8, 2 }
 0x20e   : > { %5394 = vmatprep.mubr.bf16.mxu0 %v5868_v10  ;;  %v2196_v21 = vpop.f32.mrb[10].mxu0  ;;  %v3483_v0 = vrot.slane %v5765_v48, 2  ;;  %v5774_v46 = vld [vmem:[#allocation2 + $0x68] ss:$12 sps:$4 sm:$0xff]   ;;  %v5875_v52 = vld [vmem:[#allocation2 + $0x1a0] ss:$12 sps:$4 sm:$0xff]  }
 0x20f   : > { %4422 = vperm.xlu1 %5591, %v4319_v40   ;;  %v7935_v41 = vadd.f32 %v7741_v51, %v2196_v21  ;;  %v2198_v9 = vpop.f32.mrb[11].mxu0  ;;  %v3476_v32 = vsel %vm3435_vm9, %v3469_v35, %v3475_v13  ;;  %v3442_v35 = vrot.slane %v5772_v63, 2  ;;  %v5775_v21 = vld [vmem:[#allocation2 + $0x124] ss:$12 sps:$4 sm:$0xff]   ;;  %v5777_v63 = vld [vmem:[#allocation2 + $0x120] ss:$12 sps:$4 sm:$0xff]  }
 0x210   : > { %4419 = vperm.xlu0 %5590, %v4318_v37   ;;  %v3484_v10 = vsel %vm3435_vm9, %v3477_v25, %v3483_v0  ;;  %v5771_v25 = vld [vmem:[#allocation2 + $0x108] ss:$12 sps:$4 sm:$0xff]   ;;  %v3490_v61 = vsel %vm3435_vm9, %v3483_v0, %v3489_v5 }
 0x211   : > { %v3487_v9 = vrot.slane %v5771_v25, 2 }
 0x212   : > { %v7938_v3 = vpop.f32.mrb[24].mxu1 }
 0x213   : > { %4428 = vperm.xlu1 %5591, %v4321_v28   ;;  %v7940_v47 = vpop.f32.mrb[25].mxu1 }
 0x214   : > { %3810 = vmatmul.mubr.bf16.gmra.mrb[120].mxu1 %v3464_v30  ;;  %4425 = vperm.xlu0 %5590, %v4320_v54   ;;  %v7942_v14 = vpop.f32.mrb[26].mxu1  ;;  %v5873_v30 = vld [vmem:[#allocation2 + $0x170] ss:$12 sps:$4 sm:$0xff]   ;;  %v3443_v54 = vrot.slane %v5773_v56, 2 }
 0x215   : > { %5395 = vmatmul.mubr.bf16.gmra.mrb[96].mxu0 %v5869_v34  ;;  %3817 = vmatprep.mubr.bf16.mxu1 %v3472_v24  ;;  %v7944_v51 = vpop.f32.mrb[27].mxu1 }
 0x216   : > { %5398 = vmatprep.mubr.bf16.mxu0 %v5870_v29  ;;  %v3482_v29 = vsel %vm3435_vm9, %v3475_v13, %v3481_v22 }
 0x21a   : > { %v2201_v40 = vpop.f32.mrb[12].mxu0 }
 0x21b   : > { %v7949_v37 = vadd.f32 %v7733_v19, %v2201_v40  ;;  %v2203_v24 = vpop.f32.mrb[13].mxu0  ;;  %v3444_v19 = vsel %vm3435_vm9, %v3442_v35, %v3443_v54  ;;  %v5783_v35 = vld [vmem:[#allocation2 + $0xb0] ss:$12 sps:$4 sm:$0xff]  }
 0x21c   : > { %3818 = vmatmul.mubr.bf16.gmra.mrb[124].mxu1 %v3470_v33  ;;  %v2204_v23 = vpop.f32.mrb[14].mxu0  ;;  %v5778_v33 = vld [vmem:[#allocation2 + $0x80] ss:$12 sps:$4 sm:$0xff]  }
 0x21d   : > { %5399 = vmatmul.mubr.bf16.gmra.mrb[100].mxu0 %v5871_v15  ;;  %3825 = vmatprep.mubr.bf16.mxu1 %v3478_v31  ;;  %v7952_v28 = vadd.f32 %v7739_v39, %v2204_v23  ;;  %v2206_v34 = vpop.f32.mrb[15].mxu0  ;;  %v3449_v39 = vrot.slane %v5774_v46, 2  ;;  %v3495_v31 = vrot.slane %v5775_v21, 2  ;;  %v3455_v13 = vrot.slane %v5778_v33, 2 }
 0x21e   : > { %5402 = vmatprep.mubr.bf16.mxu0 %v5872_v42 }
 0x21f   : > { %v3450_v24 = vsel %vm3435_vm9, %v3443_v54, %v3449_v39  ;;  %v3496_v23 = vsel %vm3435_vm9, %v3489_v5, %v3495_v31  ;;  %v3456_v34 = vsel %vm3435_vm9, %v3449_v39, %v3455_v13 }
 0x224   : > { %3826 = vmatmul.mubr.bf16.gmra.mrb[128].mxu1 %v3476_v32 }
 0x225   : > { %5403 = vmatmul.mubr.bf16.gmra.mrb[104].mxu0 %v5873_v30  ;;  %3833 = vmatprep.mubr.bf16.mxu1 %v3484_v10  ;;  %v3488_v10 = vsel %vm3435_vm9, %v3481_v22, %v3487_v9  ;;  %v3493_v22 = vrot.slane %v5777_v63, 2  ;;  %v5785_v63 = vld [vmem:[#allocation2 + $0x154] ss:$12 sps:$4 sm:$0xff]  }
 0x226   : > { %5406 = vmatprep.mubr.bf16.mxu0 %v5874_v11  ;;  %v5779_v11 = vld [vmem:[#allocation2 + $0x98] ss:$12 sps:$4 sm:$0xff]  }
 0x227   : > { %v3494_v5 = vsel %vm3435_vm9, %v3487_v9, %v3493_v22  ;;  %v5788_v9 = vld [vmem:[#allocation2 + $0xe0] ss:$12 sps:$4 sm:$0xff]  }
 0x228   : > { %v7957_v48 = vpop.f32.mrb[28].mxu1 }
 0x229   : > { %v7959_v42 = vpop.f32.mrb[29].mxu1 }
 0x22a   : > { %v2209_v15 = vpop.f32.mrb[16].mxu0  ;;  %v7964_v8 = vpop.f32.mrb[30].mxu1 }
 0x22b   : > { %v7962_v0 = vadd.f32 %v7751_v18, %v2209_v15  ;;  %v2211_v32 = vpop.f32.mrb[17].mxu0  ;;  %v7967_v56 = vpop.f32.mrb[31].mxu1  ;;  %v5780_v18 = vld [vmem:[#allocation2 + $0x13c] ss:$12 sps:$4 sm:$0xff]  }
 0x22c   : > { %3834 = vmatmul.mubr.bf16.gmra.mrb[132].mxu1 %v3482_v29  ;;  %v2212_v50 = vpop.f32.mrb[18].mxu0  ;;  %v3461_v29 = vrot.slane %v5779_v11, 2  ;;  %v3501_v25 = vrot.slane %v5780_v18, 2  ;;  %v3507_v18 = vrot.slane %v5785_v63, 2 }
 0x22d   : > { %5407 = vmatmul.mubr.bf16.gmra.mrb[108].mxu0 %v5875_v52  ;;  %3841 = vmatprep.mubr.bf16.mxu1 %v3490_v61  ;;  %v7970_v40 = vadd.f32 %v7764_v26, %v2212_v50  ;;  %v2214_v30 = vpop.f32.mrb[19].mxu0  ;;  %v3467_v26 = vrot.slane %v5783_v35, 2  ;;  %v5782_v52 = vld [vmem:[#allocation2 + $0x138] ss:$12 sps:$4 sm:$0xff]   ;;  %v5784_v50 = vld [vmem:[#allocation2 + $0xc8] ss:$12 sps:$4 sm:$0xff]  }
 0x22e   : > { %5426 = vmatprep.mubr.bf16.mxu0 %v3444_v19  ;;  %v3462_v32 = vsel %vm3435_vm9, %v3455_v13, %v3461_v29  ;;  %v3473_v11 = vrot.slane %v5784_v50, 2  ;;  %v3479_v13 = vrot.slane %v5788_v9, 2 }
 0x230   : > { %v7975_v61 = vpop.f32.mrb[32].mxu1 }
 0x231   : > { %v2752_v46 = vpop.f32.mrb[33].mxu1 }
 0x232   : > { %v2217_v21 = vpop.f32.mrb[20].mxu0  ;;  %v7977_v54 = vpop.f32.mrb[34].mxu1 }
 0x233   : > { %v7981_v19 = vadd.f32 %v7749_v57, %v2217_v21  ;;  %v2219_v33 = vpop.f32.mrb[21].mxu0  ;;  %v2755_v39 = vpop.f32.mrb[35].mxu1  ;;  %v3499_v57 = vrot.slane %v5782_v52, 2  ;;  %v3474_v52 = vsel %vm3435_vm9, %v3467_v26, %v3473_v11 }
 0x234   : > { %3842 = vmatmul.mubr.bf16.gmra.mrb[136].mxu1 %v3488_v10  ;;  %v2220_v15 = vpop.f32.mrb[22].mxu0  ;;  %v3502_v10 = vsel %vm3435_vm9, %v3495_v31, %v3501_v25 }
 0x235   : > { %5427 = vmatmul.mubr.bf16.vlgmr.msra.gmra.mrb[112].mxu0 %v3450_v24  ;;  %3849 = vmatprep.mubr.bf16.mxu1 %v3496_v23  ;;  %v7986_v30 = vadd.f32 %v7757_v45, %v2220_v15  ;;  %v2222_v24 = vpop.f32.mrb[23].mxu0  ;;  %v3468_v23 = vsel %vm3435_vm9, %v3461_v29, %v3467_v26  ;;  %v3500_v45 = vsel %vm3435_vm9, %v3493_v22, %v3499_v57  ;;  %v5793_v22 = vld [vmem:[#allocation2 + $0x110] ss:$12 sps:$4 sm:$0xff]  }
 0x236   : > { %5430 = vmatprep.mubr.bf16.mxu0 %v3456_v34  ;;  %v3508_v15 = vsel %vm3435_vm9, %v3501_v25, %v3507_v18  ;;  %v3480_v24 = vsel %vm3435_vm9, %v3473_v11, %v3479_v13  ;;  %v3491_v26 = vrot.slane %v5793_v22, 2  ;;  %v5798_v22 = vld [vmem:[#allocation2 + $0x140] ss:$12 sps:$4 sm:$0xff]  }
 0x238   : > { %v7989_v34 = vpop.f32.mrb[36].mxu1 }
 0x239   : > { %v2760_v31 = vpop.f32.mrb[37].mxu1 }
 0x23a   : > { %v2225_v35 = vpop.f32.mrb[24].mxu0  ;;  %v7991_v46 = vpop.f32.mrb[38].mxu1 }
 0x23b   : > { %v7995_v21 = vadd.f32 %v7783_v60, %v2225_v35  ;;  %v2227_v29 = vpop.f32.mrb[25].mxu0  ;;  %v2763_v33 = vpop.f32.mrb[39].mxu1 }
 0x23c   : > { %3850 = vmatmul.mubr.bf16.gmra.mrb[140].mxu1 %v3494_v5  ;;  %v5787_v5 = vld [vmem:[#allocation2 + $0x150] ss:$12 sps:$4 sm:$0xff]   ;;  %v2228_v39 = vpop.f32.mrb[26].mxu0 }
 0x23d   : > { %5431 = vmatmul.mubr.bf16.gmra.mrb[116].mxu0 %v3462_v32  ;;  %3857 = vmatprep.mubr.bf16.mxu1 %v3502_v10  ;;  %v5789_v32 = vld [vmem:[#allocation2 + $0xf8] ss:$12 sps:$4 sm:$0xff]   ;;  %v8000_v50 = vadd.f32 %v7795_v43, %v2228_v39  ;;  %v2230_v63 = vpop.f32.mrb[27].mxu0  ;;  %v3505_v60 = vrot.slane %v5787_v5, 2  ;;  %v5792_v39 = vld [vmem:[#allocation2 + $0x168] ss:$12 sps:$4 sm:$0xff]  }
 0x23e   : > { %5434 = vmatprep.mubr.bf16.mxu0 %v3468_v23  ;;  %v5790_v10 = vld [vmem:[#allocation2 + $0x16c] ss:$12 sps:$4 sm:$0xff]   ;;  %v3485_v23 = vrot.slane %v5789_v32, 2  ;;  %v5795_v63 = vld [vmem:[#allocation2 + $0x184] ss:$12 sps:$4 sm:$0xff]  }
 0x23f   : > { %v3513_v9 = vrot.slane %v5790_v10, 2  ;;  %v3506_v33 = vsel %vm3435_vm9, %v3499_v57, %v3505_v60  ;;  %v5794_v10 = vld [vmem:[#allocation2 + $0x128] ss:$12 sps:$4 sm:$0xff]  }
 0x240   : > { %v3486_v32 = vsel %vm3435_vm9, %v3479_v13, %v3485_v23  ;;  %v3503_v13 = vrot.slane %v5798_v22, 2  ;;  %v5803_v22 = vld [vmem:[#allocation2 + $0x170] ss:$12 sps:$4 sm:$0xff]  }
 0x242   : > { %v2233_v29 = vpop.f32.mrb[28].mxu0 }
 0x243   : > { %v8008_v11 = vadd.f32 %v7779_v38, %v2233_v29  ;;  %v3492_v38 = vsel %vm3435_vm9, %v3485_v23, %v3491_v26 }
 0x244   : > { %3858 = vmatmul.mubr.bf16.gmra.mrb[144].mxu1 %v3500_v45  ;;  %v2235_v45 = vpop.f32.mrb[29].mxu0 }
 0x245   : > { %5435 = vmatmul.mubr.bf16.gmra.mrb[120].mxu0 %v3474_v52  ;;  %3865 = vmatprep.mubr.bf16.mxu1 %v3508_v15  ;;  %v2766_v31 = vpop.f32.mrb[40].mxu1  ;;  %v2236_v15 = vpop.f32.mrb[30].mxu0 }
 0x246   : > { %5438 = vmatprep.mubr.bf16.mxu0 %v3480_v24  ;;  %v8004_v25 = vadd.f32 %v2766_v31, %v7931_v49  ;;  %v2768_v35 = vpop.f32.mrb[41].mxu1  ;;  %v3514_v49 = vsel %vm3435_vm9, %v3507_v18, %v3513_v9  ;;  %v8016_v24 = vadd.f32 %v7788_v53, %v2236_v15  ;;  %v2238_v57 = vpop.f32.mrb[31].mxu0  ;;  %v3497_v31 = vrot.slane %v5794_v10, 2  ;;  %v5797_v15 = vld [vmem:[#allocation2 + $0x180] ss:$12 sps:$4 sm:$0xff]  }
 0x247   : > { %v2769_v43 = vpop.f32.mrb[42].mxu1  ;;  %v3519_v35 = vrot.slane %v5795_v63, 2  ;;  %v5799_v63 = vld [vmem:[#allocation2 + $0x158] ss:$12 sps:$4 sm:$0xff]   ;;  %v5800_v57 = vld [vmem:[#allocation2 + $0x19c] ss:$12 sps:$4 sm:$0xff]  }
 0x248   : > { %v8011_v5 = vadd.f32 %v2769_v43, %v7935_v41  ;;  %v2771_v52 = vpop.f32.mrb[43].mxu1  ;;  %v3511_v41 = vrot.slane %v5792_v39, 2  ;;  %v3498_v10 = vsel %vm3435_vm9, %v3491_v26, %v3497_v31  ;;  %v3515_v26 = vrot.slane %v5803_v22, 2  ;;  %v5808_v22 = vld [vmem:[#allocation2 + $0x1a0] ss:$12 sps:$4 sm:$0xff]  }
 0x24a   : > { %v2241_v45 = vpop.f32.mrb[32].mxu0  ;;  %v3512_v52 = vsel %vm3435_vm9, %v3505_v60, %v3511_v41 }
 0x24b   : > { %v8024_v23 = vadd.f32 %v7827_v62, %v2241_v45  ;;  %v3504_v62 = vsel %vm3435_vm9, %v3497_v31, %v3503_v13 }
 0x24c   : > { %3866 = vmatmul.mubr.bf16.gmra.mrb[148].mxu1 %v3506_v33  ;;  %v2243_v33 = vpop.f32.mrb[33].mxu0 }
 0x24d   : > { %5439 = vmatmul.mubr.bf16.gmra.mrb[124].mxu0 %v3486_v32  ;;  %3873 = vmatprep.mubr.bf16.mxu1 %v3514_v49  ;;  %v2244_v49 = vpop.f32.mrb[34].mxu0 }
 0x24e   : > { %5442 = vmatprep.mubr.bf16.mxu0 %v3492_v38  ;;  %v8032_v38 = vadd.f32 %v7838_v55, %v2244_v49  ;;  %v2246_v60 = vpop.f32.mrb[35].mxu0  ;;  %v5802_v49 = vld [vmem:[#allocation2 + $0x198] ss:$12 sps:$4 sm:$0xff]  }
 0x24f   : > { %v2774_v29 = vpop.f32.mrb[44].mxu1  ;;  %v5805_v60 = vld [vmem:[#allocation2 + $0x1b4] ss:$12 sps:$4 sm:$0xff]  }
 0x250   : > { %v8020_v18 = vadd.f32 %v2774_v29, %v7949_v37  ;;  %v2776_v43 = vpop.f32.mrb[45].mxu1  ;;  %v3520_v37 = vsel %vm3435_vm9, %v3513_v9, %v3519_v35  ;;  %v3509_v29 = vrot.slane %v5799_v63, 2 }
 0x251   : > { %v2777_v53 = vpop.f32.mrb[46].mxu1  ;;  %v3525_v43 = vrot.slane %v5800_v57, 2  ;;  %v5804_v57 = vld [vmem:[#allocation2 + $0x188] ss:$12 sps:$4 sm:$0xff]  }
 0x252   : > { %v8027_v39 = vadd.f32 %v2777_v53, %v7952_v28  ;;  %v2779_v32 = vpop.f32.mrb[47].mxu1  ;;  %v3517_v28 = vrot.slane %v5797_v15, 2  ;;  %v3510_v63 = vsel %vm3435_vm9, %v3503_v13, %v3509_v29  ;;  %v3527_v13 = vrot.slane %v5808_v22, 2  ;;  %v5813_v22 = vld [vmem:[#allocation2 + $0x1d0] ss:$12 sps:$4 sm:$0xff]  }
 0x254   : > { %3874 = vmatmul.mubr.bf16.gmra.mrb[152].mxu1 %v3512_v52  ;;  %v3518_v32 = vsel %vm3435_vm9, %v3511_v41, %v3517_v28 }
 0x255   : > { %5443 = vmatmul.mubr.bf16.gmra.mrb[128].mxu0 %v3498_v10  ;;  %3881 = vmatprep.mubr.bf16.mxu1 %v3520_v37  ;;  %v2249_v33 = vpop.f32.mrb[36].mxu0 }
 0x256   : > { %5446 = vmatprep.mubr.bf16.mxu0 %v3504_v62  ;;  %v8040_v31 = vadd.f32 %v7821_v36, %v2249_v33  ;;  %v2251_v52 = vpop.f32.mrb[37].mxu0  ;;  %v3516_v36 = vsel %vm3435_vm9, %v3509_v29, %v3515_v26 }
 0x257   : > { %v2782_v45 = vpop.f32.mrb[48].mxu1  ;;  %v2252_v37 = vpop.f32.mrb[38].mxu0 }
 0x258   : > { %v8036_v9 = vadd.f32 %v2782_v45, %v7962_v0  ;;  %v2784_v53 = vpop.f32.mrb[49].mxu1  ;;  %v3526_v0 = vsel %vm3435_vm9, %v3519_v35, %v3525_v43  ;;  %v8048_v62 = vadd.f32 %v7836_v6, %v2252_v37  ;;  %v2254_v41 = vpop.f32.mrb[39].mxu0  ;;  %v3521_v45 = vrot.slane %v5804_v57, 2  ;;  %v5807_v37 = vld [vmem:[#allocation2 + $0x1b0] ss:$12 sps:$4 sm:$0xff]  }
 0x259   : > { %v2785_v55 = vpop.f32.mrb[50].mxu1  ;;  %v3531_v53 = vrot.slane %v5805_v60, 2  ;;  %v5809_v60 = vld [vmem:[#allocation2 + $0x1b8] ss:$12 sps:$4 sm:$0xff]  }
 0x25a   : > { %v8043_v15 = vadd.f32 %v2785_v55, %v7970_v40  ;;  %v2787_v10 = vpop.f32.mrb[51].mxu1  ;;  %v3523_v40 = vrot.slane %v5802_v49, 2  ;;  %v3522_v57 = vsel %vm3435_vm9, %v3515_v26, %v3521_v45  ;;  %v5810_v41 = vld [vmem:[#allocation2 + $0x1cc] ss:$12 sps:$4 sm:$0xff]   ;;  %v3539_v26 = vrot.slane %v5813_v22, 2 }
 0x25c   : > { %3882 = vmatmul.mubr.bf16.gmra.mrb[156].mxu1 %v3518_v32  ;;  %v3524_v10 = vsel %vm3435_vm9, %v3517_v28, %v3523_v40 }
 0x25d   : > { %5447 = vmatmul.mubr.bf16.gmra.mrb[132].mxu0 %v3510_v63  ;;  %3889 = vmatprep.mubr.bf16.mxu1 %v3526_v0 }
 0x25e   : > { %5450 = vmatprep.mubr.bf16.mxu0 %v3516_v36  ;;  %v2257_v52 = vpop.f32.mrb[40].mxu0 }
 0x25f   : > { %v2790_v33 = vpop.f32.mrb[52].mxu1  ;;  %v8056_v29 = vadd.f32 %v7890_v20, %v2257_v52  ;;  %v2259_v32 = vpop.f32.mrb[41].mxu0  ;;  %v3528_v20 = vsel %vm3435_vm9, %v3521_v45, %v3527_v13 }
 0x260   : > { %v8052_v35 = vadd.f32 %v2790_v33, %v7981_v19  ;;  %v2792_v55 = vpop.f32.mrb[53].mxu1  ;;  %v2260_v0 = vpop.f32.mrb[42].mxu0  ;;  %v3532_v19 = vsel %vm3435_vm9, %v3525_v43, %v3531_v53  ;;  %v3533_v33 = vrot.slane %v5809_v60, 2 }
 0x261   : > { %v2793_v6 = vpop.f32.mrb[54].mxu1  ;;  %v8064_v36 = vadd.f32 %v7896_v58, %v2260_v0  ;;  %v2262_v28 = vpop.f32.mrb[43].mxu0  ;;  %v3537_v55 = vrot.slane %v5810_v41, 2 }
 0x262   : > { %v8059_v49 = vadd.f32 %v2793_v6, %v7986_v30  ;;  %v2795_v63 = vpop.f32.mrb[55].mxu1  ;;  %v3529_v30 = vrot.slane %v5807_v37, 2  ;;  %v3142_v6 = vld [vmem:[#allocation2 + $0x1e0] sm:$0x33]  ;;  %v3534_v41 = vsel %vm3435_vm9, %v3527_v13, %v3533_v33 }
 0x263   : > { %v5814_v28 = vld [vmem:[#allocation2 + $0x1e8] ss:$0 sps:$4 sm:$0x33]  }
 0x264   : > { %3890 = vmatmul.mubr.bf16.gmra.mrb[160].mxu1 %v3524_v10  ;;  %v3530_v0 = vsel %vm3435_vm9, %v3523_v40, %v3529_v30 }
 0x265   : > { %5451 = vmatmul.mubr.bf16.gmra.mrb[136].mxu0 %v3522_v57  ;;  %3897 = vmatprep.mubr.bf16.mxu1 %v3532_v19  ;;  %v5812_v57 = vld [vmem:[#allocation2 + $0x1c8] ss:$12 sps:$4 sm:$0xff]  }
 0x266   : > { %5454 = vmatprep.mubr.bf16.mxu0 %v3528_v20  ;;  %v2265_v58 = vpop.f32.mrb[44].mxu0  ;;  %v5019_v20 = vcombine.high %v3142_v6, %v3142_v6 }
 0x267   : > { %v2798_v52 = vpop.f32.mrb[56].mxu1  ;;  %v8072_v45 = vadd.f32 %v7886_v17, %v2265_v58  ;;  %v2267_v10 = vpop.f32.mrb[45].mxu0  ;;  %v3540_v17 = vsel %vm3435_vm9, %v3533_v33, %v3539_v26 }
 0x268   : > { %v8068_v43 = vadd.f32 %v2798_v52, %v7995_v21  ;;  %v2800_v32 = vpop.f32.mrb[57].mxu1  ;;  %v2268_v60 = vpop.f32.mrb[46].mxu0  ;;  %v3538_v21 = vsel %vm3435_vm9, %v3531_v53, %v3537_v55  ;;  %v3535_v52 = vrot.slane %v5812_v57, 2 }
 0x269   : > { %v2801_v63 = vpop.f32.mrb[58].mxu1  ;;  %v8080_v22 = vadd.f32 %v7892_v44, %v2268_v60  ;;  %v2270_v40 = vpop.f32.mrb[47].mxu0  ;;  %v3543_v32 = vrot.slane %v5019_v20, 2 }
 0x26a   : > { %v8075_v37 = vadd.f32 %v2801_v63, %v8000_v50  ;;  %v2803_v19 = vpop.f32.mrb[59].mxu1  ;;  %v3545_v50 = vrot.slane %v5814_v28, 2  ;;  %v3536_v44 = vsel %vm3435_vm9, %v3529_v30, %v3535_v52 }
 0x26c   : > { %3898 = vmatmul.mubr.bf16.gmra.mrb[164].mxu1 %v3530_v0  ;;  %v5018_v0 = vcombine.low %v3142_v6, %v3142_v6 }
 0x26d   : > { %5455 = vmatmul.mubr.bf16.gmra.mrb[140].mxu0 %v3534_v41  ;;  %3905 = vmatprep.mubr.bf16.mxu1 %v3538_v21  ;;  %v3546_v21 = vsel %vm3435_vm9, %v3539_v26, %v3545_v50 }
 0x26e   : > { %5458 = vmatprep.mubr.bf16.mxu0 %v3540_v17 }
 0x26f   : > { %v2806_v58 = vpop.f32.mrb[60].mxu1 }
 0x270   : > { %v8084_v13 = vadd.f32 %v2806_v58, %v8008_v11  ;;  %v2808_v53 = vpop.f32.mrb[61].mxu1  ;;  %v2273_v63 = vpop.f32.mrb[48].mxu0  ;;  %v3544_v11 = vsel %vm3435_vm9, %v3537_v55, %v3543_v32 }
 0x271   : > { %v2809_v10 = vpop.f32.mrb[62].mxu1  ;;  %v8088_v19 = vadd.f32 %v7918_v12, %v2273_v63  ;;  %v2275_v33 = vpop.f32.mrb[49].mxu0  ;;  %v3541_v12 = vrot.slane %v5018_v0, 2 }
 0x272   : > { %v8091_v60 = vadd.f32 %v2809_v10, %v8016_v24  ;;  %v2811_v57 = vpop.f32.mrb[63].mxu1  ;;  %v2276_v41 = vpop.f32.mrb[50].mxu0 }
 0x273   : > { %v8096_v28 = vadd.f32 %v7926_v4, %v2276_v41  ;;  %v2278_v20 = vpop.f32.mrb[51].mxu0  ;;  %v3542_v58 = vsel %vm3435_vm9, %v3535_v52, %v3541_v12 }
 0x274   : > { %3906 = vmatmul.mubr.bf16.gmra.mrb[168].mxu1 %v3536_v44 }
 0x275   : > { %5459 = vmatmul.mubr.bf16.gmra.mrb[144].mxu0 %v3546_v21  ;;  %3913 = vmatprep.mubr.bf16.mxu1 %v3544_v11 }
 0x277   : > { %v2814_v30 = vpop.f32.mrb[64].mxu1 }
 0x278   : > { %v8099_v6 = vadd.f32 %v2814_v30, %v8024_v23  ;;  %v2816_v24 = vpop.f32.mrb[65].mxu1  ;;  %v2281_v40 = vpop.f32.mrb[52].mxu0 }
 0x279   : > { %v2817_v17 = vpop.f32.mrb[66].mxu1  ;;  %v2459_v26 = vadd.f32 %v7916_v2, %v2281_v40  ;;  %v2283_v55 = vpop.f32.mrb[53].mxu0 }
 0x27a   : > { %v8104_v4 = vadd.f32 %v2817_v17, %v8032_v38  ;;  %v2819_v50 = vpop.f32.mrb[67].mxu1  ;;  %v2284_v32 = vpop.f32.mrb[54].mxu0 }
 0x27b   : > { %v2462_v53 = vadd.f32 %v7922_v59, %v2284_v32  ;;  %v2286_v63 = vpop.f32.mrb[55].mxu0 }
 0x27c   : > { %3914 = vmatmul.mubr.bf16.gmra.mrb[172].mxu1 %v3542_v58 }
 0x27f   : > { %v2822_v10 = vpop.f32.mrb[68].mxu1 }
 0x280   : > { %v8108_v23 = vadd.f32 %v2822_v10, %v8040_v31  ;;  %v2824_v44 = vpop.f32.mrb[69].mxu1  ;;  %v2289_v33 = vpop.f32.mrb[56].mxu0 }
 0x281   : > { %v2825_v0 = vpop.f32.mrb[70].mxu1  ;;  %v2467_v52 = vadd.f32 %v7940_v47, %v2289_v33  ;;  %v2291_v2 = vpop.f32.mrb[57].mxu0 }
 0x282   : > { %v8112_v57 = vadd.f32 %v2825_v0, %v8048_v62  ;;  %v2827_v38 = vpop.f32.mrb[71].mxu1  ;;  %v2292_v41 = vpop.f32.mrb[58].mxu0 }
 0x283   : > { %v2470_v21 = vadd.f32 %v7944_v51, %v2292_v41  ;;  %v2294_v59 = vpop.f32.mrb[59].mxu0 }
 0x287   : > { %v2830_v11 = vpop.f32.mrb[72].mxu1 }
 0x288   : > { %v8116_v20 = vadd.f32 %v2830_v11, %v8056_v29  ;;  %v2832_v31 = vpop.f32.mrb[73].mxu1  ;;  %v2297_v12 = vpop.f32.mrb[60].mxu0 }
 0x289   : > { %v2833_v30 = vpop.f32.mrb[74].mxu1  ;;  %v2475_v24 = vadd.f32 %v7938_v3, %v2297_v12  ;;  %v2299_v40 = vpop.f32.mrb[61].mxu0 }
 0x28a   : > { %v8120_v47 = vadd.f32 %v2833_v30, %v8064_v36  ;;  %v2835_v62 = vpop.f32.mrb[75].mxu1  ;;  %v2300_v17 = vpop.f32.mrb[62].mxu0 }
 0x28b   : > { %v2478_v58 = vadd.f32 %v7942_v14, %v2300_v17  ;;  %v2302_v55 = vpop.f32.mrb[63].mxu0 }
 0x28f   : > { %v2838_v51 = vpop.f32.mrb[76].mxu1 }
 0x290   : > { %v8124_v50 = vadd.f32 %v2838_v51, %v8072_v45  ;;  %v2840_v29 = vpop.f32.mrb[77].mxu1  ;;  %v2305_v32 = vpop.f32.mrb[64].mxu0 }
 0x291   : > { %v2841_v63 = vpop.f32.mrb[78].mxu1  ;;  %v2483_v10 = vadd.f32 %v7959_v42, %v2305_v32  ;;  %v2307_v44 = vpop.f32.mrb[65].mxu0 }
 0x292   : > { %v8128_v3 = vadd.f32 %v2841_v63, %v8080_v22  ;;  %v2843_v36 = vpop.f32.mrb[79].mxu1  ;;  %v2308_v33 = vpop.f32.mrb[66].mxu0 }
 0x293   : > { %v2486_v0 = vadd.f32 %v7967_v56, %v2308_v33  ;;  %v2310_v2 = vpop.f32.mrb[67].mxu0 }
 0x297   : > { %v2846_v14 = vpop.f32.mrb[80].mxu1 }
 0x298   : > { %v8132_v38 = vadd.f32 %v2846_v14, %v8088_v19  ;;  %v2848_v45 = vpop.f32.mrb[81].mxu1  ;;  %v2313_v41 = vpop.f32.mrb[68].mxu0 }
 0x299   : > { %v2849_v59 = vpop.f32.mrb[82].mxu1  ;;  %v2491_v11 = vadd.f32 %v7957_v48, %v2313_v41  ;;  %v2315_v31 = vpop.f32.mrb[69].mxu0 }
 0x29a   : > { %v8136_v42 = vadd.f32 %v2849_v59, %v8096_v28  ;;  %v2851_v22 = vpop.f32.mrb[83].mxu1  ;;  %v2316_v12 = vpop.f32.mrb[70].mxu0 }
 0x29b   : > { %v2494_v30 = vadd.f32 %v7964_v8, %v2316_v12  ;;  %v2318_v40 = vpop.f32.mrb[71].mxu0 }
 0x29f   : > { %v2854_v56 = vpop.f32.mrb[84].mxu1 }
 0x2a0   : > { %v8139_v62 = vadd.f32 %v2854_v56, %v2459_v26  ;;  %v2856_v17 = vpop.f32.mrb[85].mxu1  ;;  %v5324_v19 = vpop.f32.mrb[72].mxu0 }
 0x2a1   : > { %v2857_v55 = vpop.f32.mrb[86].mxu1  ;;  %v2363_v51 = vadd.f32 %v5324_v19, %v7900_v1  ;;  %v2354_v29 = vpop.f32.mrb[73].mxu0 }
 0x2a2   : > { %v8142_v32 = vadd.f32 %v2857_v55, %v2462_v53  ;;  %v2859_v48 = vpop.f32.mrb[87].mxu1  ;;  %v2355_v28 = vadd.f32 %v2354_v29, %v7876_v27  ;;  %v5325_v63 = vpop.f32.mrb[74].mxu0 }
 0x2a3   : > { %v2366_v44 = vadd.f32 %v5325_v63, %v7910_v7  ;;  %v2357_v36 = vpop.f32.mrb[75].mxu0  ;;  %v2759_v8 = vadd.f32 %v7989_v34, %v2363_v51 }
 0x2a4   : > { %v2358_v26 = vadd.f32 %v2357_v36, %v7888_v16  ;;  %v2751_v33 = vadd.f32 %v7975_v61, %v2355_v28 }
 0x2a5   : > { %v2762_v2 = vadd.f32 %v7991_v46, %v2366_v44 }
 0x2a6   : > { %v2754_v1 = vadd.f32 %v7977_v54, %v2358_v26 }
 0x2a7   : > { %v2862_v14 = vpop.f32.mrb[88].mxu1 }
 0x2a8   : > { %v8151_v53 = vadd.f32 %v2862_v14, %v2467_v52  ;;  %v2864_v45 = vpop.f32.mrb[89].mxu1 }
 0x2a9   : > { %v2865_v41 = vpop.f32.mrb[90].mxu1 }
 0x2aa   : > { %v8153_v27 = vadd.f32 %v2865_v41, %v2470_v21  ;;  %v2867_v59 = vpop.f32.mrb[91].mxu1 }
 0x2af   : > { %v2870_v7 = vpop.f32.mrb[92].mxu1 }
 0x2b0   : > { %v8155_v31 = vadd.f32 %v2870_v7, %v2475_v24  ;;  %v2872_v34 = vpop.f32.mrb[93].mxu1  ;;  %v8191_v7 = vpop.permute.xlu1 %4329 }
 0x2b1   : > { %v2873_v22 = vpop.f32.mrb[94].mxu1  ;;  %vm4432_vm9 = vcmp.eq.s32.totalorder %v8191_v7, 1 }
 0x2b2   : > { %v8157_v16 = vadd.f32 %v2873_v22, %v2478_v58  ;;  %v2875_v61 = vpop.f32.mrb[95].mxu1  ;;  %v8195_v22 = vpop.permute.xlu0 %4323 }
 0x2b3   : > { %vm4430_vm6 = vcmp.eq.s32.totalorder %v8195_v22, 1 }
 0x2b7   : > { %v2878_v12 = vpop.f32.mrb[96].mxu1 }
 0x2b8   : > { %v8159_v46 = vadd.f32 %v2878_v12, %v2483_v10  ;;  %v2880_v54 = vpop.f32.mrb[97].mxu1 }
 0x2b9   : > { %v2881_v40 = vpop.f32.mrb[98].mxu1 }
 0x2ba   : > { %v8161_v52 = vadd.f32 %v2881_v40, %v2486_v0  ;;  %v2883_v56 = vpop.f32.mrb[99].mxu1 }
 0x2bf   : > { %v2886_v17 = vpop.f32.mrb[100].mxu1 }
 0x2c0   : > { %v8163_v21 = vadd.f32 %v2886_v17, %v2491_v11  ;;  %v2888_v19 = vpop.f32.mrb[101].mxu1  ;;  %v5376_v55 = vpop.f32.mrb[76].mxu0 }
 0x2c1   : > { %v2889_v24 = vpop.f32.mrb[102].mxu1  ;;  %v8165_v51 = vadd.f32 %v5376_v55, %v2759_v8  ;;  %v2927_v29 = vpop.f32.mrb[77].mxu0 }
 0x2c2   : > { %v8167_v58 = vadd.f32 %v2889_v24, %v2494_v30  ;;  %v2891_v48 = vpop.f32.mrb[103].mxu1  ;;  %v8169_v28 = vadd.f32 %v2927_v29, %v2751_v33  ;;  %v5377_v10 = vpop.f32.mrb[78].mxu0 }
 0x2c3   : > { %v8171_v63 = vadd.f32 %v5377_v10, %v2762_v2  ;;  %v2930_v0 = vpop.f32.mrb[79].mxu0  ;;  %v8211_v55 = vpop.permute.xlu1 %4332 }
 0x2c4   : > { %v8173_v44 = vadd.f32 %v2930_v0, %v2754_v1  ;;  %v8213_v24 = vpop.permute.xlu0 %4326  ;;  %vm4433_vm7 = vcmp.eq.s32.totalorder %v8211_v55, 1 }
 0x2c5   : > { %vm4431_vm4 = vcmp.eq.s32.totalorder %v8213_v24, 1 }
 0x2c7   : > { %v8175_v36 = vpop.f32.mrb[104].mxu1 }
 0x2c8   : > { %v3781_v11 = vpop.f32.mrb[105].mxu1  ;;  %v5380_v26 = vpop.f32.mrb[80].mxu0 }
 0x2c9   : > { %v8177_v14 = vpop.f32.mrb[106].mxu1  ;;  %v8180_v8 = vadd.f32 %v5380_v26, %v8020_v18  ;;  %v2943_v30 = vpop.f32.mrb[81].mxu0 }
 0x2ca   : > { %v3784_v45 = vpop.f32.mrb[107].mxu1  ;;  %v8183_v33 = vadd.f32 %v2943_v30, %v8004_v25  ;;  %v5381_v41 = vpop.f32.mrb[82].mxu0 }
 0x2cb   : > { %v8186_v2 = vadd.f32 %v5381_v41, %v8027_v39  ;;  %v2946_v1 = vpop.f32.mrb[83].mxu0  ;;  %v8231_v41 = vpop.permute.xlu1 %4338 }
 0x2cc   : > { %v8189_v59 = vadd.f32 %v2946_v1, %v8011_v5  ;;  %v8233_v1 = vpop.permute.xlu0 %4335  ;;  %vm4435_vm8 = vcmp.eq.s32.totalorder %v8231_v41, 1 }
 0x2cd   : > { %vm4434_vm3 = vcmp.eq.s32.totalorder %v8233_v1, 1 }
 0x2cf   : > { %v8193_v34 = vpop.f32.mrb[108].mxu1 }
 0x2d0   : > { %v3789_v18 = vpop.f32.mrb[109].mxu1  ;;  %v5384_v61 = vpop.f32.mrb[84].mxu0 }
 0x2d1   : > { %v8197_v12 = vpop.f32.mrb[110].mxu1  ;;  %v8200_v25 = vadd.f32 %v5384_v61, %v8052_v35  ;;  %v2959_v54 = vpop.f32.mrb[85].mxu0 }
 0x2d2   : > { %v3792_v39 = vpop.f32.mrb[111].mxu1  ;;  %v8203_v40 = vadd.f32 %v2959_v54, %v8036_v9  ;;  %v5385_v5 = vpop.f32.mrb[86].mxu0 }
 0x2d3   : > { %v8206_v56 = vadd.f32 %v5385_v5, %v8059_v49  ;;  %v2962_v17 = vpop.f32.mrb[87].mxu0 }
 0x2d4   : > { %v8209_v19 = vadd.f32 %v2962_v17, %v8043_v15 }
 0x2d7   : > { %v8215_v29 = vpop.f32.mrb[112].mxu1 }
 0x2d8   : > { %v3797_v35 = vpop.f32.mrb[113].mxu1  ;;  %v5388_v48 = vpop.f32.mrb[88].mxu0 }
 0x2d9   : > { %v8217_v10 = vpop.f32.mrb[114].mxu1  ;;  %v8220_v9 = vadd.f32 %v5388_v48, %v8084_v13  ;;  %v2975_v0 = vpop.f32.mrb[89].mxu0 }
 0x2da   : > { %v3800_v49 = vpop.f32.mrb[115].mxu1  ;;  %v8223_v11 = vadd.f32 %v2975_v0, %v8068_v43  ;;  %v5389_v15 = vpop.f32.mrb[90].mxu0 }
 0x2db   : > { %v8226_v26 = vadd.f32 %v5389_v15, %v8091_v60  ;;  %v2978_v30 = vpop.f32.mrb[91].mxu0  ;;  %v8251_v0 = vpop.permute.xlu1 %4344 }
 0x2dc   : > { %v8229_v45 = vadd.f32 %v2978_v30, %v8075_v37  ;;  %v8253_v49 = vpop.permute.xlu0 %4341  ;;  %vm4437_vm14 = vcmp.eq.s32.totalorder %v8251_v0, 1 }
 0x2dd   : > { %vm4436_vm10 = vcmp.eq.s32.totalorder %v8253_v49, 1 }
 0x2df   : > { %v8235_v18 = vpop.f32.mrb[116].mxu1 }
 0x2e0   : > { %v3805_v13 = vpop.f32.mrb[117].mxu1  ;;  %v5392_v61 = vpop.f32.mrb[92].mxu0 }
 0x2e1   : > { %v8237_v54 = vpop.f32.mrb[118].mxu1  ;;  %v8240_v43 = vadd.f32 %v5392_v61, %v8108_v23  ;;  %v2991_v39 = vpop.f32.mrb[93].mxu0 }
 0x2e2   : > { %v3808_v60 = vpop.f32.mrb[119].mxu1  ;;  %v8243_v5 = vadd.f32 %v2991_v39, %v8099_v6  ;;  %v5393_v37 = vpop.f32.mrb[94].mxu0 }
 0x2e3   : > { %v8246_v17 = vadd.f32 %v5393_v37, %v8112_v57  ;;  %v2994_v35 = vpop.f32.mrb[95].mxu0 }
 0x2e4   : > { %v8249_v48 = vadd.f32 %v2994_v35, %v8104_v4 }
 0x2e5   : > { %8877 = vst [vmem:[#allocation19_spill] sm:$0xff] %v8246_v17 }
 0x2e6   : > { %8878 = vst [vmem:[#allocation20_spill] sm:$0xff] %v8249_v48  ;;  %v8273_v48 = vpop.permute.xlu0 %4347 }
 0x2e7   : > { %v8255_v15 = vpop.f32.mrb[120].mxu1  ;;  %vm4438_vm12 = vcmp.eq.s32.totalorder %v8273_v48, 1 }
 0x2e8   : > { %v3813_v23 = vpop.f32.mrb[121].mxu1  ;;  %v5396_v30 = vpop.f32.mrb[96].mxu0 }
 0x2e9   : > { %v8257_v13 = vpop.f32.mrb[122].mxu1  ;;  %v8260_v6 = vadd.f32 %v5396_v30, %v8124_v50  ;;  %v3007_v61 = vpop.f32.mrb[97].mxu0 }
 0x2ea   : > { %v3816_v57 = vpop.f32.mrb[123].mxu1  ;;  %v8263_v39 = vadd.f32 %v3007_v61, %v8116_v20  ;;  %v5397_v4 = vpop.f32.mrb[98].mxu0 }
 0x2eb   : > { %8879 = vst [vmem:[#allocation25_spill] sm:$0xff] %v8260_v6  ;;  %v8266_v60 = vadd.f32 %v5397_v4, %v8128_v3  ;;  %v3010_v37 = vpop.f32.mrb[99].mxu0  ;;  %v8271_v23 = vpop.permute.xlu1 %4350 }
 0x2ec   : > { %8880 = vst [vmem:[#allocation22_spill] sm:$0xff] %v8263_v39  ;;  %v8269_v35 = vadd.f32 %v3010_v37, %v8120_v47  ;;  %v8293_v39 = vpop.permute.xlu0 %4353  ;;  %vm4439_vm13 = vcmp.eq.s32.totalorder %v8271_v23, 1 }
 0x2ed   : > { %8881 = vst [vmem:[#allocation23_spill] sm:$0xff] %v8266_v60  ;;  %vm4440_vm15 = vcmp.eq.s32.totalorder %v8293_v39, 1 }
 0x2ee   : > { %8882 = vst [vmem:[#allocation24_spill] sm:$0xff] %v8269_v35 }
 0x2ef   : > { %v8275_v17 = vpop.f32.mrb[124].mxu1 }
 0x2f0   : > { %v3821_v50 = vpop.f32.mrb[125].mxu1  ;;  %v5400_v30 = vpop.f32.mrb[100].mxu0 }
 0x2f1   : > { %v8277_v57 = vpop.f32.mrb[126].mxu1  ;;  %v8280_v20 = vadd.f32 %v5400_v30, %v8139_v62  ;;  %v3023_v61 = vpop.f32.mrb[101].mxu0 }
 0x2f2   : > { %v3824_v3 = vpop.f32.mrb[127].mxu1  ;;  %v8283_v4 = vadd.f32 %v3023_v61, %v8132_v38  ;;  %v5401_v47 = vpop.f32.mrb[102].mxu0 }
 0x2f3   : > { %8883 = vst [vmem:[#allocation21_spill] sm:$0xff] %v8280_v20  ;;  %v8286_v37 = vadd.f32 %v5401_v47, %v8142_v32  ;;  %v3026_v35 = vpop.f32.mrb[103].mxu0  ;;  %v8291_v50 = vpop.permute.xlu1 %4356 }
 0x2f4   : > { %8884 = vst [vmem:[#allocation28_spill] sm:$0xff] %v8283_v4  ;;  %v8289_v60 = vadd.f32 %v3026_v35, %v8136_v42  ;;  %v8313_v4 = vpop.permute.xlu0 %4359  ;;  %vm4441_vm1 = vcmp.eq.s32.totalorder %v8291_v50, 1 }
 0x2f5   : > { %8885 = vst [vmem:[#allocation27_spill] sm:$0xff] %v8286_v37  ;;  %vm4442_vm2 = vcmp.eq.s32.totalorder %v8313_v4, 1 }
 0x2f6   : > { %8886 = vst [vmem:[#allocation26_spill] sm:$0xff] %v8289_v60 }
 0x2f7   : > { %v8295_v6 = vpop.f32.mrb[128].mxu1 }
 0x2f8   : > { %v3829_v62 = vpop.f32.mrb[129].mxu1  ;;  %v5404_v30 = vpop.f32.mrb[104].mxu0 }
 0x2f9   : > { %v8297_v3 = vpop.f32.mrb[130].mxu1  ;;  %v8300_v38 = vadd.f32 %v5404_v30, %v8155_v31  ;;  %v3039_v61 = vpop.f32.mrb[105].mxu0 }
 0x2fa   : > { %v3832_v32 = vpop.f32.mrb[131].mxu1  ;;  %v8303_v47 = vadd.f32 %v3039_v61, %v8151_v53  ;;  %v5405_v42 = vpop.f32.mrb[106].mxu0 }
 0x2fb   : > { %8887 = vst [vmem:[#allocation29_spill] sm:$0xff] %v8300_v38  ;;  %v8306_v35 = vadd.f32 %v5405_v42, %v8157_v16  ;;  %v3042_v60 = vpop.f32.mrb[107].mxu0  ;;  %v8311_v62 = vpop.permute.xlu1 %4362 }
 0x2fc   : > { %8888 = vst [vmem:[#allocation30_spill] sm:$0xff] %v8303_v47  ;;  %v8309_v37 = vadd.f32 %v3042_v60, %v8153_v27  ;;  %v8333_v47 = vpop.permute.xlu0 %4365  ;;  %vm4443_vm0 = vcmp.eq.s32.totalorder %v8311_v62, 1 }
 0x2fd   : > { %8889 = vst [vmem:[#allocation31_spill] sm:$0xff] %v8306_v35  ;;  %vm4444_vm11 = vcmp.eq.s32.totalorder %v8333_v47, 1 }
 0x2fe   : > { %8890 = vst [vmem:[#allocation32_spill] sm:$0xff] %v8309_v37 }
 0x2ff   : > { %v8315_v20 = vpop.f32.mrb[132].mxu1 }
 0x300   : > { %v3837_v31 = vpop.f32.mrb[133].mxu1  ;;  %v5408_v30 = vpop.f32.mrb[108].mxu0 }
 0x301   : > { %v8317_v32 = vpop.f32.mrb[134].mxu1  ;;  %v8320_v53 = vadd.f32 %v5408_v30, %v8163_v21  ;;  %v3055_v61 = vpop.f32.mrb[109].mxu0 }
 0x302   : > { %v3840_v16 = vpop.f32.mrb[135].mxu1  ;;  %v8323_v42 = vadd.f32 %v3055_v61, %v8159_v46  ;;  %v5409_v27 = vpop.f32.mrb[110].mxu0 }
 0x303   : > { %8891 = vst [vmem:[#allocation33_spill] sm:$0xff] %v8320_v53  ;;  %v8326_v60 = vadd.f32 %v5409_v27, %v8167_v58  ;;  %v3058_v37 = vpop.f32.mrb[111].mxu0  ;;  %v8331_v31 = vpop.permute.xlu1 %4368  ;;  %v8340_v58 = vld [vmem:[#allocation9] ss:$0 sm:$0xff] }
 0x304   : > { %8892 = vst [vmem:[#allocation34_spill] sm:$0xff] %v8323_v42  ;;  %v8329_v35 = vadd.f32 %v3058_v37, %v8161_v52  ;;  %vm4445_vm5 = vcmp.eq.s32.totalorder %v8331_v31, 1 }
 0x305   : > { %8893 = vst [vmem:[#allocation35_spill] sm:$0xff] %v8326_v60 }
 0x306   : > { %8894 = vst [vmem:[#allocation36_spill] sm:$0xff] %v8329_v35 }
 0x307   : > { %v8335_v38 = vpop.f32.mrb[136].mxu1 }
 0x308   : > { %v3845_v21 = vpop.f32.mrb[137].mxu1  ;;  %v5428_v30 = vpop.f32.mrb[112].mxu0 }
 0x309   : > { %v8337_v16 = vpop.f32.mrb[138].mxu1  ;;  %v3965_v46 = vadd.f32 %v5428_v30, %v8193_v34  ;;  %v3956_v61 = vpop.f32.mrb[113].mxu0 }
 0x30a   : > { %8895 = vst [vmem:[#allocation37_spill] sm:$0xff] %v8337_v16  ;;  %v3848_v53 = vpop.f32.mrb[139].mxu1  ;;  %v3957_v27 = vadd.f32 %v3956_v61, %v8175_v36  ;;  %v5429_v52 = vpop.f32.mrb[114].mxu0 }
 0x30b   : > { %v4101_v37 = vadd.f32 %v3965_v46, %v8165_v51  ;;  %v3968_v60 = vadd.f32 %v5429_v52, %v8197_v12  ;;  %v3959_v35 = vpop.f32.mrb[115].mxu0  ;;  %v8349_v30 = vpop.permute.xlu1 %4374 }
 0x30c   : > { %v4099_v42 = vadd.f32 %v3957_v27, %v8169_v28  ;;  %v3960_v21 = vadd.f32 %v3959_v35, %v8177_v14  ;;  %v8354_v51 = vpop.permute.xlu0 %4371 }
 0x30d   : > { %v4144_v16 = vadd.f32 %v8340_v58, %v4101_v37  ;;  %v4102_v34 = vadd.f32 %v3968_v60, %v8171_v63 }
 0x30e   : > { %v4142_v53 = vadd.f32 %v8340_v58, %v4099_v42  ;;  %v4100_v36 = vadd.f32 %v3960_v21, %v8173_v44 }
 0x30f   : > { %v4180_v12 = vmax.f32 %v4144_v16, 0.0  ;;  %v8356_v46 = vpop.f32.mrb[140].mxu1  ;;  %v4145_v28 = vadd.f32 %v8340_v58, %v4102_v34 }
 0x310   : > { %v4178_v14 = vmax.f32 %v4142_v53, 0.0  ;;  %v3853_v35 = vpop.f32.mrb[141].mxu1  ;;  %v4143_v63 = vadd.f32 %v8340_v58, %v4100_v36  ;;  %v5432_v60 = vpop.f32.mrb[116].mxu0 }
 0x311   : > { %v4181_v42 = vmax.f32 %v4145_v28, 0.0  ;;  %v8362_v44 = vpop.f32.mrb[142].mxu1  ;;  %v3981_v61 = vadd.f32 %v5432_v60, %v8235_v18  ;;  %v3972_v27 = vpop.f32.mrb[117].mxu0  ;;  %v4468_v16 = vsel %vm4432_vm9, %v4180_v12, 0.0  ;;  %vm4447_vm9 = vcmp.eq.s32.totalorder %v8349_v30, 1 }
 0x312   : > { %v4179_v52 = vmax.f32 %v4143_v63, 0.0  ;;  %v3856_v37 = vpop.f32.mrb[143].mxu1  ;;  %v3973_v21 = vadd.f32 %v3972_v27, %v8215_v29  ;;  %v5433_v34 = vpop.f32.mrb[118].mxu0  ;;  %v4466_v55 = vsel %vm4430_vm6, %v4178_v14, 0.0  ;;  %vm4446_vm6 = vcmp.eq.s32.totalorder %v8354_v51, 1 }
 0x313   : > { %v4469_v53 = vsel %vm4433_vm7, %v4181_v42, 0.0  ;;  %v4105_v36 = vadd.f32 %v3981_v61, %v8180_v8  ;;  %v3984_v18 = vadd.f32 %v5433_v34, %v8237_v54  ;;  %v3975_v28 = vpop.f32.mrb[119].mxu0  ;;  %v8377_v27 = vpop.permute.xlu1 %4380 }
 0x314   : > { %v5129_v35 = vpack.c.bf16 %v4469_v53, %v4468_v16  ;;  %v4467_v24 = vsel %vm4431_vm4, %v4179_v52, 0.0  ;;  %v4103_v7 = vadd.f32 %v3973_v21, %v8183_v33  ;;  %v3976_v12 = vadd.f32 %v3975_v28, %v8217_v10  ;;  %v8386_v33 = vpop.permute.xlu0 %4377 }
 0x315   : > { %v5124_v63 = vpack.c.bf16 %v4467_v24, %v4466_v55  ;;  %v4148_v60 = vadd.f32 %v8340_v58, %v4105_v36  ;;  %v4106_v29 = vadd.f32 %v3984_v18, %v8186_v2  ;;  %vm4448_vm7 = vcmp.eq.s32.totalorder %v8386_v33, 1 }
 0x316   : > { %5211 = vst [vmem:[%s8381_s24 + $0x8] sm:$0xff] %v5129_v35   ;;  %v4146_v8 = vadd.f32 %v8340_v58, %v4103_v7  ;;  %v4104_v22 = vadd.f32 %v3976_v12, %v8189_v59  ;;  %vm4449_vm4 = vcmp.eq.s32.totalorder %v8377_v27, 1  ;;  %v8900_v27 = vld [vmem:[#allocation22_spill] sm:$0xff] }
 0x317   : > { %5125 = vst [vmem:[%s8381_s24] sm:$0xff] %v5124_v63   ;;  %v4184_v10 = vmax.f32 %v4148_v60, 0.0  ;;  %v8389_v54 = vpop.f32.mrb[144].mxu1  ;;  %v4149_v2 = vadd.f32 %v8340_v58, %v4106_v29  ;;  %v8409_v29 = vpop.permute.xlu1 %4386 }
 0x318   : > { %v4182_v14 = vmax.f32 %v4146_v8, 0.0  ;;  %v3861_v42 = vpop.f32.mrb[145].mxu1  ;;  %v4147_v61 = vadd.f32 %v8340_v58, %v4104_v22  ;;  %v5436_v16 = vpop.f32.mrb[120].mxu0 }
 0x319   : > { %v4185_v59 = vmax.f32 %v4149_v2, 0.0  ;;  %v8396_v52 = vpop.f32.mrb[146].mxu1  ;;  %v3997_v37 = vadd.f32 %v5436_v16, %v8275_v17  ;;  %v3988_v21 = vpop.f32.mrb[121].mxu0  ;;  %v4472_v34 = vsel %vm4436_vm10, %v4184_v10, 0.0 }
 0x31a   : > { %v4183_v55 = vmax.f32 %v4147_v61, 0.0  ;;  %v3864_v53 = vpop.f32.mrb[147].mxu1  ;;  %v3989_v36 = vadd.f32 %v3988_v21, %v8255_v15  ;;  %v5437_v18 = vpop.f32.mrb[122].mxu0  ;;  %v4470_v28 = vsel %vm4434_vm3, %v4182_v14, 0.0 }
 0x31b   : > { %v4473_v35 = vsel %vm4437_vm14, %v4185_v59, 0.0  ;;  %v4109_v1 = vadd.f32 %v3997_v37, %v8200_v25  ;;  %v4000_v49 = vadd.f32 %v5437_v18, %v8277_v57  ;;  %v3991_v24 = vpop.f32.mrb[123].mxu0  ;;  %v8414_v8 = vpop.permute.xlu0 %4383 }
 0x31c   : > { %v5139_v7 = vpack.c.bf16 %v4473_v35, %v4472_v34  ;;  %v4471_v17 = vsel %vm4435_vm8, %v4183_v55, 0.0  ;;  %v4107_v0 = vadd.f32 %v3989_v36, %v8203_v40  ;;  %v3992_v12 = vadd.f32 %v3991_v24, %v8257_v13 }
 0x31d   : > { %v5134_v63 = vpack.c.bf16 %v4471_v17, %v4470_v28  ;;  %v4152_v15 = vadd.f32 %v8340_v58, %v4109_v1  ;;  %v4110_v60 = vadd.f32 %v4000_v49, %v8206_v56  ;;  %v8437_v49 = vpop.permute.xlu1 %4392  ;;  %vm4451_vm8 = vcmp.eq.s32.totalorder %v8409_v29, 1 }
 0x31e   : > { %5213 = vst [vmem:[%s8381_s24 + $0x18] sm:$0xff] %v5139_v7   ;;  %v4150_v25 = vadd.f32 %v8340_v58, %v4107_v0  ;;  %v4108_v57 = vadd.f32 %v3992_v12, %v8209_v19  ;;  %vm4450_vm3 = vcmp.eq.s32.totalorder %v8414_v8, 1  ;;  %vm4453_vm14 = vcmp.eq.s32.totalorder %v8437_v49, 1 }
 0x31f   : > { %5212 = vst [vmem:[%s8381_s24 + $0x10] sm:$0xff] %v5134_v63   ;;  %v4188_v41 = vmax.f32 %v4152_v15, 0.0  ;;  %v8417_v22 = vpop.f32.mrb[148].mxu1  ;;  %v4153_v40 = vadd.f32 %v8340_v58, %v4110_v60  ;;  %v8442_v24 = vpop.permute.xlu0 %4389 }
 0x320   : > { %v4186_v13 = vmax.f32 %v4150_v25, 0.0  ;;  %v3869_v10 = vpop.f32.mrb[149].mxu1  ;;  %v4151_v56 = vadd.f32 %v8340_v58, %v4108_v57  ;;  %v5440_v2 = vpop.f32.mrb[124].mxu0  ;;  %vm4452_vm10 = vcmp.eq.s32.totalorder %v8442_v24, 1 }
 0x321   : > { %v4189_v19 = vmax.f32 %v4153_v40, 0.0  ;;  %v8424_v14 = vpop.f32.mrb[150].mxu1  ;;  %v4013_v42 = vadd.f32 %v5440_v2, %v8315_v20  ;;  %v4004_v61 = vpop.f32.mrb[125].mxu0  ;;  %v4476_v16 = vsel %vm4440_vm15, %v4188_v41, 0.0 }
 0x322   : > { %v4187_v59 = vmax.f32 %v4151_v56, 0.0  ;;  %v3872_v37 = vpop.f32.mrb[151].mxu1  ;;  %v4005_v21 = vadd.f32 %v4004_v61, %v8295_v6  ;;  %v5441_v34 = vpop.f32.mrb[126].mxu0  ;;  %v4474_v55 = vsel %vm4438_vm12, %v4186_v13, 0.0 }
 0x323   : > { %v4477_v53 = vsel %vm4441_vm1, %v4189_v19, 0.0  ;;  %v4113_v48 = vadd.f32 %v4013_v42, %v8220_v9  ;;  %v4016_v39 = vadd.f32 %v5441_v34, %v8317_v32  ;;  %v4007_v36 = vpop.f32.mrb[127].mxu0  ;;  %v8896_v19 = vld [vmem:[#allocation37_spill] sm:$0xff]  ;;  %v8465_v37 = vpop.permute.xlu1 %4398 }
 0x324   : > { %v5149_v18 = vpack.c.bf16 %v4477_v53, %v4476_v16  ;;  %v4475_v20 = vsel %vm4439_vm13, %v4187_v59, 0.0  ;;  %v4111_v50 = vadd.f32 %v4005_v21, %v8223_v11  ;;  %v4008_v28 = vadd.f32 %v4007_v36, %v8297_v3  ;;  %v8897_v16 = vld [vmem:[#allocation19_spill] sm:$0xff]  ;;  %v8470_v34 = vpop.permute.xlu0 %4395 }
 0x325   : > { %v5144_v35 = vpack.c.bf16 %v4475_v20, %v4474_v55  ;;  %v4156_v6 = vadd.f32 %v8340_v58, %v4113_v48  ;;  %v4114_v1 = vadd.f32 %v4016_v39, %v8226_v26  ;;  %vm4455_vm13 = vcmp.eq.s32.totalorder %v8465_v37, 1 }
 0x326   : > { %5215 = vst [vmem:[%s8381_s24 + $0x28] sm:$0xff] %v5149_v18   ;;  %v4154_v9 = vadd.f32 %v8340_v58, %v4111_v50  ;;  %v4112_v32 = vadd.f32 %v4008_v28, %v8229_v45  ;;  %vm4454_vm12 = vcmp.eq.s32.totalorder %v8470_v34, 1 }
 0x327   : > { %5214 = vst [vmem:[%s8381_s24 + $0x20] sm:$0xff] %v5144_v35   ;;  %v4192_v23 = vmax.f32 %v4156_v6, 0.0  ;;  %v8445_v7 = vpop.f32.mrb[152].mxu1  ;;  %v4157_v11 = vadd.f32 %v8340_v58, %v4114_v1 }
 0x328   : > { %v4190_v3 = vmax.f32 %v4154_v9, 0.0  ;;  %v3877_v17 = vpop.f32.mrb[153].mxu1  ;;  %v4155_v26 = vadd.f32 %v8340_v58, %v4112_v32  ;;  %v5444_v0 = vpop.f32.mrb[128].mxu0 }
 0x329   : > { %v4193_v45 = vmax.f32 %v4157_v11, 0.0  ;;  %v8452_v12 = vpop.f32.mrb[154].mxu1  ;;  %v4029_v63 = vadd.f32 %v5444_v0, %v8356_v46  ;;  %v4020_v15 = vpop.f32.mrb[129].mxu0  ;;  %v4480_v60 = vsel %vm4444_vm11, %v4192_v23, 0.0 }
 0x32a   : > { %v4191_v25 = vmax.f32 %v4155_v26, 0.0  ;;  %v3880_v57 = vpop.f32.mrb[155].mxu1  ;;  %v4021_v41 = vadd.f32 %v4020_v15, %v8335_v38  ;;  %v5445_v40 = vpop.f32.mrb[130].mxu0  ;;  %v4478_v13 = vsel %vm4442_vm2, %v4190_v3, 0.0  ;;  %v8899_v3 = vld [vmem:[#allocation25_spill] sm:$0xff]  ;;  %v8901_v15 = vld [vmem:[#allocation23_spill] sm:$0xff] }
 0x32b   : > { %v4481_v10 = vsel %vm4445_vm5, %v4193_v45, 0.0  ;;  %v4117_v4 = vadd.f32 %v4029_v63, %v8240_v43  ;;  %v4032_v47 = vadd.f32 %v5445_v40, %v8362_v44  ;;  %v4023_v56 = vpop.f32.mrb[131].mxu0  ;;  %v8898_v44 = vld [vmem:[#allocation20_spill] sm:$0xff]  ;;  %v4402_v40 = vpop.permute.xlu0 %4401 }
 0x32c   : > { %v5159_v2 = vpack.c.bf16 %v4481_v10, %v4480_v60  ;;  %v4479_v46 = vsel %vm4443_vm0, %v4191_v25, 0.0  ;;  %v4115_v31 = vadd.f32 %v4021_v41, %v8243_v5  ;;  %v4024_v42 = vadd.f32 %v4023_v56, %v8896_v19  ;;  %v8489_v25 = vpop.permute.xlu1 %4404 }
 0x32d   : > { %v5154_v61 = vpack.c.bf16 %v4479_v46, %v4478_v13  ;;  %v4160_v38 = vadd.f32 %v8340_v58, %v4117_v4  ;;  %v4118_v59 = vadd.f32 %v4032_v47, %v8897_v16  ;;  %vm4456_vm15 = vcmp.eq.s32.totalorder %v4402_v40, 1  ;;  %v8908_v40 = vld [vmem:[#allocation30_spill] sm:$0xff] }
 0x32e   : > { %5217 = vst [vmem:[%s8381_s24 + $0x38] sm:$0xff] %v5159_v2   ;;  %v4158_v43 = vadd.f32 %v8340_v58, %v4115_v31  ;;  %v4116_v21 = vadd.f32 %v4024_v42, %v8898_v44  ;;  %vm4457_vm1 = vcmp.eq.s32.totalorder %v8489_v25, 1 }
 0x32f   : > { %5216 = vst [vmem:[%s8381_s24 + $0x30] sm:$0xff] %v5154_v61   ;;  %v4196_v62 = vmax.f32 %v4160_v38, 0.0  ;;  %v3883_v55 = vpop.f32.mrb[156].mxu1  ;;  %v4161_v5 = vadd.f32 %v8340_v58, %v4118_v59 }
 0x330   : > { %v4194_v53 = vmax.f32 %v4158_v43, 0.0  ;;  %v3885_v48 = vpop.f32.mrb[157].mxu1  ;;  %v4159_v39 = vadd.f32 %v8340_v58, %v4116_v21  ;;  %v5448_v36 = vpop.f32.mrb[132].mxu0  ;;  %v8903_v21 = vld [vmem:[#allocation21_spill] sm:$0xff] }
 0x331   : > { %v4197_v18 = vmax.f32 %v4161_v5, 0.0  ;;  %v3886_v20 = vpop.f32.mrb[158].mxu1  ;;  %v4045_v50 = vadd.f32 %v5448_v36, %v8417_v22  ;;  %v4036_v28 = vpop.f32.mrb[133].mxu0  ;;  %v4484_v35 = vsel %vm4448_vm7, %v4196_v62, 0.0 }
 0x332   : > { %v4195_v6 = vmax.f32 %v4159_v39, 0.0  ;;  %v3888_v1 = vpop.f32.mrb[159].mxu1  ;;  %v4037_v9 = vadd.f32 %v4036_v28, %v8389_v54  ;;  %v5449_v32 = vpop.f32.mrb[134].mxu0  ;;  %v4482_v23 = vsel %vm4446_vm6, %v4194_v53, 0.0  ;;  %v8904_v53 = vld [vmem:[#allocation28_spill] sm:$0xff] }
 0x333   : > { %v4485_v11 = vsel %vm4449_vm4, %v4197_v18, 0.0  ;;  %v4121_v51 = vadd.f32 %v4045_v50, %v8899_v3  ;;  %v4048_v33 = vadd.f32 %v5449_v32, %v8424_v14  ;;  %v4039_v17 = vpop.f32.mrb[135].mxu0  ;;  %v8902_v14 = vld [vmem:[#allocation24_spill] sm:$0xff]  ;;  %v8509_v50 = vpop.permute.xlu1 %4410 }
 0x334   : > { %v5169_v26 = vpack.c.bf16 %v4485_v11, %v4484_v35  ;;  %v4483_v22 = vsel %vm4447_vm9, %v4195_v6, 0.0  ;;  %v4119_v0 = vadd.f32 %v4037_v9, %v8900_v27  ;;  %v4040_v45 = vadd.f32 %v4039_v17, %v8396_v52  ;;  %v4408_v6 = vpop.permute.xlu0 %4407 }
 0x335   : > { %v5164_v63 = vpack.c.bf16 %v4483_v22, %v4482_v23  ;;  %v4164_v54 = vadd.f32 %v8340_v58, %v4121_v51  ;;  %v4122_v60 = vadd.f32 %v4048_v33, %v8901_v15  ;;  %v8907_v15 = vld [vmem:[#allocation29_spill] sm:$0xff]  ;;  %vm4458_vm0 = vcmp.eq.s32.totalorder %v4408_v6, 1  ;;  %v8912_v6 = vld [vmem:[#allocation36_spill] sm:$0xff] }
 0x336   : > { %5219 = vst [vmem:[%s8381_s24 + $0x48] sm:$0xff] %v5169_v26   ;;  %v4162_v57 = vadd.f32 %v8340_v58, %v4119_v0  ;;  %v4120_v41 = vadd.f32 %v4040_v45, %v8902_v14  ;;  %vm4459_vm5 = vcmp.eq.s32.totalorder %v8509_v50, 1 }
 0x337   : > { %5218 = vst [vmem:[%s8381_s24 + $0x40] sm:$0xff] %v5164_v63   ;;  %v4200_v30 = vmax.f32 %v4164_v54, 0.0  ;;  %v3891_v13 = vpop.f32.mrb[160].mxu1  ;;  %v4165_v10 = vadd.f32 %v8340_v58, %v4122_v60 }
 0x338   : > { %v4198_v52 = vmax.f32 %v4162_v57, 0.0  ;;  %v3893_v4 = vpop.f32.mrb[161].mxu1  ;;  %v4163_v47 = vadd.f32 %v8340_v58, %v4120_v41  ;;  %v5452_v56 = vpop.f32.mrb[136].mxu0 }
 0x339   : > { %v4201_v2 = vmax.f32 %v4165_v10, 0.0  ;;  %v3894_v46 = vpop.f32.mrb[162].mxu1  ;;  %v4061_v31 = vadd.f32 %v5452_v56, %v3883_v55  ;;  %v4052_v19 = vpop.f32.mrb[137].mxu0  ;;  %v4488_v42 = vsel %vm4452_vm10, %v4200_v30, 0.0  ;;  %v8909_v4 = vld [vmem:[#allocation31_spill] sm:$0xff] }
 0x33a   : > { %v4199_v61 = vmax.f32 %v4163_v47, 0.0  ;;  %v3896_v38 = vpop.f32.mrb[163].mxu1  ;;  %v4053_v16 = vadd.f32 %v4052_v19, %v8445_v7  ;;  %v5453_v59 = vpop.f32.mrb[138].mxu0  ;;  %v4486_v43 = vsel %vm4450_vm3, %v4198_v52, 0.0  ;;  %v8905_v7 = vld [vmem:[#allocation27_spill] sm:$0xff] }
 0x33b   : > { %v4489_v44 = vsel %vm4453_vm14, %v4201_v2, 0.0  ;;  %v4125_v8 = vadd.f32 %v4061_v31, %v8903_v21  ;;  %v4064_v62 = vadd.f32 %v5453_v59, %v3886_v20  ;;  %v4055_v24 = vpop.f32.mrb[139].mxu0  ;;  %v8906_v20 = vld [vmem:[#allocation26_spill] sm:$0xff]  ;;  %v4417_v47 = vpop.permute.xlu1 %4416  ;;  %v8910_v2 = vld [vmem:[#allocation32_spill] sm:$0xff] }
 0x33c   : > { %v5179_v5 = vpack.c.bf16 %v4489_v44, %v4488_v42  ;;  %v4487_v55 = vsel %vm4451_vm8, %v4199_v61, 0.0  ;;  %v4123_v49 = vadd.f32 %v4053_v16, %v8904_v53  ;;  %v4056_v48 = vadd.f32 %v4055_v24, %v8452_v12  ;;  %v4414_v19 = vpop.permute.xlu0 %4413 }
 0x33d   : > { %v5174_v39 = vpack.c.bf16 %v4487_v55, %v4486_v43  ;;  %v4168_v36 = vadd.f32 %v8340_v58, %v4125_v8  ;;  %v4126_v18 = vadd.f32 %v4064_v62, %v8905_v7  ;;  %vm4461_vm2 = vcmp.eq.s32.totalorder %v4417_v47, 1  ;;  %v8911_v7 = vld [vmem:[#allocation34_spill] sm:$0xff] }
 0x33e   : > { %5221 = vst [vmem:[%s8381_s24 + $0x58] sm:$0xff] %v5179_v5   ;;  %v4166_v28 = vadd.f32 %v8340_v58, %v4123_v49  ;;  %v4124_v35 = vadd.f32 %v4056_v48, %v8906_v20  ;;  %vm4460_vm11 = vcmp.eq.s32.totalorder %v4414_v19, 1 }
 0x33f   : > { %5220 = vst [vmem:[%s8381_s24 + $0x50] sm:$0xff] %v5174_v39   ;;  %v4204_v29 = vmax.f32 %v4168_v36, 0.0  ;;  %v3899_v1 = vpop.f32.mrb[164].mxu1  ;;  %v4169_v9 = vadd.f32 %v8340_v58, %v4126_v18 }
 0x340   : > { %v4202_v12 = vmax.f32 %v4166_v28, 0.0  ;;  %v3901_v32 = vpop.f32.mrb[165].mxu1  ;;  %v4167_v23 = vadd.f32 %v8340_v58, %v4124_v35  ;;  %v5456_v11 = vpop.f32.mrb[140].mxu0 }
 0x341   : > { %v4205_v3 = vmax.f32 %v4169_v9, 0.0  ;;  %v3902_v51 = vpop.f32.mrb[166].mxu1  ;;  %v4077_v33 = vadd.f32 %v5456_v11, %v3899_v1  ;;  %v4068_v17 = vpop.f32.mrb[141].mxu0  ;;  %v4492_v26 = vsel %vm4456_vm15, %v4204_v29, 0.0 }
 0x342   : > { %v4203_v22 = vmax.f32 %v4167_v23, 0.0  ;;  %v3904_v27 = vpop.f32.mrb[167].mxu1  ;;  %v4069_v0 = vadd.f32 %v4068_v17, %v3891_v13  ;;  %v5457_v45 = vpop.f32.mrb[142].mxu0  ;;  %v4490_v63 = vsel %vm4454_vm12, %v4202_v12, 0.0 }
 0x343   : > { %v4493_v54 = vsel %vm4457_vm1, %v4205_v3, 0.0  ;;  %v4129_v60 = vadd.f32 %v4077_v33, %v8907_v15  ;;  %v4080_v57 = vadd.f32 %v5457_v45, %v3902_v51  ;;  %v4071_v34 = vpop.f32.mrb[143].mxu0  ;;  %v4423_v1 = vpop.permute.xlu1 %4422  ;;  %v8913_v51 = vld [vmem:[#allocation33_spill] sm:$0xff] }
 0x344   : > { %v5189_v14 = vpack.c.bf16 %v4493_v54, %v4492_v26  ;;  %v4491_v41 = vsel %vm4455_vm13, %v4203_v22, 0.0  ;;  %v4127_v30 = vadd.f32 %v4069_v0, %v8908_v40  ;;  %v4072_v25 = vadd.f32 %v4071_v34, %v3894_v46  ;;  %v4420_v12 = vpop.permute.xlu0 %4419 }
 0x345   : > { %v5184_v10 = vpack.c.bf16 %v4491_v41, %v4490_v63  ;;  %v4172_v52 = vadd.f32 %v8340_v58, %v4129_v60  ;;  %v4130_v13 = vadd.f32 %v4080_v57, %v8909_v4  ;;  %vm4463_vm9 = vcmp.eq.s32.totalorder %v4423_v1, 1  ;;  %v8914_v63 = vld [vmem:[#allocation35_spill] sm:$0xff] }
 0x346   : > { %5223 = vst [vmem:[%s8381_s24 + $0x68] sm:$0xff] %v5189_v14   ;;  %v4170_v56 = vadd.f32 %v8340_v58, %v4127_v30  ;;  %v4128_v31 = vadd.f32 %v4072_v25, %v8910_v2  ;;  %vm4462_vm6 = vcmp.eq.s32.totalorder %v4420_v12, 1 }
 0x347   : > { %5222 = vst [vmem:[%s8381_s24 + $0x60] sm:$0xff] %v5184_v10   ;;  %v4208_v42 = vmax.f32 %v4172_v52, 0.0  ;;  %v3907_v61 = vpop.f32.mrb[168].mxu1  ;;  %v4173_v37 = vadd.f32 %v8340_v58, %v4130_v13  ;;  %v4429_v60 = vpop.permute.xlu1 %4428 }
 0x348   : > { %v4206_v38 = vmax.f32 %v4170_v56, 0.0  ;;  %v3909_v16 = vpop.f32.mrb[169].mxu1  ;;  %v4171_v46 = vadd.f32 %v8340_v58, %v4128_v31  ;;  %v5460_v59 = vpop.f32.mrb[144].mxu0  ;;  %vm4465_vm7 = vcmp.eq.s32.totalorder %v4429_v60, 1 }
 0x349   : > { %v4209_v43 = vmax.f32 %v4173_v37, 0.0  ;;  %v3910_v44 = vpop.f32.mrb[170].mxu1  ;;  %v4084_v21 = vpop.f32.mrb[145].mxu0  ;;  %v4496_v55 = vsel %vm4460_vm11, %v4208_v42, 0.0 }
 0x34a   : > { %v4207_v8 = vmax.f32 %v4171_v46, 0.0  ;;  %v3912_v62 = vpop.f32.mrb[171].mxu1  ;;  %v4085_v24 = vadd.f32 %v4084_v21, %v3907_v61  ;;  %v5461_v5 = vpop.f32.mrb[146].mxu0  ;;  %v4494_v53 = vsel %vm4458_vm0, %v4206_v38, 0.0 }
 0x34b   : > { %v4497_v49 = vsel %vm4461_vm2, %v4209_v43, 0.0  ;;  %v4087_v48 = vpop.f32.mrb[147].mxu0  ;;  %v4426_v57 = vpop.permute.xlu0 %4425 }
 0x34c   : > { %v5199_v39 = vpack.c.bf16 %v4497_v49, %v4496_v55  ;;  %v4495_v36 = vsel %vm4459_vm5, %v4207_v8, 0.0  ;;  %v4131_v18 = vadd.f32 %v4085_v24, %v8911_v7  ;;  %v4088_v28 = vadd.f32 %v4087_v48, %v3910_v44 }
 0x34d   : > { %v5194_v20 = vpack.c.bf16 %v4495_v36, %v4494_v53  ;;  %vm4464_vm4 = vcmp.eq.s32.totalorder %v4426_v57, 1 }
 0x34e   : > { %5225 = vst [vmem:[%s8381_s24 + $0x78] sm:$0xff] %v5199_v39   ;;  %v4174_v35 = vadd.f32 %v8340_v58, %v4131_v18  ;;  %v4132_v29 = vadd.f32 %v4088_v28, %v8912_v6 }
 0x34f   : > { %5224 = vst [vmem:[%s8381_s24 + $0x70] sm:$0xff] %v5194_v20   ;;  %v3915_v9 = vpop.f32.mrb[172].mxu1 }
 0x350   : > { %v4210_v50 = vmax.f32 %v4174_v35, 0.0  ;;  %v4093_v32 = vadd.f32 %v5460_v59, %v3915_v9  ;;  %v3917_v23 = vpop.f32.mrb[173].mxu1  ;;  %v4175_v11 = vadd.f32 %v8340_v58, %v4132_v29 }
 0x351   : > { %v3918_v3 = vpop.f32.mrb[174].mxu1 }
 0x352   : > { %v4133_v33 = vadd.f32 %v4093_v32, %v8913_v51  ;;  %v4211_v17 = vmax.f32 %v4175_v11, 0.0  ;;  %v4096_v26 = vadd.f32 %v5461_v5, %v3918_v3  ;;  %v3920_v22 = vpop.f32.mrb[175].mxu1  ;;  %v4498_v27 = vsel %vm4462_vm6, %v4210_v50, 0.0 }
 0x354   : > { %v4176_v0 = vadd.f32 %v8340_v58, %v4133_v33  ;;  %v4499_v45 = vsel %vm4463_vm9, %v4211_v17, 0.0  ;;  %v4134_v54 = vadd.f32 %v4096_v26, %v8914_v63 }
 0x355   : > { %v5204_v15 = vpack.c.bf16 %v4499_v45, %v4498_v27 }
 0x356   : > { %v4212_v34 = vmax.f32 %v4176_v0, 0.0  ;;  %v4177_v14 = vadd.f32 %v8340_v58, %v4134_v54 }
 0x357   : > { %5226 = vst [vmem:[%s8381_s24 + $0x80] sm:$0xff] %v5204_v15  }
 0x358   : > { %v4213_v41 = vmax.f32 %v4177_v14, 0.0  ;;  %v4500_v40 = vsel %vm4464_vm4, %v4212_v34, 0.0 }
 0x35a   : > { %v4501_v30 = vsel %vm4465_vm7, %v4213_v41, 0.0 }
 0x35b   : > { %v5209_v58 = vpack.c.bf16 %v4501_v30, %v4500_v40 }
 0x35d   : > { %5227 = vst [vmem:[%s8381_s24 + $0x88] sm:$0xff] %v5209_v58  }
 0x35e   : > { %6033 = shalt.err (!%p6030_p11)
}
 0x35f   : > { %s6034_s17 = scalar_lea.hbm %s8549_s16, 2304  ;;  %s6038_s7 = scalar_lea.hbm %s8606_s5, 4608 }
 0x360   : > { %p6035_p12 = scmp.ne.s32.totalorder %s8549_s16, %s6034_s17  ;;  %p6039_p9 = scmp.lt.u32.totalorder %s8549_s16, %s8606_s5 }
 0x361   : > { %p6040_p0 = scmp.lt.u32.totalorder %s6038_s7, %s6034_s17  ;;  %p6042_p4 = scmp.lt.u32.totalorder %s6034_s17, %s8549_s16 }
 0x362   : > { %p6036_p6 = pnand %p6035_p12, %p6310_p10 }
 0x363   : > { %p6041_p2 = por %p6040_p0, %p6039_p9 }
 0x364   : > { %p6037_p7 = pneg %p6036_p6 }
 0x365   : > { %p6043_p8 = por %p6042_p4, %p6041_p2 }
 0x367   : > { %p6044_p1 = pnand %p6043_p8, %p6037_p7 }
 0x369   : > { %6047 = shalt.err (!%p6044_p1)
}
 0x36a   : > { %s6127_s28 = smov 64   ;;  %s6128_s10 = smov 4  }
 0x36b   : > { %5501 = dma.vmem_to_hbm [thread:$0]  (%p6310_p10), %s8551_s25, 2304, %s8549_s16, %s4683_s21, %s6127_s28, %s6127_s28, %s6128_s10  }
 0x36c PF: > { %s8915_s9 = sld [smem:[#allocation18_spill]]  ;;  %s4713_s24 = sand.u32 1, %s6094_s18  }
 0x36d   : > { %p8917_p3 = scmp.ge.s32.totalorder %s6114_s23, 2  ;;  %s4714_s26 = scalar_lea.sflag [#allocation5], %s4713_s24 }
 0x372   : > { %p8916_p13 = scmp.ne.s32.totalorder %s8915_s9, 0 }
 0x374   : > { %p5521_p5 = pnand %p8917_p3, %p8916_p13 }
 0x376   : > { %6089 = dma.done.wait (!%p5521_p5), %s4714_s26, 2304  }
 0x377   : > { %6091 = vsyncadd (!%p5521_p5), %s4714_s26, 4294964992  ;;  %s25_s23 = sadd.s32 1, %s6114_s23   ;;  %s8918_s18 = smov %s6098_s19 }
 0x378   : > { %p22_p11 = scmp.ge.s32.totalorder %s25_s23, 4   ;;  %s8919_s19 = smov %s6102_s20 }
 0x379   : > { %s8920_s20 = smov %s6329_s30  ;;  %s8921_s21 = smov %s6110_s22 }
 0x37a   : > { %s8922_s22 = smov %s8924_s14  ;;  %24 = sbr.rel (!%p22_p11) target bundleno = 14 (0xe), region = 112 }
 0x381   :  { %4719 = vsyncpa [#allocation4], 1 }
 0x382   :  { %4721 = vsyncpa [#allocation4 + $0x1], 1 }
 0x383   :  { %4722 = vsyncpa [#allocation7], 1 }
 0x384   :  { %4724 = vsyncpa [#allocation7 + $0x1], 1 }
 0x385   :  { %4725 = vsyncpa [#allocation10], 1 }
 0x386   :  { %4726 = vsyncpa [#allocation5], 1 }
 0x387   :  { %4728 = vsyncpa [#allocation5 + $0x1], 1 }

// kernel: class_subnet_forward.9
= control target key start
LH: loop header
LB: loop body
LE: loop exit
PB: predicated region body
PF: predicated region fallthrough
CT: control target
= control target key end

     0   :  { %s8691_s0 = inlined_call_operand.hbm [shape: bf16[2,288,128], index: 0, kind: input, shape index: {}]   ;;  %s8692_s1 = inlined_call_operand.hbm [shape: bf16[2,1,36,128], index: 1, kind: input, shape index: {}]   ;;  %s8693_s2 = inlined_call_operand.hbm [shape: bf16[3,384,128], index: 2, kind: input, shape index: {}]   ;;  %s8694_s3 = inlined_call_operand.hbm [shape: f32[1,128], index: 3, kind: input, shape index: {}]   ;;  %s8695_s4 = inlined_call_operand.hbm [shape: f32[288,1], index: 4, kind: input, shape index: {}]   ;;  %s8696_s5 = inlined_call_operand.hbm [shape: f32[2,288,128], index: 5, kind: output, shape index: {}]  }
   0x1   :  { %8801 = sst [smem:[#allocation29_spill]] %s8691_s0 }
   0x2   :  { %8802 = sst [smem:[#allocation30_spill]] %s8693_s2 }
   0x3   :  { %8803 = sst [smem:[#allocation31_spill]] %s8694_s3 }
   0x4   :  { %8804 = sst [smem:[#allocation32_spill]] %s8695_s4 }
   0x5   :  { %10 = vsyncpa [#allocation4], 0 }
   0x6   :  { %12 = vsyncpa [#allocation4 + $0x1], 0 }
   0x7   :  { %13 = vsyncpa [#allocation7], 0 }
   0x8   :  { %15 = vsyncpa [#allocation7 + $0x1], 0 }
   0x9   :  { %16 = vsyncpa [#allocation10], 0 }
   0xa   :  { %17 = vsyncpa [#allocation5], 0 }
   0xb   :  { %19 = vsyncpa [#allocation5 + $0x1], 0  ;;  %s6197_s18 = smov 0   ;;  %s6199_s19 = smov 0  }
   0xc   :  { %s6201_s20 = smov 0   ;;  %s6203_s21 = smov 0  }
   0xd   :  { %s6205_s22 = smov 0   ;;  %s6207_s23 = smov 0  }
   0xe LB: > { %s6228_s24 = sadd.s32 4294967295, %s6152_s23   ;;  %s4876_s25 = sadd.s32 4294967294, %s6152_s23   ;;  %s6152_s23 = sphi %s6207_s23, %s25_s23   ;;  %s6148_s22 = sphi %s6205_s22, %s8994_s22   ;;  %s6144_s21 = sphi %s6203_s21, %s8993_s21   ;;  %s6140_s20 = sphi %s6201_s20, %s8992_s20   ;;  %s6136_s19 = sphi %s6199_s19, %s8991_s19   ;;  %s6132_s18 = sphi %s6197_s18, %s8990_s18  }
   0xf   : > { %p59_p0 = scmp.ne.s32.totalorder %s6136_s19, %s6132_s18  ;;  %p8697_p1 = scmp.eq.s32.totalorder %s6228_s24, 0 }
  0x10   : > { %p182_p3 = scmp.eq.s32.totalorder %s4876_s25, 1  ;;  %p4877_p5 = scmp.ge.s32.totalorder %s6152_s23, 1 }
  0x11   : > { %p6237_p4 = por %p8697_p1, %p59_p0  ;;  %p189_p7 = scmp.lt.s32.totalorder %s6152_s23, 3 }
  0x12   : > { %p6242_p6 = por %p182_p3, %p59_p0  ;;  %s6154_s29 = smov [#allocation8]  }
  0x13   : > { %s8805_s26 = scalar_select %p6237_p4, 1, 0 }
  0x14   : > { %s8806_s27 = scalar_select %p6242_p6, 1, 0 }
  0x15   : > { %p6247_p8 = pnand %p4877_p5, %p189_p7  ;;  %s201_s30 = sshll.u32 %s6154_s29, 4  ;;  %s6251_s30 = int_to_ptr.vmem [resolvable:$true] %s201_s30 }
  0x16   : > { %8807 = sst [smem:[#allocation18_spill]] %s8806_s27  ;;  %s6155_s7 = smov [#allocation9]  }
  0x17   : > { %s8808_s28 = scalar_select %p6247_p8, 1, 0 }
  0x18   : > { %p5397_p9 = pneg %p6247_p8  ;;  %s215_s8 = sshll.u32 %s6155_s7, 4  ;;  %s6262_s8 = int_to_ptr.vmem [resolvable:$true] %s215_s8 }
  0x19   : > { %s6156_s9 = smov [#allocation11]   ;;  %s8810_s2 = sld [smem:[#allocation30_spill]] }
  0x1a   : > { %p6258_p11 = pnand %p5397_p9, %p8697_p1  ;;  %s6264_s10 = sshll.u32 %s6156_s9, 4  ;;  %s226_s10 = int_to_ptr.vmem [resolvable:$true] %s6264_s10 }
  0x1c   : > { %p6274_p13 = pneg %p6258_p11 }
  0x1f   : > { %s5914_s13 = scalar_lea.hbm %s8810_s2, 9216 }
  0x20   : > { %p5915_p12 = scmp.ne.s32.totalorder %s8810_s2, %s5914_s13  ;;  %p5921_p5 = scmp.lt.u32.totalorder %s5914_s13, %s8810_s2 }
  0x22   : > { %p5917_p0 = pnand %p6274_p13, %p5915_p12 }
  0x24   : > { %p5918_p3 = pneg %p5917_p0 }
  0x26   : > { %p5923_p7 = pnand %p5921_p5, %p5918_p3 }
  0x28   : > { %5926 = shalt.err (!%p5923_p7)
}
  0x29   : > { %s5927_s29 = scalar_lea.vmem %s6251_s30, 9216  ;;  %p5935_p2 = scmp.lt.s32.totalorder %s6251_s30, %s6251_s30 }
  0x2a   : > { %p5928_p9 = scmp.ne.s32.totalorder %s6251_s30, %s5927_s29  ;;  %p5936_p6 = scmp.lt.s32.totalorder %s5927_s29, %s5927_s29 }
  0x2c   : > { %p5930_p10 = pnand %p5928_p9, %p6274_p13  ;;  %p5937_p12 = por %p5936_p6, %p5935_p2 }
  0x2e   : > { %p5931_p1 = pneg %p5930_p10 }
  0x30   : > { %p5938_p0 = pnand %p5937_p12, %p5931_p1 }
  0x32   : > { %5941 = shalt.err (!%p5938_p0)
}
  0x33   : > { %s8701_s7 = smov 64   ;;  %s8703_s9 = smov 4  }
  0x34   : > { %5400 = dma.hbm_to_vmem [thread:$0]  (!%p6258_p11), %s8810_s2, 9216, %s6251_s30, [#allocation7], %s8701_s7, %s8701_s7, %s8703_s9  }
  0x35   : > { %s8812_s3 = sld [smem:[#allocation31_spill]] }
  0x3b   : > { %s5942_s15 = scalar_lea.hbm %s8812_s3, 16 }
  0x3c   : > { %p5943_p1 = scmp.ne.s32.totalorder %s8812_s3, %s5942_s15  ;;  %p5949_p10 = scmp.lt.u32.totalorder %s5942_s15, %s8812_s3 }
  0x3e   : > { %p5945_p2 = pnand %p5943_p1, %p6274_p13 }
  0x40   : > { %p5946_p6 = pneg %p5945_p2 }
  0x42   : > { %p5951_p3 = pnand %p5949_p10, %p5946_p6 }
  0x44   : > { %5954 = shalt.err (!%p5951_p3)
}
  0x45   : > { %s5955_s30 = scalar_lea.vmem %s6262_s8, 16  ;;  %s5962_s11 = scalar_lea.vmem %s6262_s8, 32 }
  0x46   : > { %p5956_p5 = scmp.ne.s32.totalorder %s6262_s8, %s5955_s30  ;;  %p5963_p12 = scmp.lt.s32.totalorder %s6262_s8, %s6262_s8 }
  0x47   : > { %p5964_p0 = scmp.lt.s32.totalorder %s5962_s11, %s5955_s30 }
  0x48   : > { %p5958_p7 = pnand %p5956_p5, %p6274_p13 }
  0x49   : > { %p5965_p1 = por %p5964_p0, %p5963_p12 }
  0x4a   : > { %p5959_p9 = pneg %p5958_p7 }
  0x4c   : > { %p5966_p2 = pnand %p5965_p1, %p5959_p9 }
  0x4e   : > { %5969 = shalt.err (!%p5966_p2)
}
  0x4f   : > { %5403 = dma.hbm_to_vmem [thread:$0]  (!%p6258_p11), %s8812_s3, 16, %s6262_s8, [#allocation10]  }
  0x50   : > { %s8813_s4 = sld [smem:[#allocation32_spill]] }
  0x56   : > { %s5970_s15 = scalar_lea.hbm %s8813_s4, 4608 }
  0x57   : > { %p5971_p6 = scmp.ne.s32.totalorder %s8813_s4, %s5970_s15  ;;  %p5977_p5 = scmp.lt.u32.totalorder %s5970_s15, %s8813_s4 }
  0x59   : > { %p5973_p10 = pnand %p5971_p6, %p6274_p13 }
  0x5b   : > { %p5974_p3 = pneg %p5973_p10 }
  0x5d   : > { %p5979_p7 = pnand %p5977_p5, %p5974_p3 }
  0x5f   : > { %5982 = shalt.err (!%p5979_p7)
}
  0x60   : > { %s5983_s11 = scalar_lea.vmem %s226_s10, 4608  ;;  %p5991_p1 = scmp.lt.s32.totalorder %s226_s10, %s226_s10 }
  0x61   : > { %p5984_p9 = scmp.ne.s32.totalorder %s226_s10, %s5983_s11  ;;  %p5992_p2 = scmp.lt.s32.totalorder %s5983_s11, %s5983_s11 }
  0x63   : > { %p5986_p12 = pnand %p5984_p9, %p6274_p13  ;;  %p5993_p4 = por %p5992_p2, %p5991_p1 }
  0x65   : > { %p5987_p0 = pneg %p5986_p12 }
  0x67   : > { %p5994_p8 = pnand %p5993_p4, %p5987_p0 }
  0x69   : > { %5997 = shalt.err (!%p5994_p8)
}
  0x6a   : > { %s6159_s8 = smov 128   ;;  %s6160_s16 = smov 8  }
  0x6b   : > { %5406 = dma.hbm_to_vmem [thread:$0]  (!%p6258_p11), %s8813_s4, 4608, %s226_s10, [#allocation10], %s6159_s8, %s6159_s8, %s6160_s16  }
  0x6c   : > { %s46_s13 = sadd.s32 1, %s6140_s20  ;;  %s37_s14 = sadd.s32 1, %s6148_s22 }
  0x6d   : > { %p53_p4 = scmp.ne.s32.totalorder %s6140_s20, %s6136_s19  ;;  %p39_p8 = scmp.ge.s32.totalorder %s37_s14, 2 }
  0x6e   : > { %p54_p13 = scmp.eq.s32.totalorder %s6152_s23, 0  ;;  %p8814_p6 = scmp.eq.s32.totalorder %s6228_s24, 1 }
  0x6f   : > { %p5421_p3 = scmp.lt.s32.totalorder %s6152_s23, 2  ;;  %s8996_s14 = smov (%p39_p8, %s37_s14), 0 }
  0x70   : > { %p6348_p10 = por %p8814_p6, %p53_p4  ;;  %p55_p5 = por %p54_p13, %p53_p4 }
  0x71   : > { %s6356_s6 = sand.u32 1, %s6140_s20   ;;  %s41_s10 = ssub.s32 %s6148_s22, %s8996_s14 }
  0x72   : > { %p44_p11 = scmp.eq.s32.totalorder %s41_s10, 0  ;;  %s5371_s17 = smul.u32 144, %s6356_s6 }
  0x73   : > { %s5372_s25 = smul.u32 2304, %s6148_s22  ;;  %p6362_p7 = pnand %p5421_p3, %p55_p5 }
  0x74   : > { %s6367_s30 = scalar_select %p44_p11, %s6140_s20, %s46_s13  }
  0x75   : > { %s8817_s0 = sld [smem:[#allocation29_spill]]  ;;  %s243_s27 = scalar_lea.vmem [#allocation3], %s5371_s17 }
  0x76   : > { %s252_s12 = sshll.u32 %s243_s27, 4  ;;  %s240_s7 = scalar_lea.sflag [#allocation4], %s6356_s6  ;;  %s6374_s12 = int_to_ptr.vmem [resolvable:$true] %s252_s12 }
  0x77   : > { %p6000_p12 = pneg %p6362_p7 }
  0x7b   : > { %s6372_s16 = scalar_lea.hbm %s8817_s0, %s5372_s25  ;;  %s6003_s11 = scalar_lea.hbm %s8817_s0, 4608 }
  0x7c   : > { %s5998_s9 = scalar_lea.hbm %s6372_s16, 2304  ;;  %p6004_p2 = scmp.lt.u32.totalorder %s6372_s16, %s8817_s0 }
  0x7d   : > { %p5999_p9 = scmp.ne.s32.totalorder %s6372_s16, %s5998_s9  ;;  %p6005_p4 = scmp.lt.u32.totalorder %s6003_s11, %s5998_s9 }
  0x7e   : > { %p6007_p13 = scmp.lt.u32.totalorder %s5998_s9, %s6372_s16 }
  0x7f   : > { %p6001_p0 = pnand %p6000_p12, %p5999_p9  ;;  %p6006_p8 = por %p6005_p4, %p6004_p2 }
  0x81   : > { %p6002_p1 = pneg %p6001_p0  ;;  %p6008_p6 = por %p6007_p13, %p6006_p8 }
  0x83   : > { %p6009_p3 = pnand %p6008_p6, %p6002_p1 }
  0x85   : > { %6012 = shalt.err (!%p6009_p3)
}
  0x86   : > { %s6013_s17 = scalar_lea.vmem %s6374_s12, 2304  ;;  %s6161_s27 = smov [#allocation3]  }
  0x87   : > { %p6014_p5 = scmp.ne.s32.totalorder %s6374_s12, %s6013_s17  ;;  %s6018_s13 = sshll.u32 %s6161_s27, 4  ;;  %s6019_s13 = int_to_ptr.vmem [resolvable:$false] %s6018_s13 }
  0x88   : > { %s6020_s2 = scalar_lea.vmem %s6019_s13, 4608  ;;  %p6021_p0 = scmp.lt.s32.totalorder %s6374_s12, %s6019_s13 }
  0x89   : > { %p6016_p11 = pnand %p6014_p5, %p6000_p12  ;;  %p6022_p2 = scmp.lt.s32.totalorder %s6020_s2, %s6013_s17 }
  0x8b   : > { %p6017_p9 = pneg %p6016_p11  ;;  %p6023_p4 = por %p6022_p2, %p6021_p0 }
  0x8d   : > { %p6024_p8 = pnand %p6023_p4, %p6017_p9 }
  0x8f   : > { %6027 = shalt.err (!%p6024_p8)
}
  0x90   : > { %s8818_s9 = smov 4   ;;  %s8819_s25 = smov 64  }
  0x91   : > { %5410 = dma.hbm_to_vmem [thread:$0]  (!%p6362_p7), %s6372_s16, 2304, %s6374_s12, %s240_s7, %s8819_s25, %s8819_s25, %s8818_s9  }
  0x92   : > { %s5373_s11 = smul.u32 20, %s6356_s6  ;;  %s8820_s0 = sand.u32 1, %s6152_s23  }
  0x93   : > { %s5374_s8 = smul.u32 320, %s6148_s22  ;;  %s6419_s3 = scalar_lea.sflag [#allocation7], %s8820_s0 }
  0x94   : > { %s266_s2 = scalar_lea.vmem [#allocation6], %s5373_s11  ;;  %s6033_s16 = scalar_lea.hbm %s8692_s1, 640 }
  0x95   : > { %s6413_s13 = scalar_lea.hbm %s8692_s1, %s5374_s8  ;;  %s275_s10 = sshll.u32 %s266_s2, 4  ;;  %s6415_s10 = int_to_ptr.vmem [resolvable:$true] %s275_s10 }
  0x96   : > { %s6028_s4 = scalar_lea.hbm %s6413_s13, 320  ;;  %p6034_p3 = scmp.lt.u32.totalorder %s6413_s13, %s8692_s1 }
  0x97   : > { %p6029_p1 = scmp.ne.s32.totalorder %s6413_s13, %s6028_s4  ;;  %p6035_p5 = scmp.lt.u32.totalorder %s6033_s16, %s6028_s4 }
  0x98   : > { %p6037_p9 = scmp.lt.u32.totalorder %s6028_s4, %s6413_s13 }
  0x99   : > { %p6031_p13 = pnand %p6029_p1, %p6000_p12  ;;  %p6036_p11 = por %p6035_p5, %p6034_p3 }
  0x9b   : > { %p6032_p6 = pneg %p6031_p13  ;;  %p6038_p0 = por %p6037_p9, %p6036_p11 }
  0x9d   : > { %p6039_p2 = pnand %p6038_p0, %p6032_p6 }
  0x9f   : > { %6042 = shalt.err (!%p6039_p2)
}
  0xa0   : > { %s6043_s0 = scalar_lea.vmem %s6415_s10, 320  ;;  %s6162_s11 = smov [#allocation6]  }
  0xa1   : > { %p6044_p4 = scmp.ne.s32.totalorder %s6415_s10, %s6043_s0  ;;  %s6048_s17 = sshll.u32 %s6162_s11, 4  ;;  %s6049_s17 = int_to_ptr.vmem [resolvable:$false] %s6048_s17 }
  0xa2   : > { %s6050_s27 = scalar_lea.vmem %s6049_s17, 640  ;;  %p6051_p13 = scmp.lt.s32.totalorder %s6415_s10, %s6049_s17 }
  0xa3   : > { %p6046_p8 = pnand %p6044_p4, %p6000_p12  ;;  %p6052_p3 = scmp.lt.s32.totalorder %s6050_s27, %s6043_s0 }
  0xa5   : > { %p6047_p1 = pneg %p6046_p8  ;;  %p6053_p5 = por %p6052_p3, %p6051_p13 }
  0xa7   : > { %p6054_p11 = pnand %p6053_p5, %p6047_p1 }
  0xa9   : > { %6057 = shalt.err (!%p6054_p11)
}
  0xaa   : > { %5413 = dma.hbm_to_vmem [thread:$0]  (!%p6362_p7), %s6413_s13, 320, %s6415_s10, %s6419_s3, %s8819_s25, %s8819_s25, %s8818_s9  }
  0xab   : > { %p8821_p12 = scmp.ne.s32.totalorder %s8808_s28, 0 }
  0xad   : > { %287 = sbr.rel (%p8821_p12) target bundleno = 905 (0x389), region = 40 }
  0xb4   : > { %s6451_s4 = sand.u32 1, %s6136_s19   ;;  %p8822_p6 = scmp.ne.s32.totalorder %s8805_s26, 0 }
  0xb5   : > { %s5375_s2 = smul.u32 144, %s6451_s4  ;;  %s290_s7 = scalar_lea.sflag [#allocation4], %s6451_s4 }
  0xb7   : > { %s6455_s6 = scalar_lea.vmem [#allocation3], %s5375_s2 }
  0xb8   : > { %6111 = dma.done.wait (%p8822_p6), %s290_s7, 2304  }
  0xb9   : > { %6113 = vsyncadd (%p8822_p6), %s290_s7, 4294964992  ;;  %s298_s3 = sand.u32 1, %s6228_s24   ;;  %s5376_s28 = smul.u32 20, %s6451_s4 }
  0xba   : > { %s299_s29 = scalar_lea.sflag [#allocation7], %s298_s3 }
  0xbb   : > { %s6463_s10 = scalar_lea.vmem [#allocation6], %s5376_s28 }
  0xbc   : > { %6115 = dma.done.wait (%p8822_p6), %s299_s29, 320  }
  0xbd   : > { %6117 = vsyncadd (%p8822_p6), %s299_s29, 4294966976  ;;  %p8823_p7 = scmp.eq.s32.totalorder %s6228_s24, 0 }
  0xbf   : > { %6119 = dma.done.wait (%p8823_p7), [#allocation7], 9216   ;;  %p8824_p9 = pmov %p8823_p7 }
  0xc0   : > { %p8825_p0 = pmov %p8823_p7 }
  0xc1   : > { %6121 = vsyncadd (%p8824_p9), [#allocation7], 4294958080 }
  0xc2   : > { %6123 = dma.done.wait (%p8825_p0), [#allocation10], 4624   ;;  %p8826_p2 = pmov %p8825_p0 }
  0xc3   : > { %v8760_v0 = vmov 0   ;;  %v5486_v1 = vld [vmem:[#allocation8 + $0xc0] sm:$0xff]   ;;  %v5488_v3 = vld [vmem:[#allocation8 + $0xc8] sm:$0xff]   ;;  %v5491_v5 = vld [vmem:[#allocation8 + $0x150] sm:$0xff]   ;;  %vm617_vm0 = vsmask.f32 256 }
  0xc4   : > { %6125 = vsyncadd (%p8826_p2), [#allocation10], 4294962672  ;;  %2143 = vmatprep.subr.bf16.mxu0 %v8760_v0  ;;  %5485 = vset.pattern.permute.xlu1 %v8760_v0  ;;  %v6480_v2 = vld [vmem:[#allocation8 + $0x140] sm:$0xff]   ;;  %v5489_v4 = vld [vmem:[#allocation8 + $0x148] sm:$0xff]   ;;  %vm622_vm1 = vsmask.f32 4368 }
  0xc5   : > { %5484 = vset.pattern.permute.xlu0 %v8760_v0  ;;  %2144 = vmatpush1.bf16.msra.mxu0 %v5486_v1  ;;  %v5490_v6 = vld [vmem:[#allocation8 + $0xd0] sm:$0xff]   ;;  %v5493_v7 = vld [vmem:[#allocation8 + $0x158] sm:$0xff]   ;;  %v5495_v9 = vld [vmem:[#allocation8 + $0x160] sm:$0xff]   ;;  %vm1833_vm3 = vcmask 1046528   ;;  %vm430_vm4 = vcmask 1040384   ;;  %vm431_vm5 = vcmask 1044484  }
  0xc6   : > { %5355 = vmatprep.subr.bf16.mxu1 %v6480_v2  ;;  %2145 = vmatprep.subr.bf16.mxu0 %v8760_v0  ;;  %v5492_v8 = vld [vmem:[#allocation8 + $0xd8] sm:$0xff]   ;;  %v5494_v10 = vld [vmem:[#allocation8 + $0xe0] sm:$0xff]   ;;  %v5497_v11 = vld [vmem:[#allocation8 + $0x168] sm:$0xff]   ;;  %vm659_vm6 = vcmask 1041408   ;;  %vm660_vm7 = vsmask.f32 1280 }
  0xc7   : > { %5363 = vmatpush3.bf16.msra.mxu1 %v6480_v2  ;;  %v5496_v12 = vld [vmem:[#allocation8 + $0xe8] sm:$0xff]   ;;  %v6489_v13 = vld [vmem:[%s6455_s6 + $0xc] sm:$0xf]  ;;  %v6498_v16 = vld [vmem:[%s6455_s6 + $0x18] sm:$0xf]  ;;  %vm1063_vm10 = vcmask 1043457  }
  0xc8   : > { %5356 = vmatprep.subr.bf16.mxu1 %v5489_v4  ;;  %8827 = vst [vmem:[#allocation19_spill] sm:$0xff] %v6489_v13  ;;  %v6492_v14 = vld [vmem:[%s6455_s6 + $0x10] sm:$0xf]  ;;  %v6495_v15 = vld [vmem:[%s6455_s6 + $0x14] sm:$0xf]  ;;  %v697_v18 = vshrl.u32 %v6489_v13, 16  ;;  %vm6528_vm2 = vmor %vm617_vm0, %vm622_vm1 }
  0xc9   : > { %2146 = vmatpush1.bf16.msra.mxu0 %v5488_v3  ;;  %v6501_v17 = vld [vmem:[%s6455_s6 + $0x1c] sm:$0xf]  ;;  %v707_v19 = vshrl.u32 %v6492_v14, 16  ;;  %v710_v20 = vshll.u32 %v6492_v14, 16  ;;  %v717_v21 = vshrl.u32 %v6495_v15, 16  ;;  %v8749_v22 = vshll.u32 %v6495_v15, 16  ;;  %vm6750_vm9 = vmor %vm430_vm4, %vm431_vm5 }
  0xca   : > { %2147 = vmatprep.subr.bf16.mxu0 %v8760_v0  ;;  %v8745_v23 = vshrl.u32 %v6498_v16, 16  ;;  %v8743_v24 = vshll.u32 %v6498_v16, 16  ;;  %v8738_v25 = vshrl.u32 %v6501_v17, 16  ;;  %v8737_v26 = vshll.u32 %v6501_v17, 16  ;;  %v5498_v28 = vld [vmem:[#allocation8 + $0xf0] sm:$0xff]   ;;  %v5500_v52 = vld [vmem:[#allocation8 + $0xf8] sm:$0xff]   ;;  %vm6786_vm12 = vmand %vm659_vm6, %vm660_vm7 }
  0xcb   : > { %5364 = vmatpush3.bf16.msra.mxu1 %v5489_v4  ;;  %v6515_v27 = vrot.slane %v697_v18, 7  ;;  %v5499_v29 = vld [vmem:[#allocation8 + $0x170] sm:$0xff]   ;;  %v1179_v30 = vrot.slane %v707_v19, 7  ;;  %v1183_v31 = vrot.slane %v717_v21, 7  ;;  %v6524_v33 = vld [vmem:[%s6455_s6 + $0x20] sm:$0xf] }
  0xcc   : > { %5357 = vmatprep.subr.bf16.mxu1 %v5491_v5  ;;  %v1187_v32 = vrot.slane %v8745_v23, 7  ;;  %v1191_v36 = vrot.slane %v8738_v25, 7  ;;  %v6536_v37 = vld [vmem:[%s6455_s6 + $0x24] sm:$0xf]  ;;  %v8736_v38 = vshrl.u32 %v6524_v33, 16  ;;  %v8735_v39 = vshll.u32 %v6524_v33, 16 }
  0xcd   : > { %2148 = vmatpush1.bf16.msra.mxu0 %v5490_v6  ;;  %8828 = vst [vmem:[#allocation20_spill] sm:$0xff] %v6515_v27  ;;  %v1178_v35 = vrot.slane %v6515_v27, 4  ;;  %v1180_v40 = vor.u32 %v1179_v30, %v710_v20  ;;  %v1182_v41 = vrot.slane %v1179_v30, 4  ;;  %v1184_v42 = vor.u32 %v1183_v31, %v8749_v22  ;;  %v5501_v53 = vld [vmem:[#allocation8 + $0x178] sm:$0xff]   ;;  %v6564_v58 = vld [vmem:[%s6455_s6 + $0x28] sm:$0xf] }
  0xce   : > { %2149 = vmatprep.subr.bf16.mxu0 %v8760_v0  ;;  %v1186_v43 = vrot.slane %v1183_v31, 4  ;;  %v1188_v44 = vor.u32 %v1187_v32, %v8743_v24  ;;  %v1190_v45 = vrot.slane %v1187_v32, 4  ;;  %v1192_v46 = vor.u32 %v1191_v36, %v8737_v26  ;;  %v6567_v59 = vld [vmem:[%s6455_s6 + $0x2c] sm:$0xf]  ;;  %v6576_v1 = vld [vmem:[%s6455_s6 + $0x30] sm:$0xf] }
  0xcf   : > { %5365 = vmatpush3.bf16.msra.mxu1 %v5491_v5  ;;  %v8734_v47 = vshrl.u32 %v6536_v37, 16  ;;  %v1181_v48 = vsel %vm6528_vm2, %v1178_v35, %v1180_v40  ;;  %v1185_v49 = vsel %vm6528_vm2, %v1182_v41, %v1184_v42  ;;  %v8733_v50 = vshll.u32 %v6536_v37, 16  ;;  %v7038_v27 = vld [vmem:[%s6455_s6 + $0x80] sm:$0xf]  ;;  %s5377_s24 = smul.u32 288, %s6451_s4  ;;  %s4719_s8 = scalar_lea.sflag [#allocation5], %s6451_s4 }
  0xd0   : > { %5358 = vmatprep.subr.bf16.mxu1 %v5493_v7  ;;  %v1194_v51 = vrot.slane %v1191_v36, 4  ;;  %v1189_v54 = vsel %vm6528_vm2, %v1186_v43, %v1188_v44  ;;  %v1193_v55 = vsel %vm6528_vm2, %v1190_v45, %v1192_v46  ;;  %1350 = vst [vmem:[#allocation2 + $0x50] sm:$0xf] %v1181_v48  ;;  %1351 = vst [vmem:[#allocation2 + $0x5c] sm:$0xf] %v1185_v49  ;;  %v1195_v56 = vrot.slane %v8736_v38, 7 }
  0xd1   : > { %2150 = vmatpush1.bf16.msra.mxu0 %v5492_v8  ;;  %v1199_v57 = vrot.slane %v8734_v47, 7  ;;  %1352 = vst [vmem:[#allocation2 + $0x68] sm:$0xf] %v1189_v54  ;;  %1353 = vst [vmem:[#allocation2 + $0x74] sm:$0xf] %v1193_v55  ;;  %v8730_v63 = vshrl.u32 %v6564_v58, 16 }
  0xd2   : > { %2151 = vmatprep.subr.bf16.mxu0 %v8760_v0  ;;  %v1196_v60 = vor.u32 %v1195_v56, %v8735_v39  ;;  %v1198_v61 = vrot.slane %v1195_v56, 4  ;;  %v8728_v3 = vshll.u32 %v6564_v58, 16  ;;  %v8727_v4 = vshrl.u32 %v6567_v59, 16  ;;  %v5507_v46 = vld [vmem:[#allocation8 + $0x108] sm:$0xff]   ;;  %v6617_v54 = vld [vmem:[%s6455_s6 + $0x38] sm:$0xf] }
  0xd3   : > { %5366 = vmatpush3.bf16.msra.mxu1 %v5493_v7  ;;  %v1200_v62 = vor.u32 %v1199_v57, %v8733_v50  ;;  %v8726_v5 = vshll.u32 %v6567_v59, 16  ;;  %v1202_v6 = vrot.slane %v1199_v57, 4  ;;  %v6582_v7 = vld [vmem:[%s6455_s6 + $0x34] sm:$0xf]  ;;  %v5510_v55 = vld [vmem:[#allocation8 + $0x110] sm:$0xff]   ;;  %vm652_vm5 = vcmask 1043456  }
  0xd4   : > { %5359 = vmatprep.subr.bf16.mxu1 %v5495_v9  ;;  %v1197_v8 = vsel %vm6528_vm2, %v1194_v51, %v1196_v60  ;;  %v8723_v30 = vshrl.u32 %v6582_v7, 16  ;;  %v8718_v31 = vshll.u32 %v6582_v7, 16  ;;  %v6622_v57 = vld [vmem:[%s6455_s6 + $0x3c] sm:$0xf]  ;;  %v8716_v60 = vshrl.u32 %v6617_v54, 16  ;;  %v5526_v38 = vld [vmem:[#allocation8 + $0x38] sm:$0xff]  }
  0xd5   : > { %2152 = vmatpush1.bf16.msra.mxu0 %v5494_v10  ;;  %v1203_v10 = vrot.slane %v8730_v63, 7  ;;  %1354 = vst [vmem:[#allocation2 + $0x80] sm:$0xf] %v1197_v8  ;;  %vm665_vm8 = vsmask.f32 5392  ;;  %v4400_v34 = vld [vmem:[#allocation11 + $0x30] sm:$0xff] }
  0xd6   : > { %2153 = vmatprep.subr.bf16.mxu0 %v8760_v0  ;;  %vm1064_vm11 = vsmask.f32 7942  ;;  %vm6822_vm13 = vmor %vm660_vm7, %vm665_vm8  ;;  %vm1140_vm15 = vsmask.f32 3328  ;;  %vm1141_vm1 = vsmask.f32 7440 }
  0xd7   : > { %5367 = vmatpush3.bf16.msra.mxu1 %v5495_v9  ;;  %v1201_v9 = vsel %vm6528_vm2, %v1198_v61, %v1200_v62  ;;  %v1204_v32 = vor.u32 %v1203_v10, %v8728_v3  ;;  %v1206_v35 = vrot.slane %v1203_v10, 4  ;;  %v6601_v40 = vld [vmem:[#allocation2 + $0x50] ss:$12 sps:$4 sm:$0xff]   ;;  %v8714_v61 = vshll.u32 %v6617_v54, 16  ;;  %vm6861_vm14 = vmand %vm1063_vm10, %vm1064_vm11  ;;  %s8467_s26 = scalar_lea.vmem [#allocation12], %s5377_s24  ;;  %s5378_s9 = smul.u32 4608, %s6144_s21 }
  0xd8   : > { %5360 = vmatprep.subr.bf16.mxu1 %v5497_v11  ;;  %1355 = vst [vmem:[#allocation2 + $0x8c] sm:$0xf] %v1201_v9  ;;  %8831 = vst [vmem:[#allocation21_spill] sm:$0xff] %v6601_v40  ;;  %v5503_v42 = vld [vmem:[#allocation2 + $0x68] ss:$12 sps:$4 sm:$0xff]   ;;  %v8705_v45 = vrot.slane %v6601_v40, 1 }
  0xd9   : > { %2154 = vmatpush1.bf16.msra.mxu0 %v5496_v12  ;;  %v5504_v12 = vld [vmem:[#allocation8 + $0x100] sm:$0xff]   ;;  %v1205_v43 = vsel %vm6528_vm2, %v1202_v6, %v1204_v32  ;;  %v8709_v9 = vshrl.u32 %v6622_v57, 16  ;;  %v8707_v10 = vshll.u32 %v6622_v57, 16  ;;  %vm653_vm6 = vsmask.f32 7938  ;;  %vm7192_vm7 = vmand %vm430_vm4, %vm617_vm0  ;;  %s4734_s25 = sshll.u32 %s8467_s26, 4  ;;  %s8639_s12 = scalar_lea.hbm %s8696_s5, %s5378_s9  ;;  %s8641_s25 = int_to_ptr.vmem [resolvable:$true] %s4734_s25 }
  0xda   : > { %2155 = vmatprep.subr.bf16.mxu0 %v8760_v0  ;;  %1356 = vst [vmem:[#allocation2 + $0x98] sm:$0xf] %v1205_v43  ;;  %vm7235_vm0 = vmor %vm1140_vm15, %vm1141_vm1  ;;  %vm4436_vm1 = vcmp.ne.f32.partialorder %v4400_v34, 0.0  ;;  %s6058_s21 = scalar_lea.vmem %s8641_s25, 4608  ;;  %s6164_s0 = smov [#allocation12]  }
  0xdb   : > { %5368 = vmatpush3.bf16.msra.mxu1 %v5497_v11  ;;  %v8725_v11 = vshrl.u32 %v6576_v1, 16  ;;  %vm7256_vm4 = vmand %vm652_vm5, %vm653_vm6  ;;  %p6059_p4 = scmp.ne.s32.totalorder %s8641_s25, %s6058_s21  ;;  %s6062_s11 = sshll.u32 %s6164_s0, 4  ;;  %s6063_s11 = int_to_ptr.vmem [resolvable:$false] %s6062_s11 }
  0xdc   : > { %5361 = vmatprep.subr.bf16.mxu1 %v5499_v29  ;;  %s6064_s17 = scalar_lea.vmem %s6063_s11, 9216  ;;  %p6065_p13 = scmp.lt.s32.totalorder %s8641_s25, %s6063_s11 }
  0xdd   : > { %2156 = vmatpush1.bf16.msra.mxu0 %v5498_v28  ;;  %v1207_v28 = vrot.slane %v8727_v4, 7  ;;  %v1211_v36 = vrot.slane %v8725_v11, 7  ;;  %p6060_p8 = pnand %p6059_p4, %p6348_p10  ;;  %p6066_p3 = scmp.lt.s32.totalorder %s6064_s17, %s6058_s21 }
  0xde   : > { %2157 = vmatprep.subr.bf16.mxu0 %v8760_v0 }
  0xdf   : > { %5369 = vmatpush3.bf16.msra.mxu1 %v5499_v29  ;;  %v8724_v29 = vshll.u32 %v6576_v1, 16  ;;  %v1208_v41 = vor.u32 %v1207_v28, %v8726_v5  ;;  %v1210_v49 = vrot.slane %v1207_v28, 4  ;;  %v1214_v51 = vrot.slane %v1211_v36, 4  ;;  %v5505_v6 = vld [vmem:[#allocation2 + $0x80] ss:$12 sps:$4 sm:$0xff]   ;;  %p6061_p1 = pneg %p6060_p8  ;;  %p6067_p5 = por %p6066_p3, %p6065_p13 }
  0xe0   : > { %5362 = vmatprep.subr.bf16.mxu1 %v5501_v53  ;;  %v1219_v28 = vrot.slane %v8716_v60, 7  ;;  %v1859_v32 = vrot.slane %v5505_v6, 1 }
  0xe1   : > { %2158 = vmatpush1.bf16.msra.mxu0 %v5500_v52  ;;  %v1212_v44 = vor.u32 %v1211_v36, %v8724_v29  ;;  %v1209_v48 = vsel %vm6528_vm2, %v1206_v35, %v1208_v41  ;;  %v1853_v52 = vrot.slane %v5503_v42, 1  ;;  %v5506_v35 = vld [vmem:[#allocation8] sm:$0xff]   ;;  %v6639_v41 = vld [vmem:[%s6455_s6 + $0x40] sm:$0xf]  ;;  %v6642_v42 = vld [vmem:[%s6455_s6 + $0x44] sm:$0xf]  ;;  %p6068_p11 = pnand %p6067_p5, %p6061_p1 }
  0xe2   : > { %2159 = vmatprep.subr.bf16.mxu0 %v8760_v0  ;;  %1357 = vst [vmem:[#allocation2 + $0xa4] sm:$0xf] %v1209_v48  ;;  %v1220_v43 = vor.u32 %v1219_v28, %v8714_v61  ;;  %v8706_v48 = vshrl.u32 %v6639_v41, 16 }
  0xe3   : > { %5370 = vmatpush3.bf16.msra.mxu1 %v5501_v53  ;;  %v1215_v53 = vrot.slane %v8723_v30, 7  ;;  %v1213_v56 = vsel %vm6528_vm2, %v1210_v49, %v1212_v44  ;;  %v1854_v62 = vsel %vm1833_vm3, %v8705_v45, %v1853_v52  ;;  %v1222_v44 = vrot.slane %v1219_v28, 4  ;;  %v5508_v45 = vld [vmem:[#allocation8 + $0x8] sm:$0xff]  }
  0xe4   : > { %2716 = vmatprep.subr.bf16.mxu1 %v8760_v0  ;;  %1358 = vst [vmem:[#allocation2 + $0xb0] sm:$0xf] %v1213_v56  ;;  %5219 = vmatprep.mubr.bf16.mxu1 %v1854_v62  ;;  %v1860_v49 = vsel %vm1833_vm3, %v1853_v52, %v1859_v32  ;;  %v8711_v56 = vshll.u32 %v6639_v41, 16  ;;  %v8710_v62 = vshll.u32 %v6642_v42, 16  ;;  %v1227_v52 = vrot.slane %v8706_v48, 7 }
  0xe5   : > { %2160 = vmatpush1.bf16.msra.mxu0 %v5504_v12  ;;  %v1216_v8 = vor.u32 %v1215_v53, %v8718_v31  ;;  %v1218_v12 = vrot.slane %v1215_v53, 4  ;;  %v5513_v53 = vld [vmem:[#allocation8 + $0x118] sm:$0xff]  }
  0xe6   : > { %2161 = vmatprep.subr.bf16.mxu0 %v8760_v0  ;;  %5220 = vmatmul.mubr.bf16.vlgmr.msra.gmra.mrb[0].mxu1 %v1860_v49  ;;  %v1228_v49 = vor.u32 %v1227_v52, %v8711_v56  ;;  %v1230_v48 = vrot.slane %v1227_v52, 4 }
  0xe7   : > { %v1217_v36 = vsel %vm6528_vm2, %v1214_v51, %v1216_v8  ;;  %v8708_v51 = vshrl.u32 %v6642_v42, 16  ;;  %v1221_v8 = vsel %vm6528_vm2, %v1218_v12, %v1220_v43  ;;  %2717 = vmatpush1.bf16.msra.mxu1 %v5506_v35  ;;  %v5512_v35 = vld [vmem:[#allocation8 + $0x10] sm:$0xff]  }
  0xe8   : > { %1359 = vst [vmem:[#allocation2 + $0xbc] sm:$0xf] %v1217_v36  ;;  %1360 = vst [vmem:[#allocation2 + $0xc8] sm:$0xf] %v1221_v8  ;;  %2718 = vmatprep.subr.bf16.mxu1 %v8760_v0  ;;  %v6670_v8 = vld [vmem:[%s6455_s6 + $0x48] sm:$0xf] }
  0xe9   : > { %2162 = vmatpush1.bf16.msra.mxu0 %v5507_v46  ;;  %v1223_v46 = vrot.slane %v8709_v9, 7  ;;  %v5509_v6 = vld [vmem:[#allocation2 + $0x98] ss:$12 sps:$4 sm:$0xff]  }
  0xea   : > { %2163 = vmatprep.subr.bf16.mxu0 %v8760_v0  ;;  %v1865_v12 = vrot.slane %v5509_v6, 1  ;;  %v6676_v9 = vld [vmem:[%s6455_s6 + $0x4c] sm:$0xf] }
  0xeb   : > { %v1224_v28 = vor.u32 %v1223_v46, %v8707_v10  ;;  %v1226_v36 = vrot.slane %v1223_v46, 4  ;;  %v5516_v46 = vld [vmem:[#allocation8 + $0x120] sm:$0xff]   ;;  %2719 = vmatpush1.bf16.msra.mxu1 %v5508_v45 }
  0xec   : > { %2720 = vmatprep.subr.bf16.mxu1 %v8760_v0 }
  0xed   : > { %2164 = vmatpush1.bf16.msra.mxu0 %v5510_v55  ;;  %v1231_v55 = vrot.slane %v8708_v51, 7  ;;  %v1225_v43 = vsel %vm6528_vm2, %v1222_v44, %v1224_v28  ;;  %v1866_v51 = vsel %vm1833_vm3, %v1859_v32, %v1865_v12  ;;  %v1229_v6 = vsel %vm6528_vm2, %v1226_v36, %v1228_v49  ;;  %v5514_v49 = vld [vmem:[#allocation8 + $0x18] sm:$0xff]  }
  0xee   : > { %2165 = vmatprep.subr.bf16.mxu0 %v8760_v0  ;;  %1361 = vst [vmem:[#allocation2 + $0xd4] sm:$0xf] %v1225_v43  ;;  %v8712_v44 = vshrl.u32 %v6670_v8, 16  ;;  %v8715_v28 = vshll.u32 %v6670_v8, 16  ;;  %5223 = vmatprep.mubr.bf16.mxu1 %v1866_v51  ;;  %1362 = vst [vmem:[#allocation2 + $0xe0] sm:$0xf] %v1229_v6 }
  0xef   : > { %v1232_v10 = vor.u32 %v1231_v55, %v8710_v62  ;;  %v5511_v52 = vld [vmem:[#allocation2 + $0xb0] ss:$12 sps:$4 sm:$0xff]   ;;  %v8713_v32 = vshrl.u32 %v6676_v9, 16  ;;  %v1234_v36 = vrot.slane %v1231_v55, 4  ;;  %2721 = vmatpush1.bf16.msra.mxu1 %v5512_v35  ;;  %v5518_v35 = vld [vmem:[#allocation8 + $0x20] sm:$0xff]  }
  0xf0   : > { %v1235_v45 = vrot.slane %v8712_v44, 7  ;;  %v1871_v51 = vrot.slane %v5511_v52, 1  ;;  %v6694_v6 = vld [vmem:[%s6455_s6 + $0x54] sm:$0xf]  ;;  %2722 = vmatprep.subr.bf16.mxu1 %v8760_v0 }
  0xf1   : > { %2166 = vmatpush1.bf16.msra.mxu0 %v5513_v53  ;;  %v1233_v43 = vsel %vm6528_vm2, %v1230_v48, %v1232_v10  ;;  %v8717_v53 = vshll.u32 %v6676_v9, 16  ;;  %v1239_v10 = vrot.slane %v8713_v32, 7  ;;  %v6691_v48 = vld [vmem:[%s6455_s6 + $0x50] sm:$0xf]  ;;  %v8720_v61 = vshrl.u32 %v6694_v6, 16 }
  0xf2   : > { %2167 = vmatprep.subr.bf16.mxu0 %v8760_v0  ;;  %1363 = vst [vmem:[#allocation2 + $0xec] sm:$0xf] %v1233_v43  ;;  %v5519_v62 = vld [vmem:[#allocation8 + $0x128] sm:$0xff]   ;;  %v1236_v43 = vor.u32 %v1235_v45, %v8715_v28  ;;  %v1238_v55 = vrot.slane %v1235_v45, 4  ;;  %v8722_v56 = vshrl.u32 %v6691_v48, 16  ;;  %v8721_v44 = vshll.u32 %v6691_v48, 16 }
  0xf3   : > { %v1872_v52 = vsel %vm1833_vm3, %v1865_v12, %v1871_v51  ;;  %v1240_v32 = vor.u32 %v1239_v10, %v8717_v53  ;;  %v1242_v60 = vrot.slane %v1239_v10, 4  ;;  %v6715_v31 = vrot.slane %v8720_v61, 7  ;;  %2723 = vmatpush1.bf16.msra.mxu1 %v5514_v49  ;;  %v6736_v49 = vld [vmem:[%s6455_s6 + $0x8] sm:$0xf] }
  0xf4   : > { %5224 = vmatmul.mubr.bf16.gmra.mrb[4].mxu1 %v1872_v52  ;;  %v1237_v28 = vsel %vm6528_vm2, %v1234_v36, %v1236_v43  ;;  %v1243_v12 = vrot.slane %v8722_v56, 7  ;;  %v5522_v52 = vld [vmem:[#allocation8 + $0x130] sm:$0xff]   ;;  %2724 = vmatprep.subr.bf16.mxu1 %v8760_v0  ;;  %8833 = vst [vmem:[#allocation23_spill] sm:$0xff] %v6736_v49 }
  0xf5   : > { %2168 = vmatpush1.bf16.msra.mxu0 %v5516_v46  ;;  %v8719_v46 = vshll.u32 %v6694_v6, 16  ;;  %v5515_v45 = vld [vmem:[#allocation2 + $0xc8] ss:$12 sps:$4 sm:$0xff]   ;;  %v1241_v53 = vsel %vm6528_vm2, %v1238_v55, %v1240_v32  ;;  %1364 = vst [vmem:[#allocation2 + $0xf8] sm:$0xf] %v1237_v28 }
  0xf6   : > { %2169 = vmatprep.subr.bf16.mxu0 %v8760_v0  ;;  %v1877_v36 = vrot.slane %v5515_v45, 1  ;;  %1365 = vst [vmem:[#allocation2 + $0x104] sm:$0xf] %v1241_v53  ;;  %v1244_v10 = vor.u32 %v1243_v12, %v8721_v44  ;;  %v1246_v43 = vrot.slane %v1243_v12, 4  ;;  %v6730_v53 = vld [vmem:[%s6455_s6] sm:$0xf] }
  0xf7   : > { %v1248_v28 = vor.u32 %v6715_v31, %v8719_v46  ;;  %v6733_v45 = vld [vmem:[%s6455_s6 + $0x4] sm:$0xf]  ;;  %v6745_v61 = vld [vmem:[%s6463_s10 + $0x8] sm:$0x1]  ;;  %2725 = vmatpush1.bf16.msra.mxu1 %v5518_v35  ;;  %v668_v35 = vshrl.u32 %v6730_v53, 16  ;;  %v671_v3 = vshll.u32 %v6730_v53, 16 }
  0xf8   : > { %v1878_v55 = vsel %vm1833_vm3, %v1871_v51, %v1877_v36  ;;  %8832 = vst [vmem:[#allocation22_spill] sm:$0xff] %v6733_v45  ;;  %v6742_v51 = vld [vmem:[%s6463_s10 + $0x4] sm:$0xf]  ;;  %393 = vst [vmem:[#allocation2 + $0x1c] sm:$0x1] %v6745_v61  ;;  %v8731_v56 = vshrl.u32 %v6745_v61, 16  ;;  %2726 = vmatprep.subr.bf16.mxu1 %v8760_v0 }
  0xf9   : > { %2170 = vmatpush1.bf16.msra.mxu0 %v5519_v62  ;;  %v6719_v32 = vld [vmem:[#allocation2 + $0xe0] ss:$12 sps:$4 sm:$0xff]   ;;  %v1245_v62 = vsel %vm6528_vm2, %v1242_v60, %v1244_v10  ;;  %5227 = vmatprep.mubr.bf16.mxu1 %v1878_v55  ;;  %v1249_v46 = vsel %vm6528_vm2, %v1246_v43, %v1248_v28  ;;  %v433_v60 = vrot.slane %v6730_v53, 7  ;;  %v438_v43 = vrot.slane %v6736_v49, 7  ;;  %392 = vst [vmem:[#allocation2 + $0x10] sm:$0xf] %v6742_v51 }
  0xfa   : > { %2171 = vmatprep.subr.bf16.mxu0 %v8760_v0  ;;  %v1883_v12 = vrot.slane %v6719_v32, 1  ;;  %1366 = vst [vmem:[#allocation2 + $0x110] sm:$0xf] %v1245_v62  ;;  %1367 = vst [vmem:[#allocation2 + $0x11c] sm:$0xf] %v1249_v46  ;;  %v5525_v10 = vld [vmem:[#allocation8 + $0x138] sm:$0xff]  }
  0xfb   : > { %v435_v32 = vrot.slane %v6733_v45, 7  ;;  %v441_v28 = vrot.slane %v6489_v13, 7  ;;  %v8729_v55 = vshrl.u32 %v6742_v51, 16  ;;  %v434_v62 = vrot.slane %v433_v60, 4  ;;  %577 = vst [vmem:[#allocation2 + $0x1c] sm:$0xe] %v433_v60 }
  0xfc   : > { %v1884_v46 = vsel %vm1833_vm3, %v1877_v36, %v1883_v12  ;;  %v8732_v30 = vshll.u32 %v6745_v61, 16  ;;  %v440_v11 = vrot.slane %v438_v43, 4  ;;  %v644_v60 = vrot.slane %v8731_v56, 7  ;;  %v5524_v56 = vld [vmem:[#allocation8 + $0x30] sm:$0xff]  }
  0xfd   : > { %2172 = vmatpush1.bf16.msra.mxu0 %v5522_v52  ;;  %v5520_v52 = vld [vmem:[#allocation8 + $0x28] sm:$0xff]   ;;  %5228 = vmatmul.mubr.bf16.gmra.mrb[8].mxu1 %v1884_v46  ;;  %v437_v29 = vrot.slane %v435_v32, 4  ;;  %v6767_v5 = vrot.slane %v8729_v55, 7  ;;  %v5521_v36 = vld [vmem:[#allocation2 + $0xf8] ss:$12 sps:$4 sm:$0xff]   ;;  %v436_v4 = vsel %vm6750_vm9, %v434_v62, %v435_v32  ;;  %v670_v63 = vrot.slane %v668_v35, 6 }
  0xfe   : > { %2173 = vmatprep.subr.bf16.mxu0 %v8760_v0  ;;  %v442_v55 = vsel %vm6750_vm9, %v440_v11, %v441_v28  ;;  %578 = vst [vmem:[#allocation2 + $0x28] sm:$0xf] %v436_v4  ;;  %v662_v62 = vld [vmem:[#allocation2 + $0x18] sm:$0x3]  ;;  %2727 = vmatpush1.bf16.msra.mxu1 %v5520_v52  ;;  %v1889_v53 = vrot.slane %v5521_v36, 1  ;;  %v673_v4 = vrot.slane %v671_v3, 7 }
  0xff   : > { %v439_v46 = vsel %vm6750_vm9, %v437_v29, %v438_v43  ;;  %v640_v32 = vrot.slane %v6767_v5, 4  ;;  %580 = vst [vmem:[#allocation2 + $0x40] sm:$0xf] %v442_v55  ;;  %v8836_v29 = vmov 0  ;;  %v8742_v11 = vshrl.u32 %v6733_v45, 16  ;;  %2728 = vmatprep.subr.bf16.mxu1 %v8760_v0 }
 0x100   : > { %579 = vst [vmem:[#allocation2 + $0x34] sm:$0xf] %v439_v46  ;;  %v8837_v29 = vsel %vm6786_vm12, 4294967295, %v8836_v29  ;;  %v6792_v43 = vld [vmem:[%s6455_s6 + $0x58] sm:$0xf]  ;;  %v8740_v55 = vshll.u32 %v6733_v45, 16  ;;  %v674_v47 = vor.u32 %v673_v4, %v670_v63 }
 0x101   : > { %2174 = vmatpush1.bf16.msra.mxu0 %v5525_v10  ;;  %v647_v10 = vor.u32 %v8732_v30, %v644_v60  ;;  %8838 = vst [vmem:[#allocation24_spill] sm:$0xff] %v8837_v29  ;;  %v8741_v52 = vshrl.u32 %v6736_v49, 16  ;;  %v8739_v36 = vshll.u32 %v6736_v49, 16  ;;  %v699_v60 = vrot.slane %v697_v18, 6  ;;  %v6802_v46 = vld [vmem:[%s6455_s6 + $0x5c] sm:$0xf] }
 0x102   : > { %5199 = vmatprep.subr.bf16.mxu0 %v6480_v2  ;;  %v1890_v30 = vsel %vm1833_vm3, %v1883_v12, %v1889_v53  ;;  %v6805_v50 = vld [vmem:[#allocation2 + $0x110] ss:$12 sps:$4 sm:$0xff]   ;;  %v679_v39 = vrot.slane %v8742_v11, 6  ;;  %v682_v18 = vrot.slane %v8740_v55, 7  ;;  %2729 = vmatpush1.bf16.msra.mxu1 %v5524_v56  ;;  %v8755_v56 = vshll.u32 %v6792_v43, 16  ;;  %v5857_v29 = vld [vmem:[#allocation8 + $0x140] sm:$0xff]  }
 0x103   : > { %v648_v2 = vsel %vm6528_vm2, %v640_v32, %v647_v10  ;;  %5231 = vmatprep.mubr.bf16.mxu1 %v1890_v30  ;;  %v689_v12 = vrot.slane %v8741_v52, 6  ;;  %v692_v25 = vrot.slane %v8739_v36, 7  ;;  %v8748_v32 = vrot.slane %v6805_v50, 1  ;;  %2730 = vmatprep.subr.bf16.mxu1 %v8760_v0  ;;  %v6842_v11 = vld [vmem:[%s6455_s6 + $0x60] sm:$0xf] }
 0x104   : > { %v663_v26 = vsel %vm6786_vm12, %v648_v2, %v662_v62  ;;  %v675_v30 = vrot.slane %v674_v47, 4  ;;  %v8744_v62 = vshll.u32 %v6489_v13, 16  ;;  %v6827_v10 = vrot.slane %v668_v35, 7 }
 0x105   : > { %664 = vst [vmem:[#allocation2 + $0x18] sm:$0x3] %v663_v26  ;;  %v683_v4 = vor.u32 %v682_v18, %v679_v39  ;;  %v693_v2 = vor.u32 %v692_v25, %v689_v12  ;;  %v8747_v36 = vshrl.u32 %v6792_v43, 16  ;;  %v1896_v26 = vsel %vm1833_vm3, %v1889_v53, %v8748_v32  ;;  %v6845_v39 = vld [vmem:[%s6455_s6 + $0x64] sm:$0xf] }
 0x106   : > { %8841 = vst [vmem:[#allocation25_spill] sm:$0xff] %v6827_v10  ;;  %v702_v55 = vrot.slane %v8744_v62, 7  ;;  %v6838_v52 = vor.u32 %v6827_v10, %v671_v3  ;;  %v8746_v35 = vshrl.u32 %v6802_v46, 16  ;;  %5232 = vmatmul.mubr.bf16.gmra.mrb[12].mxu1 %v1896_v26  ;;  %v8752_v53 = vshll.u32 %v6802_v46, 16  ;;  %v5533_v26 = vld [vmem:[#allocation8 + $0x40] sm:$0xff]  }
 0x107   : > { %v684_v25 = vsel %vm6822_vm13, %v675_v30, %v683_v4  ;;  %v685_v18 = vrot.slane %v683_v4, 4  ;;  %v695_v12 = vrot.slane %v693_v2, 4  ;;  %2731 = vmatpush1.bf16.msra.mxu1 %v5526_v38  ;;  %v1250_v3 = vrot.slane %v6715_v31, 4 }
 0x108   : > { %v6850_v24 = vor.u32 %v702_v55, %v699_v60  ;;  %1069 = vst [vmem:[#allocation2 + $0x24] sm:$0xf] %v684_v25  ;;  %v1251_v62 = vrot.slane %v8747_v36, 7  ;;  %v1255_v23 = vrot.slane %v8746_v35, 7  ;;  %v8842_v4 = vmov 0  ;;  %2732 = vmatprep.subr.bf16.mxu1 %v8760_v0 }
 0x109   : > { %v694_v30 = vsel %vm6822_vm13, %v685_v18, %v693_v2  ;;  %v8843_v4 = vsel %vm6861_vm14, 4294967295, %v8842_v4  ;;  %v8750_v38 = vshrl.u32 %v6842_v11, 16  ;;  %v8754_v31 = vshll.u32 %v6842_v11, 16 }
 0x10a   : > { %8844 = vst [vmem:[#allocation26_spill] sm:$0xff] %v8843_v4  ;;  %v8751_v55 = vshrl.u32 %v6845_v39, 16  ;;  %v704_v60 = vsel %vm6822_vm13, %v695_v12, %v6850_v24  ;;  %1070 = vst [vmem:[#allocation2 + $0x30] sm:$0xf] %v694_v30  ;;  %v1252_v2 = vor.u32 %v1251_v62, %v8755_v56  ;;  %v1254_v25 = vrot.slane %v1251_v62, 4 }
 0x10b   : > { %v1256_v18 = vor.u32 %v1255_v23, %v8752_v53  ;;  %1071 = vst [vmem:[#allocation2 + $0x3c] sm:$0xf] %v704_v60  ;;  %v8753_v36 = vshll.u32 %v6845_v39, 16  ;;  %v1258_v32 = vrot.slane %v1255_v23, 4  ;;  %v1259_v22 = vrot.slane %v8750_v38, 7  ;;  %2733 = vmatpush1.bf16.msra.mxu1 %v5533_v26  ;;  %v5534_v23 = vld [vmem:[#allocation8 + $0x48] sm:$0xff]  }
 0x10c   : > { %v1066_v35 = vld [vmem:[#allocation2 + $0x18] sm:$0xe]  ;;  %v6881_v12 = vrot.slane %v8751_v55, 7  ;;  %v1253_v30 = vsel %vm6528_vm2, %v1250_v3, %v1252_v2  ;;  %v443_v38 = vrot.slane %v441_v28, 4  ;;  %2734 = vmatprep.subr.bf16.mxu1 %v8760_v0  ;;  %v6899_v3 = vld [vmem:[%s6455_s6 + $0x68] sm:$0xf] }
 0x10d   : > { %v1067_v62 = vsel %vm6861_vm14, %v674_v47, %v1066_v35  ;;  %v1257_v60 = vsel %vm6528_vm2, %v1254_v25, %v1256_v18  ;;  %1368 = vst [vmem:[#allocation2 + $0x128] sm:$0xf] %v1253_v30  ;;  %v1260_v55 = vor.u32 %v1259_v22, %v8754_v31  ;;  %v1262_v53 = vrot.slane %v1259_v22, 4  ;;  %v6902_v26 = vld [vmem:[%s6455_s6 + $0x6c] sm:$0xf] }
 0x10e   : > { %1068 = vst [vmem:[#allocation2 + $0x18] sm:$0xe] %v1067_v62  ;;  %1369 = vst [vmem:[#allocation2 + $0x134] sm:$0xf] %v1257_v60  ;;  %v1264_v47 = vor.u32 %v6881_v12, %v8753_v36  ;;  %v444_v35 = vrot.slane %v6492_v14, 7  ;;  %v8756_v28 = vrot.slane %v6495_v15, 7 }
 0x10f   : > { %v705_v2 = vrot.slane %v6850_v24, 4  ;;  %v709_v25 = vrot.slane %v707_v19, 6  ;;  %v712_v22 = vrot.slane %v710_v20, 7  ;;  %v6911_v18 = vld [vmem:[%s6455_s6 + $0x70] sm:$0xf]  ;;  %v1261_v62 = vsel %vm6528_vm2, %v1258_v32, %v1260_v55  ;;  %v5540_v31 = vld [vmem:[#allocation8 + $0x50] sm:$0xff]   ;;  %2735 = vmatpush1.bf16.msra.mxu1 %v5534_v23 }
 0x110   : > { %v1265_v30 = vsel %vm6528_vm2, %v1262_v53, %v1264_v47  ;;  %v445_v60 = vsel %vm6750_vm9, %v443_v38, %v444_v35  ;;  %v446_v36 = vrot.slane %v444_v35, 4  ;;  %v6919_v24 = vld [vmem:[#allocation2 + $0x24] sm:$0xff]  ;;  %1370 = vst [vmem:[#allocation2 + $0x140] sm:$0xf] %v1261_v62  ;;  %v719_v19 = vrot.slane %v717_v21, 6  ;;  %2736 = vmatprep.subr.bf16.mxu1 %v8760_v0 }
 0x111   : > { %1371 = vst [vmem:[#allocation2 + $0x14c] sm:$0xf] %v1265_v30  ;;  %581 = vst [vmem:[#allocation2 + $0x4c] sm:$0xf] %v445_v60  ;;  %v713_v14 = vor.u32 %v712_v22, %v709_v25  ;;  %v8845_v20 = vshll.u32 %v6495_v15, 16  ;;  %v8758_v53 = vshrl.u32 %v6899_v3, 16 }
 0x112   : > { %v448_v38 = vsel %vm6750_vm9, %v446_v36, %v8756_v28  ;;  %v8759_v55 = vshll.u32 %v6899_v3, 16  ;;  %v8757_v23 = vshrl.u32 %v6902_v26, 16  ;;  %v8762_v47 = vshll.u32 %v6902_v26, 16  ;;  %v6934_v21 = vld [vmem:[#allocation2 + $0x34] ss:$12 sps:$4 sm:$0xff]   ;;  %v5541_v36 = vld [vmem:[#allocation8 + $0x58] sm:$0xff]  }
 0x113   : > { %v722_v32 = vrot.slane %v8845_v20, 7  ;;  %v6936_v35 = vld [vmem:[#allocation2 + $0x30] ss:$12 sps:$4 sm:$0xff]   ;;  %582 = vst [vmem:[#allocation2 + $0x58] sm:$0xf] %v448_v38  ;;  %v714_v25 = vsel %vm6822_vm13, %v705_v2, %v713_v14  ;;  %v715_v22 = vrot.slane %v713_v14, 4  ;;  %2737 = vmatpush1.bf16.msra.mxu1 %v5540_v31 }
 0x114   : > { %1072 = vst [vmem:[#allocation2 + $0x48] sm:$0xf] %v714_v25  ;;  %v1266_v30 = vrot.slane %v6881_v12, 4  ;;  %v1267_v60 = vrot.slane %v8758_v53, 7  ;;  %v6947_v20 = vrot.slane %v8757_v23, 7  ;;  %2738 = vmatprep.subr.bf16.mxu1 %v8760_v0  ;;  %v8846_v31 = vshrl.u32 %v6911_v18, 16 }
 0x115   : > { %v6940_v62 = vor.u32 %v722_v32, %v719_v19  ;;  %v6950_v56 = vld [vmem:[%s6455_s6 + $0x74] sm:$0xf]  ;;  %v1534_v28 = vld [vmem:[#allocation2 + $0x18] sm:$0xee]  ;;  %v5531_v25 = vld [vmem:[#allocation2 + $0x128] ss:$12 sps:$4 sm:$0xff]  }
 0x116   : > { %v4890_v19 = vcombine.high %v1534_v28, %v6919_v24  ;;  %v4889_v32 = vcombine.low %v1534_v28, %v6919_v24  ;;  %v1268_v23 = vor.u32 %v1267_v60, %v8759_v55  ;;  %v1270_v53 = vrot.slane %v1267_v60, 4  ;;  %v5547_v55 = vld [vmem:[#allocation8 + $0x60] sm:$0xff]  }
 0x117   : > { %v724_v12 = vsel %vm6822_vm13, %v715_v22, %v6940_v62  ;;  %v1272_v14 = vor.u32 %v6947_v20, %v8762_v47  ;;  %v1274_v2 = vrot.slane %v6947_v20, 4  ;;  %v1275_v22 = vrot.slane %v8846_v31, 7  ;;  %2739 = vmatpush1.bf16.msra.mxu1 %v5541_v36  ;;  %v6993_v36 = vld [vmem:[%s6463_s10 + $0x8] sm:$0xe]  ;;  %v7013_v4 = vld [vmem:[%s6455_s6 + $0x1c] sm:$0xf] }
 0x118   : > { %1073 = vst [vmem:[#allocation2 + $0x54] sm:$0xf] %v724_v12  ;;  %v1837_v38 = vrot.slane %v4890_v19, 1  ;;  %v1834_v28 = vrot.slane %v4889_v32, 1  ;;  %v1901_v12 = vrot.slane %v5531_v25, 1  ;;  %v1269_v60 = vsel %vm6528_vm2, %v1266_v30, %v1268_v23  ;;  %8852 = vst [vmem:[#allocation27_spill] sm:$0xff] %v6993_v36 }
 0x119   : > { %v6971_v0 = vld [vmem:[#allocation2 + $0x140] ss:$12 sps:$4 sm:$0xff]   ;;  %v1273_v47 = vsel %vm6528_vm2, %v1270_v53, %v1272_v14  ;;  %1372 = vst [vmem:[#allocation2 + $0x158] sm:$0xf] %v1269_v60  ;;  %v8847_v19 = vrot.slane %v6934_v21, 1  ;;  %v8848_v23 = vrot.slane %v6936_v35, 1 }
 0x11a   : > { %v8849_v25 = vrot.slane %v6805_v50, 1  ;;  %1373 = vst [vmem:[#allocation2 + $0x164] sm:$0xf] %v1273_v47  ;;  %v8850_v20 = vshrl.u32 %v6950_v56, 16  ;;  %v8851_v31 = vmov 0   ;;  %v1278_v60 = vrot.slane %v1275_v22, 4 }
 0x11b   : > { %v1839_v32 = vsel %vm1833_vm3, %v1837_v38, %v8847_v19  ;;  %v1836_v30 = vsel %vm1833_vm3, %v1834_v28, %v8848_v23  ;;  %2740 = vmatprep.subr.bf16.mxu1 %v8851_v31  ;;  %v6996_v38 = vld [vmem:[%s6463_s10 + $0xc] sm:$0xf]  ;;  %v8854_v28 = vshll.u32 %v6911_v18, 16  ;;  %v8855_v19 = vrot.slane %v6495_v15, 7  ;;  %614 = vst [vmem:[#allocation2 + $0x1cc] sm:$0xe] %v6993_v36 }
 0x11c   : > { %v1902_v53 = vsel %vm1833_vm3, %v8849_v25, %v1901_v12  ;;  %v6989_v14 = vrot.slane %v8850_v20, 7  ;;  %8853 = vst [vmem:[#allocation28_spill] sm:$0xff] %v6996_v38  ;;  %2175 = vmatprep.mubr.bf16.mxu0 %v1839_v32  ;;  %v7004_v25 = vld [vmem:[%s6455_s6 + $0x78] sm:$0xf]  ;;  %615 = vst [vmem:[#allocation2 + $0x1d8] sm:$0xf] %v6996_v38  ;;  %2741 = vmatpush1.bf16.msra.mxu1 %v5547_v55 }
 0x11d   : > { %5235 = vmatprep.mubr.bf16.mxu1 %v1902_v53  ;;  %v1276_v47 = vor.u32 %v1275_v22, %v8854_v28  ;;  %v449_v23 = vrot.slane %v8855_v19, 4  ;;  %2176 = vmatmul.mubr.bf16.vlgmr.msra.gmra.mrb[0].mxu0 %v1836_v30  ;;  %v8856_v32 = vshll.u32 %v6950_v56, 16  ;;  %v5855_v20 = vld [vmem:[%s6455_s6 + $0x18] sm:$0xf]  ;;  %v725_v15 = vrot.slane %v6940_v62, 4  ;;  %v5548_v19 = vld [vmem:[#allocation8 + $0x68] sm:$0xff]  }
 0x11e   : > { %v450_v50 = vrot.slane %v5855_v20, 7  ;;  %v7018_v28 = vld [vmem:[%s6455_s6 + $0x7c] sm:$0xf]  ;;  %v8857_v40 = vrot.slane %v6971_v0, 1  ;;  %5200 = vmatpush3.bf16.msra.mxu0 %v5857_v29  ;;  %v8858_v22 = vshrl.u32 %v6498_v16, 16  ;;  %2742 = vmatprep.subr.bf16.mxu1 %v8851_v31 }
 0x11f   : > { %v1280_v53 = vor.u32 %v6989_v14, %v8856_v32  ;;  %v7023_v49 = vld [vmem:[#allocation2 + $0x4c] ss:$12 sps:$4 sm:$0xff]   ;;  %v7025_v32 = vld [vmem:[#allocation2 + $0x48] ss:$12 sps:$4 sm:$0xff]   ;;  %v1277_v20 = vsel %vm6528_vm2, %v1274_v2, %v1276_v47  ;;  %v5858_v2 = vld [vmem:[#allocation8 + $0x148] sm:$0xff]  }
 0x120   : > { %v1908_v30 = vsel %vm1833_vm3, %v1901_v12, %v8857_v40  ;;  %v729_v62 = vrot.slane %v8858_v22, 6  ;;  %1374 = vst [vmem:[#allocation2 + $0x170] sm:$0xf] %v1277_v20  ;;  %v451_v40 = vsel %vm6750_vm9, %v449_v23, %v450_v50  ;;  %v452_v29 = vrot.slane %v450_v50, 4  ;;  %5201 = vmatprep.subr.bf16.mxu0 %v5858_v2  ;;  %v7047_v22 = vld [vmem:[%s6455_s6 + $0x84] sm:$0xf]  ;;  %2743 = vmatpush1.bf16.msra.mxu1 %v5548_v19 }
 0x121   : > { %5236 = vmatmul.mubr.bf16.gmra.mrb[16].mxu1 %v1908_v30  ;;  %v1281_v45 = vsel %vm6528_vm2, %v1278_v60, %v1280_v53  ;;  %v8859_v12 = vshll.u32 %v6498_v16, 16  ;;  %v8777_v55 = vrot.slane %v7023_v49, 1  ;;  %v8776_v47 = vrot.slane %v7025_v32, 1  ;;  %583 = vst [vmem:[#allocation2 + $0x64] sm:$0xf] %v451_v40  ;;  %2744 = vmatprep.subr.bf16.mxu1 %v8851_v31 }
 0x122   : > { %1375 = vst [vmem:[#allocation2 + $0x17c] sm:$0xf] %v1281_v45  ;;  %v8860_v60 = vshrl.u32 %v6501_v17, 16  ;;  %v8861_v23 = vshll.u32 %v6501_v17, 16  ;;  %v8862_v16 = vrot.slane %v7013_v4, 7  ;;  %v8781_v45 = vshll.u32 %v7004_v25, 16  ;;  %5202 = vmatpush3.bf16.msra.mxu0 %v5858_v2 }
 0x123   : > { %v732_v10 = vrot.slane %v8859_v12, 7  ;;  %v8775_v12 = vshrl.u32 %v7004_v25, 16  ;;  %v7057_v40 = vld [vmem:[%s6463_s10] sm:$0xf]  ;;  %v8863_v17 = vrot.slane %v6934_v21, 1 }
 0x124   : > { %v739_v53 = vrot.slane %v8860_v60, 6  ;;  %v742_v50 = vrot.slane %v8861_v23, 7  ;;  %v454_v30 = vsel %vm6750_vm9, %v452_v29, %v8862_v16  ;;  %v8864_v23 = vrot.slane %v6936_v35, 1  ;;  %v7069_v29 = vld [vmem:[#allocation2 + $0x158] ss:$12 sps:$4 sm:$0xff]  }
 0x125   : > { %v733_v20 = vor.u32 %v732_v10, %v729_v62  ;;  %v1846_v60 = vsel %vm1833_vm3, %v8863_v17, %v8777_v55  ;;  %584 = vst [vmem:[#allocation2 + $0x70] sm:$0xf] %v454_v30  ;;  %v8774_v62 = vshrl.u32 %v7018_v28, 16  ;;  %v5554_v16 = vld [vmem:[#allocation8 + $0x70] sm:$0xff]   ;;  %391 = vst [vmem:[#allocation2 + $0x4] sm:$0xf] %v7057_v40 }
 0x126   : > { %v1844_v13 = vsel %vm1833_vm3, %v8864_v23, %v8776_v47  ;;  %v7071_v10 = vor.u32 %v742_v50, %v739_v53  ;;  %2183 = vmatprep.mubr.bf16.mxu0 %v1846_v60  ;;  %v8779_v35 = vshll.u32 %v7018_v28, 16  ;;  %v1282_v23 = vrot.slane %v6989_v14, 4  ;;  %v5859_v30 = vld [vmem:[#allocation8 + $0x150] sm:$0xff]   ;;  %2745 = vmatpush1.bf16.msra.mxu1 %v5554_v16 }
 0x127   : > { %v734_v21 = vsel %vm6822_vm13, %v725_v15, %v733_v20  ;;  %v735_v17 = vrot.slane %v733_v20, 4  ;;  %v1913_v53 = vrot.slane %v7069_v29, 1  ;;  %v1283_v19 = vrot.slane %v8775_v12, 7  ;;  %5203 = vmatprep.subr.bf16.mxu0 %v5859_v30  ;;  %2184 = vmatmul.mubr.bf16.gmra.mrb[4].mxu0 %v1844_v13 }
 0x128   : > { %1074 = vst [vmem:[#allocation2 + $0x60] sm:$0xf] %v734_v21  ;;  %v1287_v2 = vrot.slane %v8774_v62, 7  ;;  %v8778_v50 = vshrl.u32 %v7038_v27, 16  ;;  %v8783_v15 = vshll.u32 %v7038_v27, 16  ;;  %v8780_v20 = vshrl.u32 %v7047_v22, 16  ;;  %5204 = vmatpush3.bf16.msra.mxu0 %v5859_v30  ;;  %2746 = vmatprep.subr.bf16.mxu1 %v8851_v31 }
 0x129   : > { %v744_v14 = vsel %vm6822_vm13, %v735_v17, %v7071_v10  ;;  %v8782_v60 = vshll.u32 %v7047_v22, 16  ;;  %v8865_v29 = vrot.slane %v6971_v0, 1  ;;  %v1284_v62 = vor.u32 %v1283_v19, %v8781_v45  ;;  %v5555_v17 = vld [vmem:[#allocation8 + $0x78] sm:$0xff]  }
 0x12a   : > { %1075 = vst [vmem:[#allocation2 + $0x6c] sm:$0xf] %v744_v14  ;;  %v1286_v13 = vrot.slane %v1283_v19, 4  ;;  %v1288_v12 = vor.u32 %v1287_v2, %v8779_v35  ;;  %v7099_v47 = vld [vmem:[#allocation2 + $0x170] ss:$12 sps:$4 sm:$0xff]   ;;  %v1290_v55 = vrot.slane %v1287_v2, 4  ;;  %2747 = vmatpush1.bf16.msra.mxu1 %v5555_v17 }
 0x12b   : > { %v1914_v21 = vsel %vm1833_vm3, %v8865_v29, %v1913_v53  ;;  %v1291_v0 = vrot.slane %v8778_v50, 7  ;;  %v1285_v19 = vsel %vm6528_vm2, %v1282_v23, %v1284_v62  ;;  %v7110_v30 = vrot.slane %v8780_v20, 7  ;;  %v7115_v29 = vld [vmem:[%s6455_s6 + $0x88] sm:$0xf]  ;;  %v7122_v35 = vld [vmem:[%s6455_s6 + $0x8c] sm:$0xf]  ;;  %3745 = vmatprep.subr.bf16.mxu1 %v8851_v31 }
 0x12c   : > { %5239 = vmatprep.mubr.bf16.mxu1 %v1914_v21  ;;  %v1289_v16 = vsel %vm6528_vm2, %v1286_v13, %v1288_v12  ;;  %v8866_v14 = vrot.slane %v7013_v4, 7  ;;  %v5860_v21 = vld [vmem:[#allocation8 + $0x158] sm:$0xff]   ;;  %v1919_v50 = vrot.slane %v7099_v47, 1  ;;  %1376 = vst [vmem:[#allocation2 + $0x188] sm:$0xf] %v1285_v19  ;;  %v745_v45 = vrot.slane %v7071_v10, 4 }
 0x12d   : > { %5205 = vmatprep.subr.bf16.mxu0 %v5860_v21  ;;  %1377 = vst [vmem:[#allocation2 + $0x194] sm:$0xf] %v1289_v16  ;;  %v1292_v62 = vor.u32 %v1291_v0, %v8783_v15  ;;  %v1294_v23 = vrot.slane %v1291_v0, 4  ;;  %v5861_v12 = vld [vmem:[%s6455_s6 + $0x20] sm:$0xf]  ;;  %v1296_v4 = vor.u32 %v7110_v30, %v8782_v60  ;;  %v8867_v19 = vshrl.u32 %v6524_v33, 16 }
 0x12e   : > { %v455_v2 = vrot.slane %v8866_v14, 4  ;;  %v456_v13 = vrot.slane %v5861_v12, 7  ;;  %v7128_v14 = vld [vmem:[%s6455_s6 + $0x24] sm:$0xf]  ;;  %5206 = vmatpush3.bf16.msra.mxu0 %v5860_v21  ;;  %v1920_v0 = vsel %vm1833_vm3, %v1913_v53, %v1919_v50  ;;  %v5863_v20 = vld [vmem:[#allocation8 + $0x160] sm:$0xff]   ;;  %v8868_v17 = vshll.u32 %v6524_v33, 16 }
 0x12f   : > { %v749_v16 = vrot.slane %v8867_v19, 6  ;;  %v1293_v12 = vsel %vm6528_vm2, %v1290_v55, %v1292_v62  ;;  %5207 = vmatprep.subr.bf16.mxu0 %v5863_v20  ;;  %5240 = vmatmul.mubr.bf16.gmra.mrb[20].mxu1 %v1920_v0  ;;  %v1297_v10 = vsel %vm6528_vm2, %v1294_v23, %v1296_v4  ;;  %v8869_v21 = vshrl.u32 %v6536_v37, 16 }
 0x130   : > { %v457_v60 = vsel %vm6750_vm9, %v455_v2, %v456_v13  ;;  %v458_v15 = vrot.slane %v456_v13, 4  ;;  %1378 = vst [vmem:[#allocation2 + $0x1a0] sm:$0xf] %v1293_v12  ;;  %v752_v53 = vrot.slane %v8868_v17, 7  ;;  %v8870_v62 = vshll.u32 %v6536_v37, 16 }
 0x131   : > { %585 = vst [vmem:[#allocation2 + $0x7c] sm:$0xf] %v457_v60  ;;  %v759_v55 = vrot.slane %v8869_v21, 6  ;;  %v7150_v13 = vld [vmem:[#allocation2 + $0x64] ss:$12 sps:$4 sm:$0xff]   ;;  %v8871_v0 = vrot.slane %v7128_v14, 7 }
 0x132   : > { %v762_v2 = vrot.slane %v8870_v62, 7  ;;  %v7152_v19 = vld [vmem:[#allocation2 + $0x60] ss:$12 sps:$4 sm:$0xff]   ;;  %1379 = vst [vmem:[#allocation2 + $0x1ac] sm:$0xf] %v1297_v10  ;;  %v8787_v60 = vshrl.u32 %v7115_v29, 16  ;;  %v753_v33 = vor.u32 %v752_v53, %v749_v16  ;;  %5208 = vmatpush3.bf16.msra.mxu0 %v5863_v20 }
 0x133   : > { %v460_v23 = vsel %vm6750_vm9, %v458_v15, %v8871_v0  ;;  %v8786_v12 = vshll.u32 %v7115_v29, 16  ;;  %v8785_v37 = vshrl.u32 %v7122_v35, 16  ;;  %v8784_v10 = vrot.slane %v7150_v13, 1  ;;  %v5864_v62 = vld [vmem:[#allocation8 + $0x168] sm:$0xff]  }
 0x134   : > { %586 = vst [vmem:[#allocation2 + $0x88] sm:$0xf] %v460_v23  ;;  %v7159_v4 = vor.u32 %v762_v2, %v759_v55  ;;  %v8788_v17 = vrot.slane %v7152_v19, 1  ;;  %v1298_v15 = vrot.slane %v7110_v30, 4  ;;  %5209 = vmatprep.subr.bf16.mxu0 %v5864_v62  ;;  %v5545_v16 = vld [vmem:[#allocation2 + $0x188] ss:$12 sps:$4 sm:$0xff]   ;;  %v754_v53 = vsel %vm6822_vm13, %v745_v45, %v753_v33 }
 0x135   : > { %v8872_v55 = vrot.slane %v7023_v49, 1  ;;  %v8873_v2 = vrot.slane %v7025_v32, 1  ;;  %v755_v23 = vrot.slane %v753_v33, 4  ;;  %1076 = vst [vmem:[#allocation2 + $0x78] sm:$0xf] %v754_v53  ;;  %v1299_v30 = vrot.slane %v8787_v60, 7 }
 0x136   : > { %v1382_v45 = vld [vmem:[#allocation2 + $0x1d0] sm:$0x1]  ;;  %v1925_v21 = vrot.slane %v5545_v16, 1  ;;  %v1303_v49 = vrot.slane %v8785_v37, 7  ;;  %5210 = vmatpush3.bf16.msra.mxu0 %v5864_v62  ;;  %v619_v60 = vld [vmem:[#allocation2] sm:$0x1] }
 0x137   : > { %v1852_v20 = vsel %vm1833_vm3, %v8872_v55, %v8784_v10  ;;  %v1850_v0 = vsel %vm1833_vm3, %v8873_v2, %v8788_v17  ;;  %v8789_v55 = vshrl.u32 %v6993_v36, 16  ;;  %v8790_v10 = vshll.u32 %v6993_v36, 16  ;;  %v5865_v2 = vld [vmem:[#allocation8 + $0x170] sm:$0xff]  }
 0x138   : > { %2191 = vmatprep.mubr.bf16.mxu0 %v1852_v20  ;;  %v764_v32 = vsel %vm6822_vm13, %v755_v23, %v7159_v4  ;;  %v1300_v33 = vor.u32 %v1299_v30, %v8786_v12  ;;  %v1302_v53 = vrot.slane %v1299_v30, 4  ;;  %v8791_v20 = vshll.u32 %v6996_v38, 16  ;;  %5211 = vmatprep.subr.bf16.mxu0 %v5865_v2  ;;  %v5868_v38 = vld [vmem:[#allocation8 + $0x178] sm:$0xff]  }
 0x139   : > { %2192 = vmatmul.mubr.bf16.gmra.mrb[8].mxu0 %v1850_v0  ;;  %v1926_v62 = vsel %vm1833_vm3, %v1919_v50, %v1925_v21  ;;  %v7200_v0 = vld [vmem:[#allocation2 + $0x1a0] ss:$12 sps:$4 sm:$0xff]   ;;  %1077 = vst [vmem:[#allocation2 + $0x84] sm:$0xf] %v764_v32  ;;  %v8876_v23 = vshll.u32 %v7122_v35, 16  ;;  %v1306_v37 = vrot.slane %v1303_v49, 4 }
 0x13a   : > { %v1385_v12 = vrot.slane %v8789_v55, 4  ;;  %5243 = vmatprep.mubr.bf16.mxu1 %v1926_v62  ;;  %v1301_v17 = vsel %vm6528_vm2, %v1298_v15, %v1300_v33  ;;  %v1386_v47 = vrot.slane %v8790_v10, 5  ;;  %v7212_v50 = vrot.slane %v8791_v20, 5  ;;  %v5866_v15 = vld [vmem:[%s6455_s6 + $0x28] sm:$0xf]  ;;  %5212 = vmatpush3.bf16.msra.mxu0 %v5865_v2 }
 0x13b   : > { %v1304_v30 = vor.u32 %v1303_v49, %v8876_v23  ;;  %v8877_v32 = vrot.slane %v7128_v14, 7  ;;  %1380 = vst [vmem:[#allocation2 + $0x1b8] sm:$0xf] %v1301_v17  ;;  %v1383_v62 = vsel %vm7192_vm7, %v1306_v37, %v1382_v45  ;;  %v462_v33 = vrot.slane %v5866_v15, 7  ;;  %v5867_v20 = vld [vmem:[%s6455_s6 + $0x2c] sm:$0xf]  ;;  %5213 = vmatprep.subr.bf16.mxu0 %v5868_v38 }
 0x13c   : > { %1384 = vst [vmem:[#allocation2 + $0x1d0] sm:$0x1] %v1383_v62  ;;  %v1387_v10 = vor.u32 %v1386_v47, %v1385_v12  ;;  %v465_v36 = vrot.slane %v5867_v20, 7  ;;  %v765_v14 = vrot.slane %v7159_v4, 4  ;;  %v8879_v17 = vrot.slane %v7200_v0, 1 }
 0x13d   : > { %v461_v23 = vrot.slane %v8877_v32, 4  ;;  %v1305_v55 = vsel %vm6528_vm2, %v1302_v53, %v1304_v30  ;;  %v8878_v32 = vshrl.u32 %v6564_v58, 16  ;;  %v464_v45 = vrot.slane %v462_v33, 4 }
 0x13e   : > { %1381 = vst [vmem:[#allocation2 + $0x1c4] sm:$0xf] %v1305_v55  ;;  %v1932_v53 = vsel %vm1833_vm3, %v1925_v21, %v8879_v17  ;;  %v8880_v55 = vshll.u32 %v6564_v58, 16  ;;  %v1388_v20 = vrot.slane %v1387_v10, 4  ;;  %v8883_v2 = vshrl.u32 %v6567_v59, 16  ;;  %5214 = vmatpush3.bf16.msra.mxu0 %v5868_v38 }
 0x13f   : > { %v769_v49 = vrot.slane %v8878_v32, 6  ;;  %v463_v37 = vsel %vm6750_vm9, %v461_v23, %v462_v33  ;;  %5244 = vmatmul.mubr.bf16.gmra.mrb[24].mxu1 %v1932_v53  ;;  %v8884_v21 = vshll.u32 %v6567_v59, 16  ;;  %v620_v23 = vsel %vm7192_vm7, 0, %v619_v60  ;;  %v7249_v10 = vld [vmem:[#allocation2 + $0x7c] ss:$12 sps:$4 sm:$0xff]  }
 0x140   : > { %v772_v12 = vrot.slane %v8880_v55, 7  ;;  %587 = vst [vmem:[#allocation2 + $0x94] sm:$0xf] %v463_v37  ;;  %v779_v30 = vrot.slane %v8883_v2, 6  ;;  %v466_v58 = vsel %vm6750_vm9, %v464_v45, %v465_v36  ;;  %621 = vst [vmem:[#allocation2] sm:$0x1] %v620_v23 }
 0x141   : > { %v782_v47 = vrot.slane %v8884_v21, 7  ;;  %v8798_v15 = vshrl.u32 %v7057_v40, 16  ;;  %v8797_v33 = vshll.u32 %v7057_v40, 16  ;;  %v7251_v32 = vld [vmem:[#allocation2 + $0x78] ss:$12 sps:$4 sm:$0xff]   ;;  %v8796_v17 = vshll.u32 %v6742_v51, 16 }
 0x142   : > { %v773_v62 = vor.u32 %v772_v12, %v769_v49  ;;  %588 = vst [vmem:[#allocation2 + $0xa0] sm:$0xf] %v466_v58  ;;  %v1390_v49 = vsel %vm7235_vm0, %v1388_v20, %v7212_v50  ;;  %v8799_v45 = vrot.slane %v7249_v10, 1  ;;  %v8800_v55 = vrot.slane %v7251_v32, 1  ;;  %v5615_v2 = vld [vmem:[#allocation8 + $0x80] sm:$0xff]  }
 0x143   : > { %v783_v59 = vor.u32 %v782_v47, %v779_v30  ;;  %v627_v37 = vrot.slane %v8798_v15, 7  ;;  %v638_v12 = vor.u32 %v8796_v17, %v6767_v5  ;;  %v1402_v20 = vld [vmem:[#allocation2 + $0x1d0] sm:$0xf]  ;;  %v8887_v47 = vrot.slane %v7150_v13, 1  ;;  %5251 = vmatprep.subr.bf16.mxu0 %v5615_v2 }
 0x144   : > { %v774_v38 = vsel %vm6822_vm13, %v765_v14, %v773_v62  ;;  %v775_v53 = vrot.slane %v773_v62, 4  ;;  %v8888_v5 = vrot.slane %v7152_v19, 1  ;;  %v1403_v62 = vsel %vm7256_vm4, %v1390_v49, %v1402_v20 }
 0x145   : > { %1078 = vst [vmem:[#allocation2 + $0x90] sm:$0xf] %v774_v38  ;;  %v7272_v30 = vld [vmem:[#allocation2 + $0x1b8] ss:$12 sps:$4 sm:$0xff]   ;;  %v630_v21 = vor.u32 %v8797_v33, %v627_v37  ;;  %v1858_v23 = vsel %vm1833_vm3, %v8887_v47, %v8799_v45  ;;  %v631_v38 = vrot.slane %v627_v37, 4  ;;  %v467_v17 = vrot.slane %v465_v36, 4 }
 0x146   : > { %v784_v14 = vsel %vm6822_vm13, %v775_v53, %v783_v59  ;;  %v1856_v58 = vsel %vm1833_vm3, %v8888_v5, %v8800_v55  ;;  %2199 = vmatprep.mubr.bf16.mxu0 %v1858_v23  ;;  %v1937_v53 = vrot.slane %v7272_v30, 1  ;;  %1404 = vst [vmem:[#allocation2 + $0x1d0] sm:$0xf] %v1403_v62  ;;  %v5869_v33 = vld [vmem:[%s6455_s6 + $0x30] sm:$0xf]  ;;  %v785_v55 = vrot.slane %v783_v59, 4 }
 0x147   : > { %1079 = vst [vmem:[#allocation2 + $0x9c] sm:$0xf] %v784_v14  ;;  %v468_v15 = vrot.slane %v5869_v33, 7  ;;  %v5870_v47 = vld [vmem:[%s6455_s6 + $0x34] sm:$0xf]  ;;  %2200 = vmatmul.mubr.bf16.gmra.mrb[12].mxu0 %v1856_v58  ;;  %v639_v19 = vsel %vm6528_vm2, %v631_v38, %v638_v12  ;;  %v8889_v49 = vshrl.u32 %v6576_v1, 16 }
 0x148   : > { %v471_v45 = vrot.slane %v5870_v47, 7  ;;  %v655_v5 = vld [vmem:[#allocation2] sm:$0xf]  ;;  %v8890_v37 = vshll.u32 %v6576_v1, 16  ;;  %v8891_v36 = vrot.slane %v7200_v0, 1  ;;  %v8892_v58 = vshrl.u32 %v6582_v7, 16 }
 0x149   : > { %v789_v20 = vrot.slane %v8889_v49, 6  ;;  %v1161_v14 = vld [vmem:[#allocation2 + $0x20] sm:$0x1]  ;;  %v656_v12 = vsel %vm7256_vm4, %v630_v21, %v655_v5  ;;  %658 = vst [vmem:[#allocation2 + $0xc] sm:$0xf] %v639_v19  ;;  %v469_v59 = vsel %vm6750_vm9, %v467_v17, %v468_v15  ;;  %v470_v23 = vrot.slane %v468_v15, 4 }
 0x14a   : > { %v792_v2 = vrot.slane %v8890_v37, 7  ;;  %v1938_v33 = vsel %vm1833_vm3, %v8891_v36, %v1937_v53  ;;  %657 = vst [vmem:[#allocation2] sm:$0xf] %v656_v12  ;;  %589 = vst [vmem:[#allocation2 + $0xac] sm:$0xf] %v469_v59  ;;  %v799_v62 = vrot.slane %v8892_v58, 6 }
 0x14b   : > { %5247 = vmatprep.mubr.bf16.mxu1 %v1938_v33  ;;  %v8893_v0 = vshll.u32 %v6582_v7, 16  ;;  %v473_v47 = vrot.slane %v471_v45, 4  ;;  %v472_v49 = vsel %vm6750_vm9, %v470_v23, %v471_v45  ;;  %v5871_v21 = vld [vmem:[%s6455_s6 + $0x38] sm:$0xf]  ;;  %v5872_v5 = vld [vmem:[%s6455_s6 + $0x3c] sm:$0xf] }
 0x14c   : > { %v793_v1 = vor.u32 %v792_v2, %v789_v20  ;;  %v474_v19 = vrot.slane %v5871_v21, 7  ;;  %v477_v37 = vrot.slane %v5872_v5, 7  ;;  %v8894_v15 = vshrl.u32 %v6617_v54, 16  ;;  %590 = vst [vmem:[#allocation2 + $0xb8] sm:$0xf] %v472_v49 }
 0x14d   : > { %v802_v38 = vrot.slane %v8893_v0, 7  ;;  %v8895_v7 = vshll.u32 %v6617_v54, 16  ;;  %v7322_v12 = vld [vmem:[#allocation2 + $0x94] ss:$12 sps:$4 sm:$0xff]   ;;  %v8896_v58 = vshrl.u32 %v6745_v61, 16  ;;  %v8897_v16 = vshrl.u32 %v6622_v57, 16 }
 0x14e   : > { %v809_v17 = vrot.slane %v8894_v15, 6  ;;  %v794_v20 = vsel %vm6822_vm13, %v785_v55, %v793_v1  ;;  %v795_v2 = vrot.slane %v793_v1, 4  ;;  %v7324_v59 = vld [vmem:[#allocation2 + $0x90] ss:$12 sps:$4 sm:$0xff]   ;;  %v475_v45 = vsel %vm6750_vm9, %v473_v47, %v474_v19 }
 0x14f   : > { %v803_v36 = vor.u32 %v802_v38, %v799_v62  ;;  %v812_v33 = vrot.slane %v8895_v7, 7  ;;  %1080 = vst [vmem:[#allocation2 + $0xa8] sm:$0xf] %v794_v20  ;;  %v476_v23 = vrot.slane %v474_v19, 4  ;;  %v1162_v0 = vsel %vm7192_vm7, %v8896_v58, %v1161_v14  ;;  %591 = vst [vmem:[#allocation2 + $0xc4] sm:$0xf] %v475_v45 }
 0x150   : > { %v5553_v55 = vld [vmem:[#allocation2 + $0x1d0] ss:$0 sps:$4 sm:$0x11]   ;;  %1163 = vst [vmem:[#allocation2 + $0x20] sm:$0x1] %v1162_v0  ;;  %v1863_v38 = vrot.slane %v7322_v12, 1 }
 0x151   : > { %v804_v1 = vsel %vm6822_vm13, %v795_v2, %v803_v36  ;;  %v805_v54 = vrot.slane %v803_v36, 4  ;;  %v813_v62 = vor.u32 %v812_v33, %v809_v17  ;;  %v1861_v49 = vrot.slane %v7324_v59, 1  ;;  %v5561_v33 = vld [vmem:[#allocation2 + $0x4] ss:$12 sps:$4 sm:$0xff]   ;;  %v5873_v58 = vld [vmem:[%s6455_s6 + $0x40] sm:$0xf] }
 0x152   : > { %1081 = vst [vmem:[#allocation2 + $0xb4] sm:$0xf] %v804_v1  ;;  %v478_v47 = vsel %vm6750_vm9, %v476_v23, %v477_v37  ;;  %v819_v14 = vrot.slane %v8897_v16, 6  ;;  %v1943_v21 = vrot.slane %v5553_v55, 1  ;;  %v8898_v15 = vshll.u32 %v6622_v57, 16 }
 0x153   : > { %592 = vst [vmem:[#allocation2 + $0xd0] sm:$0xf] %v478_v47  ;;  %v814_v19 = vsel %vm6822_vm13, %v805_v54, %v813_v62  ;;  %v815_v5 = vrot.slane %v813_v62, 4  ;;  %v8899_v20 = vrot.slane %v7249_v10, 1  ;;  %v8900_v36 = vrot.slane %v7251_v32, 1  ;;  %v7359_v54 = vld [vmem:[#allocation2 + $0x18] sm:$0xff] }
 0x154   : > { %v822_v17 = vrot.slane %v8898_v15, 7  ;;  %1082 = vst [vmem:[#allocation2 + $0xc0] sm:$0xf] %v814_v19  ;;  %v479_v45 = vrot.slane %v477_v37, 4  ;;  %v1944_v57 = vsel %vm1833_vm3, %v1937_v53, %v1943_v21  ;;  %v480_v0 = vrot.slane %v5873_v58, 7 }
 0x155   : > { %v1864_v2 = vsel %vm1833_vm3, %v8899_v20, %v1863_v38  ;;  %v1862_v7 = vsel %vm1833_vm3, %v8900_v36, %v1861_v49  ;;  %v5874_v55 = vld [vmem:[%s6455_s6 + $0x44] sm:$0xf]  ;;  %5248 = vmatmul.mubr.bf16.gmra.mrb[28].mxu1 %v1944_v57  ;;  %v8901_v62 = vshrl.u32 %v6639_v41, 16  ;;  %v8902_v37 = vshll.u32 %v6639_v41, 16  ;;  %v5875_v57 = vld [vmem:[%s6455_s6 + $0x48] sm:$0xf] }
 0x156   : > { %2207 = vmatprep.mubr.bf16.mxu0 %v1864_v2  ;;  %v823_v23 = vor.u32 %v822_v17, %v819_v14  ;;  %v483_v1 = vrot.slane %v5874_v55, 7  ;;  %v8903_v30 = vshrl.u32 %v6642_v42, 16  ;;  %v8904_v14 = vshll.u32 %v6642_v42, 16  ;;  %2748 = vmatprep.mubr.bf16.mxu1 %v5561_v33  ;;  %v5559_v2 = vld [vmem:[#allocation2] ss:$12 sps:$4 sm:$0xff]  }
 0x157   : > { %2208 = vmatmul.mubr.bf16.gmra.mrb[16].mxu0 %v1862_v7  ;;  %v829_v47 = vrot.slane %v8901_v62, 6  ;;  %v832_v16 = vrot.slane %v8902_v37, 7  ;;  %v481_v15 = vsel %vm6750_vm9, %v479_v45, %v480_v0  ;;  %v482_v17 = vrot.slane %v480_v0, 4  ;;  %v1344_v42 = vld [vmem:[#allocation2 + $0x20] sm:$0xf] }
 0x158   : > { %v839_v53 = vrot.slane %v8903_v30, 6  ;;  %v842_v21 = vrot.slane %v8904_v14, 7  ;;  %v824_v19 = vsel %vm6822_vm13, %v815_v5, %v823_v23  ;;  %v825_v20 = vrot.slane %v823_v23, 4  ;;  %593 = vst [vmem:[#allocation2 + $0xdc] sm:$0xf] %v481_v15 }
 0x159   : > { %1083 = vst [vmem:[#allocation2 + $0xcc] sm:$0xf] %v824_v19  ;;  %v833_v41 = vor.u32 %v832_v16, %v829_v47  ;;  %v485_v7 = vrot.slane %v483_v1, 4  ;;  %v486_v58 = vrot.slane %v5875_v57, 7  ;;  %v7374_v55 = vld [vmem:[#allocation2 + $0xac] ss:$12 sps:$4 sm:$0xff]   ;;  %v4974_v5 = vcombine.high %v7359_v54, %v6919_v24 }
 0x15a   : > { %v843_v36 = vor.u32 %v842_v21, %v839_v53  ;;  %v7376_v33 = vld [vmem:[#allocation2 + $0xa8] ss:$12 sps:$4 sm:$0xff]   ;;  %v484_v45 = vsel %vm6750_vm9, %v482_v17, %v483_v1  ;;  %v1345_v62 = vsel %vm7256_vm4, %v6838_v52, %v1344_v42  ;;  %v1869_v14 = vrot.slane %v7374_v55, 1 }
 0x15b   : > { %v5876_v23 = vld [vmem:[%s6455_s6 + $0x4c] sm:$0xf]  ;;  %594 = vst [vmem:[#allocation2 + $0xe8] sm:$0xf] %v484_v45  ;;  %v834_v47 = vsel %vm6822_vm13, %v825_v20, %v833_v41  ;;  %v835_v37 = vrot.slane %v833_v41, 4  ;;  %v487_v16 = vsel %vm6750_vm9, %v485_v7, %v486_v58  ;;  %v488_v30 = vrot.slane %v486_v58, 4 }
 0x15c   : > { %v489_v0 = vrot.slane %v5876_v23, 7  ;;  %1346 = vst [vmem:[#allocation2 + $0x20] sm:$0xf] %v1345_v62  ;;  %v5562_v53 = vld [vmem:[#allocation8 + $0x180] sm:$0xff]   ;;  %v1867_v1 = vrot.slane %v7376_v33, 1  ;;  %v845_v21 = vrot.slane %v843_v36, 4  ;;  %v1870_v57 = vsel %vm1833_vm3, %v1863_v38, %v1869_v14 }
 0x15d   : > { %1084 = vst [vmem:[#allocation2 + $0xd8] sm:$0xf] %v834_v47  ;;  %595 = vst [vmem:[#allocation2 + $0xf4] sm:$0xf] %v487_v16  ;;  %v8905_v52 = vshrl.u32 %v6670_v8, 16  ;;  %v844_v19 = vsel %vm6822_vm13, %v835_v37, %v843_v36  ;;  %v8906_v17 = vshll.u32 %v6670_v8, 16  ;;  %2749 = vmatmul.mubr.bf16.vlgmr.msra.gmra.mrb[32].mxu1 %v5559_v2  ;;  %2215 = vmatprep.mubr.bf16.mxu0 %v1870_v57 }
 0x15e   : > { %v490_v15 = vsel %vm6750_vm9, %v488_v30, %v489_v0  ;;  %v8907_v41 = vshrl.u32 %v6676_v9, 16  ;;  %v1868_v58 = vsel %vm1833_vm3, %v1861_v49, %v1867_v1  ;;  %1085 = vst [vmem:[#allocation2 + $0xe4] sm:$0xf] %v844_v19  ;;  %v8908_v36 = vshll.u32 %v6676_v9, 16  ;;  %v5566_v8 = vld [vmem:[#allocation8 + $0x188] sm:$0xff]   ;;  %3746 = vmatpush1.bf16.msra.mxu1 %v5562_v53  ;;  %2756 = vmatprep.mubr.bf16.mxu1 %v4974_v5 }
 0x15f   : > { %v849_v60 = vrot.slane %v8905_v52, 6  ;;  %v852_v20 = vrot.slane %v8906_v17, 7  ;;  %596 = vst [vmem:[#allocation2 + $0x100] sm:$0xf] %v490_v15  ;;  %v491_v45 = vrot.slane %v489_v0, 4  ;;  %v8909_v38 = vshrl.u32 %v6691_v48, 16  ;;  %2216 = vmatmul.mubr.bf16.gmra.mrb[20].mxu0 %v1868_v58  ;;  %3747 = vmatprep.subr.bf16.mxu1 %v8851_v31 }
 0x160   : > { %v859_v7 = vrot.slane %v8907_v41, 6  ;;  %v862_v42 = vrot.slane %v8908_v36, 7  ;;  %v5877_v62 = vld [vmem:[%s6455_s6 + $0x50] sm:$0xf]  ;;  %v5878_v37 = vld [vmem:[%s6455_s6 + $0x54] sm:$0xf]  ;;  %v4973_v49 = vcombine.low %v7359_v54, %v6919_v24 }
 0x161   : > { %v853_v23 = vor.u32 %v852_v20, %v849_v60  ;;  %v492_v47 = vrot.slane %v5877_v62, 7  ;;  %v495_v16 = vrot.slane %v5878_v37, 7  ;;  %v869_v30 = vrot.slane %v8909_v38, 6  ;;  %v7416_v52 = vld [vmem:[#allocation2 + $0xc4] ss:$12 sps:$4 sm:$0xff]  }
 0x162   : > { %v7418_v9 = vld [vmem:[#allocation2 + $0xc0] ss:$12 sps:$4 sm:$0xff]   ;;  %v863_v2 = vor.u32 %v862_v42, %v859_v7  ;;  %v8910_v0 = vshll.u32 %v6691_v48, 16  ;;  %v1875_v24 = vrot.slane %v7416_v52, 1  ;;  %v5570_v41 = vld [vmem:[#allocation8 + $0x190] sm:$0xff]   ;;  %v8911_v7 = vshrl.u32 %v6694_v6, 16  ;;  %3748 = vmatpush1.bf16.msra.mxu1 %v5566_v8 }
 0x163   : > { %v854_v19 = vsel %vm6822_vm13, %v845_v21, %v853_v23  ;;  %v855_v15 = vrot.slane %v853_v23, 4  ;;  %v493_v53 = vsel %vm6750_vm9, %v491_v45, %v492_v47  ;;  %v494_v17 = vrot.slane %v492_v47, 4  ;;  %3749 = vmatprep.subr.bf16.mxu1 %v8851_v31  ;;  %v5879_v37 = vld [vmem:[%s6455_s6 + $0x58] sm:$0xf] }
 0x164   : > { %v872_v60 = vrot.slane %v8910_v0, 7  ;;  %v1873_v54 = vrot.slane %v7418_v9, 1  ;;  %1086 = vst [vmem:[#allocation2 + $0xf0] sm:$0xf] %v854_v19  ;;  %597 = vst [vmem:[#allocation2 + $0x10c] sm:$0xf] %v493_v53  ;;  %v1876_v42 = vsel %vm1833_vm3, %v1869_v14, %v1875_v24 }
 0x165   : > { %v865_v20 = vrot.slane %v863_v2, 4  ;;  %v864_v5 = vsel %vm6822_vm13, %v855_v15, %v863_v2  ;;  %v496_v21 = vsel %vm6750_vm9, %v494_v17, %v495_v16  ;;  %v879_v57 = vrot.slane %v8911_v7, 6  ;;  %2223 = vmatprep.mubr.bf16.mxu0 %v1876_v42  ;;  %v7446_v47 = vld [vmem:[#allocation2 + $0xd8] ss:$12 sps:$4 sm:$0xff]   ;;  %2757 = vmatmul.mubr.bf16.gmra.mrb[36].mxu1 %v4973_v49 }
 0x166   : > { %v873_v48 = vor.u32 %v872_v60, %v869_v30  ;;  %v8912_v58 = vshll.u32 %v6694_v6, 16  ;;  %1087 = vst [vmem:[#allocation2 + $0xfc] sm:$0xf] %v864_v5  ;;  %598 = vst [vmem:[#allocation2 + $0x118] sm:$0xf] %v496_v21  ;;  %v1874_v62 = vsel %vm1833_vm3, %v1867_v1, %v1873_v54  ;;  %v497_v14 = vrot.slane %v495_v16, 4  ;;  %3750 = vmatpush1.bf16.msra.mxu1 %v5570_v41 }
 0x167   : > { %v7444_v6 = vld [vmem:[#allocation2 + $0xdc] ss:$12 sps:$4 sm:$0xff]   ;;  %v498_v38 = vrot.slane %v5879_v37, 7  ;;  %v8913_v0 = vshrl.u32 %v6792_v43, 16  ;;  %v8914_v19 = vshll.u32 %v6792_v43, 16  ;;  %2224 = vmatmul.mubr.bf16.gmra.mrb[24].mxu0 %v1874_v62  ;;  %v8915_v43 = vshrl.u32 %v6802_v46, 16  ;;  %3751 = vmatprep.subr.bf16.mxu1 %v8851_v31 }
 0x168   : > { %v882_v36 = vrot.slane %v8912_v58, 7  ;;  %v874_v45 = vsel %vm6822_vm13, %v865_v20, %v873_v48  ;;  %v875_v23 = vrot.slane %v873_v48, 4  ;;  %v5880_v30 = vld [vmem:[%s6455_s6 + $0x5c] sm:$0xf]  ;;  %v1881_v1 = vrot.slane %v7444_v6, 1 }
 0x169   : > { %1088 = vst [vmem:[#allocation2 + $0x108] sm:$0xf] %v874_v45  ;;  %v501_v2 = vrot.slane %v5880_v30, 7  ;;  %v889_v60 = vrot.slane %v8913_v0, 6  ;;  %v892_v15 = vrot.slane %v8914_v19, 7  ;;  %v499_v16 = vsel %vm6750_vm9, %v497_v14, %v498_v38 }
 0x16a   : > { %v883_v8 = vor.u32 %v882_v36, %v879_v57  ;;  %v5881_v20 = vld [vmem:[#allocation2 + $0x34] ss:$12 sps:$4 sm:$0xff]   ;;  %v500_v48 = vrot.slane %v498_v38, 4  ;;  %v899_v21 = vrot.slane %v8915_v43, 6  ;;  %v1882_v49 = vsel %vm1833_vm3, %v1875_v24, %v1881_v1  ;;  %v5574_v57 = vld [vmem:[#allocation8 + $0x198] sm:$0xff]  }
 0x16b   : > { %2764 = vmatprep.mubr.bf16.mxu1 %v5881_v20  ;;  %v893_v5 = vor.u32 %v892_v15, %v889_v60  ;;  %v1879_v7 = vrot.slane %v7446_v47, 1  ;;  %599 = vst [vmem:[#allocation2 + $0x124] sm:$0xf] %v499_v16  ;;  %v8916_v58 = vshll.u32 %v6802_v46, 16  ;;  %v503_v42 = vrot.slane %v501_v2, 4  ;;  %2231 = vmatprep.mubr.bf16.mxu0 %v1882_v49  ;;  %v5578_v20 = vld [vmem:[#allocation8 + $0x1a0] sm:$0xff]  }
 0x16c   : > { %v884_v53 = vsel %vm6822_vm13, %v875_v23, %v883_v8  ;;  %v885_v17 = vrot.slane %v883_v8, 4  ;;  %v502_v45 = vsel %vm6750_vm9, %v500_v48, %v501_v2  ;;  %v5882_v24 = vld [vmem:[%s6455_s6 + $0x60] sm:$0xf]  ;;  %v7471_v8 = vld [vmem:[#allocation2 + $0xf4] ss:$12 sps:$4 sm:$0xff]   ;;  %v8917_v2 = vshrl.u32 %v6842_v11, 16  ;;  %3752 = vmatpush1.bf16.msra.mxu1 %v5574_v57 }
 0x16d   : > { %1089 = vst [vmem:[#allocation2 + $0x114] sm:$0xf] %v884_v53  ;;  %v902_v36 = vrot.slane %v8916_v58, 7  ;;  %v895_v23 = vrot.slane %v893_v5, 4  ;;  %v504_v62 = vrot.slane %v5882_v24, 7  ;;  %v8918_v19 = vshll.u32 %v6842_v11, 16  ;;  %3753 = vmatprep.subr.bf16.mxu1 %v8851_v31 }
 0x16e   : > { %v894_v41 = vsel %vm6822_vm13, %v885_v17, %v893_v5  ;;  %600 = vst [vmem:[#allocation2 + $0x130] sm:$0xf] %v502_v45  ;;  %v5883_v46 = vld [vmem:[%s6455_s6 + $0x64] sm:$0xf]  ;;  %v909_v60 = vrot.slane %v8917_v2, 6  ;;  %v1880_v53 = vsel %vm1833_vm3, %v1873_v54, %v1879_v7  ;;  %v1887_v17 = vrot.slane %v7471_v8, 1 }
 0x16f   : > { %v903_v14 = vor.u32 %v902_v36, %v899_v21  ;;  %1090 = vst [vmem:[#allocation2 + $0x120] sm:$0xf] %v894_v41  ;;  %v507_v37 = vrot.slane %v5883_v46, 7  ;;  %v7474_v38 = vld [vmem:[#allocation2 + $0xf0] ss:$12 sps:$4 sm:$0xff]   ;;  %v505_v30 = vsel %vm6750_vm9, %v503_v42, %v504_v62  ;;  %v506_v0 = vrot.slane %v504_v62, 4  ;;  %2232 = vmatmul.mubr.bf16.gmra.mrb[28].mxu0 %v1880_v53 }
 0x170   : > { %v912_v15 = vrot.slane %v8918_v19, 7  ;;  %601 = vst [vmem:[#allocation2 + $0x13c] sm:$0xf] %v505_v30  ;;  %v8919_v43 = vshrl.u32 %v6845_v39, 16  ;;  %v8920_v21 = vshll.u32 %v6845_v39, 16  ;;  %v1888_v58 = vsel %vm1833_vm3, %v1881_v1, %v1887_v17  ;;  %v5584_v41 = vld [vmem:[#allocation8 + $0x1a8] sm:$0xff]   ;;  %3754 = vmatpush1.bf16.msra.mxu1 %v5578_v20 }
 0x171   : > { %v904_v16 = vsel %vm6822_vm13, %v895_v23, %v903_v14  ;;  %v905_v48 = vrot.slane %v903_v14, 4  ;;  %v508_v11 = vsel %vm6750_vm9, %v506_v0, %v507_v37  ;;  %v5884_v57 = vld [vmem:[#allocation2 + $0x30] ss:$12 sps:$4 sm:$0xff]   ;;  %v7498_v36 = vld [vmem:[#allocation2 + $0x10c] ss:$12 sps:$4 sm:$0xff]   ;;  %v509_v42 = vrot.slane %v507_v37, 4  ;;  %2239 = vmatprep.mubr.bf16.mxu0 %v1888_v58  ;;  %3755 = vmatprep.subr.bf16.mxu1 %v8851_v31 }
 0x172   : > { %1091 = vst [vmem:[#allocation2 + $0x12c] sm:$0xf] %v904_v16  ;;  %v913_v5 = vor.u32 %v912_v15, %v909_v60  ;;  %v919_v54 = vrot.slane %v8919_v43, 6  ;;  %v922_v49 = vrot.slane %v8920_v21, 7  ;;  %2765 = vmatmul.mubr.bf16.gmra.mrb[40].mxu1 %v5884_v57  ;;  %602 = vst [vmem:[#allocation2 + $0x148] sm:$0xf] %v508_v11 }
 0x173   : > { %v5885_v45 = vld [vmem:[#allocation2 + $0x4c] ss:$12 sps:$4 sm:$0xff]   ;;  %v5886_v39 = vld [vmem:[%s6455_s6 + $0x68] sm:$0xf]  ;;  %v1885_v46 = vrot.slane %v7474_v38, 1  ;;  %v1893_v1 = vrot.slane %v7498_v36, 1 }
 0x174   : > { %2772 = vmatprep.mubr.bf16.mxu1 %v5885_v45  ;;  %v914_v23 = vsel %vm6822_vm13, %v905_v48, %v913_v5  ;;  %v915_v24 = vrot.slane %v913_v5, 4  ;;  %v923_v62 = vor.u32 %v922_v49, %v919_v54  ;;  %v510_v14 = vrot.slane %v5886_v39, 7  ;;  %v7505_v30 = vld [vmem:[#allocation2 + $0x108] ss:$12 sps:$4 sm:$0xff]   ;;  %v5888_v58 = vld [vmem:[%s6455_s6 + $0x70] sm:$0xf]  ;;  %3756 = vmatpush1.bf16.msra.mxu1 %v5584_v41 }
 0x175   : > { %1092 = vst [vmem:[#allocation2 + $0x138] sm:$0xf] %v914_v23  ;;  %v5887_v37 = vld [vmem:[%s6455_s6 + $0x6c] sm:$0xf]  ;;  %v8921_v2 = vshrl.u32 %v6899_v3, 16  ;;  %v8922_v48 = vshll.u32 %v6899_v3, 16  ;;  %v1886_v45 = vsel %vm1833_vm3, %v1879_v7, %v1885_v46  ;;  %v1894_v3 = vsel %vm1833_vm3, %v1887_v17, %v1893_v1  ;;  %3757 = vmatprep.subr.bf16.mxu1 %v8851_v31 }
 0x176   : > { %v513_v0 = vrot.slane %v5887_v37, 7  ;;  %v924_v19 = vsel %vm6822_vm13, %v915_v24, %v923_v62  ;;  %v511_v15 = vsel %vm6750_vm9, %v509_v42, %v510_v14  ;;  %v512_v53 = vrot.slane %v510_v14, 4  ;;  %v5589_v16 = vld [vmem:[#allocation8 + $0x1b0] sm:$0xff]  }
 0x177   : > { %v929_v60 = vrot.slane %v8921_v2, 6  ;;  %v925_v20 = vrot.slane %v923_v62, 4  ;;  %1093 = vst [vmem:[#allocation2 + $0x144] sm:$0xf] %v924_v19  ;;  %603 = vst [vmem:[#allocation2 + $0x154] sm:$0xf] %v511_v15  ;;  %2240 = vmatmul.mubr.bf16.gmra.mrb[32].mxu0 %v1886_v45 }
 0x178   : > { %v932_v11 = vrot.slane %v8922_v48, 7  ;;  %v8923_v5 = vshrl.u32 %v6902_v26, 16  ;;  %v514_v54 = vsel %vm6750_vm9, %v512_v53, %v513_v0  ;;  %v8924_v21 = vshll.u32 %v6902_v26, 16  ;;  %v7532_v23 = vld [vmem:[#allocation2 + $0x124] ss:$12 sps:$4 sm:$0xff]   ;;  %2247 = vmatprep.mubr.bf16.mxu0 %v1894_v3  ;;  %3758 = vmatpush1.bf16.msra.mxu1 %v5589_v16 }
 0x179   : > { %v515_v57 = vrot.slane %v513_v0, 4  ;;  %v516_v42 = vrot.slane %v5888_v58, 7  ;;  %v7534_v24 = vld [vmem:[#allocation2 + $0x120] ss:$12 sps:$4 sm:$0xff]   ;;  %604 = vst [vmem:[#allocation2 + $0x160] sm:$0xf] %v514_v54  ;;  %3759 = vmatprep.subr.bf16.mxu1 %v8851_v31 }
 0x17a   : > { %v939_v43 = vrot.slane %v8923_v5, 6  ;;  %v942_v49 = vrot.slane %v8924_v21, 7  ;;  %v933_v26 = vor.u32 %v932_v11, %v929_v60  ;;  %v5889_v62 = vld [vmem:[%s6455_s6 + $0x74] sm:$0xf]  ;;  %v8925_v0 = vshrl.u32 %v6911_v18, 16 }
 0x17b   : > { %v519_v39 = vrot.slane %v5889_v62, 7  ;;  %v517_v37 = vsel %vm6750_vm9, %v515_v57, %v516_v42  ;;  %v518_v7 = vrot.slane %v516_v42, 4  ;;  %v5890_v17 = vld [vmem:[#allocation2 + $0x48] ss:$12 sps:$4 sm:$0xff]   ;;  %v1891_v41 = vrot.slane %v7505_v30, 1  ;;  %v5593_v15 = vld [vmem:[#allocation8 + $0x1b8] sm:$0xff]  }
 0x17c   : > { %v943_v14 = vor.u32 %v942_v49, %v939_v43  ;;  %v949_v2 = vrot.slane %v8925_v0, 6  ;;  %2773 = vmatmul.mubr.bf16.gmra.mrb[44].mxu1 %v5890_v17  ;;  %v934_v19 = vsel %vm6822_vm13, %v925_v20, %v933_v26  ;;  %v935_v60 = vrot.slane %v933_v26, 4  ;;  %605 = vst [vmem:[#allocation2 + $0x16c] sm:$0xf] %v517_v37  ;;  %v5597_v37 = vld [vmem:[#allocation8 + $0x1c0] sm:$0xff]  }
 0x17d   : > { %2780 = vmatprep.mubr.bf16.mxu1 %v7150_v13  ;;  %1094 = vst [vmem:[#allocation2 + $0x150] sm:$0xf] %v934_v19  ;;  %v520_v53 = vsel %vm6750_vm9, %v518_v7, %v519_v39  ;;  %v8926_v11 = vshll.u32 %v6911_v18, 16  ;;  %v8927_v43 = vshrl.u32 %v6950_v56, 16  ;;  %v8928_v21 = vshrl.u32 %v7057_v40, 16  ;;  %3760 = vmatpush1.bf16.msra.mxu1 %v5593_v15 }
 0x17e   : > { %v945_v48 = vrot.slane %v943_v14, 4  ;;  %v8929_v49 = vshll.u32 %v7057_v40, 16  ;;  %v944_v57 = vsel %vm6822_vm13, %v935_v60, %v943_v14  ;;  %606 = vst [vmem:[#allocation2 + $0x178] sm:$0xf] %v520_v53  ;;  %v8930_v18 = vshll.u32 %v6950_v56, 16  ;;  %3761 = vmatprep.subr.bf16.mxu1 %v8851_v31 }
 0x17f   : > { %v952_v5 = vrot.slane %v8926_v11, 7  ;;  %v959_v54 = vrot.slane %v8927_v43, 6  ;;  %v7554_v20 = vrot.slane %v8928_v21, 4  ;;  %v1899_v42 = vrot.slane %v7532_v23, 1  ;;  %1095 = vst [vmem:[#allocation2 + $0x15c] sm:$0xf] %v944_v57 }
 0x180   : > { %v7558_v13 = vrot.slane %v8929_v49, 5  ;;  %v962_v58 = vrot.slane %v8930_v18, 7  ;;  %v1897_v45 = vrot.slane %v7534_v24, 1  ;;  %v521_v26 = vrot.slane %v519_v39, 4  ;;  %v5891_v3 = vld [vmem:[%s6455_s6 + $0x78] sm:$0xf] }
 0x181   : > { %v953_v40 = vor.u32 %v952_v5, %v949_v2  ;;  %v522_v16 = vrot.slane %v5891_v3, 7  ;;  %v5892_v7 = vld [vmem:[%s6455_s6 + $0x7c] sm:$0xf]  ;;  %v8931_v14 = vshrl.u32 %v7004_v25, 16  ;;  %v1892_v56 = vsel %vm1833_vm3, %v1885_v46, %v1891_v41  ;;  %v5893_v21 = vld [vmem:[#allocation2 + $0x60] ss:$12 sps:$4 sm:$0xff]   ;;  %3762 = vmatpush1.bf16.msra.mxu1 %v5597_v37 }
 0x182   : > { %v963_v62 = vor.u32 %v962_v58, %v959_v54  ;;  %v525_v0 = vrot.slane %v5892_v7, 7  ;;  %v7576_v19 = vld [vmem:[#allocation2 + $0x13c] ss:$12 sps:$4 sm:$0xff]   ;;  %v8932_v5 = vshll.u32 %v7004_v25, 16  ;;  %v1900_v46 = vsel %vm1833_vm3, %v1893_v1, %v1899_v42  ;;  %2248 = vmatmul.mubr.bf16.gmra.mrb[36].mxu0 %v1892_v56  ;;  %3763 = vmatprep.subr.bf16.mxu1 %v8851_v31 }
 0x183   : > { %v969_v17 = vrot.slane %v8931_v14, 6  ;;  %v954_v39 = vsel %vm6822_vm13, %v945_v48, %v953_v40  ;;  %v955_v2 = vrot.slane %v953_v40, 4  ;;  %v523_v60 = vsel %vm6750_vm9, %v521_v26, %v522_v16  ;;  %v5894_v58 = vld [vmem:[%s6455_s6 + $0x80] sm:$0xf]  ;;  %v5895_v26 = vld [vmem:[%s6455_s6 + $0x84] sm:$0xf]  ;;  %2255 = vmatprep.mubr.bf16.mxu0 %v1900_v46 }
 0x184   : > { %1096 = vst [vmem:[#allocation2 + $0x168] sm:$0xf] %v954_v39  ;;  %v524_v53 = vrot.slane %v522_v16, 4  ;;  %v965_v11 = vrot.slane %v963_v62, 4  ;;  %v972_v43 = vrot.slane %v8932_v5, 7  ;;  %v8933_v15 = vshrl.u32 %v7018_v28, 16  ;;  %2781 = vmatmul.mubr.bf16.gmra.mrb[48].mxu1 %v5893_v21 }
 0x185   : > { %v964_v48 = vsel %vm6822_vm13, %v955_v2, %v963_v62  ;;  %607 = vst [vmem:[#allocation2 + $0x184] sm:$0xf] %v523_v60  ;;  %v8934_v57 = vshll.u32 %v7018_v28, 16  ;;  %v527_v18 = vrot.slane %v525_v0, 4  ;;  %2788 = vmatprep.mubr.bf16.mxu1 %v7249_v10  ;;  %v528_v40 = vrot.slane %v5894_v58, 7  ;;  %v5601_v56 = vld [vmem:[#allocation8 + $0x1c8] sm:$0xff]  }
 0x186   : > { %v979_v54 = vrot.slane %v8933_v15, 6  ;;  %1097 = vst [vmem:[#allocation2 + $0x174] sm:$0xf] %v964_v48  ;;  %v526_v25 = vsel %vm6750_vm9, %v524_v53, %v525_v0  ;;  %v973_v49 = vor.u32 %v972_v43, %v969_v17  ;;  %v531_v62 = vrot.slane %v5895_v26, 7  ;;  %v7608_v39 = vld [vmem:[#allocation2 + $0x138] ss:$12 sps:$4 sm:$0xff]   ;;  %3764 = vmatpush1.bf16.msra.mxu1 %v5601_v56 }
 0x187   : > { %v982_v1 = vrot.slane %v8934_v57, 7  ;;  %608 = vst [vmem:[#allocation2 + $0x190] sm:$0xf] %v526_v25  ;;  %v8935_v3 = vshrl.u32 %v7038_v27, 16  ;;  %v8936_v7 = vshll.u32 %v7038_v27, 16  ;;  %v1905_v17 = vrot.slane %v7576_v19, 1  ;;  %3765 = vmatprep.subr.bf16.mxu1 %v8851_v31 }
 0x188   : > { %v974_v28 = vsel %vm6822_vm13, %v965_v11, %v973_v49  ;;  %v975_v0 = vrot.slane %v973_v49, 4  ;;  %v529_v2 = vsel %vm6750_vm9, %v527_v18, %v528_v40  ;;  %v530_v27 = vrot.slane %v528_v40, 4  ;;  %v7615_v5 = vld [vmem:[#allocation2 + $0x154] ss:$12 sps:$4 sm:$0xff]   ;;  %v5605_v46 = vld [vmem:[#allocation8 + $0x1d0] sm:$0xff]  }
 0x189   : > { %v989_v16 = vrot.slane %v8935_v3, 6  ;;  %v992_v14 = vrot.slane %v8936_v7, 7  ;;  %v983_v10 = vor.u32 %v982_v1, %v979_v54  ;;  %1098 = vst [vmem:[#allocation2 + $0x180] sm:$0xf] %v974_v28  ;;  %v8937_v53 = vshrl.u32 %v7047_v22, 16 }
 0x18a   : > { %609 = vst [vmem:[#allocation2 + $0x19c] sm:$0xf] %v529_v2  ;;  %v532_v48 = vsel %vm6750_vm9, %v530_v27, %v531_v62  ;;  %v8938_v54 = vshll.u32 %v7047_v22, 16  ;;  %v533_v25 = vrot.slane %v531_v62, 4  ;;  %v1898_v49 = vsel %vm1833_vm3, %v1891_v41, %v1897_v45  ;;  %v5896_v1 = vld [vmem:[%s6455_s6 + $0x88] sm:$0xf]  ;;  %3766 = vmatpush1.bf16.msra.mxu1 %v5605_v46 }
 0x18b   : > { %v993_v60 = vor.u32 %v992_v14, %v989_v16  ;;  %v999_v37 = vrot.slane %v8937_v53, 6  ;;  %v984_v11 = vsel %vm6822_vm13, %v975_v0, %v983_v10  ;;  %v985_v43 = vrot.slane %v983_v10, 4  ;;  %610 = vst [vmem:[#allocation2 + $0x1a8] sm:$0xf] %v532_v48  ;;  %v5897_v41 = vld [vmem:[%s6455_s6 + $0x8c] sm:$0xf]  ;;  %2256 = vmatmul.mubr.bf16.gmra.mrb[40].mxu0 %v1898_v49  ;;  %3767 = vmatprep.subr.bf16.mxu1 %v8851_v31 }
 0x18c   : > { %1099 = vst [vmem:[#allocation2 + $0x18c] sm:$0xf] %v984_v11  ;;  %v1002_v21 = vrot.slane %v8938_v54, 7  ;;  %v534_v18 = vrot.slane %v5896_v1, 7  ;;  %v1906_v22 = vsel %vm1833_vm3, %v1899_v42, %v1905_v17  ;;  %v1903_v58 = vrot.slane %v7608_v39, 1  ;;  %2789 = vmatmul.mubr.bf16.gmra.mrb[52].mxu1 %v7251_v32  ;;  %v5609_v53 = vld [vmem:[#allocation8 + $0x1d8] sm:$0xff]  }
 0x18d   : > { %v995_v15 = vrot.slane %v993_v60, 4  ;;  %v994_v57 = vsel %vm6822_vm13, %v985_v43, %v993_v60  ;;  %v537_v26 = vrot.slane %v5897_v41, 7  ;;  %v8939_v16 = vshrl.u32 %v7115_v29, 16  ;;  %2796 = vmatprep.mubr.bf16.mxu1 %v7322_v12  ;;  %2263 = vmatprep.mubr.bf16.mxu0 %v1906_v22  ;;  %v8943_v11 = vld [vmem:[#allocation19_spill] sm:$0xff]  ;;  %v1104_v54 = vld [vmem:[#allocation2 + $0x1c8] sm:$0x3] }
 0x18e   : > { %v1003_v40 = vor.u32 %v1002_v21, %v999_v37  ;;  %1100 = vst [vmem:[#allocation2 + $0x198] sm:$0xf] %v994_v57  ;;  %v535_v62 = vsel %vm6750_vm9, %v533_v25, %v534_v18  ;;  %v536_v3 = vrot.slane %v534_v18, 4  ;;  %v8940_v14 = vshll.u32 %v7115_v29, 16  ;;  %v7667_v46 = vld [vmem:[#allocation2 + $0x150] ss:$12 sps:$4 sm:$0xff]   ;;  %3768 = vmatpush1.bf16.msra.mxu1 %v5609_v53 }
 0x18f   : > { %v1009_v7 = vrot.slane %v8939_v16, 6  ;;  %v1911_v28 = vrot.slane %v7615_v5, 1  ;;  %611 = vst [vmem:[#allocation2 + $0x1b4] sm:$0xf] %v535_v62  ;;  %v1145_v10 = vor.u32 %v7558_v13, %v7554_v20  ;;  %v8941_v2 = vshrl.u32 %v7122_v35, 16  ;;  %v8945_v13 = vld [vmem:[#allocation20_spill] sm:$0xff]  ;;  %3769 = vmatprep.subr.bf16.mxu1 %v8851_v31 }
 0x190   : > { %v1012_v42 = vrot.slane %v8940_v14, 7  ;;  %v1004_v0 = vsel %vm6822_vm13, %v995_v15, %v1003_v40  ;;  %v1005_v32 = vrot.slane %v1003_v40, 4  ;;  %v538_v29 = vsel %vm6750_vm9, %v536_v3, %v537_v26  ;;  %v7671_v21 = vld [vmem:[#allocation2 + $0x16c] ss:$12 sps:$4 sm:$0xff]  }
 0x191   : > { %1101 = vst [vmem:[#allocation2 + $0x1a4] sm:$0xf] %v1004_v0  ;;  %v1019_v12 = vrot.slane %v8941_v2, 6  ;;  %v8942_v27 = vshll.u32 %v7122_v35, 16  ;;  %612 = vst [vmem:[#allocation2 + $0x1c0] sm:$0xf] %v538_v29  ;;  %v1904_v44 = vsel %vm1833_vm3, %v1897_v45, %v1903_v58 }
 0x192   : > { %v1013_v56 = vor.u32 %v1012_v42, %v1009_v7  ;;  %v539_v37 = vrot.slane %v537_v26, 4  ;;  %v8944_v20 = vshll.u32 %v8943_v11, 16  ;;  %v8946_v25 = vld [vmem:[#allocation25_spill] sm:$0xff]  ;;  %v8947_v57 = vld [vmem:[#allocation22_spill] sm:$0xff]  ;;  %v8949_v22 = vld [vmem:[#allocation23_spill] sm:$0xff]  ;;  %v1146_v41 = vrot.slane %v1145_v10, 4 }
 0x193   : > { %v1022_v60 = vrot.slane %v8942_v27, 7  ;;  %v1166_v49 = vrot.slane %v8946_v25, 4  ;;  %v8948_v1 = vshrl.u32 %v8947_v57, 16  ;;  %v8950_v40 = vshrl.u32 %v8949_v22, 16  ;;  %v5612_v16 = vld [vmem:[#allocation8 + $0x1e0] sm:$0xff]   ;;  %2264 = vmatmul.mubr.bf16.gmra.mrb[44].mxu0 %v1904_v44  ;;  %v5621_v44 = vld [vmem:[#allocation8 + $0x1f0] sm:$0xff]  }
 0x194   : > { %v1176_v43 = vor.u32 %v8945_v13, %v8944_v20  ;;  %v1014_v35 = vsel %vm6822_vm13, %v1005_v32, %v1013_v56  ;;  %v1015_v48 = vrot.slane %v1013_v56, 4  ;;  %613 = vst [vmem:[#allocation2 + $0x1cc] sm:$0x1] %v539_v37  ;;  %v1912_v26 = vsel %vm1833_vm3, %v1905_v17, %v1911_v28  ;;  %2797 = vmatmul.mubr.bf16.gmra.mrb[56].mxu1 %v7324_v59  ;;  %v5624_v25 = vld [vmem:[#allocation8 + $0x1f8] sm:$0xff]  }
 0x195   : > { %v1023_v15 = vor.u32 %v1022_v60, %v1019_v12  ;;  %1102 = vst [vmem:[#allocation2 + $0x1b0] sm:$0xf] %v1014_v35  ;;  %v1167_v18 = vrot.slane %v8948_v1, 7  ;;  %v1171_v45 = vrot.slane %v8950_v40, 7  ;;  %v8951_v7 = vshll.u32 %v6742_v51, 16  ;;  %2804 = vmatprep.mubr.bf16.mxu1 %v7374_v55  ;;  %2271 = vmatprep.mubr.bf16.mxu0 %v1912_v26  ;;  %v5618_v55 = vld [vmem:[#allocation8 + $0x1e8] sm:$0xff]  }
 0x196   : > { %v8952_v42 = vshll.u32 %v8947_v57, 16  ;;  %v8953_v10 = vshll.u32 %v8949_v22, 16  ;;  %v8955_v59 = vshrl.u32 %v6742_v51, 16  ;;  %v1909_v37 = vrot.slane %v7667_v46, 1  ;;  %3770 = vmatpush1.bf16.msra.mxu1 %v5612_v16  ;;  %v7733_v1 = vld [vmem:[#allocation2 + $0x19c] ss:$12 sps:$4 sm:$0xff]  }
 0x197   : > { %v1024_v62 = vsel %vm6822_vm13, %v1015_v48, %v1023_v15  ;;  %v1025_v3 = vrot.slane %v1023_v15, 4  ;;  %v1147_v14 = vrot.slane %v8951_v7, 5  ;;  %v1170_v32 = vrot.slane %v1167_v18, 4  ;;  %3771 = vmatprep.subr.bf16.mxu1 %v8851_v31  ;;  %v7714_v48 = vld [vmem:[#allocation2 + $0x168] ss:$12 sps:$4 sm:$0xff]  }
 0x198   : > { %1103 = vst [vmem:[#allocation2 + $0x1bc] sm:$0xf] %v1024_v62  ;;  %v1168_v0 = vor.u32 %v1167_v18, %v8952_v42  ;;  %v1172_v29 = vor.u32 %v1171_v45, %v8953_v10  ;;  %v1174_v17 = vrot.slane %v1171_v45, 4  ;;  %v1149_v53 = vrot.slane %v8955_v59, 4  ;;  %v7716_v15 = vld [vmem:[#allocation2 + $0x184] ss:$12 sps:$4 sm:$0xff]  }
 0x199   : > { %v1105_v56 = vsel %vm6786_vm12, %v1025_v3, %v1104_v54  ;;  %v1148_v2 = vsel %vm7235_vm0, %v1146_v41, %v1147_v14  ;;  %v1917_v11 = vrot.slane %v7671_v21, 1  ;;  %v8956_v13 = vshll.u32 %v6745_v61, 16  ;;  %v7740_v40 = vld [vmem:[#allocation2 + $0x198] ss:$12 sps:$4 sm:$0xff]   ;;  %v5606_v41 = vld [vmem:[#allocation2 + $0x1b4] ss:$12 sps:$4 sm:$0xff]  }
 0x19a   : > { %1106 = vst [vmem:[#allocation2 + $0x1c8] sm:$0x3] %v1105_v56  ;;  %v1169_v12 = vsel %vm6528_vm2, %v1166_v49, %v1168_v0  ;;  %v1173_v27 = vsel %vm6528_vm2, %v1170_v32, %v1172_v29  ;;  %v1177_v60 = vsel %vm6528_vm2, %v1174_v17, %v1176_v43  ;;  %1159 = vst [vmem:[#allocation2 + $0x8] sm:$0xf] %v1148_v2  ;;  %3772 = vmatpush1.bf16.msra.mxu1 %v5618_v55  ;;  %v1535_v42 = vld [vmem:[#allocation2 + $0x20] sm:$0xe] }
 0x19b   : > { %1347 = vst [vmem:[#allocation2 + $0x2c] sm:$0xf] %v1169_v12  ;;  %1348 = vst [vmem:[#allocation2 + $0x38] sm:$0xf] %v1173_v27  ;;  %v1150_v20 = vor.u32 %v1149_v53, %v1147_v14  ;;  %v1152_v43 = vrot.slane %v8956_v13, 5  ;;  %v1910_v35 = vsel %vm1833_vm3, %v1903_v58, %v1909_v37  ;;  %v1918_v54 = vsel %vm1833_vm3, %v1911_v28, %v1917_v11  ;;  %v8957_v27 = vld [vmem:[#allocation21_spill] sm:$0xff] }
 0x19c   : > { %1349 = vst [vmem:[#allocation2 + $0x44] sm:$0xf] %v1177_v60  ;;  %3773 = vmatprep.subr.bf16.mxu1 %v8851_v31  ;;  %2805 = vmatmul.mubr.bf16.gmra.mrb[60].mxu1 %v7376_v33  ;;  %v1915_v58 = vrot.slane %v7714_v48, 1  ;;  %v1923_v49 = vrot.slane %v7716_v15, 1  ;;  %v7729_v28 = vld [vmem:[#allocation2 + $0x180] ss:$12 sps:$4 sm:$0xff]  }
 0x19d   : > { %v1151_v51 = vrot.slane %v1150_v20, 4  ;;  %2272 = vmatmul.mubr.bf16.gmra.mrb[48].mxu0 %v1910_v35  ;;  %2812 = vmatprep.mubr.bf16.mxu1 %v7416_v52  ;;  %v1921_v52 = vrot.slane %v7729_v28, 1  ;;  %v1929_v18 = vrot.slane %v7733_v1, 1  ;;  %v5616_v59 = vld [vmem:[#allocation8 + $0x88] sm:$0xff]   ;;  %v5898_v53 = vld [vmem:[#allocation8 + $0x80] sm:$0xff]   ;;  %vm1409_vm13 = vcmask 1041409  }
 0x19e   : > { %2279 = vmatprep.mubr.bf16.mxu0 %v1918_v54  ;;  %3774 = vmatpush1.bf16.msra.mxu1 %v5621_v44  ;;  %v1916_v57 = vsel %vm1833_vm3, %v1909_v37, %v1915_v58  ;;  %v1924_v33 = vsel %vm1833_vm3, %v1917_v11, %v1923_v49  ;;  %v5619_v11 = vld [vmem:[#allocation8 + $0x98] sm:$0xff]   ;;  %v5622_v13 = vld [vmem:[#allocation8 + $0xa8] sm:$0xff]  }
 0x19f   : > { %v1153_v61 = vsel %vm7235_vm0, %v1151_v51, %v1152_v43  ;;  %3775 = vmatprep.subr.bf16.mxu1 %v8851_v31  ;;  %v1922_v22 = vsel %vm1833_vm3, %v1915_v58, %v1921_v52  ;;  %v1930_v45 = vsel %vm1833_vm3, %v1923_v49, %v1929_v18  ;;  %v5608_v3 = vld [vmem:[#allocation2 + $0x1b0] ss:$12 sps:$4 sm:$0xff]  }
 0x1a0   : > { %1160 = vst [vmem:[#allocation2 + $0x14] sm:$0xf] %v1153_v61  ;;  %v7784_v44 = vld [vmem:[%s6463_s10 + $0x10] sm:$0x3]  ;;  %v8959_v58 = vld [vmem:[#allocation28_spill] sm:$0xff] }
 0x1a1   : > { %v1540_v26 = vld [vmem:[#allocation2 + $0x1c8] sm:$0x11]  ;;  %616 = vst [vmem:[#allocation2 + $0x1e4] sm:$0x3] %v7784_v44 }
 0x1a2   : > { %3776 = vmatpush1.bf16.msra.mxu1 %v5624_v25  ;;  %v4944_v7 = vcombine.high %v1540_v26, %v1540_v26  ;;  %v4943_v32 = vcombine.low %v1540_v26, %v1540_v26  ;;  %v1116_v25 = vshrl.u32 %v8959_v58, 16  ;;  %v1406_v26 = vld [vmem:[#allocation2 + $0x1e8] sm:$0x3] }
 0x1a3   : > { %v7755_v17 = vld [vmem:[#allocation2 + $0x38] ss:$12 sps:$4 sm:$0xff]  }
 0x1a4   : > { %2813 = vmatmul.mubr.bf16.gmra.mrb[64].mxu1 %v7418_v9  ;;  %v1927_v9 = vrot.slane %v7740_v40, 1  ;;  %v1941_v14 = vrot.slane %v4944_v7, 1  ;;  %v1841_v56 = vrot.slane %v7755_v17, 1 }
 0x1a5   : > { %2280 = vmatmul.mubr.bf16.gmra.mrb[52].mxu0 %v1916_v57  ;;  %2820 = vmatprep.mubr.bf16.mxu1 %v7444_v6  ;;  %v1935_v6 = vrot.slane %v5606_v41, 1  ;;  %v5630_v57 = vld [vmem:[#allocation2 + $0x34] ss:$12 sps:$4 sm:$0xfc]  }
 0x1a6   : > { %2287 = vmatprep.mubr.bf16.mxu0 %v1924_v33  ;;  %v1928_v62 = vsel %vm1833_vm3, %v1921_v52, %v1927_v9  ;;  %v7801_v33 = vld [vmem:[#allocation2 + $0x4c] ss:$12 sps:$4 sm:$0xff]  }
 0x1a7   : > { %v1936_v16 = vsel %vm1833_vm3, %v1929_v18, %v1935_v6  ;;  %v1942_v10 = vsel %vm1833_vm3, %v1935_v6, %v1941_v14 }
 0x1ac   : > { %2821 = vmatmul.mubr.bf16.gmra.mrb[68].mxu1 %v7446_v47  ;;  %v1933_v47 = vrot.slane %v5608_v3, 1 }
 0x1ad   : > { %2288 = vmatmul.mubr.bf16.gmra.mrb[56].mxu0 %v1922_v22  ;;  %2828 = vmatprep.mubr.bf16.mxu1 %v7471_v8  ;;  %v7750_v8 = vld [vmem:[#allocation2 + $0x2c] sm:$0xf] }
 0x1ae   : > { %2295 = vmatprep.mubr.bf16.mxu0 %v1930_v45  ;;  %v1934_v0 = vsel %vm1833_vm3, %v1927_v9, %v1933_v47  ;;  %v4891_v29 = vcombine.low %v1535_v42, %v7750_v8  ;;  %v7807_v45 = vrot.slane %v1116_v25, 7  ;;  %v5625_v9 = vld [vmem:[#allocation8 + $0xb8] sm:$0xff]  }
 0x1b4   : > { %2829 = vmatmul.mubr.bf16.gmra.mrb[72].mxu1 %v7474_v38  ;;  %v1939_v38 = vrot.slane %v4943_v32, 1 }
 0x1b5   : > { %2296 = vmatmul.mubr.bf16.gmra.mrb[60].mxu0 %v1928_v62  ;;  %2836 = vmatprep.mubr.bf16.mxu1 %v7498_v36  ;;  %v1840_v36 = vrot.slane %v4891_v29, 1  ;;  %v3440_v29 = vrot.slane %v7801_v33, 2 }
 0x1b6   : > { %2303 = vmatprep.mubr.bf16.mxu0 %v1936_v16  ;;  %v1940_v2 = vsel %vm1833_vm3, %v1933_v47, %v1939_v38  ;;  %v8963_v47 = vshll.u32 %v8959_v58, 16  ;;  %v4396_v38 = vld [vmem:[#allocation11 + $0x10] sm:$0xff] }
 0x1b7   : > { %v1842_v12 = vsel %vm1833_vm3, %v1840_v36, %v1841_v56  ;;  %v4394_v36 = vld [vmem:[#allocation11] sm:$0xff]  ;;  %vm4432_vm8 = vcmp.ne.f32.partialorder %v4396_v38, 0.0 }
 0x1b8   : > { %v1121_v14 = vor.u32 %v8963_v47, %v7807_v45  ;;  %vm4430_vm9 = vcmp.ne.f32.partialorder %v4394_v36, 0.0  ;;  %v5899_v38 = vld [vmem:[#allocation2 + $0x50] ss:$12 sps:$4 sm:$0xff]   ;;  %v5900_v36 = vld [vmem:[#allocation2 + $0x68] ss:$12 sps:$4 sm:$0xff]  }
 0x1b9   : > { %v7769_v37 = vpop.f32.mrb[0].mxu1 }
 0x1bc   : > { %2837 = vmatmul.mubr.bf16.gmra.mrb[76].mxu1 %v7505_v30  ;;  %v8958_v30 = vrot.slane %v8957_v27, 1  ;;  %v5628_v27 = vld [vmem:[#allocation2 + $0x30] ss:$12 sps:$4 sm:$0xfc]  }
 0x1bd   : > { %2304 = vmatmul.mubr.bf16.gmra.mrb[64].mxu0 %v1934_v0  ;;  %2844 = vmatprep.mubr.bf16.mxu1 %v7532_v23  ;;  %v5626_v23 = vld [vmem:[#allocation2 + $0x8] ss:$12 sps:$4 sm:$0xff]   ;;  %v3439_v0 = vrot.slane %v5630_v57, 2  ;;  %v3436_v58 = vrot.slane %v5628_v27, 2 }
 0x1be   : > { %2311 = vmatprep.mubr.bf16.mxu0 %v1942_v10  ;;  %v1848_v60 = vsel %vm1833_vm3, %v1841_v56, %v8958_v30  ;;  %v1135_v10 = vld [vmem:[#allocation2 + $0x1c8] sm:$0xe]  ;;  %vm3435_vm3 = vcmask 1045504   ;;  %v4468_v30 = vsel %vm4432_vm8, 1, %v8851_v31 }
 0x1bf   : > { %4509 = vperm.xlu1 %5485, %v4468_v30   ;;  %v7885_v30 = vld [vmem:[#allocation2 + $0x78] ss:$12 sps:$4 sm:$0xff]  }
 0x1c4   : > { %2845 = vmatmul.mubr.bf16.gmra.mrb[80].mxu1 %v7534_v24  ;;  %v5617_v24 = vld [vmem:[#allocation8 + $0x90] sm:$0xff]  }
 0x1c5   : > { %2312 = vmatmul.mubr.bf16.gmra.mrb[68].mxu0 %v1940_v2  ;;  %2852 = vmatprep.mubr.bf16.mxu1 %v7576_v19  ;;  %v7771_v19 = vpop.f32.mrb[1].mxu1  ;;  %v4403_v2 = vld [vmem:[#allocation11 + $0x48] sm:$0xff] }
 0x1c6   : > { %5215 = vmatprep.mubr.bf16.mxu0 %v1842_v12  ;;  %v7773_v55 = vpop.f32.mrb[2].mxu1  ;;  %v1391_v12 = vrot.slane %v1116_v25, 4  ;;  %vm4439_vm5 = vcmp.ne.f32.partialorder %v4403_v2, 0.0 }
 0x1c7   : > { %v7775_v20 = vpop.f32.mrb[3].mxu1 }
 0x1cc   : > { %2853 = vmatmul.mubr.bf16.gmra.mrb[84].mxu1 %v7608_v39  ;;  %v5620_v39 = vld [vmem:[#allocation8 + $0xa0] sm:$0xff]  }
 0x1cd   : > { %5216 = vmatmul.mubr.bf16.vlgmr.msra.gmra.mrb[72].mxu0 %v1848_v60  ;;  %2860 = vmatprep.mubr.bf16.mxu1 %v7615_v5  ;;  %v7779_v5 = vpop.f32.mrb[4].mxu1  ;;  %v4466_v60 = vsel %vm4430_vm9, 1, %v8851_v31 }
 0x1ce   : > { %5252 = vmatpush3.bf16.msra.mxu0 %v5898_v53  ;;  %5267 = vmatprep.mubr.bf16.mxu0 %v5626_v23  ;;  %v7781_v43 = vpop.f32.mrb[5].mxu1  ;;  %v1392_v53 = vor.u32 %v1391_v12, %v7212_v50  ;;  %v5650_v12 = vld [vmem:[#allocation8 + $0x220] sm:$0xff]  }
 0x1cf   : > { %5253 = vmatprep.subr.bf16.mxu0 %v5616_v59  ;;  %v7787_v51 = vpop.f32.mrb[6].mxu1  ;;  %4503 = vperm.xlu0 %5484, %v4466_v60  }
 0x1d0   : > { %v7793_v35 = vpop.f32.mrb[7].mxu1 }
 0x1d1   : > { %v7803_v52 = vpop.f32.mrb[8].mxu1 }
 0x1d2   : > { %5254 = vmatpush3.bf16.msra.mxu0 %v5616_v59  ;;  %v7809_v6 = vpop.f32.mrb[9].mxu1  ;;  %v7832_v59 = vld [vmem:[#allocation2 + $0x48] ss:$12 sps:$4 sm:$0xff]  }
 0x1d3   : > { %5255 = vmatprep.subr.bf16.mxu0 %v5617_v24  ;;  %v7812_v62 = vpop.f32.mrb[10].mxu1 }
 0x1d4   : > { %2861 = vmatmul.mubr.bf16.gmra.mrb[88].mxu1 %v7667_v46  ;;  %v1128_v46 = vshll.u32 %v7784_v44, 16  ;;  %v7822_v32 = vpop.f32.mrb[11].mxu1 }
 0x1d5   : > { %2868 = vmatprep.mubr.bf16.mxu1 %v7671_v21  ;;  %v1125_v21 = vshrl.u32 %v7784_v44, 16  ;;  %v1123_v44 = vrot.slane %v7807_v45, 4 }
 0x1d6   : > { %5256 = vmatpush3.bf16.msra.mxu0 %v5617_v24  ;;  %v7797_v54 = vrot.slane %v1128_v46, 5 }
 0x1d7   : > { %5257 = vmatprep.subr.bf16.mxu0 %v5619_v11  ;;  %v1396_v61 = vrot.slane %v1125_v21, 4  ;;  %v1127_v24 = vrot.slane %v1125_v21, 7 }
 0x1d9   : > { %v1397_v49 = vor.u32 %v1396_v61, %v7797_v54  ;;  %v4395_v61 = vld [vmem:[#allocation11 + $0x8] sm:$0xff]  ;;  %v7841_v25 = vpop.f32.mrb[12].mxu1  ;;  %v1130_v21 = vor.u32 %v1128_v46, %v1127_v24  ;;  %v4404_v24 = vld [vmem:[#allocation11 + $0x50] sm:$0xff] }
 0x1da   : > { %5258 = vmatpush3.bf16.msra.mxu0 %v5619_v11  ;;  %v3441_v11 = vsel %vm3435_vm3, %v3439_v0, %v3440_v29  ;;  %v7847_v57 = vpop.f32.mrb[13].mxu1  ;;  %v4401_v0 = vld [vmem:[#allocation11 + $0x38] sm:$0xff] }
 0x1db   : > { %5259 = vmatprep.subr.bf16.mxu0 %v5620_v39  ;;  %v1398_v41 = vrot.slane %v1397_v49, 4  ;;  %v3437_v49 = vrot.slane %v7832_v59, 2  ;;  %v7889_v59 = vld [vmem:[#allocation2 + $0x94] ss:$12 sps:$4 sm:$0xff]  }
 0x1dc   : > { %2869 = vmatmul.mubr.bf16.gmra.mrb[92].mxu1 %v7714_v48  ;;  %v5623_v48 = vld [vmem:[#allocation8 + $0xb0] sm:$0xff]  }
 0x1dd   : > { %2876 = vmatprep.mubr.bf16.mxu1 %v7716_v15  ;;  %v8960_v15 = vld [vmem:[#allocation27_spill] sm:$0xff]  ;;  %v1407_v42 = vsel %vm6786_vm12, %v1398_v41, %v1406_v26  ;;  %vm4431_vm12 = vcmp.ne.f32.partialorder %v4395_v61, 0.0  ;;  %v7861_v41 = vpop.f32.mrb[14].mxu1  ;;  %v3451_v61 = vrot.slane %v7885_v30, 2 }
 0x1de   : > { %5260 = vmatpush3.bf16.msra.mxu0 %v5620_v39  ;;  %v8961_v18 = vshrl.u32 %v8960_v15, 16  ;;  %v8962_v3 = vshll.u32 %v8960_v15, 16  ;;  %1408 = vst [vmem:[#allocation2 + $0x1e8] sm:$0x3] %v1407_v42  ;;  %v7838_v39 = vld [vmem:[#allocation2 + $0x64] ss:$12 sps:$4 sm:$0xff]  }
 0x1df   : > { %5261 = vmatprep.subr.bf16.mxu0 %v5622_v13  ;;  %v4467_v15 = vsel %vm4431_vm12, 1, %v8851_v31  ;;  %v3447_v46 = vrot.slane %v7838_v39, 2  ;;  %v4398_v26 = vld [vmem:[#allocation11 + $0x20] sm:$0xff] }
 0x1e0   : > { %v1110_v22 = vrot.slane %v8961_v18, 7  ;;  %vm4434_vm15 = vcmp.ne.f32.partialorder %v4398_v26, 0.0  ;;  %4506 = vperm.xlu0 %5484, %v4467_v15   ;;  %v7877_v42 = vld [vmem:[#allocation2 + $0x7c] ss:$12 sps:$4 sm:$0xff]   ;;  %v7903_v26 = vld [vmem:[#allocation2 + $0xac] ss:$12 sps:$4 sm:$0xff]  }
 0x1e1   : > { %v4470_v47 = vsel %vm4434_vm15, 1, %v8851_v31 }
 0x1e2   : > { %5262 = vmatpush3.bf16.msra.mxu0 %v5622_v13  ;;  %v1113_v16 = vor.u32 %v8962_v3, %v1110_v22  ;;  %v1114_v7 = vrot.slane %v1110_v22, 4  ;;  %v4397_v13 = vld [vmem:[#allocation11 + $0x18] sm:$0xff]  ;;  %v7865_v3 = vpop.f32.mrb[15].mxu1 }
 0x1e3   : > { %5263 = vmatprep.subr.bf16.mxu0 %v5623_v48  ;;  %vm4433_vm10 = vcmp.ne.f32.partialorder %v4397_v13, 0.0  ;;  %v5901_v13 = vld [vmem:[#allocation2 + $0x80] ss:$12 sps:$4 sm:$0xff]  }
 0x1e4   : > { %2877 = vmatmul.mubr.bf16.gmra.mrb[96].mxu1 %v7729_v28  ;;  %v1419_v28 = vld [vmem:[#allocation2 + $0x20] sm:$0xf]  ;;  %v1122_v56 = vsel %vm6528_vm2, %v1114_v7, %v1121_v14  ;;  %v1136_v63 = vsel %vm6861_vm14, %v1113_v16, %v1135_v10  ;;  %v4469_v50 = vsel %vm4433_vm10, 1, %v8851_v31  ;;  %vm7854_vm14 = vmand %vm1409_vm13, %vm1064_vm11  ;;  %v3438_v16 = vsel %vm3435_vm3, %v3436_v58, %v3437_v49  ;;  %v5646_v10 = vld [vmem:[#allocation8 + $0x218] sm:$0xff]   ;;  %4515 = vperm.xlu0 %5484, %v4470_v47  }
 0x1e5   : > { %2884 = vmatprep.mubr.bf16.mxu1 %v7733_v1  ;;  %v5634_v1 = vld [vmem:[#allocation8 + $0x200] sm:$0xff]   ;;  %1137 = vst [vmem:[#allocation2 + $0x1c8] sm:$0xe] %v1136_v63  ;;  %1138 = vst [vmem:[#allocation2 + $0x1d4] sm:$0xf] %v1122_v56  ;;  %v4975_v23 = vcombine.low %v1419_v28, %v7750_v8  ;;  %v1393_v8 = vrot.slane %v1392_v53, 4  ;;  %4512 = vperm.xlu1 %5485, %v4469_v50   ;;  %v3448_v14 = vsel %vm3435_vm3, %v3440_v29, %v3447_v46 }
 0x1e6   : > { %5264 = vmatpush3.bf16.msra.mxu0 %v5623_v48  ;;  %v5638_v48 = vld [vmem:[#allocation8 + $0x208] sm:$0xff]   ;;  %v1411_v22 = vld [vmem:[#allocation2 + $0x1e8] sm:$0x2]  ;;  %v4472_v29 = vsel %vm4436_vm1, 1, %v8851_v31  ;;  %v3453_v56 = vrot.slane %v7877_v42, 2  ;;  %v4405_v53 = vld [vmem:[#allocation11 + $0x58] sm:$0xff] }
 0x1e7   : > { %5265 = vmatprep.subr.bf16.mxu0 %v5625_v9  ;;  %v1412_v4 = vsel %vm7854_vm14, 0, %v1411_v22  ;;  %v7871_v7 = vld [vmem:[#allocation2 + $0x60] ss:$12 sps:$4 sm:$0xff]   ;;  %v4402_v63 = vld [vmem:[#allocation11 + $0x40] sm:$0xff]  ;;  %vm4441_vm7 = vcmp.ne.f32.partialorder %v4405_v53, 0.0  ;;  %v3459_v58 = vrot.slane %v7889_v59, 2 }
 0x1e8   : > { %1413 = vst [vmem:[#allocation2 + $0x1e8] sm:$0x2] %v1412_v4  ;;  %v3445_v33 = vrot.slane %v7871_v7, 2  ;;  %vm4438_vm6 = vcmp.ne.f32.partialorder %v4402_v63, 0.0  ;;  %4521 = vperm.xlu0 %5484, %v4472_v29   ;;  %v4477_v39 = vsel %vm4441_vm7, 1, %v8851_v31  ;;  %v4407_v50 = vld [vmem:[#allocation11 + $0x68] sm:$0xff] }
 0x1e9   : > { %v4474_v60 = vsel %vm4438_vm6, 1, %v8851_v31  ;;  %vm4443_vm4 = vcmp.ne.f32.partialorder %v4407_v50, 0.0  ;;  %v7899_v22 = vld [vmem:[#allocation2 + $0x90] ss:$12 sps:$4 sm:$0xff]   ;;  %v4412_v53 = vld [vmem:[#allocation11 + $0x90] sm:$0xff] }
 0x1ea   : > { %5266 = vmatpush3.bf16.msra.mxu0 %v5625_v9  ;;  %v4399_v9 = vld [vmem:[#allocation11 + $0x28] sm:$0xff]  ;;  %v3446_v27 = vsel %vm3435_vm3, %v3437_v49, %v3445_v33  ;;  %v3452_v18 = vsel %vm3435_vm3, %v3445_v33, %v3451_v61  ;;  %v5662_v47 = vld [vmem:[#allocation8 + $0x238] sm:$0xff]   ;;  %v3457_v34 = vrot.slane %v7899_v22, 2  ;;  %v3465_v33 = vrot.slane %v7903_v26, 2  ;;  %v4414_v50 = vld [vmem:[#allocation11 + $0xa0] sm:$0xff] }
 0x1eb   : > { %5303 = vmatprep.subr.bf16.mxu0 %v5634_v1  ;;  %vm4435_vm11 = vcmp.ne.f32.partialorder %v4399_v9, 0.0  ;;  %v5658_v49 = vld [vmem:[#allocation8 + $0x230] sm:$0xff]   ;;  %v3460_v9 = vsel %vm3435_vm3, %v3453_v56, %v3459_v58  ;;  %v4413_v59 = vld [vmem:[#allocation11 + $0x98] sm:$0xff] }
 0x1ec   : > { %2885 = vmatmul.mubr.bf16.gmra.mrb[100].mxu1 %v7740_v40  ;;  %v1395_v40 = vsel %vm7235_vm0, %v1393_v8, %v7797_v54  ;;  %v5642_v54 = vld [vmem:[#allocation8 + $0x210] sm:$0xff]   ;;  %v4471_v45 = vsel %vm4435_vm11, 1, %v8851_v31  ;;  %4527 = vperm.xlu0 %5484, %v4474_v60   ;;  %vm4440_vm0 = vcmp.ne.f32.partialorder %v4404_v24, 0.0  ;;  %v3458_v63 = vsel %vm3435_vm3, %v3451_v61, %v3457_v34  ;;  %v7941_v22 = vld [vmem:[#allocation2 + $0xc0] ss:$12 sps:$4 sm:$0xff]  }
 0x1ed   : > { %5268 = vmatmul.mubr.bf16.vlgmr.msra.gmra.mrb[76].mxu0 %v4975_v23  ;;  %3777 = vmatprep.mubr.bf16.mxu1 %v3441_v11  ;;  %1405 = vst [vmem:[#allocation2 + $0x1dc] sm:$0xf] %v1395_v40  ;;  %v3454_v23 = vsel %vm3435_vm3, %v3447_v46, %v3453_v56  ;;  %v5654_v11 = vld [vmem:[#allocation8 + $0x228] sm:$0xff]   ;;  %v5902_v8 = vld [vmem:[#allocation2 + $0x98] ss:$12 sps:$4 sm:$0xff]   ;;  %v4479_v40 = vsel %vm4443_vm4, 1, %v8851_v31  ;;  %v3466_v30 = vsel %vm3435_vm3, %v3459_v58, %v3465_v33 }
 0x1ee   : > { %5304 = vmatpush3.bf16.msra.mxu0 %v5634_v1  ;;  %5271 = vmatprep.mubr.bf16.mxu0 %v7755_v17  ;;  %v1131_v17 = vsel %vm6528_vm2, %v1123_v44, %v1130_v21  ;;  %vm4437_vm2 = vcmp.ne.f32.partialorder %v4401_v0, 0.0  ;;  %v4475_v1 = vsel %vm4439_vm5, 1, %v8851_v31  ;;  %v4406_v21 = vld [vmem:[#allocation11 + $0x60] sm:$0xff]  ;;  %v4411_v29 = vld [vmem:[#allocation11 + $0x88] sm:$0xff]  ;;  %vm4449_vm14 = vcmp.ne.f32.partialorder %v4413_v59, 0.0 }
 0x1ef   : > { %5305 = vmatprep.subr.bf16.mxu0 %v5638_v48  ;;  %1139 = vst [vmem:[#allocation2 + $0x1e0] sm:$0x3] %v1131_v17  ;;  %4518 = vperm.xlu1 %5485, %v4471_v45   ;;  %v4473_v28 = vsel %vm4437_vm2, 1, %v8851_v31  ;;  %vm4442_vm8 = vcmp.ne.f32.partialorder %v4406_v21, 0.0  ;;  %v4409_v17 = vld [vmem:[#allocation11 + $0x78] sm:$0xff]  ;;  %v4408_v45 = vld [vmem:[#allocation11 + $0x70] sm:$0xff] }
 0x1f0   : > { %v7895_v15 = vpop.f32.mrb[0].mxu0  ;;  %v4478_v46 = vsel %vm4442_vm8, 1, %v8851_v31  ;;  %vm4445_vm9 = vcmp.ne.f32.partialorder %v4409_v17, 0.0  ;;  %vm4444_vm10 = vcmp.ne.f32.partialorder %v4408_v45, 0.0  ;;  %v5903_v0 = vld [vmem:[#allocation2 + $0xb0] ss:$12 sps:$4 sm:$0xff]  }
 0x1f1   : > { %v2179_v44 = vpop.f32.mrb[1].mxu0  ;;  %v4481_v42 = vsel %vm4445_vm9, 1, %v8851_v31  ;;  %vm4447_vm12 = vcmp.ne.f32.partialorder %v4411_v29, 0.0  ;;  %v7927_v60 = vld [vmem:[#allocation2 + $0xc4] ss:$12 sps:$4 sm:$0xff]   ;;  %vm4448_vm11 = vcmp.ne.f32.partialorder %v4412_v53, 0.0 }
 0x1f2   : > { %5306 = vmatpush3.bf16.msra.mxu0 %v5638_v48  ;;  %v4476_v48 = vsel %vm4440_vm0, 1, %v8851_v31  ;;  %v4483_v2 = vsel %vm4447_vm12, 1, %v8851_v31  ;;  %v4484_v61 = vsel %vm4448_vm11, 1, %v8851_v31  ;;  %v4415_v58 = vld [vmem:[#allocation11 + $0xa8] sm:$0xff]  ;;  %vm4450_vm2 = vcmp.ne.f32.partialorder %v4414_v50, 0.0  ;;  %v4417_v45 = vld [vmem:[#allocation11 + $0xb8] sm:$0xff] }
 0x1f3   : > { %5307 = vmatprep.subr.bf16.mxu0 %v5642_v54  ;;  %4524 = vperm.xlu1 %5485, %v4473_v28   ;;  %v4480_v28 = vsel %vm4444_vm10, 1, %v8851_v31  ;;  %vm4451_vm15 = vcmp.ne.f32.partialorder %v4415_v58, 0.0  ;;  %v7949_v17 = vld [vmem:[#allocation2 + $0xdc] ss:$12 sps:$4 sm:$0xff]   ;;  %vm4453_vm1 = vcmp.ne.f32.partialorder %v4417_v45, 0.0 }
 0x1f4   : > { %3778 = vmatmul.mubr.bf16.vlgmr.msra.gmra.mrb[104].mxu1 %v3438_v16  ;;  %4533 = vperm.xlu0 %5484, %v4476_v48   ;;  %v7905_v4 = vpop.f32.mrb[16].mxu1  ;;  %v5906_v48 = vld [vmem:[#allocation2 + $0xf8] ss:$12 sps:$4 sm:$0xff]  }
 0x1f5   : > { %5272 = vmatmul.mubr.bf16.gmra.mrb[80].mxu0 %v5899_v38  ;;  %3785 = vmatprep.mubr.bf16.mxu1 %v3448_v14  ;;  %v7909_v16 = vpop.f32.mrb[17].mxu1  ;;  %v5904_v38 = vld [vmem:[#allocation2 + $0xc8] ss:$12 sps:$4 sm:$0xff]   ;;  %v4419_v29 = vld [vmem:[#allocation11 + $0xc8] sm:$0xff] }
 0x1f6   : > { %5275 = vmatprep.mubr.bf16.mxu0 %v5900_v36  ;;  %5308 = vmatpush3.bf16.msra.mxu0 %v5642_v54  ;;  %v7907_v54 = vpop.f32.mrb[2].mxu0  ;;  %v7911_v14 = vpop.f32.mrb[18].mxu1  ;;  %v4410_v36 = vld [vmem:[#allocation11 + $0x80] sm:$0xff]  ;;  %vm4455_vm6 = vcmp.ne.f32.partialorder %v4419_v29, 0.0  ;;  %v4424_v29 = vld [vmem:[#allocation11 + $0xf0] sm:$0xff] }
 0x1f7   : > { %5309 = vmatprep.subr.bf16.mxu0 %v5646_v10  ;;  %4530 = vperm.xlu1 %5485, %v4475_v1   ;;  %v2182_v7 = vpop.f32.mrb[3].mxu0  ;;  %vm4446_vm13 = vcmp.ne.f32.partialorder %v4410_v36, 0.0  ;;  %v4418_v36 = vld [vmem:[#allocation11 + $0xc0] sm:$0xff]  ;;  %vm4460_vm12 = vcmp.ne.f32.partialorder %v4424_v29, 0.0 }
 0x1f8   : > { %4539 = vperm.xlu0 %5484, %v4478_v46   ;;  %v4486_v46 = vsel %vm4450_vm2, 1, %v8851_v31  ;;  %v4416_v7 = vld [vmem:[#allocation11 + $0xb0] sm:$0xff]  ;;  %vm4454_vm7 = vcmp.ne.f32.partialorder %v4418_v36, 0.0  ;;  %v7989_v36 = vld [vmem:[#allocation2 + $0x50] ss:$12 sps:$4 sm:$0xff]  }
 0x1f9   : > { %vm4452_vm5 = vcmp.ne.f32.partialorder %v4416_v7, 0.0  ;;  %v4490_v53 = vsel %vm4454_vm7, 1, %v8851_v31  ;;  %v7983_v7 = vld [vmem:[#allocation2 + $0xf0] ss:$12 sps:$4 sm:$0xff]  }
 0x1fa   : > { %5310 = vmatpush3.bf16.msra.mxu0 %v5646_v10  ;;  %v7915_v10 = vpop.f32.mrb[19].mxu1  ;;  %v7919_v56 = vpop.f32.mrb[4].mxu0 }
 0x1fb   : > { %5311 = vmatprep.subr.bf16.mxu0 %v5650_v12  ;;  %4536 = vperm.xlu1 %5485, %v4477_v39   ;;  %v2187_v1 = vpop.f32.mrb[5].mxu0  ;;  %v5905_v39 = vld [vmem:[#allocation2 + $0xe0] ss:$12 sps:$4 sm:$0xff]  }
 0x1fc   : > { %3786 = vmatmul.mubr.bf16.gmra.mrb[108].mxu1 %v3446_v27  ;;  %4545 = vperm.xlu0 %5484, %v4480_v28   ;;  %v4482_v27 = vsel %vm4446_vm13, 1, %v8851_v31  ;;  %v5908_v28 = vld [vmem:[#allocation2 + $0x128] ss:$12 sps:$4 sm:$0xff]   ;;  %v4491_v1 = vsel %vm4455_vm6, 1, %v8851_v31 }
 0x1fd   : > { %5276 = vmatmul.mubr.bf16.gmra.mrb[84].mxu0 %v5901_v13  ;;  %3793 = vmatprep.mubr.bf16.mxu1 %v3454_v23  ;;  %v7929_v23 = vpop.f32.mrb[6].mxu0 }
 0x1fe   : > { %5279 = vmatprep.mubr.bf16.mxu0 %v5902_v8  ;;  %5312 = vmatpush3.bf16.msra.mxu0 %v5650_v12  ;;  %v7923_v12 = vld [vmem:[#allocation2 + $0xa8] ss:$12 sps:$4 sm:$0xff]   ;;  %v2190_v24 = vpop.f32.mrb[7].mxu0  ;;  %v3471_v8 = vrot.slane %v7927_v60, 2 }
 0x1ff   : > { %5313 = vmatprep.subr.bf16.mxu0 %v5654_v11  ;;  %4542 = vperm.xlu1 %5485, %v4479_v40   ;;  %v3463_v13 = vrot.slane %v7923_v12, 2  ;;  %v4487_v40 = vsel %vm4451_vm15, 1, %v8851_v31  ;;  %v7967_v24 = vld [vmem:[#allocation2 + $0xf4] ss:$12 sps:$4 sm:$0xff]  }
 0x200   : > { %4551 = vperm.xlu0 %5484, %v4482_v27  }
 0x202   : > { %5314 = vmatpush3.bf16.msra.mxu0 %v5654_v11  ;;  %v4485_v11 = vsel %vm4449_vm14, 1, %v8851_v31  ;;  %v7935_v21 = vpop.f32.mrb[20].mxu1 }
 0x203   : > { %5315 = vmatprep.subr.bf16.mxu0 %v5658_v49  ;;  %4548 = vperm.xlu1 %5485, %v4481_v42   ;;  %v5907_v42 = vld [vmem:[#allocation2 + $0x110] ss:$12 sps:$4 sm:$0xff]  }
 0x204   : > { %3794 = vmatmul.mubr.bf16.gmra.mrb[112].mxu1 %v3452_v18  ;;  %4557 = vperm.xlu0 %5484, %v4484_v61   ;;  %v3464_v18 = vsel %vm3435_vm3, %v3457_v34, %v3463_v13  ;;  %v4488_v34 = vsel %vm4452_vm5, 1, %v8851_v31 }
 0x205   : > { %5280 = vmatmul.mubr.bf16.gmra.mrb[88].mxu0 %v5903_v0  ;;  %3801 = vmatprep.mubr.bf16.mxu1 %v3460_v9  ;;  %v3472_v9 = vsel %vm3435_vm3, %v3465_v33, %v3471_v8  ;;  %v3469_v0 = vrot.slane %v7941_v22, 2  ;;  %v4423_v22 = vld [vmem:[#allocation11 + $0xe8] sm:$0xff] }
 0x206   : > { %5283 = vmatprep.mubr.bf16.mxu0 %v5904_v38  ;;  %5316 = vmatpush3.bf16.msra.mxu0 %v5658_v49  ;;  %v7937_v49 = vpop.f32.mrb[21].mxu1  ;;  %v3477_v38 = vrot.slane %v7949_v17, 2  ;;  %vm4459_vm8 = vcmp.ne.f32.partialorder %v4423_v22, 0.0  ;;  %v5665_v22 = vld [vmem:[#allocation2 + $0x108] ss:$12 sps:$4 sm:$0xff]  }
 0x207   : > { %5317 = vmatprep.subr.bf16.mxu0 %v5662_v47  ;;  %4554 = vperm.xlu1 %5485, %v4483_v2   ;;  %v7943_v44 = vpop.f32.mrb[22].mxu1  ;;  %v3470_v27 = vsel %vm3435_vm3, %v3463_v13, %v3469_v0  ;;  %v4495_v17 = vsel %vm4459_vm8, 1, %v8851_v31 }
 0x208   : > { %v7947_v26 = vpop.f32.mrb[23].mxu1  ;;  %4563 = vperm.xlu0 %5484, %v4486_v46   ;;  %v4422_v46 = vld [vmem:[#allocation11 + $0xe0] sm:$0xff] }
 0x209   : > { %vm4458_vm9 = vcmp.ne.f32.partialorder %v4422_v46, 0.0  ;;  %v5668_v46 = vld [vmem:[#allocation2 + $0x68] ss:$12 sps:$4 sm:$0xff]  }
 0x20a   : > { %5318 = vmatpush3.bf16.msra.mxu0 %v5662_v47  ;;  %v4489_v47 = vsel %vm4453_vm1, 1, %v8851_v31 }
 0x20b   : > { %4560 = vperm.xlu1 %5485, %v4485_v11   ;;  %v4421_v11 = vld [vmem:[#allocation11 + $0xd8] sm:$0xff] }
 0x20c   : > { %3802 = vmatmul.mubr.bf16.gmra.mrb[116].mxu1 %v3458_v63  ;;  %v2193_v33 = vpop.f32.mrb[8].mxu0  ;;  %4569 = vperm.xlu0 %5484, %v4488_v34   ;;  %vm4457_vm0 = vcmp.ne.f32.partialorder %v4421_v11, 0.0  ;;  %v4427_v11 = vld [vmem:[#allocation11 + $0x108] sm:$0xff] }
 0x20d   : > { %5284 = vmatmul.mubr.bf16.gmra.mrb[92].mxu0 %v5905_v39  ;;  %3809 = vmatprep.mubr.bf16.mxu1 %v3466_v30  ;;  %v7956_v2 = vadd.f32 %v7771_v19, %v2193_v33  ;;  %v2195_v63 = vpop.f32.mrb[9].mxu0  ;;  %v7960_v30 = vld [vmem:[#allocation2 + $0xd8] ss:$12 sps:$4 sm:$0xff]   ;;  %v3478_v19 = vsel %vm3435_vm3, %v3471_v8, %v3477_v38  ;;  %v4493_v13 = vsel %vm4457_vm0, 1, %v8851_v31  ;;  %v4425_v33 = vld [vmem:[#allocation11 + $0xf8] sm:$0xff]  ;;  %vm4463_vm13 = vcmp.ne.f32.partialorder %v4427_v11, 0.0 }
 0x20e   : > { %5287 = vmatprep.mubr.bf16.mxu0 %v5906_v48  ;;  %v2196_v12 = vpop.f32.mrb[10].mxu0  ;;  %v4420_v39 = vld [vmem:[#allocation11 + $0xd0] sm:$0xff]  ;;  %v3475_v48 = vrot.slane %v7960_v30, 2  ;;  %vm4461_vm10 = vcmp.ne.f32.partialorder %v4425_v33, 0.0  ;;  %v4496_v30 = vsel %vm4460_vm12, 1, %v8851_v31  ;;  %v3487_v33 = vrot.slane %v5665_v22, 2 }
 0x20f   : > { %4566 = vperm.xlu1 %5485, %v4487_v40   ;;  %v7963_v60 = vadd.f32 %v7775_v20, %v2196_v12  ;;  %v2198_v59 = vpop.f32.mrb[11].mxu0  ;;  %vm4456_vm4 = vcmp.ne.f32.partialorder %v4420_v39, 0.0  ;;  %v5909_v20 = vld [vmem:[#allocation2 + $0x140] ss:$12 sps:$4 sm:$0xff]   ;;  %v5910_v40 = vld [vmem:[#allocation2 + $0x158] ss:$12 sps:$4 sm:$0xff]  }
 0x210   : > { %4575 = vperm.xlu0 %5484, %v4490_v53   ;;  %v4492_v8 = vsel %vm4456_vm4, 1, %v8851_v31  ;;  %v3476_v45 = vsel %vm3435_vm3, %v3469_v0, %v3475_v48  ;;  %v4497_v0 = vsel %vm4461_vm10, 1, %v8851_v31  ;;  %v5911_v12 = vld [vmem:[#allocation2 + $0x170] ss:$12 sps:$4 sm:$0xff]   ;;  %v5912_v53 = vld [vmem:[#allocation2 + $0x188] ss:$12 sps:$4 sm:$0xff]  }
 0x211   : > { %v4426_v39 = vld [vmem:[#allocation11 + $0x100] sm:$0xff]  ;;  %v5671_v11 = vld [vmem:[#allocation2 + $0x120] ss:$12 sps:$4 sm:$0xff]  }
 0x212   : > { %v7969_v61 = vpop.f32.mrb[24].mxu1  ;;  %vm4462_vm14 = vcmp.ne.f32.partialorder %v4426_v39, 0.0 }
 0x213   : > { %4572 = vperm.xlu1 %5485, %v4489_v47   ;;  %v7973_v58 = vpop.f32.mrb[25].mxu1  ;;  %v7985_v47 = vld [vmem:[#allocation2 + $0x10c] ss:$12 sps:$4 sm:$0xff]  }
 0x214   : > { %3810 = vmatmul.mubr.bf16.gmra.mrb[120].mxu1 %v3464_v18  ;;  %v7976_v50 = vpop.f32.mrb[26].mxu1  ;;  %v3483_v18 = vrot.slane %v7967_v24, 2  ;;  %4581 = vperm.xlu0 %5484, %v4492_v8   ;;  %v3443_v8 = vrot.slane %v7989_v36, 2 }
 0x215   : > { %5288 = vmatmul.mubr.bf16.gmra.mrb[96].mxu0 %v5907_v42  ;;  %3817 = vmatprep.mubr.bf16.mxu1 %v3472_v9  ;;  %v7979_v9 = vpop.f32.mrb[27].mxu1  ;;  %v4494_v42 = vsel %vm4458_vm9, 1, %v8851_v31 }
 0x216   : > { %5291 = vmatprep.mubr.bf16.mxu0 %v5908_v28  ;;  %v3484_v34 = vsel %vm3435_vm3, %v3477_v38, %v3483_v18  ;;  %v5666_v28 = vld [vmem:[#allocation2 + $0x38] ss:$12 sps:$4 sm:$0xfc]  }
 0x217   : > { %4578 = vperm.xlu1 %5485, %v4491_v1   ;;  %v3481_v1 = vrot.slane %v7983_v7, 2  ;;  %v3442_v24 = vrot.slane %v5666_v28, 2  ;;  %v5669_v7 = vld [vmem:[#allocation2 + $0x124] ss:$12 sps:$4 sm:$0xff]  }
 0x218   : > { %4587 = vperm.xlu0 %5484, %v4494_v42   ;;  %v3495_v36 = vrot.slane %v5669_v7, 2 }
 0x219   : > { %v3444_v42 = vsel %vm3435_vm3, %v3442_v24, %v3443_v8  ;;  %v3488_v24 = vsel %vm3435_vm3, %v3481_v1, %v3487_v33 }
 0x21a   : > { %v2201_v63 = vpop.f32.mrb[12].mxu0 }
 0x21b   : > { %4584 = vperm.xlu1 %5485, %v4493_v13   ;;  %v7994_v38 = vadd.f32 %v7769_v37, %v2201_v63  ;;  %v4499_v37 = vsel %vm4463_vm13, 1, %v8851_v31 }
 0x21c   : > { %3818 = vmatmul.mubr.bf16.gmra.mrb[124].mxu1 %v3470_v27  ;;  %v2203_v27 = vpop.f32.mrb[13].mxu0  ;;  %4593 = vperm.xlu0 %5484, %v4496_v30  }
 0x21d   : > { %5292 = vmatmul.mubr.bf16.gmra.mrb[100].mxu0 %v5909_v20  ;;  %3825 = vmatprep.mubr.bf16.mxu1 %v3478_v19  ;;  %v2204_v59 = vpop.f32.mrb[14].mxu0  ;;  %v3489_v19 = vrot.slane %v7985_v47, 2  ;;  %v4428_v47 = vld [vmem:[#allocation11 + $0x110] sm:$0xff] }
 0x21e   : > { %5295 = vmatprep.mubr.bf16.mxu0 %v5910_v40  ;;  %v7999_v13 = vadd.f32 %v7773_v55, %v2204_v59  ;;  %v2206_v20 = vpop.f32.mrb[15].mxu0  ;;  %v3482_v40 = vsel %vm3435_vm3, %v3475_v48, %v3481_v1  ;;  %v4429_v55 = vld [vmem:[#allocation11 + $0x118] sm:$0xff]  ;;  %vm4464_vm15 = vcmp.ne.f32.partialorder %v4428_v47, 0.0  ;;  %v3493_v1 = vrot.slane %v5671_v11, 2 }
 0x21f   : > { %4590 = vperm.xlu1 %5485, %v4495_v17   ;;  %v4498_v17 = vsel %vm4462_vm14, 1, %v8851_v31  ;;  %vm4465_vm11 = vcmp.ne.f32.partialorder %v4429_v55, 0.0  ;;  %v5913_v48 = vld [vmem:[#allocation2 + $0x1a0] ss:$12 sps:$4 sm:$0xff]   ;;  %v4500_v29 = vsel %vm4464_vm15, 1, %v8851_v31  ;;  %v3496_v22 = vsel %vm3435_vm3, %v3489_v19, %v3495_v36 }
 0x220   : > { %4599 = vperm.xlu0 %5484, %v4498_v17   ;;  %v4501_v28 = vsel %vm4465_vm11, 1, %v8851_v31  ;;  %v5679_v11 = vld [vmem:[#allocation2 + $0x154] ss:$12 sps:$4 sm:$0xff]  }
 0x223   : > { %4596 = vperm.xlu1 %5485, %v4497_v0  }
 0x224   : > { %3826 = vmatmul.mubr.bf16.gmra.mrb[128].mxu1 %v3476_v45  ;;  %v3490_v45 = vsel %vm3435_vm3, %v3483_v18, %v3489_v19  ;;  %v3449_v18 = vrot.slane %v5668_v46, 2  ;;  %4605 = vperm.xlu0 %5484, %v4500_v29   ;;  %v5674_v46 = vld [vmem:[#allocation2 + $0x13c] ss:$12 sps:$4 sm:$0xff]   ;;  %v3494_v19 = vsel %vm3435_vm3, %v3487_v33, %v3493_v1  ;;  %v5676_v29 = vld [vmem:[#allocation2 + $0x138] ss:$12 sps:$4 sm:$0xff]  }
 0x225   : > { %5296 = vmatmul.mubr.bf16.gmra.mrb[104].mxu0 %v5911_v12  ;;  %3833 = vmatprep.mubr.bf16.mxu1 %v3484_v34  ;;  %v5672_v34 = vld [vmem:[#allocation2 + $0x80] ss:$12 sps:$4 sm:$0xff]   ;;  %v3501_v55 = vrot.slane %v5674_v46, 2  ;;  %v3507_v46 = vrot.slane %v5679_v11, 2 }
 0x226   : > { %5299 = vmatprep.mubr.bf16.mxu0 %v5912_v53  ;;  %v3455_v12 = vrot.slane %v5672_v34, 2  ;;  %v5682_v33 = vld [vmem:[#allocation2 + $0xe0] ss:$12 sps:$4 sm:$0xff]  }
 0x227   : > { %4602 = vperm.xlu1 %5485, %v4499_v37  }
 0x228   : > { %v8009_v63 = vpop.f32.mrb[28].mxu1  ;;  %v3456_v17 = vsel %vm3435_vm3, %v3449_v18, %v3455_v12 }
 0x229   : > { %v8011_v27 = vpop.f32.mrb[29].mxu1 }
 0x22a   : > { %v2209_v0 = vpop.f32.mrb[16].mxu0  ;;  %v8016_v53 = vpop.f32.mrb[30].mxu1 }
 0x22b   : > { %4608 = vperm.xlu1 %5485, %v4501_v28   ;;  %v8014_v30 = vadd.f32 %v7781_v43, %v2209_v0  ;;  %v2211_v59 = vpop.f32.mrb[17].mxu0  ;;  %v8019_v39 = vpop.f32.mrb[31].mxu1  ;;  %v5673_v43 = vld [vmem:[#allocation2 + $0x98] ss:$12 sps:$4 sm:$0xff]  }
 0x22c   : > { %3834 = vmatmul.mubr.bf16.gmra.mrb[132].mxu1 %v3482_v40  ;;  %v2212_v31 = vpop.f32.mrb[18].mxu0  ;;  %v3450_v40 = vsel %vm3435_vm3, %v3443_v8, %v3449_v18  ;;  %v3461_v7 = vrot.slane %v5673_v43, 2 }
 0x22d   : > { %5300 = vmatmul.mubr.bf16.gmra.mrb[108].mxu0 %v5913_v48  ;;  %3841 = vmatprep.mubr.bf16.mxu1 %v3490_v45  ;;  %v8022_v20 = vadd.f32 %v7793_v35, %v2212_v31  ;;  %v2214_v37 = vpop.f32.mrb[19].mxu0  ;;  %v5677_v45 = vld [vmem:[#allocation2 + $0xb0] ss:$12 sps:$4 sm:$0xff]   ;;  %v5678_v31 = vld [vmem:[#allocation2 + $0xc8] ss:$12 sps:$4 sm:$0xff]  }
 0x22e   : > { %5319 = vmatprep.mubr.bf16.mxu0 %v3444_v42  ;;  %v3467_v35 = vrot.slane %v5677_v45, 2  ;;  %v3462_v59 = vsel %vm3435_vm3, %v3455_v12, %v3461_v7  ;;  %v3473_v43 = vrot.slane %v5678_v31, 2  ;;  %v3479_v12 = vrot.slane %v5682_v33, 2 }
 0x230   : > { %v8027_v47 = vpop.f32.mrb[32].mxu1 }
 0x231   : > { %v2752_v42 = vpop.f32.mrb[33].mxu1 }
 0x232   : > { %v2217_v34 = vpop.f32.mrb[20].mxu0  ;;  %v8029_v8 = vpop.f32.mrb[34].mxu1 }
 0x233   : > { %v8033_v28 = vadd.f32 %v7779_v5, %v2217_v34  ;;  %v2219_v48 = vpop.f32.mrb[21].mxu0  ;;  %v2755_v18 = vpop.f32.mrb[35].mxu1  ;;  %v3499_v5 = vrot.slane %v5676_v29, 2  ;;  %v3474_v29 = vsel %vm3435_vm3, %v3467_v35, %v3473_v43 }
 0x234   : > { %3842 = vmatmul.mubr.bf16.gmra.mrb[136].mxu1 %v3488_v24  ;;  %v2220_v0 = vpop.f32.mrb[22].mxu0  ;;  %v3502_v24 = vsel %vm3435_vm3, %v3495_v36, %v3501_v55 }
 0x235   : > { %5320 = vmatmul.mubr.bf16.vlgmr.msra.gmra.mrb[112].mxu0 %v3450_v40  ;;  %3849 = vmatprep.mubr.bf16.mxu1 %v3496_v22  ;;  %v8038_v37 = vadd.f32 %v7787_v51, %v2220_v0  ;;  %v2222_v40 = vpop.f32.mrb[23].mxu0  ;;  %v3468_v22 = vsel %vm3435_vm3, %v3461_v7, %v3467_v35  ;;  %v3500_v51 = vsel %vm3435_vm3, %v3493_v1, %v3499_v5  ;;  %v5687_v1 = vld [vmem:[#allocation2 + $0x110] ss:$12 sps:$4 sm:$0xff]  }
 0x236   : > { %5323 = vmatprep.mubr.bf16.mxu0 %v3456_v17  ;;  %v3508_v0 = vsel %vm3435_vm3, %v3501_v55, %v3507_v46  ;;  %v3480_v40 = vsel %vm3435_vm3, %v3473_v43, %v3479_v12  ;;  %v3491_v35 = vrot.slane %v5687_v1, 2  ;;  %v5692_v1 = vld [vmem:[#allocation2 + $0x140] ss:$12 sps:$4 sm:$0xff]  }
 0x238   : > { %v8041_v17 = vpop.f32.mrb[36].mxu1 }
 0x239   : > { %v2760_v36 = vpop.f32.mrb[37].mxu1 }
 0x23a   : > { %v2225_v45 = vpop.f32.mrb[24].mxu0  ;;  %v8043_v42 = vpop.f32.mrb[38].mxu1 }
 0x23b   : > { %v8047_v34 = vadd.f32 %v7809_v6, %v2225_v45  ;;  %v2227_v7 = vpop.f32.mrb[25].mxu0  ;;  %v2763_v48 = vpop.f32.mrb[39].mxu1 }
 0x23c   : > { %3850 = vmatmul.mubr.bf16.gmra.mrb[140].mxu1 %v3494_v19  ;;  %v5681_v19 = vld [vmem:[#allocation2 + $0x150] ss:$12 sps:$4 sm:$0xff]   ;;  %v2228_v18 = vpop.f32.mrb[26].mxu0 }
 0x23d   : > { %5324 = vmatmul.mubr.bf16.gmra.mrb[116].mxu0 %v3462_v59  ;;  %3857 = vmatprep.mubr.bf16.mxu1 %v3502_v24  ;;  %v5683_v59 = vld [vmem:[#allocation2 + $0xf8] ss:$12 sps:$4 sm:$0xff]   ;;  %v8052_v31 = vadd.f32 %v7822_v32, %v2228_v18  ;;  %v2230_v11 = vpop.f32.mrb[27].mxu0  ;;  %v3505_v6 = vrot.slane %v5681_v19, 2  ;;  %v5686_v18 = vld [vmem:[#allocation2 + $0x168] ss:$12 sps:$4 sm:$0xff]  }
 0x23e   : > { %5327 = vmatprep.mubr.bf16.mxu0 %v3468_v22  ;;  %v5684_v24 = vld [vmem:[#allocation2 + $0x16c] ss:$12 sps:$4 sm:$0xff]   ;;  %v3485_v22 = vrot.slane %v5683_v59, 2  ;;  %v5689_v11 = vld [vmem:[#allocation2 + $0x184] ss:$12 sps:$4 sm:$0xff]  }
 0x23f   : > { %v3513_v33 = vrot.slane %v5684_v24, 2  ;;  %v3506_v48 = vsel %vm3435_vm3, %v3499_v5, %v3505_v6  ;;  %v5688_v24 = vld [vmem:[#allocation2 + $0x128] ss:$12 sps:$4 sm:$0xff]  }
 0x240   : > { %v3486_v59 = vsel %vm3435_vm3, %v3479_v12, %v3485_v22  ;;  %v3503_v12 = vrot.slane %v5692_v1, 2  ;;  %v5697_v1 = vld [vmem:[#allocation2 + $0x170] ss:$12 sps:$4 sm:$0xff]  }
 0x242   : > { %v2233_v7 = vpop.f32.mrb[28].mxu0 }
 0x243   : > { %v8060_v43 = vadd.f32 %v7803_v52, %v2233_v7  ;;  %v3492_v52 = vsel %vm3435_vm3, %v3485_v22, %v3491_v35 }
 0x244   : > { %3858 = vmatmul.mubr.bf16.gmra.mrb[144].mxu1 %v3500_v51  ;;  %v2235_v51 = vpop.f32.mrb[29].mxu0 }
 0x245   : > { %5328 = vmatmul.mubr.bf16.gmra.mrb[120].mxu0 %v3474_v29  ;;  %3865 = vmatprep.mubr.bf16.mxu1 %v3508_v0  ;;  %v2766_v36 = vpop.f32.mrb[40].mxu1  ;;  %v2236_v0 = vpop.f32.mrb[30].mxu0 }
 0x246   : > { %5331 = vmatprep.mubr.bf16.mxu0 %v3480_v40  ;;  %v8056_v55 = vadd.f32 %v2766_v36, %v7956_v2  ;;  %v2768_v45 = vpop.f32.mrb[41].mxu1  ;;  %v3514_v2 = vsel %vm3435_vm3, %v3507_v46, %v3513_v33  ;;  %v8068_v40 = vadd.f32 %v7812_v62, %v2236_v0  ;;  %v2238_v5 = vpop.f32.mrb[31].mxu0  ;;  %v3497_v36 = vrot.slane %v5688_v24, 2  ;;  %v5691_v0 = vld [vmem:[#allocation2 + $0x180] ss:$12 sps:$4 sm:$0xff]  }
 0x247   : > { %v2769_v32 = vpop.f32.mrb[42].mxu1  ;;  %v3519_v45 = vrot.slane %v5689_v11, 2  ;;  %v5693_v11 = vld [vmem:[#allocation2 + $0x158] ss:$12 sps:$4 sm:$0xff]   ;;  %v5694_v5 = vld [vmem:[#allocation2 + $0x19c] ss:$12 sps:$4 sm:$0xff]  }
 0x248   : > { %v8063_v19 = vadd.f32 %v2769_v32, %v7963_v60  ;;  %v2771_v29 = vpop.f32.mrb[43].mxu1  ;;  %v3511_v60 = vrot.slane %v5686_v18, 2  ;;  %v3498_v24 = vsel %vm3435_vm3, %v3491_v35, %v3497_v36  ;;  %v3515_v35 = vrot.slane %v5697_v1, 2  ;;  %v5702_v1 = vld [vmem:[#allocation2 + $0x1a0] ss:$12 sps:$4 sm:$0xff]  }
 0x24a   : > { %v2241_v51 = vpop.f32.mrb[32].mxu0  ;;  %v3512_v29 = vsel %vm3435_vm3, %v3505_v6, %v3511_v60 }
 0x24b   : > { %v8076_v22 = vadd.f32 %v7847_v57, %v2241_v51  ;;  %v3504_v57 = vsel %vm3435_vm3, %v3497_v36, %v3503_v12 }
 0x24c   : > { %3866 = vmatmul.mubr.bf16.gmra.mrb[148].mxu1 %v3506_v48  ;;  %v2243_v48 = vpop.f32.mrb[33].mxu0 }
 0x24d   : > { %5332 = vmatmul.mubr.bf16.gmra.mrb[124].mxu0 %v3486_v59  ;;  %3873 = vmatprep.mubr.bf16.mxu1 %v3514_v2  ;;  %v2244_v2 = vpop.f32.mrb[34].mxu0 }
 0x24e   : > { %5335 = vmatprep.mubr.bf16.mxu0 %v3492_v52  ;;  %v8084_v52 = vadd.f32 %v7865_v3, %v2244_v2  ;;  %v2246_v6 = vpop.f32.mrb[35].mxu0  ;;  %v5696_v2 = vld [vmem:[#allocation2 + $0x198] ss:$12 sps:$4 sm:$0xff]  }
 0x24f   : > { %v2774_v7 = vpop.f32.mrb[44].mxu1  ;;  %v5699_v6 = vld [vmem:[#allocation2 + $0x1b4] ss:$12 sps:$4 sm:$0xff]  }
 0x250   : > { %v8072_v46 = vadd.f32 %v2774_v7, %v7994_v38  ;;  %v2776_v32 = vpop.f32.mrb[45].mxu1  ;;  %v3520_v38 = vsel %vm3435_vm3, %v3513_v33, %v3519_v45  ;;  %v3509_v7 = vrot.slane %v5693_v11, 2 }
 0x251   : > { %v2777_v62 = vpop.f32.mrb[46].mxu1  ;;  %v3525_v32 = vrot.slane %v5694_v5, 2  ;;  %v5698_v5 = vld [vmem:[#allocation2 + $0x188] ss:$12 sps:$4 sm:$0xff]  }
 0x252   : > { %v8079_v18 = vadd.f32 %v2777_v62, %v7999_v13  ;;  %v2779_v59 = vpop.f32.mrb[47].mxu1  ;;  %v3517_v13 = vrot.slane %v5691_v0, 2  ;;  %v3510_v11 = vsel %vm3435_vm3, %v3503_v12, %v3509_v7  ;;  %v3527_v12 = vrot.slane %v5702_v1, 2  ;;  %v5707_v1 = vld [vmem:[#allocation2 + $0x1d0] ss:$12 sps:$4 sm:$0xff]  }
 0x254   : > { %3874 = vmatmul.mubr.bf16.gmra.mrb[152].mxu1 %v3512_v29  ;;  %v3518_v59 = vsel %vm3435_vm3, %v3511_v60, %v3517_v13 }
 0x255   : > { %5336 = vmatmul.mubr.bf16.gmra.mrb[128].mxu0 %v3498_v24  ;;  %3881 = vmatprep.mubr.bf16.mxu1 %v3520_v38  ;;  %v2249_v48 = vpop.f32.mrb[36].mxu0 }
 0x256   : > { %5339 = vmatprep.mubr.bf16.mxu0 %v3504_v57  ;;  %v8092_v36 = vadd.f32 %v7841_v25, %v2249_v48  ;;  %v2251_v29 = vpop.f32.mrb[37].mxu0  ;;  %v3516_v25 = vsel %vm3435_vm3, %v3509_v7, %v3515_v35 }
 0x257   : > { %v2782_v51 = vpop.f32.mrb[48].mxu1  ;;  %v2252_v38 = vpop.f32.mrb[38].mxu0 }
 0x258   : > { %v8088_v33 = vadd.f32 %v2782_v51, %v8014_v30  ;;  %v2784_v62 = vpop.f32.mrb[49].mxu1  ;;  %v3526_v30 = vsel %vm3435_vm3, %v3519_v45, %v3525_v32  ;;  %v8100_v57 = vadd.f32 %v7861_v41, %v2252_v38  ;;  %v2254_v60 = vpop.f32.mrb[39].mxu0  ;;  %v3521_v51 = vrot.slane %v5698_v5, 2  ;;  %v5701_v38 = vld [vmem:[#allocation2 + $0x1b0] ss:$12 sps:$4 sm:$0xff]  }
 0x259   : > { %v2785_v3 = vpop.f32.mrb[50].mxu1  ;;  %v3531_v62 = vrot.slane %v5699_v6, 2  ;;  %v5703_v6 = vld [vmem:[#allocation2 + $0x1b8] ss:$12 sps:$4 sm:$0xff]  }
 0x25a   : > { %v8095_v0 = vadd.f32 %v2785_v3, %v8022_v20  ;;  %v2787_v24 = vpop.f32.mrb[51].mxu1  ;;  %v3523_v20 = vrot.slane %v5696_v2, 2  ;;  %v3522_v5 = vsel %vm3435_vm3, %v3515_v35, %v3521_v51  ;;  %v5704_v60 = vld [vmem:[#allocation2 + $0x1cc] ss:$12 sps:$4 sm:$0xff]   ;;  %v3539_v35 = vrot.slane %v5707_v1, 2 }
 0x25c   : > { %3882 = vmatmul.mubr.bf16.gmra.mrb[156].mxu1 %v3518_v59  ;;  %v3524_v24 = vsel %vm3435_vm3, %v3517_v13, %v3523_v20 }
 0x25d   : > { %5340 = vmatmul.mubr.bf16.gmra.mrb[132].mxu0 %v3510_v11  ;;  %3889 = vmatprep.mubr.bf16.mxu1 %v3526_v30 }
 0x25e   : > { %5343 = vmatprep.mubr.bf16.mxu0 %v3516_v25  ;;  %v2257_v29 = vpop.f32.mrb[40].mxu0 }
 0x25f   : > { %v2790_v48 = vpop.f32.mrb[52].mxu1  ;;  %v8108_v7 = vadd.f32 %v7909_v16, %v2257_v29  ;;  %v2259_v59 = vpop.f32.mrb[41].mxu0  ;;  %v3528_v16 = vsel %vm3435_vm3, %v3521_v51, %v3527_v12 }
 0x260   : > { %v8104_v45 = vadd.f32 %v2790_v48, %v8033_v28  ;;  %v2792_v3 = vpop.f32.mrb[53].mxu1  ;;  %v2260_v30 = vpop.f32.mrb[42].mxu0  ;;  %v3532_v28 = vsel %vm3435_vm3, %v3525_v32, %v3531_v62  ;;  %v3533_v48 = vrot.slane %v5703_v6, 2 }
 0x261   : > { %v2793_v41 = vpop.f32.mrb[54].mxu1  ;;  %v8116_v25 = vadd.f32 %v7915_v10, %v2260_v30  ;;  %v2262_v13 = vpop.f32.mrb[43].mxu0  ;;  %v3537_v3 = vrot.slane %v5704_v60, 2 }
 0x262   : > { %v8111_v2 = vadd.f32 %v2793_v41, %v8038_v37  ;;  %v2795_v11 = vpop.f32.mrb[55].mxu1  ;;  %v3529_v37 = vrot.slane %v5701_v38, 2  ;;  %v3142_v41 = vld [vmem:[#allocation2 + $0x1e0] sm:$0x33]  ;;  %v3534_v60 = vsel %vm3435_vm3, %v3527_v12, %v3533_v48 }
 0x263   : > { %v5708_v13 = vld [vmem:[#allocation2 + $0x1e8] ss:$0 sps:$4 sm:$0x33]  }
 0x264   : > { %3890 = vmatmul.mubr.bf16.gmra.mrb[160].mxu1 %v3524_v24  ;;  %v3530_v30 = vsel %vm3435_vm3, %v3523_v20, %v3529_v37 }
 0x265   : > { %5344 = vmatmul.mubr.bf16.gmra.mrb[136].mxu0 %v3522_v5  ;;  %3897 = vmatprep.mubr.bf16.mxu1 %v3532_v28  ;;  %v5706_v5 = vld [vmem:[#allocation2 + $0x1c8] ss:$12 sps:$4 sm:$0xff]  }
 0x266   : > { %5347 = vmatprep.mubr.bf16.mxu0 %v3528_v16  ;;  %v2265_v10 = vpop.f32.mrb[44].mxu0  ;;  %v5055_v16 = vcombine.high %v3142_v41, %v3142_v41 }
 0x267   : > { %v2798_v29 = vpop.f32.mrb[56].mxu1  ;;  %v8124_v51 = vadd.f32 %v7905_v4, %v2265_v10  ;;  %v2267_v24 = vpop.f32.mrb[45].mxu0  ;;  %v3540_v4 = vsel %vm3435_vm3, %v3533_v48, %v3539_v35 }
 0x268   : > { %v8120_v32 = vadd.f32 %v2798_v29, %v8047_v34  ;;  %v2800_v59 = vpop.f32.mrb[57].mxu1  ;;  %v2268_v6 = vpop.f32.mrb[46].mxu0  ;;  %v3538_v34 = vsel %vm3435_vm3, %v3531_v62, %v3537_v3  ;;  %v3535_v29 = vrot.slane %v5706_v5, 2 }
 0x269   : > { %v2801_v11 = vpop.f32.mrb[58].mxu1  ;;  %v8132_v1 = vadd.f32 %v7911_v14, %v2268_v6  ;;  %v2270_v20 = vpop.f32.mrb[47].mxu0  ;;  %v3543_v59 = vrot.slane %v5055_v16, 2 }
 0x26a   : > { %v8127_v38 = vadd.f32 %v2801_v11, %v8052_v31  ;;  %v2803_v28 = vpop.f32.mrb[59].mxu1  ;;  %v3545_v31 = vrot.slane %v5708_v13, 2  ;;  %v3536_v14 = vsel %vm3435_vm3, %v3529_v37, %v3535_v29 }
 0x26c   : > { %3898 = vmatmul.mubr.bf16.gmra.mrb[164].mxu1 %v3530_v30  ;;  %v5054_v30 = vcombine.low %v3142_v41, %v3142_v41 }
 0x26d   : > { %5348 = vmatmul.mubr.bf16.gmra.mrb[140].mxu0 %v3534_v60  ;;  %3905 = vmatprep.mubr.bf16.mxu1 %v3538_v34  ;;  %v3546_v34 = vsel %vm3435_vm3, %v3539_v35, %v3545_v31 }
 0x26e   : > { %5351 = vmatprep.mubr.bf16.mxu0 %v3540_v4 }
 0x26f   : > { %v2806_v10 = vpop.f32.mrb[60].mxu1 }
 0x270   : > { %v8136_v12 = vadd.f32 %v2806_v10, %v8060_v43  ;;  %v2808_v62 = vpop.f32.mrb[61].mxu1  ;;  %v2273_v11 = vpop.f32.mrb[48].mxu0  ;;  %v3544_v43 = vsel %vm3435_vm3, %v3537_v3, %v3543_v59 }
 0x271   : > { %v2809_v24 = vpop.f32.mrb[62].mxu1  ;;  %v8140_v28 = vadd.f32 %v7937_v49, %v2273_v11  ;;  %v2275_v48 = vpop.f32.mrb[49].mxu0  ;;  %v3541_v49 = vrot.slane %v5054_v30, 2 }
 0x272   : > { %v8143_v6 = vadd.f32 %v2809_v24, %v8068_v40  ;;  %v2811_v5 = vpop.f32.mrb[63].mxu1  ;;  %v2276_v60 = vpop.f32.mrb[50].mxu0 }
 0x273   : > { %v8148_v13 = vadd.f32 %v7947_v26, %v2276_v60  ;;  %v2278_v16 = vpop.f32.mrb[51].mxu0  ;;  %v3542_v10 = vsel %vm3435_vm3, %v3535_v29, %v3541_v49 }
 0x274   : > { %3906 = vmatmul.mubr.bf16.gmra.mrb[168].mxu1 %v3536_v14 }
 0x275   : > { %5352 = vmatmul.mubr.bf16.gmra.mrb[144].mxu0 %v3546_v34  ;;  %3913 = vmatprep.mubr.bf16.mxu1 %v3544_v43 }
 0x277   : > { %v2814_v37 = vpop.f32.mrb[64].mxu1 }
 0x278   : > { %v8151_v41 = vadd.f32 %v2814_v37, %v8076_v22  ;;  %v2816_v40 = vpop.f32.mrb[65].mxu1  ;;  %v2281_v20 = vpop.f32.mrb[52].mxu0 }
 0x279   : > { %v2817_v4 = vpop.f32.mrb[66].mxu1  ;;  %v2459_v35 = vadd.f32 %v7935_v21, %v2281_v20  ;;  %v2283_v3 = vpop.f32.mrb[53].mxu0 }
 0x27a   : > { %v8156_v26 = vadd.f32 %v2817_v4, %v8084_v52  ;;  %v2819_v31 = vpop.f32.mrb[67].mxu1  ;;  %v2284_v59 = vpop.f32.mrb[54].mxu0 }
 0x27b   : > { %v2462_v62 = vadd.f32 %v7943_v44, %v2284_v59  ;;  %v2286_v11 = vpop.f32.mrb[55].mxu0 }
 0x27c   : > { %3914 = vmatmul.mubr.bf16.gmra.mrb[172].mxu1 %v3542_v10 }
 0x27f   : > { %v2822_v24 = vpop.f32.mrb[68].mxu1 }
 0x280   : > { %v8160_v22 = vadd.f32 %v2822_v24, %v8092_v36  ;;  %v2824_v14 = vpop.f32.mrb[69].mxu1  ;;  %v2289_v48 = vpop.f32.mrb[56].mxu0 }
 0x281   : > { %v2825_v30 = vpop.f32.mrb[70].mxu1  ;;  %v2467_v29 = vadd.f32 %v7973_v58, %v2289_v48  ;;  %v2291_v21 = vpop.f32.mrb[57].mxu0 }
 0x282   : > { %v8164_v5 = vadd.f32 %v2825_v30, %v8100_v57  ;;  %v2827_v52 = vpop.f32.mrb[71].mxu1  ;;  %v2292_v60 = vpop.f32.mrb[58].mxu0 }
 0x283   : > { %v2470_v34 = vadd.f32 %v7979_v9, %v2292_v60  ;;  %v2294_v44 = vpop.f32.mrb[59].mxu0 }
 0x287   : > { %v2830_v43 = vpop.f32.mrb[72].mxu1 }
 0x288   : > { %v8168_v16 = vadd.f32 %v2830_v43, %v8108_v7  ;;  %v2832_v36 = vpop.f32.mrb[73].mxu1  ;;  %v2297_v49 = vpop.f32.mrb[60].mxu0 }
 0x289   : > { %v2833_v37 = vpop.f32.mrb[74].mxu1  ;;  %v2475_v40 = vadd.f32 %v7969_v61, %v2297_v49  ;;  %v2299_v20 = vpop.f32.mrb[61].mxu0 }
 0x28a   : > { %v8172_v58 = vadd.f32 %v2833_v37, %v8116_v25  ;;  %v2835_v57 = vpop.f32.mrb[75].mxu1  ;;  %v2300_v4 = vpop.f32.mrb[62].mxu0 }
 0x28b   : > { %v2478_v10 = vadd.f32 %v7976_v50, %v2300_v4  ;;  %v2302_v3 = vpop.f32.mrb[63].mxu0 }
 0x28f   : > { %v2838_v9 = vpop.f32.mrb[76].mxu1 }
 0x290   : > { %v8176_v31 = vadd.f32 %v2838_v9, %v8124_v51  ;;  %v2840_v7 = vpop.f32.mrb[77].mxu1  ;;  %v2305_v59 = vpop.f32.mrb[64].mxu0 }
 0x291   : > { %v2841_v11 = vpop.f32.mrb[78].mxu1  ;;  %v2483_v24 = vadd.f32 %v8011_v27, %v2305_v59  ;;  %v2307_v14 = vpop.f32.mrb[65].mxu0 }
 0x292   : > { %v8180_v61 = vadd.f32 %v2841_v11, %v8132_v1  ;;  %v2843_v25 = vpop.f32.mrb[79].mxu1  ;;  %v2308_v48 = vpop.f32.mrb[66].mxu0 }
 0x293   : > { %v2486_v30 = vadd.f32 %v8019_v39, %v2308_v48  ;;  %v2310_v21 = vpop.f32.mrb[67].mxu0 }
 0x297   : > { %v2846_v50 = vpop.f32.mrb[80].mxu1 }
 0x298   : > { %v8184_v52 = vadd.f32 %v2846_v50, %v8140_v28  ;;  %v2848_v51 = vpop.f32.mrb[81].mxu1  ;;  %v2313_v60 = vpop.f32.mrb[68].mxu0 }
 0x299   : > { %v2849_v44 = vpop.f32.mrb[82].mxu1  ;;  %v2491_v43 = vadd.f32 %v8009_v63, %v2313_v60  ;;  %v2315_v36 = vpop.f32.mrb[69].mxu0 }
 0x29a   : > { %v8188_v27 = vadd.f32 %v2849_v44, %v8148_v13  ;;  %v2851_v1 = vpop.f32.mrb[83].mxu1  ;;  %v2316_v49 = vpop.f32.mrb[70].mxu0 }
 0x29b   : > { %v2494_v37 = vadd.f32 %v8016_v53, %v2316_v49  ;;  %v2318_v20 = vpop.f32.mrb[71].mxu0 }
 0x29f   : > { %v2854_v39 = vpop.f32.mrb[84].mxu1 }
 0x2a0   : > { %v8191_v57 = vadd.f32 %v2854_v39, %v2459_v35  ;;  %v2856_v4 = vpop.f32.mrb[85].mxu1  ;;  %v5217_v28 = vpop.f32.mrb[72].mxu0 }
 0x2a1   : > { %v2857_v3 = vpop.f32.mrb[86].mxu1  ;;  %v2363_v9 = vadd.f32 %v5217_v28, %v7919_v56  ;;  %v2354_v7 = vpop.f32.mrb[73].mxu0 }
 0x2a2   : > { %v8194_v59 = vadd.f32 %v2857_v3, %v2462_v62  ;;  %v2859_v63 = vpop.f32.mrb[87].mxu1  ;;  %v2355_v13 = vadd.f32 %v2354_v7, %v7895_v15  ;;  %v5218_v11 = vpop.f32.mrb[74].mxu0 }
 0x2a3   : > { %v2366_v14 = vadd.f32 %v5218_v11, %v7929_v23  ;;  %v2357_v25 = vpop.f32.mrb[75].mxu0  ;;  %v2759_v53 = vadd.f32 %v8041_v17, %v2363_v9 }
 0x2a4   : > { %v2358_v35 = vadd.f32 %v2357_v25, %v7907_v54  ;;  %v2751_v48 = vadd.f32 %v8027_v47, %v2355_v13 }
 0x2a5   : > { %v2762_v21 = vadd.f32 %v8043_v42, %v2366_v14 }
 0x2a6   : > { %v2754_v56 = vadd.f32 %v8029_v8, %v2358_v35 }
 0x2a7   : > { %v2862_v50 = vpop.f32.mrb[88].mxu1 }
 0x2a8   : > { %v8203_v62 = vadd.f32 %v2862_v50, %v2467_v29  ;;  %v2864_v51 = vpop.f32.mrb[89].mxu1 }
 0x2a9   : > { %v2865_v60 = vpop.f32.mrb[90].mxu1 }
 0x2aa   : > { %v8205_v15 = vadd.f32 %v2865_v60, %v2470_v34  ;;  %v2867_v44 = vpop.f32.mrb[91].mxu1 }
 0x2af   : > { %v2870_v23 = vpop.f32.mrb[92].mxu1 }
 0x2b0   : > { %v8207_v36 = vadd.f32 %v2870_v23, %v2475_v40  ;;  %v2872_v17 = vpop.f32.mrb[93].mxu1 }
 0x2b1   : > { %v2873_v1 = vpop.f32.mrb[94].mxu1 }
 0x2b2   : > { %v8209_v54 = vadd.f32 %v2873_v1, %v2478_v10  ;;  %v2875_v47 = vpop.f32.mrb[95].mxu1 }
 0x2b7   : > { %v2878_v49 = vpop.f32.mrb[96].mxu1 }
 0x2b8   : > { %v8211_v42 = vadd.f32 %v2878_v49, %v2483_v24  ;;  %v2880_v8 = vpop.f32.mrb[97].mxu1 }
 0x2b9   : > { %v2881_v20 = vpop.f32.mrb[98].mxu1 }
 0x2ba   : > { %v8213_v29 = vadd.f32 %v2881_v20, %v2486_v30  ;;  %v2883_v39 = vpop.f32.mrb[99].mxu1 }
 0x2bf   : > { %v2886_v4 = vpop.f32.mrb[100].mxu1 }
 0x2c0   : > { %v8215_v34 = vadd.f32 %v2886_v4, %v2491_v43  ;;  %v2888_v28 = vpop.f32.mrb[101].mxu1  ;;  %v5269_v3 = vpop.f32.mrb[76].mxu0 }
 0x2c1   : > { %v2889_v40 = vpop.f32.mrb[102].mxu1  ;;  %v8217_v9 = vadd.f32 %v5269_v3, %v2759_v53  ;;  %v2927_v7 = vpop.f32.mrb[77].mxu0 }
 0x2c2   : > { %v8219_v10 = vadd.f32 %v2889_v40, %v2494_v37  ;;  %v2891_v63 = vpop.f32.mrb[103].mxu1  ;;  %v8221_v13 = vadd.f32 %v2927_v7, %v2751_v48  ;;  %v5270_v24 = vpop.f32.mrb[78].mxu0 }
 0x2c3   : > { %v8223_v11 = vadd.f32 %v5270_v24, %v2762_v21  ;;  %v2930_v30 = vpop.f32.mrb[79].mxu0 }
 0x2c4   : > { %v8225_v14 = vadd.f32 %v2930_v30, %v2754_v56 }
 0x2c7   : > { %v8227_v25 = vpop.f32.mrb[104].mxu1 }
 0x2c8   : > { %v3781_v43 = vpop.f32.mrb[105].mxu1  ;;  %v5273_v35 = vpop.f32.mrb[80].mxu0 }
 0x2c9   : > { %v8229_v50 = vpop.f32.mrb[106].mxu1  ;;  %v8232_v53 = vadd.f32 %v5273_v35, %v8072_v46  ;;  %v2943_v37 = vpop.f32.mrb[81].mxu0 }
 0x2ca   : > { %v3784_v51 = vpop.f32.mrb[107].mxu1  ;;  %v8235_v48 = vadd.f32 %v2943_v37, %v8056_v55  ;;  %v5274_v60 = vpop.f32.mrb[82].mxu0 }
 0x2cb   : > { %v8238_v21 = vadd.f32 %v5274_v60, %v8079_v18  ;;  %v2946_v56 = vpop.f32.mrb[83].mxu0 }
 0x2cc   : > { %v8241_v44 = vadd.f32 %v2946_v56, %v8063_v19 }
 0x2cf   : > { %v8243_v23 = vpop.f32.mrb[108].mxu1 }
 0x2d0   : > { %v3789_v17 = vpop.f32.mrb[109].mxu1  ;;  %v5277_v1 = vpop.f32.mrb[84].mxu0 }
 0x2d1   : > { %v8245_v47 = vpop.f32.mrb[110].mxu1  ;;  %v8248_v46 = vadd.f32 %v5277_v1, %v8104_v45  ;;  %v2959_v49 = vpop.f32.mrb[85].mxu0 }
 0x2d2   : > { %v3792_v55 = vpop.f32.mrb[111].mxu1  ;;  %v8251_v8 = vadd.f32 %v2959_v49, %v8088_v33  ;;  %v5278_v18 = vpop.f32.mrb[86].mxu0 }
 0x2d3   : > { %v8254_v20 = vadd.f32 %v5278_v18, %v8111_v2  ;;  %v2962_v19 = vpop.f32.mrb[87].mxu0 }
 0x2d4   : > { %v8257_v39 = vadd.f32 %v2962_v19, %v8095_v0 }
 0x2d7   : > { %v8259_v4 = vpop.f32.mrb[112].mxu1 }
 0x2d8   : > { %v3797_v28 = vpop.f32.mrb[113].mxu1  ;;  %v5281_v3 = vpop.f32.mrb[88].mxu0 }
 0x2d9   : > { %v8261_v40 = vpop.f32.mrb[114].mxu1  ;;  %v8264_v45 = vadd.f32 %v5281_v3, %v8136_v12  ;;  %v2975_v7 = vpop.f32.mrb[89].mxu0 }
 0x2da   : > { %v3800_v33 = vpop.f32.mrb[115].mxu1  ;;  %v8267_v63 = vadd.f32 %v2975_v7, %v8120_v32  ;;  %v5282_v2 = vpop.f32.mrb[90].mxu0 }
 0x2db   : > { %v8270_v24 = vadd.f32 %v5282_v2, %v8143_v6  ;;  %v2978_v0 = vpop.f32.mrb[91].mxu0  ;;  %v8307_v2 = vpop.permute.xlu0 %4503 }
 0x2dc   : > { %v8273_v30 = vadd.f32 %v2978_v0, %v8127_v38  ;;  %vm4610_vm2 = vcmp.eq.s32.totalorder %v8307_v2, 1 }
 0x2df   : > { %v8275_v43 = vpop.f32.mrb[116].mxu1 }
 0x2e0   : > { %v3805_v35 = vpop.f32.mrb[117].mxu1  ;;  %v5285_v37 = vpop.f32.mrb[92].mxu0 }
 0x2e1   : > { %v8277_v51 = vpop.f32.mrb[118].mxu1  ;;  %v8280_v12 = vadd.f32 %v5285_v37, %v8160_v22  ;;  %v2991_v60 = vpop.f32.mrb[93].mxu0 }
 0x2e2   : > { %v3808_v32 = vpop.f32.mrb[119].mxu1  ;;  %v8283_v56 = vadd.f32 %v2991_v60, %v8151_v41  ;;  %v5286_v6 = vpop.f32.mrb[94].mxu0 }
 0x2e3   : > { %v8286_v17 = vadd.f32 %v5286_v6, %v8164_v5  ;;  %v2994_v38 = vpop.f32.mrb[95].mxu0 }
 0x2e4   : > { %v8289_v1 = vadd.f32 %v2994_v38, %v8156_v26 }
 0x2e7   : > { %v8291_v49 = vpop.f32.mrb[120].mxu1 }
 0x2e8   : > { %v3813_v55 = vpop.f32.mrb[121].mxu1  ;;  %v5289_v18 = vpop.f32.mrb[96].mxu0 }
 0x2e9   : > { %v8293_v19 = vpop.f32.mrb[122].mxu1  ;;  %v8296_v22 = vadd.f32 %v5289_v18, %v8176_v31  ;;  %v3007_v28 = vpop.f32.mrb[97].mxu0 }
 0x2ea   : > { %v3816_v41 = vpop.f32.mrb[123].mxu1  ;;  %v8299_v3 = vadd.f32 %v3007_v28, %v8168_v16  ;;  %v5290_v5 = vpop.f32.mrb[98].mxu0 }
 0x2eb   : > { %v8302_v7 = vadd.f32 %v5290_v5, %v8180_v61  ;;  %v3010_v26 = vpop.f32.mrb[99].mxu0  ;;  %v8325_v18 = vpop.permute.xlu1 %4509 }
 0x2ec   : > { %v8305_v33 = vadd.f32 %v3010_v26, %v8172_v58  ;;  %v8327_v28 = vpop.permute.xlu0 %4506  ;;  %vm4612_vm3 = vcmp.eq.s32.totalorder %v8325_v18, 1 }
 0x2ed   : > { %vm4611_vm5 = vcmp.eq.s32.totalorder %v8327_v28, 1 }
 0x2ef   : > { %v8309_v0 = vpop.f32.mrb[124].mxu1 }
 0x2f0   : > { %v3821_v35 = vpop.f32.mrb[125].mxu1  ;;  %v5293_v31 = vpop.f32.mrb[100].mxu0 }
 0x2f1   : > { %v8311_v37 = vpop.f32.mrb[126].mxu1  ;;  %v8314_v60 = vadd.f32 %v5293_v31, %v8191_v57  ;;  %v3023_v16 = vpop.f32.mrb[101].mxu0 }
 0x2f2   : > { %v3824_v32 = vpop.f32.mrb[127].mxu1  ;;  %v8317_v61 = vadd.f32 %v3023_v16, %v8184_v52  ;;  %v5294_v6 = vpop.f32.mrb[102].mxu0 }
 0x2f3   : > { %v8320_v58 = vadd.f32 %v5294_v6, %v8194_v59  ;;  %v3026_v38 = vpop.f32.mrb[103].mxu0 }
 0x2f4   : > { %v8323_v55 = vadd.f32 %v3026_v38, %v8188_v27  ;;  %v8345_v38 = vpop.permute.xlu1 %4512 }
 0x2f5   : > { %8967 = vst [vmem:[#allocation19_spill] sm:$0xff] %v8320_v58  ;;  %vm4613_vm1 = vcmp.eq.s32.totalorder %v8345_v38, 1 }
 0x2f6   : > { %8968 = vst [vmem:[#allocation20_spill] sm:$0xff] %v8323_v55 }
 0x2f7   : > { %v8329_v41 = vpop.f32.mrb[128].mxu1 }
 0x2f8   : > { %v3829_v57 = vpop.f32.mrb[129].mxu1  ;;  %v5297_v5 = vpop.f32.mrb[104].mxu0 }
 0x2f9   : > { %v8331_v26 = vpop.f32.mrb[130].mxu1  ;;  %v8334_v52 = vadd.f32 %v5297_v5, %v8207_v36  ;;  %v3039_v35 = vpop.f32.mrb[105].mxu0 }
 0x2fa   : > { %v3832_v59 = vpop.f32.mrb[131].mxu1  ;;  %v8337_v31 = vadd.f32 %v3039_v35, %v8203_v62  ;;  %v5298_v27 = vpop.f32.mrb[106].mxu0 }
 0x2fb   : > { %8969 = vst [vmem:[#allocation25_spill] sm:$0xff] %v8334_v52  ;;  %v8340_v16 = vadd.f32 %v5298_v27, %v8209_v54  ;;  %v3042_v32 = vpop.f32.mrb[107].mxu0  ;;  %v8347_v57 = vpop.permute.xlu0 %4515 }
 0x2fc   : > { %8970 = vst [vmem:[#allocation22_spill] sm:$0xff] %v8337_v31  ;;  %v8343_v6 = vadd.f32 %v3042_v32, %v8205_v15  ;;  %vm4614_vm6 = vcmp.eq.s32.totalorder %v8347_v57, 1 }
 0x2fd   : > { %8971 = vst [vmem:[#allocation23_spill] sm:$0xff] %v8340_v16 }
 0x2fe   : > { %8972 = vst [vmem:[#allocation24_spill] sm:$0xff] %v8343_v6 }
 0x2ff   : > { %v8349_v55 = vpop.f32.mrb[132].mxu1  ;;  %v8367_v31 = vpop.permute.xlu0 %4521 }
 0x300   : > { %v3837_v36 = vpop.f32.mrb[133].mxu1  ;;  %v5301_v5 = vpop.f32.mrb[108].mxu0  ;;  %vm4616_vm4 = vcmp.eq.s32.totalorder %v8367_v31, 1 }
 0x301   : > { %v8351_v59 = vpop.f32.mrb[134].mxu1  ;;  %v8354_v62 = vadd.f32 %v5301_v5, %v8215_v34  ;;  %v3055_v35 = vpop.f32.mrb[109].mxu0 }
 0x302   : > { %v3840_v54 = vpop.f32.mrb[135].mxu1  ;;  %v8357_v27 = vadd.f32 %v3055_v35, %v8211_v42  ;;  %v5302_v15 = vpop.f32.mrb[110].mxu0 }
 0x303   : > { %8973 = vst [vmem:[#allocation21_spill] sm:$0xff] %v8354_v62  ;;  %v8360_v32 = vadd.f32 %v5302_v15, %v8219_v10  ;;  %v3058_v6 = vpop.f32.mrb[111].mxu0  ;;  %v8365_v36 = vpop.permute.xlu1 %4518  ;;  %v8374_v10 = vld [vmem:[#allocation9] ss:$0 sm:$0xff] }
 0x304   : > { %8974 = vst [vmem:[#allocation28_spill] sm:$0xff] %v8357_v27  ;;  %v8363_v16 = vadd.f32 %v3058_v6, %v8213_v29  ;;  %vm4615_vm0 = vcmp.eq.s32.totalorder %v8365_v36, 1 }
 0x305   : > { %8975 = vst [vmem:[#allocation27_spill] sm:$0xff] %v8360_v32 }
 0x306   : > { %8976 = vst [vmem:[#allocation26_spill] sm:$0xff] %v8363_v16 }
 0x307   : > { %v8369_v52 = vpop.f32.mrb[136].mxu1 }
 0x308   : > { %v3845_v34 = vpop.f32.mrb[137].mxu1  ;;  %v5321_v5 = vpop.f32.mrb[112].mxu0 }
 0x309   : > { %v8371_v54 = vpop.f32.mrb[138].mxu1  ;;  %v3965_v42 = vadd.f32 %v5321_v5, %v8243_v23  ;;  %v3956_v35 = vpop.f32.mrb[113].mxu0 }
 0x30a   : > { %v3848_v62 = vpop.f32.mrb[139].mxu1  ;;  %v3957_v15 = vadd.f32 %v3956_v35, %v8227_v25  ;;  %v5322_v29 = vpop.f32.mrb[114].mxu0 }
 0x30b   : > { %v4101_v6 = vadd.f32 %v3965_v42, %v8217_v9  ;;  %v3968_v32 = vadd.f32 %v5322_v29, %v8245_v47  ;;  %v3959_v16 = vpop.f32.mrb[115].mxu0  ;;  %v8383_v5 = vpop.permute.xlu1 %4524 }
 0x30c   : > { %v4099_v27 = vadd.f32 %v3957_v15, %v8221_v13  ;;  %v3960_v34 = vadd.f32 %v3959_v16, %v8229_v50  ;;  %v8387_v35 = vpop.permute.xlu0 %4527  ;;  %vm4617_vm7 = vcmp.eq.s32.totalorder %v8383_v5, 1 }
 0x30d   : > { %v4144_v58 = vadd.f32 %v8374_v10, %v4101_v6  ;;  %v4102_v23 = vadd.f32 %v3968_v32, %v8223_v11  ;;  %vm4618_vm8 = vcmp.eq.s32.totalorder %v8387_v35, 1 }
 0x30e   : > { %v4142_v62 = vadd.f32 %v8374_v10, %v4099_v27  ;;  %v4100_v25 = vadd.f32 %v3960_v34, %v8225_v14 }
 0x30f   : > { %v5084_v9 = vmul.f32 -1.442695, %v4144_v58  ;;  %v8389_v42 = vpop.f32.mrb[140].mxu1  ;;  %v4145_v47 = vadd.f32 %v8374_v10, %v4102_v23 }
 0x310   : > { %v5082_v13 = vmul.f32 -1.442695, %v4142_v62  ;;  %v3853_v15 = vpop.f32.mrb[141].mxu1  ;;  %v4143_v50 = vadd.f32 %v8374_v10, %v4100_v25  ;;  %v5325_v16 = vpop.f32.mrb[116].mxu0 }
 0x311   : > { %5711 = vpow2.f32 %v5084_v9  ;;  %v5085_v11 = vmul.f32 -1.442695, %v4145_v47  ;;  %v8393_v32 = vpop.f32.mrb[142].mxu1  ;;  %v3981_v27 = vadd.f32 %v5325_v16, %v8275_v43  ;;  %v3972_v29 = vpop.f32.mrb[117].mxu0 }
 0x312   : > { %5713 = vpow2.f32 %v5082_v13  ;;  %v5083_v14 = vmul.f32 -1.442695, %v4143_v50  ;;  %v3856_v6 = vpop.f32.mrb[143].mxu1  ;;  %v3973_v58 = vadd.f32 %v3972_v29, %v8259_v4  ;;  %v5326_v34 = vpop.f32.mrb[118].mxu0 }
 0x313   : > { %5715 = vpow2.f32 %v5085_v11  ;;  %v4105_v23 = vadd.f32 %v3981_v27, %v8232_v53  ;;  %v3984_v62 = vadd.f32 %v5326_v34, %v8277_v51  ;;  %v3975_v25 = vpop.f32.mrb[119].mxu0  ;;  %v8403_v15 = vpop.permute.xlu1 %4530 }
 0x314   : > { %5717 = vpow2.f32 %v5083_v14  ;;  %v4103_v9 = vadd.f32 %v3973_v58, %v8235_v48  ;;  %v3976_v47 = vadd.f32 %v3975_v25, %v8261_v40  ;;  %v8407_v16 = vpop.permute.xlu0 %4533  ;;  %vm4619_vm10 = vcmp.eq.s32.totalorder %v8403_v15, 1 }
 0x315   : > { %v4148_v43 = vadd.f32 %v8374_v10, %v4105_v23  ;;  %v4106_v13 = vadd.f32 %v3984_v62, %v8238_v21  ;;  %vm4620_vm12 = vcmp.eq.s32.totalorder %v8407_v16, 1 }
 0x316   : > { %v4146_v4 = vadd.f32 %v8374_v10, %v4103_v9  ;;  %v4104_v50 = vadd.f32 %v3976_v47, %v8241_v44 }
 0x317   : > { %v5088_v53 = vmul.f32 -1.442695, %v4148_v43  ;;  %v8409_v51 = vpop.f32.mrb[144].mxu1  ;;  %v4149_v11 = vadd.f32 %v8374_v10, %v4106_v13 }
 0x318   : > { %v5086_v48 = vmul.f32 -1.442695, %v4146_v4  ;;  %v3861_v27 = vpop.f32.mrb[145].mxu1  ;;  %v4147_v40 = vadd.f32 %v8374_v10, %v4104_v50  ;;  %v5329_v29 = vpop.f32.mrb[120].mxu0 }
 0x319   : > { %5719 = vpow2.f32 %v5088_v53  ;;  %v5089_v21 = vmul.f32 -1.442695, %v4149_v11  ;;  %v8413_v14 = vpop.f32.mrb[146].mxu1  ;;  %v3997_v6 = vadd.f32 %v5329_v29, %v8309_v0  ;;  %v3988_v58 = vpop.f32.mrb[121].mxu0 }
 0x31a   : > { %5721 = vpow2.f32 %v5086_v48  ;;  %v5087_v44 = vmul.f32 -1.442695, %v4147_v40  ;;  %v3864_v34 = vpop.f32.mrb[147].mxu1  ;;  %v3989_v23 = vadd.f32 %v3988_v58, %v8291_v49  ;;  %v5330_v62 = vpop.f32.mrb[122].mxu0 }
 0x31b   : > { %v5712_v25 = vpop.eup %5711  ;;  %5723 = vpow2.f32 %v5089_v21  ;;  %v4109_v9 = vadd.f32 %v3997_v6, %v8248_v46  ;;  %v4000_v47 = vadd.f32 %v5330_v62, %v8311_v37  ;;  %v3991_v43 = vpop.f32.mrb[123].mxu0 }
 0x31c   : > { %v5714_v13 = vpop.eup %5713  ;;  %v4288_v4 = vadd.f32 1.0, %v5712_v25  ;;  %5725 = vpow2.f32 %v5087_v44  ;;  %v4107_v50 = vadd.f32 %v3989_v23, %v8251_v8  ;;  %v3992_v0 = vadd.f32 %v3991_v43, %v8293_v19  ;;  %v8423_v40 = vpop.permute.xlu1 %4536 }
 0x31d   : > { %v5716_v53 = vpop.eup %5715  ;;  %v4286_v11 = vadd.f32 1.0, %v5714_v13  ;;  %v4152_v48 = vadd.f32 %v8374_v10, %v4109_v9  ;;  %v4110_v49 = vadd.f32 %v4000_v47, %v8254_v20  ;;  %v8427_v21 = vpop.permute.xlu0 %4539  ;;  %vm4621_vm9 = vcmp.eq.s32.totalorder %v8423_v40, 1 }
 0x31e   : > { %v5718_v27 = vpop.eup %5717  ;;  %5727 = vrcp.f32 %v4288_v4  ;;  %v4289_v46 = vadd.f32 1.0, %v5716_v53  ;;  %v4150_v37 = vadd.f32 %v8374_v10, %v4107_v50  ;;  %v4108_v29 = vadd.f32 %v3992_v0, %v8257_v39 }
 0x31f   : > { %5729 = vrcp.f32 %v4286_v11  ;;  %v4287_v8 = vadd.f32 1.0, %v5718_v27  ;;  %v5092_v19 = vmul.f32 -1.442695, %v4152_v48  ;;  %v8429_v6 = vpop.f32.mrb[148].mxu1  ;;  %v4153_v58 = vadd.f32 %v8374_v10, %v4110_v49 }
 0x320   : > { %5731 = vrcp.f32 %v4289_v46  ;;  %v5090_v20 = vmul.f32 -1.442695, %v4150_v37  ;;  %v3869_v44 = vpop.f32.mrb[149].mxu1  ;;  %v4151_v34 = vadd.f32 %v8374_v10, %v4108_v29  ;;  %v5333_v23 = vpop.f32.mrb[124].mxu0  ;;  %vm4622_vm13 = vcmp.eq.s32.totalorder %v8427_v21, 1 }
 0x321   : > { %5733 = vrcp.f32 %v4287_v8  ;;  %v5093_v39 = vmul.f32 -1.442695, %v4153_v58  ;;  %v8434_v62 = vpop.f32.mrb[150].mxu1  ;;  %v4013_v25 = vadd.f32 %v5333_v23, %v8349_v55  ;;  %v4004_v9 = vpop.f32.mrb[125].mxu0 }
 0x322   : > { %5735 = vpow2.f32 %v5092_v19  ;;  %v5091_v47 = vmul.f32 -1.442695, %v4151_v34  ;;  %v3872_v43 = vpop.f32.mrb[151].mxu1  ;;  %v4005_v13 = vadd.f32 %v4004_v9, %v8329_v41  ;;  %v5334_v4 = vpop.f32.mrb[126].mxu0 }
 0x323   : > { %v5720_v50 = vpop.eup %5719  ;;  %5737 = vpow2.f32 %v5090_v20  ;;  %v4113_v0 = vadd.f32 %v4013_v25, %v8264_v45  ;;  %v4016_v53 = vadd.f32 %v5334_v4, %v8351_v59  ;;  %v4007_v11 = vpop.f32.mrb[127].mxu0 }
 0x324   : > { %v5722_v55 = vpop.eup %5721  ;;  %v4292_v48 = vadd.f32 1.0, %v5720_v50  ;;  %5739 = vpow2.f32 %v5093_v39  ;;  %v4111_v49 = vadd.f32 %v4005_v13, %v8267_v63  ;;  %v4008_v27 = vadd.f32 %v4007_v11, %v8331_v26  ;;  %v8447_v19 = vpop.permute.xlu1 %4542 }
 0x325   : > { %v5724_v46 = vpop.eup %5723  ;;  %v4290_v41 = vadd.f32 1.0, %v5722_v55  ;;  %5741 = vpow2.f32 %v5091_v47  ;;  %v4156_v37 = vadd.f32 %v8374_v10, %v4113_v0  ;;  %v4114_v29 = vadd.f32 %v4016_v53, %v8270_v24  ;;  %v8451_v20 = vpop.permute.xlu0 %4545 }
 0x326   : > { %v5726_v8 = vpop.eup %5725  ;;  %5743 = vrcp.f32 %v4292_v48  ;;  %v4293_v45 = vadd.f32 1.0, %v5724_v46  ;;  %v4154_v59 = vadd.f32 %v8374_v10, %v4111_v49  ;;  %v4112_v58 = vadd.f32 %v4008_v27, %v8273_v30 }
 0x327   : > { %5745 = vrcp.f32 %v4290_v41  ;;  %v4291_v63 = vadd.f32 1.0, %v5726_v8  ;;  %v5096_v26 = vmul.f32 -1.442695, %v4156_v37  ;;  %v8453_v44 = vpop.f32.mrb[152].mxu1  ;;  %v4157_v34 = vadd.f32 %v8374_v10, %v4114_v29 }
 0x328   : > { %v5728_v23 = vpop.eup %5727  ;;  %5747 = vrcp.f32 %v4293_v45  ;;  %v5094_v24 = vmul.f32 -1.442695, %v4154_v59  ;;  %v3877_v39 = vpop.f32.mrb[153].mxu1  ;;  %v4155_v25 = vadd.f32 %v8374_v10, %v4112_v58  ;;  %vm4623_vm11 = vcmp.eq.s32.totalorder %v8447_v19, 1 }
 0x329   : > { %v5337_v9 = vpop.f32.mrb[128].mxu0  ;;  %v5730_v30 = vpop.eup %5729  ;;  %v4648_v47 = vsel %vm4612_vm3, %v5728_v23, 0.0  ;;  %5749 = vrcp.f32 %v4291_v63  ;;  %v5097_v43 = vmul.f32 -1.442695, %v4157_v34  ;;  %vm4624_vm15 = vcmp.eq.s32.totalorder %v8451_v20, 1 }
 0x32a   : > { %v8461_v13 = vpop.f32.mrb[154].mxu1  ;;  %v4029_v4 = vadd.f32 %v5337_v9, %v8389_v42  ;;  %v4020_v50 = vpop.f32.mrb[129].mxu0  ;;  %4684 = vst [vmem:[%s8467_s26 + $0x10] sm:$0xff] %v4648_v47  ;;  %v4646_v18 = vsel %vm4610_vm2, %v5730_v30, 0.0  ;;  %5751 = vpow2.f32 %v5096_v26  ;;  %v5095_v53 = vmul.f32 -1.442695, %v4155_v25 }
 0x32b   : > { %v5732_v0 = vpop.eup %5731  ;;  %v3880_v11 = vpop.f32.mrb[155].mxu1  ;;  %v4021_v55 = vadd.f32 %v4020_v50, %v8369_v52  ;;  %4682 = vst [vmem:[%s8467_s26] sm:$0xff] %v4646_v18  ;;  %5753 = vpow2.f32 %v5094_v24 }
 0x32c   : > { %v5338_v42 = vpop.f32.mrb[130].mxu0  ;;  %v5734_v48 = vpop.eup %5733  ;;  %v4649_v49 = vsel %vm4613_vm1, %v5732_v0, 0.0  ;;  %v4117_v27 = vadd.f32 %v4029_v4, %v8280_v12  ;;  %5755 = vpow2.f32 %v5097_v43 }
 0x32d   : > { %v4032_v2 = vadd.f32 %v5338_v42, %v8393_v32  ;;  %v4023_v46 = vpop.f32.mrb[131].mxu0  ;;  %v5736_v41 = vpop.eup %5735  ;;  %4685 = vst [vmem:[%s8467_s26 + $0x18] sm:$0xff] %v4649_v49  ;;  %v4647_v52 = vsel %vm4611_vm5, %v5734_v48, 0.0  ;;  %v4115_v37 = vadd.f32 %v4021_v55, %v8283_v56  ;;  %5757 = vpow2.f32 %v5095_v53 }
 0x32e   : > { %v4024_v29 = vadd.f32 %v4023_v46, %v8371_v54  ;;  %v5738_v8 = vpop.eup %5737  ;;  %4683 = vst [vmem:[%s8467_s26 + $0x8] sm:$0xff] %v4647_v52  ;;  %v4296_v38 = vadd.f32 1.0, %v5736_v41  ;;  %v4160_v45 = vadd.f32 %v8374_v10, %v4117_v27  ;;  %v8488_v59 = vpop.permute.xlu1 %4548 }
 0x32f   : > { %v4118_v12 = vadd.f32 %v4032_v2, %v8286_v17  ;;  %v5740_v32 = vpop.eup %5739  ;;  %v4294_v28 = vadd.f32 1.0, %v5738_v8  ;;  %v4158_v58 = vadd.f32 %v8374_v10, %v4115_v37  ;;  %v8492_v54 = vpop.permute.xlu0 %4551  ;;  %vm4625_vm14 = vcmp.eq.s32.totalorder %v8488_v59, 1 }
 0x330   : > { %v4116_v56 = vadd.f32 %v4024_v29, %v8289_v1  ;;  %v5742_v63 = vpop.eup %5741  ;;  %5759 = vrcp.f32 %v4296_v38  ;;  %v4297_v26 = vadd.f32 1.0, %v5740_v32  ;;  %v5100_v34 = vmul.f32 -1.442695, %v4160_v45  ;;  %v8494_v23 = vpop.f32.mrb[156].mxu1 }
 0x331   : > { %v4161_v17 = vadd.f32 %v8374_v10, %v4118_v12  ;;  %v5744_v24 = vpop.eup %5743  ;;  %5761 = vrcp.f32 %v4294_v28  ;;  %v4295_v39 = vadd.f32 1.0, %v5742_v63  ;;  %v5098_v25 = vmul.f32 -1.442695, %v4158_v58  ;;  %v3885_v9 = vpop.f32.mrb[157].mxu1 }
 0x332   : > { %v4159_v30 = vadd.f32 %v8374_v10, %v4116_v56  ;;  %v5341_v47 = vpop.f32.mrb[132].mxu0  ;;  %v5746_v1 = vpop.eup %5745  ;;  %v4652_v43 = vsel %vm4616_vm4, %v5744_v24, 0.0  ;;  %5763 = vrcp.f32 %v4297_v26  ;;  %vm4626_vm3 = vcmp.eq.s32.totalorder %v8492_v54, 1 }
 0x333   : > { %v5101_v4 = vmul.f32 -1.442695, %v4161_v17  ;;  %v8500_v50 = vpop.f32.mrb[158].mxu1  ;;  %v4045_v0 = vadd.f32 %v5341_v47, %v8429_v6  ;;  %v4036_v18 = vpop.f32.mrb[133].mxu0  ;;  %4688 = vst [vmem:[%s8467_s26 + $0x30] sm:$0xff] %v4652_v43  ;;  %v4650_v11 = vsel %vm4614_vm6, %v5746_v1, 0.0  ;;  %5765 = vrcp.f32 %v4295_v39 }
 0x334   : > { %v5748_v53 = vpop.eup %5747  ;;  %v5099_v55 = vmul.f32 -1.442695, %v4159_v30  ;;  %v3888_v31 = vpop.f32.mrb[159].mxu1  ;;  %v4037_v42 = vadd.f32 %v4036_v18, %v8409_v51  ;;  %4686 = vst [vmem:[%s8467_s26 + $0x20] sm:$0xff] %v4650_v11  ;;  %5767 = vpow2.f32 %v5100_v34 }
 0x335   : > { %v5342_v48 = vpop.f32.mrb[134].mxu0  ;;  %v5750_v49 = vpop.eup %5749  ;;  %v4653_v6 = vsel %vm4617_vm7, %v5748_v53, 0.0  ;;  %v4121_v27 = vadd.f32 %v4045_v0, %v8296_v22  ;;  %5769 = vpow2.f32 %v5098_v25 }
 0x336   : > { %v4048_v57 = vadd.f32 %v5342_v48, %v8434_v62  ;;  %v4039_v2 = vpop.f32.mrb[135].mxu0  ;;  %v5752_v46 = vpop.eup %5751  ;;  %4689 = vst [vmem:[%s8467_s26 + $0x38] sm:$0xff] %v4653_v6  ;;  %v4651_v51 = vsel %vm4615_vm0, %v5750_v49, 0.0  ;;  %v4119_v41 = vadd.f32 %v4037_v42, %v8299_v3  ;;  %5771 = vpow2.f32 %v5101_v4  ;;  %v8977_v42 = vld [vmem:[#allocation19_spill] sm:$0xff] }
 0x337   : > { %v4040_v52 = vadd.f32 %v4039_v2, %v8413_v14  ;;  %v5754_v5 = vpop.eup %5753  ;;  %4687 = vst [vmem:[%s8467_s26 + $0x28] sm:$0xff] %v4651_v51  ;;  %v4300_v37 = vadd.f32 1.0, %v5752_v46  ;;  %v4164_v22 = vadd.f32 %v8374_v10, %v4121_v27  ;;  %v8523_v8 = vpop.permute.xlu1 %4554  ;;  %5773 = vpow2.f32 %v5099_v55  ;;  %v8978_v27 = vld [vmem:[#allocation20_spill] sm:$0xff] }
 0x338   : > { %v4122_v62 = vadd.f32 %v4048_v57, %v8302_v7  ;;  %v5756_v29 = vpop.eup %5755  ;;  %v4298_v38 = vadd.f32 1.0, %v5754_v5  ;;  %v4162_v36 = vadd.f32 %v8374_v10, %v4119_v41  ;;  %v8527_v12 = vpop.permute.xlu0 %4557  ;;  %vm4627_vm5 = vcmp.eq.s32.totalorder %v8523_v8, 1 }
 0x339   : > { %v4120_v45 = vadd.f32 %v4040_v52, %v8305_v33  ;;  %v5758_v3 = vpop.eup %5757  ;;  %5775 = vrcp.f32 %v4300_v37  ;;  %v4301_v14 = vadd.f32 1.0, %v5756_v29  ;;  %v5104_v32 = vmul.f32 -1.442695, %v4164_v22  ;;  %v8529_v28 = vpop.f32.mrb[160].mxu1 }
 0x33a   : > { %v4165_v58 = vadd.f32 %v8374_v10, %v4122_v62  ;;  %5777 = vrcp.f32 %v4298_v38  ;;  %v4299_v7 = vadd.f32 1.0, %v5758_v3  ;;  %v5102_v56 = vmul.f32 -1.442695, %v4162_v36  ;;  %v3893_v63 = vpop.f32.mrb[161].mxu1  ;;  %v5345_v34 = vpop.f32.mrb[136].mxu0 }
 0x33b   : > { %v4163_v26 = vadd.f32 %v8374_v10, %v4120_v45  ;;  %v5760_v17 = vpop.eup %5759  ;;  %5779 = vrcp.f32 %v4301_v14  ;;  %v8534_v24 = vpop.f32.mrb[162].mxu1  ;;  %v4061_v39 = vadd.f32 %v5345_v34, %v8494_v23  ;;  %vm4628_vm2 = vcmp.eq.s32.totalorder %v8527_v12, 1 }
 0x33c   : > { %v5105_v33 = vmul.f32 -1.442695, %v4165_v58  ;;  %v4052_v25 = vpop.f32.mrb[137].mxu0  ;;  %v5762_v9 = vpop.eup %5761  ;;  %v4656_v30 = vsel %vm4620_vm12, %v5760_v17, 0.0  ;;  %5781 = vrcp.f32 %v4299_v7 }
 0x33d   : > { %v5103_v47 = vmul.f32 -1.442695, %v4163_v26  ;;  %v3896_v1 = vpop.f32.mrb[163].mxu1  ;;  %v4053_v43 = vadd.f32 %v4052_v25, %v8453_v44  ;;  %v5346_v4 = vpop.f32.mrb[138].mxu0  ;;  %4692 = vst [vmem:[%s8467_s26 + $0x50] sm:$0xff] %v4656_v30  ;;  %v4654_v23 = vsel %vm4618_vm8, %v5762_v9, 0.0  ;;  %5783 = vpow2.f32 %v5104_v32 }
 0x33e   : > { %v5764_v16 = vpop.eup %5763  ;;  %v4125_v0 = vadd.f32 %v4061_v39, %v8314_v60  ;;  %v4064_v18 = vadd.f32 %v5346_v4, %v8500_v50  ;;  %v4055_v53 = vpop.f32.mrb[139].mxu0  ;;  %4690 = vst [vmem:[%s8467_s26 + $0x40] sm:$0xff] %v4654_v23  ;;  %5785 = vpow2.f32 %v5102_v56  ;;  %v8979_v39 = vld [vmem:[#allocation25_spill] sm:$0xff]  ;;  %v8981_v23 = vld [vmem:[#allocation23_spill] sm:$0xff] }
 0x33f   : > { %v5766_v11 = vpop.eup %5765  ;;  %v4657_v44 = vsel %vm4621_vm9, %v5764_v16, 0.0  ;;  %v4123_v55 = vadd.f32 %v4053_v43, %v8317_v61  ;;  %v4056_v35 = vadd.f32 %v4055_v53, %v8461_v13  ;;  %5787 = vpow2.f32 %v5105_v33  ;;  %v8556_v6 = vpop.permute.xlu1 %4560 }
 0x340   : > { %v5768_v31 = vpop.eup %5767  ;;  %4693 = vst [vmem:[%s8467_s26 + $0x58] sm:$0xff] %v4657_v44  ;;  %v4655_v60 = vsel %vm4619_vm10, %v5766_v11, 0.0  ;;  %v4168_v50 = vadd.f32 %v8374_v10, %v4125_v0  ;;  %v4126_v48 = vadd.f32 %v4064_v18, %v8977_v42  ;;  %5789 = vpow2.f32 %v5103_v47  ;;  %v8562_v15 = vpop.permute.xlu0 %4563  ;;  %v8982_v44 = vld [vmem:[#allocation24_spill] sm:$0xff] }
 0x341   : > { %v5770_v49 = vpop.eup %5769  ;;  %4691 = vst [vmem:[%s8467_s26 + $0x48] sm:$0xff] %v4655_v60  ;;  %v4304_v40 = vadd.f32 1.0, %v5768_v31  ;;  %v4166_v61 = vadd.f32 %v8374_v10, %v4123_v55  ;;  %v4124_v13 = vadd.f32 %v4056_v35, %v8978_v27  ;;  %v3899_v51 = vpop.f32.mrb[164].mxu1  ;;  %vm4629_vm1 = vcmp.eq.s32.totalorder %v8556_v6, 1 }
 0x342   : > { %v5772_v57 = vpop.eup %5771  ;;  %v4302_v2 = vadd.f32 1.0, %v5770_v49  ;;  %v5108_v46 = vmul.f32 -1.442695, %v4168_v50  ;;  %v4169_v41 = vadd.f32 %v8374_v10, %v4126_v48  ;;  %v3901_v22 = vpop.f32.mrb[165].mxu1  ;;  %vm4630_vm7 = vcmp.eq.s32.totalorder %v8562_v15, 1  ;;  %v8986_v15 = vld [vmem:[#allocation27_spill] sm:$0xff] }
 0x343   : > { %v5774_v52 = vpop.eup %5773  ;;  %5791 = vrcp.f32 %v4304_v40  ;;  %v4305_v5 = vadd.f32 1.0, %v5772_v57  ;;  %v5106_v37 = vmul.f32 -1.442695, %v4166_v61  ;;  %v4167_v62 = vadd.f32 %v8374_v10, %v4124_v13  ;;  %v5349_v29 = vpop.f32.mrb[140].mxu0 }
 0x344   : > { %v5776_v38 = vpop.eup %5775  ;;  %5793 = vrcp.f32 %v4302_v2  ;;  %v4303_v36 = vadd.f32 1.0, %v5774_v52  ;;  %v5109_v45 = vmul.f32 -1.442695, %v4169_v41  ;;  %v3902_v3 = vpop.f32.mrb[166].mxu1  ;;  %v4077_v14 = vadd.f32 %v5349_v29, %v3899_v51 }
 0x345   : > { %v4068_v32 = vpop.f32.mrb[141].mxu0  ;;  %v5778_v58 = vpop.eup %5777  ;;  %v4660_v7 = vsel %vm4624_vm15, %v5776_v38, 0.0  ;;  %5795 = vrcp.f32 %v4305_v5  ;;  %v5107_v56 = vmul.f32 -1.442695, %v4167_v62 }
 0x346   : > { %v3904_v63 = vpop.f32.mrb[167].mxu1  ;;  %v4069_v26 = vadd.f32 %v4068_v32, %v8529_v28  ;;  %v5350_v34 = vpop.f32.mrb[142].mxu0  ;;  %4696 = vst [vmem:[%s8467_s26 + $0x70] sm:$0xff] %v4660_v7  ;;  %v4658_v33 = vsel %vm4622_vm13, %v5778_v58, 0.0  ;;  %5797 = vrcp.f32 %v4303_v36  ;;  %v4129_v25 = vadd.f32 %v4077_v14, %v8979_v39  ;;  %v8980_v28 = vld [vmem:[#allocation22_spill] sm:$0xff] }
 0x347   : > { %v5780_v17 = vpop.eup %5779  ;;  %v4080_v9 = vadd.f32 %v5350_v34, %v3902_v3  ;;  %v4071_v30 = vpop.f32.mrb[143].mxu0  ;;  %4694 = vst [vmem:[%s8467_s26 + $0x60] sm:$0xff] %v4658_v33  ;;  %5799 = vpow2.f32 %v5108_v46  ;;  %v8984_v63 = vld [vmem:[#allocation26_spill] sm:$0xff] }
 0x348   : > { %v5782_v20 = vpop.eup %5781  ;;  %v4661_v47 = vsel %vm4625_vm14, %v5780_v17, 0.0  ;;  %v4127_v1 = vadd.f32 %v4069_v26, %v8980_v28  ;;  %v4072_v43 = vadd.f32 %v4071_v30, %v8534_v24  ;;  %5801 = vpow2.f32 %v5106_v37  ;;  %v8583_v53 = vpop.permute.xlu1 %4566 }
 0x349   : > { %v5784_v4 = vpop.eup %5783  ;;  %4697 = vst [vmem:[%s8467_s26 + $0x78] sm:$0xff] %v4661_v47  ;;  %v4659_v21 = vsel %vm4623_vm11, %v5782_v20, 0.0  ;;  %v4172_v16 = vadd.f32 %v8374_v10, %v4129_v25  ;;  %v4130_v0 = vadd.f32 %v4080_v9, %v8981_v23  ;;  %5803 = vpow2.f32 %v5109_v45  ;;  %v8588_v35 = vpop.permute.xlu0 %4569  ;;  %v8983_v45 = vld [vmem:[#allocation28_spill] sm:$0xff] }
 0x34a   : > { %v5786_v18 = vpop.eup %5785  ;;  %4695 = vst [vmem:[%s8467_s26 + $0x68] sm:$0xff] %v4659_v21  ;;  %v4308_v59 = vadd.f32 1.0, %v5784_v4  ;;  %v4170_v11 = vadd.f32 %v8374_v10, %v4127_v1  ;;  %v4128_v24 = vadd.f32 %v4072_v43, %v8982_v44  ;;  %5805 = vpow2.f32 %v5107_v56  ;;  %v3907_v31 = vpop.f32.mrb[168].mxu1 }
 0x34b   : > { %v5788_v55 = vpop.eup %5787  ;;  %v4306_v19 = vadd.f32 1.0, %v5786_v18  ;;  %v4173_v60 = vadd.f32 %v8374_v10, %v4130_v0  ;;  %v5112_v48 = vmul.f32 -1.442695, %v4172_v16  ;;  %v3909_v49 = vpop.f32.mrb[169].mxu1  ;;  %vm4632_vm6 = vcmp.eq.s32.totalorder %v8588_v35, 1  ;;  %v8985_v16 = vld [vmem:[#allocation21_spill] sm:$0xff] }
 0x34c   : > { %v5790_v50 = vpop.eup %5789  ;;  %5807 = vrcp.f32 %v4308_v59  ;;  %v4309_v42 = vadd.f32 1.0, %v5788_v55  ;;  %v4171_v40 = vadd.f32 %v8374_v10, %v4128_v24  ;;  %v5353_v61 = vpop.f32.mrb[144].mxu0  ;;  %v5110_v13 = vmul.f32 -1.442695, %v4170_v11 }
 0x34d   : > { %5809 = vrcp.f32 %v4306_v19  ;;  %v4307_v27 = vadd.f32 1.0, %v5790_v50  ;;  %v3910_v57 = vpop.f32.mrb[170].mxu1  ;;  %v4084_v2 = vpop.f32.mrb[145].mxu0  ;;  %v5113_v51 = vmul.f32 -1.442695, %v4173_v60  ;;  %vm4631_vm4 = vcmp.eq.s32.totalorder %v8583_v53, 1 }
 0x34e   : > { %v5792_v46 = vpop.eup %5791  ;;  %5811 = vrcp.f32 %v4309_v42  ;;  %v3912_v41 = vpop.f32.mrb[171].mxu1  ;;  %v4085_v52 = vadd.f32 %v4084_v2, %v3907_v31  ;;  %v5111_v62 = vmul.f32 -1.442695, %v4171_v40 }
 0x34f   : > { %v5354_v5 = vpop.f32.mrb[146].mxu0  ;;  %v5794_v37 = vpop.eup %5793  ;;  %v4664_v22 = vsel %vm4628_vm2, %v5792_v46, 0.0  ;;  %5813 = vrcp.f32 %v4307_v27 }
 0x350   : > { %v4087_v29 = vpop.f32.mrb[147].mxu0  ;;  %v5796_v38 = vpop.eup %5795  ;;  %4700 = vst [vmem:[%s8467_s26 + $0x90] sm:$0xff] %v4664_v22  ;;  %v4662_v12 = vsel %vm4626_vm3, %v5794_v37, 0.0  ;;  %5815 = vpow2.f32 %v5112_v48  ;;  %v4131_v3 = vadd.f32 %v4085_v52, %v8983_v45 }
 0x351   : > { %v4573_v36 = vpop.permute.xlu1 %4572  ;;  %v4088_v14 = vadd.f32 %v4087_v29, %v3910_v57  ;;  %v5798_v32 = vpop.eup %5797  ;;  %4698 = vst [vmem:[%s8467_s26 + $0x80] sm:$0xff] %v4662_v12  ;;  %v4665_v6 = vsel %vm4629_vm1, %v5796_v38, 0.0  ;;  %5817 = vpow2.f32 %v5110_v13 }
 0x352   : > { %v5800_v58 = vpop.eup %5799  ;;  %v8601_v7 = vpop.permute.xlu0 %4575  ;;  %4701 = vst [vmem:[%s8467_s26 + $0x98] sm:$0xff] %v4665_v6  ;;  %v4663_v56 = vsel %vm4627_vm5, %v5798_v32, 0.0  ;;  %5819 = vpow2.f32 %v5113_v51  ;;  %v4174_v54 = vadd.f32 %v8374_v10, %v4131_v3  ;;  %vm4633_vm0 = vcmp.eq.s32.totalorder %v4573_v36, 1 }
 0x353   : > { %v4132_v26 = vadd.f32 %v4088_v14, %v8984_v63  ;;  %v5802_v34 = vpop.eup %5801  ;;  %4699 = vst [vmem:[%s8467_s26 + $0x88] sm:$0xff] %v4663_v56  ;;  %v4312_v17 = vadd.f32 1.0, %v5800_v58  ;;  %5821 = vpow2.f32 %v5111_v62  ;;  %v3915_v33 = vpop.f32.mrb[172].mxu1  ;;  %vm4634_vm9 = vcmp.eq.s32.totalorder %v8601_v7, 1 }
 0x354   : > { %v5804_v39 = vpop.eup %5803  ;;  %v4310_v8 = vadd.f32 1.0, %v5802_v34  ;;  %v4093_v25 = vadd.f32 %v5353_v61, %v3915_v33  ;;  %v3917_v9 = vpop.f32.mrb[173].mxu1  ;;  %v5114_v28 = vmul.f32 -1.442695, %v4174_v54 }
 0x355   : > { %v4175_v30 = vadd.f32 %v8374_v10, %v4132_v26  ;;  %v5806_v20 = vpop.eup %5805  ;;  %5823 = vrcp.f32 %v4312_v17  ;;  %v4313_v47 = vadd.f32 1.0, %v5804_v39  ;;  %v3918_v1 = vpop.f32.mrb[174].mxu1 }
 0x356   : > { %v5808_v43 = vpop.eup %5807  ;;  %v8609_v4 = vpop.permute.xlu1 %4578  ;;  %5825 = vrcp.f32 %v4310_v8  ;;  %v4311_v21 = vadd.f32 1.0, %v5806_v20  ;;  %v4133_v23 = vadd.f32 %v4093_v25, %v8985_v16  ;;  %v4096_v44 = vadd.f32 %v5354_v5, %v3918_v1 }
 0x357   : > { %v5115_v0 = vmul.f32 -1.442695, %v4175_v30  ;;  %v3920_v18 = vpop.f32.mrb[175].mxu1  ;;  %v5810_v59 = vpop.eup %5809  ;;  %v4668_v11 = vsel %vm4632_vm6, %v5808_v43, 0.0  ;;  %5827 = vrcp.f32 %v4313_v47  ;;  %vm4635_vm12 = vcmp.eq.s32.totalorder %v8609_v4, 1 }
 0x358   : > { %v5812_v24 = vpop.eup %5811  ;;  %v4582_v55 = vpop.permute.xlu0 %4581  ;;  %4704 = vst [vmem:[%s8467_s26 + $0xb0] sm:$0xff] %v4668_v11  ;;  %v4666_v35 = vsel %vm4630_vm7, %v5810_v59, 0.0  ;;  %5829 = vrcp.f32 %v4311_v21  ;;  %v4176_v19 = vadd.f32 %v8374_v10, %v4133_v23  ;;  %v4134_v50 = vadd.f32 %v4096_v44, %v8986_v15 }
 0x359   : > { %v5814_v31 = vpop.eup %5813  ;;  %4702 = vst [vmem:[%s8467_s26 + $0xa0] sm:$0xff] %v4666_v35  ;;  %v4669_v60 = vsel %vm4633_vm0, %v5812_v24, 0.0  ;;  %5831 = vpow2.f32 %v5114_v28  ;;  %vm4636_vm8 = vcmp.eq.s32.totalorder %v4582_v55, 1 }
 0x35a   : > { %v5816_v42 = vpop.eup %5815  ;;  %4705 = vst [vmem:[%s8467_s26 + $0xb8] sm:$0xff] %v4669_v60  ;;  %v4667_v48 = vsel %vm4631_vm4, %v5814_v31, 0.0  ;;  %v5116_v49 = vmul.f32 -1.442695, %v4176_v19  ;;  %5833 = vpow2.f32 %v5115_v0  ;;  %v4177_v27 = vadd.f32 %v8374_v10, %v4134_v50  ;;  %v4585_v57 = vpop.permute.xlu1 %4584 }
 0x35b   : > { %v5818_v40 = vpop.eup %5817  ;;  %4703 = vst [vmem:[%s8467_s26 + $0xa8] sm:$0xff] %v4667_v48  ;;  %v4316_v61 = vadd.f32 1.0, %v5816_v42  ;;  %vm4637_vm10 = vcmp.eq.s32.totalorder %v4585_v57, 1 }
 0x35c   : > { %v5820_v13 = vpop.eup %5819  ;;  %v4314_v2 = vadd.f32 1.0, %v5818_v40  ;;  %5835 = vpow2.f32 %v5116_v49  ;;  %v5117_v51 = vmul.f32 -1.442695, %v4177_v27  ;;  %v4588_v41 = vpop.permute.xlu0 %4587 }
 0x35d   : > { %v5822_v53 = vpop.eup %5821  ;;  %5837 = vrcp.f32 %v4316_v61  ;;  %v4317_v46 = vadd.f32 1.0, %v5820_v13  ;;  %vm4638_vm14 = vcmp.eq.s32.totalorder %v4588_v41, 1 }
 0x35e   : > { %5839 = vrcp.f32 %v4314_v2  ;;  %v4315_v52 = vadd.f32 1.0, %v5822_v53  ;;  %v4591_v38 = vpop.permute.xlu1 %4590 }
 0x35f   : > { %v5824_v5 = vpop.eup %5823  ;;  %5841 = vrcp.f32 %v4317_v46  ;;  %vm4639_vm15 = vcmp.eq.s32.totalorder %v4591_v38, 1 }
 0x360   : > { %v5826_v37 = vpop.eup %5825  ;;  %v4672_v10 = vsel %vm4636_vm8, %v5824_v5, 0.0  ;;  %5843 = vrcp.f32 %v4315_v52  ;;  %v4594_v14 = vpop.permute.xlu0 %4593 }
 0x361   : > { %v5828_v22 = vpop.eup %5827  ;;  %4708 = vst [vmem:[%s8467_s26 + $0xd0] sm:$0xff] %v4672_v10  ;;  %v4670_v62 = vsel %vm4634_vm9, %v5826_v37, 0.0  ;;  %5845 = vpow2.f32 %v5117_v51  ;;  %vm4640_vm13 = vcmp.eq.s32.totalorder %v4594_v14, 1 }
 0x362   : > { %v5830_v29 = vpop.eup %5829  ;;  %4706 = vst [vmem:[%s8467_s26 + $0xc0] sm:$0xff] %v4670_v62  ;;  %v4673_v36 = vsel %vm4637_vm10, %v5828_v22, 0.0  ;;  %v4597_v63 = vpop.permute.xlu1 %4596 }
 0x363   : > { %v5832_v12 = vpop.eup %5831  ;;  %4709 = vst [vmem:[%s8467_s26 + $0xd8] sm:$0xff] %v4673_v36  ;;  %v4671_v45 = vsel %vm4635_vm12, %v5830_v29, 0.0  ;;  %vm4641_vm11 = vcmp.eq.s32.totalorder %v4597_v63, 1 }
 0x364   : > { %v5834_v3 = vpop.eup %5833  ;;  %4707 = vst [vmem:[%s8467_s26 + $0xc8] sm:$0xff] %v4671_v45  ;;  %v4318_v32 = vadd.f32 1.0, %v5832_v12  ;;  %v4600_v39 = vpop.permute.xlu0 %4599 }
 0x365   : > { %v4319_v6 = vadd.f32 1.0, %v5834_v3  ;;  %vm4642_vm3 = vcmp.eq.s32.totalorder %v4600_v39, 1 }
 0x366   : > { %v5836_v58 = vpop.eup %5835  ;;  %5847 = vrcp.f32 %v4318_v32  ;;  %v4603_v20 = vpop.permute.xlu1 %4602 }
 0x367   : > { %v5838_v7 = vpop.eup %5837  ;;  %v4320_v56 = vadd.f32 1.0, %v5836_v58  ;;  %5849 = vrcp.f32 %v4319_v6  ;;  %vm4643_vm2 = vcmp.eq.s32.totalorder %v4603_v20, 1 }
 0x368   : > { %v5840_v54 = vpop.eup %5839  ;;  %v4676_v26 = vsel %vm4640_vm13, %v5838_v7, 0.0  ;;  %v4606_v28 = vpop.permute.xlu0 %4605 }
 0x369   : > { %v5842_v34 = vpop.eup %5841  ;;  %4712 = vst [vmem:[%s8467_s26 + $0xf0] sm:$0xff] %v4676_v26  ;;  %v4674_v17 = vsel %vm4638_vm14, %v5840_v54, 0.0  ;;  %5851 = vrcp.f32 %v4320_v56  ;;  %vm4644_vm1 = vcmp.eq.s32.totalorder %v4606_v28, 1 }
 0x36a   : > { %v5844_v33 = vpop.eup %5843  ;;  %4710 = vst [vmem:[%s8467_s26 + $0xe0] sm:$0xff] %v4674_v17  ;;  %v4677_v8 = vsel %vm4641_vm11, %v5842_v34, 0.0  ;;  %v4609_v23 = vpop.permute.xlu1 %4608 }
 0x36b   : > { %v5846_v25 = vpop.eup %5845  ;;  %4713 = vst [vmem:[%s8467_s26 + $0xf8] sm:$0xff] %v4677_v8  ;;  %v4675_v9 = vsel %vm4639_vm15, %v5844_v33, 0.0  ;;  %vm4645_vm5 = vcmp.eq.s32.totalorder %v4609_v23, 1 }
 0x36c   : > { %4711 = vst [vmem:[%s8467_s26 + $0xe8] sm:$0xff] %v4675_v9  ;;  %v4321_v30 = vadd.f32 1.0, %v5846_v25 }
 0x36e   : > { %5853 = vrcp.f32 %v4321_v30 }
 0x370   : > { %v5848_v47 = vpop.eup %5847 }
 0x371   : > { %v5850_v1 = vpop.eup %5849  ;;  %v4678_v43 = vsel %vm4642_vm3, %v5848_v47, 0.0 }
 0x372   : > { %4714 = vst [vmem:[%s8467_s26 + $0x100] sm:$0xff] %v4678_v43  ;;  %v4679_v4 = vsel %vm4643_vm2, %v5850_v1, 0.0 }
 0x373   : > { %v5852_v21 = vpop.eup %5851  ;;  %4715 = vst [vmem:[%s8467_s26 + $0x108] sm:$0xff] %v4679_v4 }
 0x374   : > { %v4680_v16 = vsel %vm4644_vm1, %v5852_v21, 0.0 }
 0x375   : > { %4716 = vst [vmem:[%s8467_s26 + $0x110] sm:$0xff] %v4680_v16 }
 0x378   : > { %v5854_v0 = vpop.eup %5853 }
 0x379   : > { %v4681_v18 = vsel %vm4645_vm5, %v5854_v0, 0.0 }
 0x37a   : > { %4717 = vst [vmem:[%s8467_s26 + $0x118] sm:$0xff] %v4681_v18 }
 0x37b   : > { %6071 = shalt.err (!%p6068_p11)
}
 0x37c   : > { %s6072_s27 = scalar_lea.hbm %s8639_s12, 4608  ;;  %s6076_s6 = scalar_lea.hbm %s8696_s5, 9216 }
 0x37d   : > { %p6073_p12 = scmp.ne.s32.totalorder %s8639_s12, %s6072_s27  ;;  %p6077_p9 = scmp.lt.u32.totalorder %s8639_s12, %s8696_s5 }
 0x37e   : > { %p6078_p0 = scmp.lt.u32.totalorder %s6076_s6, %s6072_s27  ;;  %p6080_p4 = scmp.lt.u32.totalorder %s6072_s27, %s8639_s12 }
 0x37f   : > { %p6074_p6 = pnand %p6073_p12, %p6348_p10 }
 0x380   : > { %p6079_p2 = por %p6078_p0, %p6077_p9 }
 0x381   : > { %p6075_p7 = pneg %p6074_p6 }
 0x382   : > { %p6081_p8 = por %p6080_p4, %p6079_p2 }
 0x384   : > { %p6082_p1 = pnand %p6081_p8, %p6075_p7 }
 0x386   : > { %6085 = shalt.err (!%p6082_p1)
}
 0x387   : > { %s6165_s29 = smov 128   ;;  %s6166_s10 = smov 8  }
 0x388   : > { %5395 = dma.vmem_to_hbm [thread:$0]  (%p6348_p10), %s8641_s25, 4608, %s8639_s12, %s4719_s8, %s6165_s29, %s6165_s29, %s6166_s10  }
 0x389 PF: > { %s8987_s24 = sld [smem:[#allocation18_spill]]  ;;  %s4749_s26 = sand.u32 1, %s6132_s18  }
 0x38a   : > { %p8989_p3 = scmp.ge.s32.totalorder %s6152_s23, 2  ;;  %s4750_s9 = scalar_lea.sflag [#allocation5], %s4749_s26 }
 0x38f   : > { %p8988_p13 = scmp.ne.s32.totalorder %s8987_s24, 0 }
 0x391   : > { %p5415_p5 = pnand %p8989_p3, %p8988_p13 }
 0x393   : > { %6127 = dma.done.wait (!%p5415_p5), %s4750_s9, 4608  }
 0x394   : > { %6129 = vsyncadd (!%p5415_p5), %s4750_s9, 4294962688  ;;  %s25_s23 = sadd.s32 1, %s6152_s23   ;;  %s8990_s18 = smov %s6136_s19 }
 0x395   : > { %p22_p11 = scmp.ge.s32.totalorder %s25_s23, 4   ;;  %s8991_s19 = smov %s6140_s20 }
 0x396   : > { %s8992_s20 = smov %s6367_s30  ;;  %s8993_s21 = smov %s6148_s22 }
 0x397   : > { %s8994_s22 = smov %s8996_s14  ;;  %24 = sbr.rel (!%p22_p11) target bundleno = 14 (0xe), region = 112 }
 0x39e   :  { %4755 = vsyncpa [#allocation4], 1 }
 0x39f   :  { %4757 = vsyncpa [#allocation4 + $0x1], 1 }
 0x3a0   :  { %4758 = vsyncpa [#allocation7], 1 }
 0x3a1   :  { %4760 = vsyncpa [#allocation7 + $0x1], 1 }
 0x3a2   :  { %4761 = vsyncpa [#allocation10], 1 }
 0x3a3   :  { %4762 = vsyncpa [#allocation5], 1 }
 0x3a4   :  { %4764 = vsyncpa [#allocation5 + $0x1], 1 }

</bundles_post_ra>
